<compile_context>
chip_gen: v6e
topology: v6e:2x2x1
jax: 0.10.0
libtpu: 0.0.40
codegen_flags: <defaults>
</compile_context>

<pallas_src>
import numpy as np
import jax
import jax.numpy as jnp
from jax.experimental import pallas as pl
from jax.experimental.pallas import tpu as pltpu

EPS = 1e-5          # PyTorch BatchNorm1d default eps
N_BLOCKS = 5        # block0 .. block4
N_CBN = 2 * N_BLOCKS + 1   # bn0/bn1 per block + final bn


# --------------------------------- kernel -----------------------------------

def siren_decoder_kernel(
    p_ref,        # (B*T, Dpe)        positional-encoded points, flat
    netz_ref,     # (B*T, H)          fc_z(z) + fc_p bias, broadcast per token
    fcp_w_ref,    # (Dpe, H)          fc_p weight, pre-transposed
    gb_ref,       # (N_CBN, 2, B*T, H) CBN gamma/beta, precomputed + broadcast
    blk_w_ref,    # (N_BLOCKS, 2, H, H) fc0/fc1 weights, pre-transposed
    blk_b_ref,    # (N_BLOCKS, 2, H)    fc0/fc1 biases
    fco_w_ref,    # (1, H)            fc_out weight row (out_dim == 1)
    fco_b_ref,    # (1,)  SMEM        fc_out bias scalar
    out_ref,      # (1, B*T)          lane-dense output
):
    BT = p_ref.shape[0]
    inv_n = 1.0 / BT

    def matmul(x, w):
        # (N, K) @ (K, M) — contraction dims already aligned, no relayout.
        return jax.lax.dot_general(
            x, w, (((1,), (0,)), ((), ())),
            preferred_element_type=jnp.float32)

    def cbn_cos(x, j):
        # Fused single-pass batch statistics over all tokens, per channel.
        s = jnp.sum(x, axis=0, keepdims=True)
        ss = jnp.sum(x * x, axis=0, keepdims=True)
        mu = s * inv_n
        var = ss * inv_n - mu * mu
        xhat = (x - mu) * jax.lax.rsqrt(var + EPS)
        # gamma/beta already broadcast to (B*T, H): flat affine, no reshapes.
        return jnp.cos(gb_ref[j, 0] * xhat + gb_ref[j, 1])

    # fc_p + (fc_z(z) + fc_p bias) precomputed & broadcast in the wrapper.
    net = matmul(p_ref[...], fcp_w_ref[...]) + netz_ref[...]       # (B*T, H)

    # 5 conditional-batchnorm resnet blocks (identity shortcut: in == out).
    for i in range(N_BLOCKS):
        h = cbn_cos(net, 2 * i)
        h = matmul(h, blk_w_ref[i, 0]) + blk_b_ref[i, 0][None, :]
        h2 = cbn_cos(h, 2 * i + 1)
        dx = matmul(h2, blk_w_ref[i, 1]) + blk_b_ref[i, 1][None, :]
        net = net + dx

    # final CBN -> cos -> fc_out (out_dim == 1): VPU multiply + lane reduce
    # instead of a 1-wide MXU matmul; lane-dense (1, B*T) store.
    hf = cbn_cos(net, 2 * N_BLOCKS)
    out = jnp.sum(hf * fco_w_ref[...], axis=-1) + fco_b_ref[0]     # (B*T,)
    out_ref[...] = out[None, :]


# ------------------------------ JAX-side glue --------------------------------

def positional_encoding(x, sigma):
    # x: (B, T, dim) -> (B, T, dim*(2*pe_n+1)); same element ordering as torch:
    # per coordinate: [x_d, sin(x_d*s0..), cos(x_d*s0..)]
    xs = x[..., None] * sigma[None, None, None, :]
    y = jnp.concatenate([x[..., None], jnp.sin(xs), jnp.cos(xs)], axis=-1)
    return y.reshape(x.shape[0], x.shape[1], -1)


def siren_decoder_forward(p, z, c, params, sigma):
    p_pe = positional_encoding(p, sigma).astype(jnp.float32)
    B, T, Dpe = p_pe.shape
    H = params["fc_p_b"].shape[0]
    BT = B * T
    assert params["fco_b"].shape[0] == 1, "kernel assumes out_dim == 1"

    # ---- point-independent work hoisted out of the kernel (c / z only) ----
    # fc_z(z) + fc_p bias, broadcast over tokens.
    netz = z @ params["fc_z_w"].T + params["fc_z_b"] + params["fc_p_b"]  # (B, H)
    netz_bt = jnp.broadcast_to(netz[:, None, :], (B, T, H)).reshape(BT, H)

    # All 22 conditional-BN gamma/beta projections + final bn, stacked.
    def lin_c_blocks(w, b):      # w: (L, H, C), b: (L, H) -> (L, B, H)
        return jnp.einsum('lhc,bc->lbh', w, c) + b[:, None, :]

    def lin_c(w, b):             # w: (H, C), b: (H,) -> (B, H)
        return c @ w.T + b

    g0 = lin_c_blocks(params["bn0_wg"], params["bn0_bg"])
    b0 = lin_c_blocks(params["bn0_wb"], params["bn0_bb"])
    g1 = lin_c_blocks(params["bn1_wg"], params["bn1_bg"])
    b1 = lin_c_blocks(params["bn1_wb"], params["bn1_bb"])
    gf = lin_c(params["bnf_wg"], params["bnf_bg"])
    bf = lin_c(params["bnf_wb"], params["bnf_bb"])

    # Layer order: j = 2*i -> block i bn0, j = 2*i+1 -> block i bn1, last -> final.
    gamma = jnp.concatenate(
        [jnp.stack([g0, g1], axis=1).reshape(2 * N_BLOCKS, B, H), gf[None]], axis=0)
    beta = jnp.concatenate(
        [jnp.stack([b0, b1], axis=1).reshape(2 * N_BLOCKS, B, H), bf[None]], axis=0)
    gb = jnp.stack([gamma, beta], axis=1)                       # (L, 2, B, H)
    gb = jnp.broadcast_to(gb[:, :, :, None, :], (N_CBN, 2, B, T, H))
    gb = gb.reshape(N_CBN, 2, BT, H)                            # per-token slab

    # Pre-transposed, stacked per-block fc weights/biases.
    blk_w = jnp.stack([jnp.swapaxes(params["fc0_w"], -1, -2),
                       jnp.swapaxes(params["fc1_w"], -1, -2)], axis=1)  # (L,2,H,H)
    blk_b = jnp.stack([params["fc0_b"], params["fc1_b"]], axis=1)       # (L,2,H)

    fcp_wT = params["fc_p_w"].T                                 # (Dpe, H)
    fco_w = params["fco_w"]                                     # (1, H)
    fco_b = params["fco_b"]                                     # (1,)

    p2 = p_pe.reshape(BT, Dpe)

    vmem = pl.BlockSpec(memory_space=pltpu.MemorySpace.VMEM)
    smem = pl.BlockSpec(memory_space=pltpu.MemorySpace.SMEM)
    out = pl.pallas_call(
        siren_decoder_kernel,
        out_shape=jax.ShapeDtypeStruct((1, BT), jnp.float32),
        in_specs=[vmem, vmem, vmem, vmem, vmem, vmem, vmem, smem],
        out_specs=vmem,
    )(p2, netz_bt, fcp_wT, gb, blk_w, blk_b, fco_w, fco_b)
    # PyTorch returns (B, out_dim=1, T).squeeze(1) == (B, T)
    return out.reshape(B, T)


def ref_forward(p, z, c, params, sigma):
    # Pure-JAX reference of the PyTorch forward (training-mode batchnorm).
    p_pe = positional_encoding(p, sigma)

    def lin(x, w, b):
        return x @ w.T + b

    def cbn(x, gamma, beta):           # x: (B, T, H)
        mu = jnp.mean(x, axis=(0, 1), keepdims=True)
        var = jnp.mean((x - mu) ** 2, axis=(0, 1), keepdims=True)
        xhat = (x - mu) / jnp.sqrt(var + EPS)
        return gamma[:, None, :] * xhat + beta[:, None, :]

    net = lin(p_pe, params["fc_p_w"], params["fc_p_b"])
    net = net + lin(z, params["fc_z_w"], params["fc_z_b"])[:, None, :]
    for i in range(N_BLOCKS):
        g0 = lin(c, params["bn0_wg"][i], params["bn0_bg"][i])
        b0 = lin(c, params["bn0_wb"][i], params["bn0_bb"][i])
        h = lin(jnp.cos(cbn(net, g0, b0)), params["fc0_w"][i], params["fc0_b"][i])
        g1 = lin(c, params["bn1_wg"][i], params["bn1_bg"][i])
        b1 = lin(c, params["bn1_wb"][i], params["bn1_bb"][i])
        dx = lin(jnp.cos(cbn(h, g1, b1)), params["fc1_w"][i], params["fc1_b"][i])
        net = net + dx
    gf = lin(c, params["bnf_wg"], params["bnf_bg"])
    bf = lin(c, params["bnf_wb"], params["bnf_bb"])
    out = lin(jnp.cos(cbn(net, gf, bf)), params["fco_w"], params["fco_b"])
    return out[..., 0]


def init_params(key, dim, pe_n, z_dim, c_dim, hidden, out_dim):
    pe_dim = dim * (2 * pe_n + 1)

    def nrm(k, shape, scale=0.1):
        return scale * jax.random.normal(k, shape, dtype=jnp.float32)

    ks = iter(jax.random.split(key, 32))
    return dict(
        fc_p_w=nrm(next(ks), (hidden, pe_dim)),
        fc_p_b=nrm(next(ks), (hidden,)),
        fc_z_w=nrm(next(ks), (hidden, z_dim)),
        fc_z_b=nrm(next(ks), (hidden,)),
        # per-block CBatchNorm1d conv_gamma / conv_beta (stacked over 5 blocks)
        bn0_wg=nrm(next(ks), (N_BLOCKS, hidden, c_dim)),
        bn0_bg=1.0 + nrm(next(ks), (N_BLOCKS, hidden)),
        bn0_wb=nrm(next(ks), (N_BLOCKS, hidden, c_dim)),
        bn0_bb=nrm(next(ks), (N_BLOCKS, hidden)),
        bn1_wg=nrm(next(ks), (N_BLOCKS, hidden, c_dim)),
        bn1_bg=1.0 + nrm(next(ks), (N_BLOCKS, hidden)),
        bn1_wb=nrm(next(ks), (N_BLOCKS, hidden, c_dim)),
        bn1_bb=nrm(next(ks), (N_BLOCKS, hidden)),
        # per-block fc_0 / fc_1 (1x1 convs)
        fc0_w=nrm(next(ks), (N_BLOCKS, hidden, hidden)),
        fc0_b=nrm(next(ks), (N_BLOCKS, hidden)),
        fc1_w=nrm(next(ks), (N_BLOCKS, hidden, hidden)),
        fc1_b=nrm(next(ks), (N_BLOCKS, hidden)),
        # final CBN + fc_out
        bnf_wg=nrm(next(ks), (hidden, c_dim)),
        bnf_bg=1.0 + nrm(next(ks), (hidden,)),
        bnf_wb=nrm(next(ks), (hidden, c_dim)),
        bnf_bb=nrm(next(ks), (hidden,)),
        fco_w=nrm(next(ks), (out_dim, hidden)),
        fco_b=nrm(next(ks), (out_dim,)),
    )


if __name__ == "__main__":
    key = jax.random.PRNGKey(0)
    kp, kz, kc, kparam = jax.random.split(key, 4)

    B, T, dim = 2, 16, 3
    z_dim, c_dim, hidden, out_dim, pe_n = 16, 16, 32, 1, 4

    p = jax.random.uniform(kp, (B, T, dim), jnp.float32, -0.5, 0.5)
    z = jax.random.normal(kz, (B, z_dim), dtype=jnp.float32)
    c = jax.random.normal(kc, (B, c_dim), dtype=jnp.float32)

    params = init_params(kparam, dim, pe_n, z_dim, c_dim, hidden, out_dim)
    sigma = jnp.pi * (2.0 ** jnp.arange(pe_n, dtype=jnp.float32))  # pi*2^[0..3]

    out = siren_decoder_forward(p, z, c, params, sigma)
    out = jax.block_until_ready(out)
    assert out.shape == (B, T)

    ref = ref_forward(p, z, c, params, sigma)
    np.testing.assert_allclose(np.asarray(out), np.asarray(ref),
                               rtol=2e-3, atol=2e-3)
    print("KERNEL_OK")
</pallas_src>

<mosaic_0001>
module attributes {stable_mosaic.version = 11 : i64} {
  func.func @siren_decoder_kernel(%arg0: memref<32x27xf32, #tpu.memory_space<vmem>>, %arg1: memref<32x32xf32, #tpu.memory_space<vmem>>, %arg2: memref<27x32xf32, #tpu.memory_space<vmem>>, %arg3: memref<11x2x32x32xf32, #tpu.memory_space<vmem>>, %arg4: memref<5x2x32x32xf32, #tpu.memory_space<vmem>>, %arg5: memref<5x2x32xf32, #tpu.memory_space<vmem>>, %arg6: memref<1x32xf32, #tpu.memory_space<vmem>>, %arg7: memref<1xf32, #tpu.memory_space<smem>>, %arg8: memref<1x32xf32, #tpu.memory_space<vmem>>) attributes {dimension_semantics = [], scalar_prefetch = 0 : i64, scratch_operands = 0 : i64, tpu.core_type = #tpu.core_type<tc>} {
    %c0 = arith.constant 0 : index
    %c0_0 = arith.constant 0 : index
    %0 = vector.load %arg0[%c0, %c0_0] : memref<32x27xf32, #tpu.memory_space<vmem>>, vector<32x27xf32>
    %c0_1 = arith.constant 0 : index
    %c0_2 = arith.constant 0 : index
    %1 = vector.load %arg2[%c0_1, %c0_2] : memref<27x32xf32, #tpu.memory_space<vmem>>, vector<27x32xf32>
    %cst = arith.constant dense<0.000000e+00> : vector<32x32xf32>
    %2 = tpu.matmul %0, %1, %cst {dimension_numbers = #tpu.dot_dimension_numbers<[1], [0], [0], [1], [0, 0, 1, 1], [], []>} : vector<32x27xf32>, vector<27x32xf32>, vector<32x32xf32> -> vector<32x32xf32>
    %c0_3 = arith.constant 0 : index
    %c0_4 = arith.constant 0 : index
    %3 = vector.load %arg1[%c0_3, %c0_4] : memref<32x32xf32, #tpu.memory_space<vmem>>, vector<32x32xf32>
    %4 = arith.addf %2, %3 : vector<32x32xf32>
    %cst_5 = arith.constant dense<0.000000e+00> : vector<32xf32>
    %5 = vector.multi_reduction <add>, %4, %cst_5 [0] : vector<32x32xf32> to vector<32xf32>
    %6 = vector.shape_cast %5 : vector<32xf32> to vector<1x32xf32>
    %7 = arith.mulf %4, %4 : vector<32x32xf32>
    %cst_6 = arith.constant dense<0.000000e+00> : vector<32xf32>
    %8 = vector.multi_reduction <add>, %7, %cst_6 [0] : vector<32x32xf32> to vector<32xf32>
    %9 = vector.shape_cast %8 : vector<32xf32> to vector<1x32xf32>
    %cst_7 = arith.constant 3.125000e-02 : f32
    %10 = vector.broadcast %cst_7 : f32 to vector<1x32xf32>
    %11 = arith.mulf %6, %10 : vector<1x32xf32>
    %cst_8 = arith.constant 3.125000e-02 : f32
    %12 = vector.broadcast %cst_8 : f32 to vector<1x32xf32>
    %13 = arith.mulf %9, %12 : vector<1x32xf32>
    %14 = arith.mulf %11, %11 : vector<1x32xf32>
    %15 = arith.subf %13, %14 : vector<1x32xf32>
    %16 = vector.broadcast %11 : vector<1x32xf32> to vector<32x32xf32>
    %17 = arith.subf %4, %16 : vector<32x32xf32>
    %cst_9 = arith.constant 9.99999974E-6 : f32
    %18 = vector.broadcast %cst_9 : f32 to vector<1x32xf32>
    %19 = arith.addf %15, %18 : vector<1x32xf32>
    %20 = math.rsqrt %19 : vector<1x32xf32>
    %21 = vector.broadcast %20 : vector<1x32xf32> to vector<32x32xf32>
    %22 = arith.mulf %17, %21 : vector<32x32xf32>
    %c0_10 = arith.constant 0 : index
    %c0_11 = arith.constant 0 : index
    %c0_12 = arith.constant 0 : index
    %c0_13 = arith.constant 0 : index
    %23 = vector.load %arg3[%c0_10, %c0_11, %c0_12, %c0_13] : memref<11x2x32x32xf32, #tpu.memory_space<vmem>>, vector<1x1x32x32xf32>
    %24 = vector.shape_cast %23 : vector<1x1x32x32xf32> to vector<32x32xf32>
    %25 = arith.mulf %24, %22 : vector<32x32xf32>
    %c0_14 = arith.constant 0 : index
    %c1 = arith.constant 1 : index
    %c0_15 = arith.constant 0 : index
    %c0_16 = arith.constant 0 : index
    %26 = vector.load %arg3[%c0_14, %c1, %c0_15, %c0_16] : memref<11x2x32x32xf32, #tpu.memory_space<vmem>>, vector<1x1x32x32xf32>
    %27 = vector.shape_cast %26 : vector<1x1x32x32xf32> to vector<32x32xf32>
    %28 = arith.addf %25, %27 : vector<32x32xf32>
    %29 = math.cos %28 : vector<32x32xf32>
    %c0_17 = arith.constant 0 : index
    %c0_18 = arith.constant 0 : index
    %c0_19 = arith.constant 0 : index
    %c0_20 = arith.constant 0 : index
    %30 = vector.load %arg4[%c0_17, %c0_18, %c0_19, %c0_20] : memref<5x2x32x32xf32, #tpu.memory_space<vmem>>, vector<1x1x32x32xf32>
    %31 = vector.shape_cast %30 : vector<1x1x32x32xf32> to vector<32x32xf32>
    %cst_21 = arith.constant dense<0.000000e+00> : vector<32x32xf32>
    %32 = tpu.matmul %29, %31, %cst_21 {dimension_numbers = #tpu.dot_dimension_numbers<[1], [0], [0], [1], [0, 0, 1, 1], [], []>} : vector<32x32xf32>, vector<32x32xf32>, vector<32x32xf32> -> vector<32x32xf32>
    %c0_22 = arith.constant 0 : index
    %c0_23 = arith.constant 0 : index
    %c0_24 = arith.constant 0 : index
    %33 = vector.load %arg5[%c0_22, %c0_23, %c0_24] : memref<5x2x32xf32, #tpu.memory_space<vmem>>, vector<1x1x32xf32>
    %34 = vector.shape_cast %33 : vector<1x1x32xf32> to vector<32xf32>
    %35 = vector.shape_cast %34 : vector<32xf32> to vector<1x32xf32>
    %36 = vector.broadcast %35 : vector<1x32xf32> to vector<32x32xf32>
    %37 = arith.addf %32, %36 : vector<32x32xf32>
    %cst_25 = arith.constant dense<0.000000e+00> : vector<32xf32>
    %38 = vector.multi_reduction <add>, %37, %cst_25 [0] : vector<32x32xf32> to vector<32xf32>
    %39 = vector.shape_cast %38 : vector<32xf32> to vector<1x32xf32>
    %40 = arith.mulf %37, %37 : vector<32x32xf32>
    %cst_26 = arith.constant dense<0.000000e+00> : vector<32xf32>
    %41 = vector.multi_reduction <add>, %40, %cst_26 [0] : vector<32x32xf32> to vector<32xf32>
    %42 = vector.shape_cast %41 : vector<32xf32> to vector<1x32xf32>
    %cst_27 = arith.constant 3.125000e-02 : f32
    %43 = vector.broadcast %cst_27 : f32 to vector<1x32xf32>
    %44 = arith.mulf %39, %43 : vector<1x32xf32>
    %cst_28 = arith.constant 3.125000e-02 : f32
    %45 = vector.broadcast %cst_28 : f32 to vector<1x32xf32>
    %46 = arith.mulf %42, %45 : vector<1x32xf32>
    %47 = arith.mulf %44, %44 : vector<1x32xf32>
    %48 = arith.subf %46, %47 : vector<1x32xf32>
    %49 = vector.broadcast %44 : vector<1x32xf32> to vector<32x32xf32>
    %50 = arith.subf %37, %49 : vector<32x32xf32>
    %cst_29 = arith.constant 9.99999974E-6 : f32
    %51 = vector.broadcast %cst_29 : f32 to vector<1x32xf32>
    %52 = arith.addf %48, %51 : vector<1x32xf32>
    %53 = math.rsqrt %52 : vector<1x32xf32>
    %54 = vector.broadcast %53 : vector<1x32xf32> to vector<32x32xf32>
    %55 = arith.mulf %50, %54 : vector<32x32xf32>
    %c1_30 = arith.constant 1 : index
    %c0_31 = arith.constant 0 : index
    %c0_32 = arith.constant 0 : index
    %c0_33 = arith.constant 0 : index
    %56 = vector.load %arg3[%c1_30, %c0_31, %c0_32, %c0_33] : memref<11x2x32x32xf32, #tpu.memory_space<vmem>>, vector<1x1x32x32xf32>
    %57 = vector.shape_cast %56 : vector<1x1x32x32xf32> to vector<32x32xf32>
    %58 = arith.mulf %57, %55 : vector<32x32xf32>
    %c1_34 = arith.constant 1 : index
    %c1_35 = arith.constant 1 : index
    %c0_36 = arith.constant 0 : index
    %c0_37 = arith.constant 0 : index
    %59 = vector.load %arg3[%c1_34, %c1_35, %c0_36, %c0_37] : memref<11x2x32x32xf32, #tpu.memory_space<vmem>>, vector<1x1x32x32xf32>
    %60 = vector.shape_cast %59 : vector<1x1x32x32xf32> to vector<32x32xf32>
    %61 = arith.addf %58, %60 : vector<32x32xf32>
    %62 = math.cos %61 : vector<32x32xf32>
    %c0_38 = arith.constant 0 : index
    %c1_39 = arith.constant 1 : index
    %c0_40 = arith.constant 0 : index
    %c0_41 = arith.constant 0 : index
    %63 = vector.load %arg4[%c0_38, %c1_39, %c0_40, %c0_41] : memref<5x2x32x32xf32, #tpu.memory_space<vmem>>, vector<1x1x32x32xf32>
    %64 = vector.shape_cast %63 : vector<1x1x32x32xf32> to vector<32x32xf32>
    %cst_42 = arith.constant dense<0.000000e+00> : vector<32x32xf32>
    %65 = tpu.matmul %62, %64, %cst_42 {dimension_numbers = #tpu.dot_dimension_numbers<[1], [0], [0], [1], [0, 0, 1, 1], [], []>} : vector<32x32xf32>, vector<32x32xf32>, vector<32x32xf32> -> vector<32x32xf32>
    %c0_43 = arith.constant 0 : index
    %c1_44 = arith.constant 1 : index
    %c0_45 = arith.constant 0 : index
    %66 = vector.load %arg5[%c0_43, %c1_44, %c0_45] : memref<5x2x32xf32, #tpu.memory_space<vmem>>, vector<1x1x32xf32>
    %67 = vector.shape_cast %66 : vector<1x1x32xf32> to vector<32xf32>
    %68 = vector.shape_cast %67 : vector<32xf32> to vector<1x32xf32>
    %69 = vector.broadcast %68 : vector<1x32xf32> to vector<32x32xf32>
    %70 = arith.addf %65, %69 : vector<32x32xf32>
    %71 = arith.addf %4, %70 : vector<32x32xf32>
    %cst_46 = arith.constant dense<0.000000e+00> : vector<32xf32>
    %72 = vector.multi_reduction <add>, %71, %cst_46 [0] : vector<32x32xf32> to vector<32xf32>
    %73 = vector.shape_cast %72 : vector<32xf32> to vector<1x32xf32>
    %74 = arith.mulf %71, %71 : vector<32x32xf32>
    %cst_47 = arith.constant dense<0.000000e+00> : vector<32xf32>
    %75 = vector.multi_reduction <add>, %74, %cst_47 [0] : vector<32x32xf32> to vector<32xf32>
    %76 = vector.shape_cast %75 : vector<32xf32> to vector<1x32xf32>
    %cst_48 = arith.constant 3.125000e-02 : f32
    %77 = vector.broadcast %cst_48 : f32 to vector<1x32xf32>
    %78 = arith.mulf %73, %77 : vector<1x32xf32>
    %cst_49 = arith.constant 3.125000e-02 : f32
    %79 = vector.broadcast %cst_49 : f32 to vector<1x32xf32>
    %80 = arith.mulf %76, %79 : vector<1x32xf32>
    %81 = arith.mulf %78, %78 : vector<1x32xf32>
    %82 = arith.subf %80, %81 : vector<1x32xf32>
    %83 = vector.broadcast %78 : vector<1x32xf32> to vector<32x32xf32>
    %84 = arith.subf %71, %83 : vector<32x32xf32>
    %cst_50 = arith.constant 9.99999974E-6 : f32
    %85 = vector.broadcast %cst_50 : f32 to vector<1x32xf32>
    %86 = arith.addf %82, %85 : vector<1x32xf32>
    %87 = math.rsqrt %86 : vector<1x32xf32>
    %88 = vector.broadcast %87 : vector<1x32xf32> to vector<32x32xf32>
    %89 = arith.mulf %84, %88 : vector<32x32xf32>
    %c2 = arith.constant 2 : index
    %c0_51 = arith.constant 0 : index
    %c0_52 = arith.constant 0 : index
    %c0_53 = arith.constant 0 : index
    %90 = vector.load %arg3[%c2, %c0_51, %c0_52, %c0_53] : memref<11x2x32x32xf32, #tpu.memory_space<vmem>>, vector<1x1x32x32xf32>
    %91 = vector.shape_cast %90 : vector<1x1x32x32xf32> to vector<32x32xf32>
    %92 = arith.mulf %91, %89 : vector<32x32xf32>
    %c2_54 = arith.constant 2 : index
    %c1_55 = arith.constant 1 : index
    %c0_56 = arith.constant 0 : index
    %c0_57 = arith.constant 0 : index
    %93 = vector.load %arg3[%c2_54, %c1_55, %c0_56, %c0_57] : memref<11x2x32x32xf32, #tpu.memory_space<vmem>>, vector<1x1x32x32xf32>
    %94 = vector.shape_cast %93 : vector<1x1x32x32xf32> to vector<32x32xf32>
    %95 = arith.addf %92, %94 : vector<32x32xf32>
    %96 = math.cos %95 : vector<32x32xf32>
    %c1_58 = arith.constant 1 : index
    %c0_59 = arith.constant 0 : index
    %c0_60 = arith.constant 0 : index
    %c0_61 = arith.constant 0 : index
    %97 = vector.load %arg4[%c1_58, %c0_59, %c0_60, %c0_61] : memref<5x2x32x32xf32, #tpu.memory_space<vmem>>, vector<1x1x32x32xf32>
    %98 = vector.shape_cast %97 : vector<1x1x32x32xf32> to vector<32x32xf32>
    %cst_62 = arith.constant dense<0.000000e+00> : vector<32x32xf32>
    %99 = tpu.matmul %96, %98, %cst_62 {dimension_numbers = #tpu.dot_dimension_numbers<[1], [0], [0], [1], [0, 0, 1, 1], [], []>} : vector<32x32xf32>, vector<32x32xf32>, vector<32x32xf32> -> vector<32x32xf32>
    %c1_63 = arith.constant 1 : index
    %c0_64 = arith.constant 0 : index
    %c0_65 = arith.constant 0 : index
    %100 = vector.load %arg5[%c1_63, %c0_64, %c0_65] : memref<5x2x32xf32, #tpu.memory_space<vmem>>, vector<1x1x32xf32>
    %101 = vector.shape_cast %100 : vector<1x1x32xf32> to vector<32xf32>
    %102 = vector.shape_cast %101 : vector<32xf32> to vector<1x32xf32>
    %103 = vector.broadcast %102 : vector<1x32xf32> to vector<32x32xf32>
    %104 = arith.addf %99, %103 : vector<32x32xf32>
    %cst_66 = arith.constant dense<0.000000e+00> : vector<32xf32>
    %105 = vector.multi_reduction <add>, %104, %cst_66 [0] : vector<32x32xf32> to vector<32xf32>
    %106 = vector.shape_cast %105 : vector<32xf32> to vector<1x32xf32>
    %107 = arith.mulf %104, %104 : vector<32x32xf32>
    %cst_67 = arith.constant dense<0.000000e+00> : vector<32xf32>
    %108 = vector.multi_reduction <add>, %107, %cst_67 [0] : vector<32x32xf32> to vector<32xf32>
    %109 = vector.shape_cast %108 : vector<32xf32> to vector<1x32xf32>
    %cst_68 = arith.constant 3.125000e-02 : f32
    %110 = vector.broadcast %cst_68 : f32 to vector<1x32xf32>
    %111 = arith.mulf %106, %110 : vector<1x32xf32>
    %cst_69 = arith.constant 3.125000e-02 : f32
    %112 = vector.broadcast %cst_69 : f32 to vector<1x32xf32>
    %113 = arith.mulf %109, %112 : vector<1x32xf32>
    %114 = arith.mulf %111, %111 : vector<1x32xf32>
    %115 = arith.subf %113, %114 : vector<1x32xf32>
    %116 = vector.broadcast %111 : vector<1x32xf32> to vector<32x32xf32>
    %117 = arith.subf %104, %116 : vector<32x32xf32>
    %cst_70 = arith.constant 9.99999974E-6 : f32
    %118 = vector.broadcast %cst_70 : f32 to vector<1x32xf32>
    %119 = arith.addf %115, %118 : vector<1x32xf32>
    %120 = math.rsqrt %119 : vector<1x32xf32>
    %121 = vector.broadcast %120 : vector<1x32xf32> to vector<32x32xf32>
    %122 = arith.mulf %117, %121 : vector<32x32xf32>
    %c3 = arith.constant 3 : index
    %c0_71 = arith.constant 0 : index
    %c0_72 = arith.constant 0 : index
    %c0_73 = arith.constant 0 : index
    %123 = vector.load %arg3[%c3, %c0_71, %c0_72, %c0_73] : memref<11x2x32x32xf32, #tpu.memory_space<vmem>>, vector<1x1x32x32xf32>
    %124 = vector.shape_cast %123 : vector<1x1x32x32xf32> to vector<32x32xf32>
    %125 = arith.mulf %124, %122 : vector<32x32xf32>
    %c3_74 = arith.constant 3 : index
    %c1_75 = arith.constant 1 : index
    %c0_76 = arith.constant 0 : index
    %c0_77 = arith.constant 0 : index
    %126 = vector.load %arg3[%c3_74, %c1_75, %c0_76, %c0_77] : memref<11x2x32x32xf32, #tpu.memory_space<vmem>>, vector<1x1x32x32xf32>
    %127 = vector.shape_cast %126 : vector<1x1x32x32xf32> to vector<32x32xf32>
    %128 = arith.addf %125, %127 : vector<32x32xf32>
    %129 = math.cos %128 : vector<32x32xf32>
    %c1_78 = arith.constant 1 : index
    %c1_79 = arith.constant 1 : index
    %c0_80 = arith.constant 0 : index
    %c0_81 = arith.constant 0 : index
    %130 = vector.load %arg4[%c1_78, %c1_79, %c0_80, %c0_81] : memref<5x2x32x32xf32, #tpu.memory_space<vmem>>, vector<1x1x32x32xf32>
    %131 = vector.shape_cast %130 : vector<1x1x32x32xf32> to vector<32x32xf32>
    %cst_82 = arith.constant dense<0.000000e+00> : vector<32x32xf32>
    %132 = tpu.matmul %129, %131, %cst_82 {dimension_numbers = #tpu.dot_dimension_numbers<[1], [0], [0], [1], [0, 0, 1, 1], [], []>} : vector<32x32xf32>, vector<32x32xf32>, vector<32x32xf32> -> vector<32x32xf32>
    %c1_83 = arith.constant 1 : index
    %c1_84 = arith.constant 1 : index
    %c0_85 = arith.constant 0 : index
    %133 = vector.load %arg5[%c1_83, %c1_84, %c0_85] : memref<5x2x32xf32, #tpu.memory_space<vmem>>, vector<1x1x32xf32>
    %134 = vector.shape_cast %133 : vector<1x1x32xf32> to vector<32xf32>
    %135 = vector.shape_cast %134 : vector<32xf32> to vector<1x32xf32>
    %136 = vector.broadcast %135 : vector<1x32xf32> to vector<32x32xf32>
    %137 = arith.addf %132, %136 : vector<32x32xf32>
    %138 = arith.addf %71, %137 : vector<32x32xf32>
    %cst_86 = arith.constant dense<0.000000e+00> : vector<32xf32>
    %139 = vector.multi_reduction <add>, %138, %cst_86 [0] : vector<32x32xf32> to vector<32xf32>
    %140 = vector.shape_cast %139 : vector<32xf32> to vector<1x32xf32>
    %141 = arith.mulf %138, %138 : vector<32x32xf32>
    %cst_87 = arith.constant dense<0.000000e+00> : vector<32xf32>
    %142 = vector.multi_reduction <add>, %141, %cst_87 [0] : vector<32x32xf32> to vector<32xf32>
    %143 = vector.shape_cast %142 : vector<32xf32> to vector<1x32xf32>
    %cst_88 = arith.constant 3.125000e-02 : f32
    %144 = vector.broadcast %cst_88 : f32 to vector<1x32xf32>
    %145 = arith.mulf %140, %144 : vector<1x32xf32>
    %cst_89 = arith.constant 3.125000e-02 : f32
    %146 = vector.broadcast %cst_89 : f32 to vector<1x32xf32>
    %147 = arith.mulf %143, %146 : vector<1x32xf32>
    %148 = arith.mulf %145, %145 : vector<1x32xf32>
    %149 = arith.subf %147, %148 : vector<1x32xf32>
    %150 = vector.broadcast %145 : vector<1x32xf32> to vector<32x32xf32>
    %151 = arith.subf %138, %150 : vector<32x32xf32>
    %cst_90 = arith.constant 9.99999974E-6 : f32
    %152 = vector.broadcast %cst_90 : f32 to vector<1x32xf32>
    %153 = arith.addf %149, %152 : vector<1x32xf32>
    %154 = math.rsqrt %153 : vector<1x32xf32>
    %155 = vector.broadcast %154 : vector<1x32xf32> to vector<32x32xf32>
    %156 = arith.mulf %151, %155 : vector<32x32xf32>
    %c4 = arith.constant 4 : index
    %c0_91 = arith.constant 0 : index
    %c0_92 = arith.constant 0 : index
    %c0_93 = arith.constant 0 : index
    %157 = vector.load %arg3[%c4, %c0_91, %c0_92, %c0_93] : memref<11x2x32x32xf32, #tpu.memory_space<vmem>>, vector<1x1x32x32xf32>
    %158 = vector.shape_cast %157 : vector<1x1x32x32xf32> to vector<32x32xf32>
    %159 = arith.mulf %158, %156 : vector<32x32xf32>
    %c4_94 = arith.constant 4 : index
    %c1_95 = arith.constant 1 : index
    %c0_96 = arith.constant 0 : index
    %c0_97 = arith.constant 0 : index
    %160 = vector.load %arg3[%c4_94, %c1_95, %c0_96, %c0_97] : memref<11x2x32x32xf32, #tpu.memory_space<vmem>>, vector<1x1x32x32xf32>
    %161 = vector.shape_cast %160 : vector<1x1x32x32xf32> to vector<32x32xf32>
    %162 = arith.addf %159, %161 : vector<32x32xf32>
    %163 = math.cos %162 : vector<32x32xf32>
    %c2_98 = arith.constant 2 : index
    %c0_99 = arith.constant 0 : index
    %c0_100 = arith.constant 0 : index
    %c0_101 = arith.constant 0 : index
    %164 = vector.load %arg4[%c2_98, %c0_99, %c0_100, %c0_101] : memref<5x2x32x32xf32, #tpu.memory_space<vmem>>, vector<1x1x32x32xf32>
    %165 = vector.shape_cast %164 : vector<1x1x32x32xf32> to vector<32x32xf32>
    %cst_102 = arith.constant dense<0.000000e+00> : vector<32x32xf32>
    %166 = tpu.matmul %163, %165, %cst_102 {dimension_numbers = #tpu.dot_dimension_numbers<[1], [0], [0], [1], [0, 0, 1, 1], [], []>} : vector<32x32xf32>, vector<32x32xf32>, vector<32x32xf32> -> vector<32x32xf32>
    %c2_103 = arith.constant 2 : index
    %c0_104 = arith.constant 0 : index
    %c0_105 = arith.constant 0 : index
    %167 = vector.load %arg5[%c2_103, %c0_104, %c0_105] : memref<5x2x32xf32, #tpu.memory_space<vmem>>, vector<1x1x32xf32>
    %168 = vector.shape_cast %167 : vector<1x1x32xf32> to vector<32xf32>
    %169 = vector.shape_cast %168 : vector<32xf32> to vector<1x32xf32>
    %170 = vector.broadcast %169 : vector<1x32xf32> to vector<32x32xf32>
    %171 = arith.addf %166, %170 : vector<32x32xf32>
    %cst_106 = arith.constant dense<0.000000e+00> : vector<32xf32>
    %172 = vector.multi_reduction <add>, %171, %cst_106 [0] : vector<32x32xf32> to vector<32xf32>
    %173 = vector.shape_cast %172 : vector<32xf32> to vector<1x32xf32>
    %174 = arith.mulf %171, %171 : vector<32x32xf32>
    %cst_107 = arith.constant dense<0.000000e+00> : vector<32xf32>
    %175 = vector.multi_reduction <add>, %174, %cst_107 [0] : vector<32x32xf32> to vector<32xf32>
    %176 = vector.shape_cast %175 : vector<32xf32> to vector<1x32xf32>
    %cst_108 = arith.constant 3.125000e-02 : f32
    %177 = vector.broadcast %cst_108 : f32 to vector<1x32xf32>
    %178 = arith.mulf %173, %177 : vector<1x32xf32>
    %cst_109 = arith.constant 3.125000e-02 : f32
    %179 = vector.broadcast %cst_109 : f32 to vector<1x32xf32>
    %180 = arith.mulf %176, %179 : vector<1x32xf32>
    %181 = arith.mulf %178, %178 : vector<1x32xf32>
    %182 = arith.subf %180, %181 : vector<1x32xf32>
    %183 = vector.broadcast %178 : vector<1x32xf32> to vector<32x32xf32>
    %184 = arith.subf %171, %183 : vector<32x32xf32>
    %cst_110 = arith.constant 9.99999974E-6 : f32
    %185 = vector.broadcast %cst_110 : f32 to vector<1x32xf32>
    %186 = arith.addf %182, %185 : vector<1x32xf32>
    %187 = math.rsqrt %186 : vector<1x32xf32>
    %188 = vector.broadcast %187 : vector<1x32xf32> to vector<32x32xf32>
    %189 = arith.mulf %184, %188 : vector<32x32xf32>
    %c5 = arith.constant 5 : index
    %c0_111 = arith.constant 0 : index
    %c0_112 = arith.constant 0 : index
    %c0_113 = arith.constant 0 : index
    %190 = vector.load %arg3[%c5, %c0_111, %c0_112, %c0_113] : memref<11x2x32x32xf32, #tpu.memory_space<vmem>>, vector<1x1x32x32xf32>
    %191 = vector.shape_cast %190 : vector<1x1x32x32xf32> to vector<32x32xf32>
    %192 = arith.mulf %191, %189 : vector<32x32xf32>
    %c5_114 = arith.constant 5 : index
    %c1_115 = arith.constant 1 : index
    %c0_116 = arith.constant 0 : index
    %c0_117 = arith.constant 0 : index
    %193 = vector.load %arg3[%c5_114, %c1_115, %c0_116, %c0_117] : memref<11x2x32x32xf32, #tpu.memory_space<vmem>>, vector<1x1x32x32xf32>
    %194 = vector.shape_cast %193 : vector<1x1x32x32xf32> to vector<32x32xf32>
    %195 = arith.addf %192, %194 : vector<32x32xf32>
    %196 = math.cos %195 : vector<32x32xf32>
    %c2_118 = arith.constant 2 : index
    %c1_119 = arith.constant 1 : index
    %c0_120 = arith.constant 0 : index
    %c0_121 = arith.constant 0 : index
    %197 = vector.load %arg4[%c2_118, %c1_119, %c0_120, %c0_121] : memref<5x2x32x32xf32, #tpu.memory_space<vmem>>, vector<1x1x32x32xf32>
    %198 = vector.shape_cast %197 : vector<1x1x32x32xf32> to vector<32x32xf32>
    %cst_122 = arith.constant dense<0.000000e+00> : vector<32x32xf32>
    %199 = tpu.matmul %196, %198, %cst_122 {dimension_numbers = #tpu.dot_dimension_numbers<[1], [0], [0], [1], [0, 0, 1, 1], [], []>} : vector<32x32xf32>, vector<32x32xf32>, vector<32x32xf32> -> vector<32x32xf32>
    %c2_123 = arith.constant 2 : index
    %c1_124 = arith.constant 1 : index
    %c0_125 = arith.constant 0 : index
    %200 = vector.load %arg5[%c2_123, %c1_124, %c0_125] : memref<5x2x32xf32, #tpu.memory_space<vmem>>, vector<1x1x32xf32>
    %201 = vector.shape_cast %200 : vector<1x1x32xf32> to vector<32xf32>
    %202 = vector.shape_cast %201 : vector<32xf32> to vector<1x32xf32>
    %203 = vector.broadcast %202 : vector<1x32xf32> to vector<32x32xf32>
    %204 = arith.addf %199, %203 : vector<32x32xf32>
    %205 = arith.addf %138, %204 : vector<32x32xf32>
    %cst_126 = arith.constant dense<0.000000e+00> : vector<32xf32>
    %206 = vector.multi_reduction <add>, %205, %cst_126 [0] : vector<32x32xf32> to vector<32xf32>
    %207 = vector.shape_cast %206 : vector<32xf32> to vector<1x32xf32>
    %208 = arith.mulf %205, %205 : vector<32x32xf32>
    %cst_127 = arith.constant dense<0.000000e+00> : vector<32xf32>
    %209 = vector.multi_reduction <add>, %208, %cst_127 [0] : vector<32x32xf32> to vector<32xf32>
    %210 = vector.shape_cast %209 : vector<32xf32> to vector<1x32xf32>
    %cst_128 = arith.constant 3.125000e-02 : f32
    %211 = vector.broadcast %cst_128 : f32 to vector<1x32xf32>
    %212 = arith.mulf %207, %211 : vector<1x32xf32>
    %cst_129 = arith.constant 3.125000e-02 : f32
    %213 = vector.broadcast %cst_129 : f32 to vector<1x32xf32>
    %214 = arith.mulf %210, %213 : vector<1x32xf32>
    %215 = arith.mulf %212, %212 : vector<1x32xf32>
    %216 = arith.subf %214, %215 : vector<1x32xf32>
    %217 = vector.broadcast %212 : vector<1x32xf32> to vector<32x32xf32>
    %218 = arith.subf %205, %217 : vector<32x32xf32>
    %cst_130 = arith.constant 9.99999974E-6 : f32
    %219 = vector.broadcast %cst_130 : f32 to vector<1x32xf32>
    %220 = arith.addf %216, %219 : vector<1x32xf32>
    %221 = math.rsqrt %220 : vector<1x32xf32>
    %222 = vector.broadcast %221 : vector<1x32xf32> to vector<32x32xf32>
    %223 = arith.mulf %218, %222 : vector<32x32xf32>
    %c6 = arith.constant 6 : index
    %c0_131 = arith.constant 0 : index
    %c0_132 = arith.constant 0 : index
    %c0_133 = arith.constant 0 : index
    %224 = vector.load %arg3[%c6, %c0_131, %c0_132, %c0_133] : memref<11x2x32x32xf32, #tpu.memory_space<vmem>>, vector<1x1x32x32xf32>
    %225 = vector.shape_cast %224 : vector<1x1x32x32xf32> to vector<32x32xf32>
    %226 = arith.mulf %225, %223 : vector<32x32xf32>
    %c6_134 = arith.constant 6 : index
    %c1_135 = arith.constant 1 : index
    %c0_136 = arith.constant 0 : index
    %c0_137 = arith.constant 0 : index
    %227 = vector.load %arg3[%c6_134, %c1_135, %c0_136, %c0_137] : memref<11x2x32x32xf32, #tpu.memory_space<vmem>>, vector<1x1x32x32xf32>
    %228 = vector.shape_cast %227 : vector<1x1x32x32xf32> to vector<32x32xf32>
    %229 = arith.addf %226, %228 : vector<32x32xf32>
    %230 = math.cos %229 : vector<32x32xf32>
    %c3_138 = arith.constant 3 : index
    %c0_139 = arith.constant 0 : index
    %c0_140 = arith.constant 0 : index
    %c0_141 = arith.constant 0 : index
    %231 = vector.load %arg4[%c3_138, %c0_139, %c0_140, %c0_141] : memref<5x2x32x32xf32, #tpu.memory_space<vmem>>, vector<1x1x32x32xf32>
    %232 = vector.shape_cast %231 : vector<1x1x32x32xf32> to vector<32x32xf32>
    %cst_142 = arith.constant dense<0.000000e+00> : vector<32x32xf32>
    %233 = tpu.matmul %230, %232, %cst_142 {dimension_numbers = #tpu.dot_dimension_numbers<[1], [0], [0], [1], [0, 0, 1, 1], [], []>} : vector<32x32xf32>, vector<32x32xf32>, vector<32x32xf32> -> vector<32x32xf32>
    %c3_143 = arith.constant 3 : index
    %c0_144 = arith.constant 0 : index
    %c0_145 = arith.constant 0 : index
    %234 = vector.load %arg5[%c3_143, %c0_144, %c0_145] : memref<5x2x32xf32, #tpu.memory_space<vmem>>, vector<1x1x32xf32>
    %235 = vector.shape_cast %234 : vector<1x1x32xf32> to vector<32xf32>
    %236 = vector.shape_cast %235 : vector<32xf32> to vector<1x32xf32>
    %237 = vector.broadcast %236 : vector<1x32xf32> to vector<32x32xf32>
    %238 = arith.addf %233, %237 : vector<32x32xf32>
    %cst_146 = arith.constant dense<0.000000e+00> : vector<32xf32>
    %239 = vector.multi_reduction <add>, %238, %cst_146 [0] : vector<32x32xf32> to vector<32xf32>
    %240 = vector.shape_cast %239 : vector<32xf32> to vector<1x32xf32>
    %241 = arith.mulf %238, %238 : vector<32x32xf32>
    %cst_147 = arith.constant dense<0.000000e+00> : vector<32xf32>
    %242 = vector.multi_reduction <add>, %241, %cst_147 [0] : vector<32x32xf32> to vector<32xf32>
    %243 = vector.shape_cast %242 : vector<32xf32> to vector<1x32xf32>
    %cst_148 = arith.constant 3.125000e-02 : f32
    %244 = vector.broadcast %cst_148 : f32 to vector<1x32xf32>
    %245 = arith.mulf %240, %244 : vector<1x32xf32>
    %cst_149 = arith.constant 3.125000e-02 : f32
    %246 = vector.broadcast %cst_149 : f32 to vector<1x32xf32>
    %247 = arith.mulf %243, %246 : vector<1x32xf32>
    %248 = arith.mulf %245, %245 : vector<1x32xf32>
    %249 = arith.subf %247, %248 : vector<1x32xf32>
    %250 = vector.broadcast %245 : vector<1x32xf32> to vector<32x32xf32>
    %251 = arith.subf %238, %250 : vector<32x32xf32>
    %cst_150 = arith.constant 9.99999974E-6 : f32
    %252 = vector.broadcast %cst_150 : f32 to vector<1x32xf32>
    %253 = arith.addf %249, %252 : vector<1x32xf32>
    %254 = math.rsqrt %253 : vector<1x32xf32>
    %255 = vector.broadcast %254 : vector<1x32xf32> to vector<32x32xf32>
    %256 = arith.mulf %251, %255 : vector<32x32xf32>
    %c7 = arith.constant 7 : index
    %c0_151 = arith.constant 0 : index
    %c0_152 = arith.constant 0 : index
    %c0_153 = arith.constant 0 : index
    %257 = vector.load %arg3[%c7, %c0_151, %c0_152, %c0_153] : memref<11x2x32x32xf32, #tpu.memory_space<vmem>>, vector<1x1x32x32xf32>
    %258 = vector.shape_cast %257 : vector<1x1x32x32xf32> to vector<32x32xf32>
    %259 = arith.mulf %258, %256 : vector<32x32xf32>
    %c7_154 = arith.constant 7 : index
    %c1_155 = arith.constant 1 : index
    %c0_156 = arith.constant 0 : index
    %c0_157 = arith.constant 0 : index
    %260 = vector.load %arg3[%c7_154, %c1_155, %c0_156, %c0_157] : memref<11x2x32x32xf32, #tpu.memory_space<vmem>>, vector<1x1x32x32xf32>
    %261 = vector.shape_cast %260 : vector<1x1x32x32xf32> to vector<32x32xf32>
    %262 = arith.addf %259, %261 : vector<32x32xf32>
    %263 = math.cos %262 : vector<32x32xf32>
    %c3_158 = arith.constant 3 : index
    %c1_159 = arith.constant 1 : index
    %c0_160 = arith.constant 0 : index
    %c0_161 = arith.constant 0 : index
    %264 = vector.load %arg4[%c3_158, %c1_159, %c0_160, %c0_161] : memref<5x2x32x32xf32, #tpu.memory_space<vmem>>, vector<1x1x32x32xf32>
    %265 = vector.shape_cast %264 : vector<1x1x32x32xf32> to vector<32x32xf32>
    %cst_162 = arith.constant dense<0.000000e+00> : vector<32x32xf32>
    %266 = tpu.matmul %263, %265, %cst_162 {dimension_numbers = #tpu.dot_dimension_numbers<[1], [0], [0], [1], [0, 0, 1, 1], [], []>} : vector<32x32xf32>, vector<32x32xf32>, vector<32x32xf32> -> vector<32x32xf32>
    %c3_163 = arith.constant 3 : index
    %c1_164 = arith.constant 1 : index
    %c0_165 = arith.constant 0 : index
    %267 = vector.load %arg5[%c3_163, %c1_164, %c0_165] : memref<5x2x32xf32, #tpu.memory_space<vmem>>, vector<1x1x32xf32>
    %268 = vector.shape_cast %267 : vector<1x1x32xf32> to vector<32xf32>
    %269 = vector.shape_cast %268 : vector<32xf32> to vector<1x32xf32>
    %270 = vector.broadcast %269 : vector<1x32xf32> to vector<32x32xf32>
    %271 = arith.addf %266, %270 : vector<32x32xf32>
    %272 = arith.addf %205, %271 : vector<32x32xf32>
    %cst_166 = arith.constant dense<0.000000e+00> : vector<32xf32>
    %273 = vector.multi_reduction <add>, %272, %cst_166 [0] : vector<32x32xf32> to vector<32xf32>
    %274 = vector.shape_cast %273 : vector<32xf32> to vector<1x32xf32>
    %275 = arith.mulf %272, %272 : vector<32x32xf32>
    %cst_167 = arith.constant dense<0.000000e+00> : vector<32xf32>
    %276 = vector.multi_reduction <add>, %275, %cst_167 [0] : vector<32x32xf32> to vector<32xf32>
    %277 = vector.shape_cast %276 : vector<32xf32> to vector<1x32xf32>
    %cst_168 = arith.constant 3.125000e-02 : f32
    %278 = vector.broadcast %cst_168 : f32 to vector<1x32xf32>
    %279 = arith.mulf %274, %278 : vector<1x32xf32>
    %cst_169 = arith.constant 3.125000e-02 : f32
    %280 = vector.broadcast %cst_169 : f32 to vector<1x32xf32>
    %281 = arith.mulf %277, %280 : vector<1x32xf32>
    %282 = arith.mulf %279, %279 : vector<1x32xf32>
    %283 = arith.subf %281, %282 : vector<1x32xf32>
    %284 = vector.broadcast %279 : vector<1x32xf32> to vector<32x32xf32>
    %285 = arith.subf %272, %284 : vector<32x32xf32>
    %cst_170 = arith.constant 9.99999974E-6 : f32
    %286 = vector.broadcast %cst_170 : f32 to vector<1x32xf32>
    %287 = arith.addf %283, %286 : vector<1x32xf32>
    %288 = math.rsqrt %287 : vector<1x32xf32>
    %289 = vector.broadcast %288 : vector<1x32xf32> to vector<32x32xf32>
    %290 = arith.mulf %285, %289 : vector<32x32xf32>
    %c8 = arith.constant 8 : index
    %c0_171 = arith.constant 0 : index
    %c0_172 = arith.constant 0 : index
    %c0_173 = arith.constant 0 : index
    %291 = vector.load %arg3[%c8, %c0_171, %c0_172, %c0_173] : memref<11x2x32x32xf32, #tpu.memory_space<vmem>>, vector<1x1x32x32xf32>
    %292 = vector.shape_cast %291 : vector<1x1x32x32xf32> to vector<32x32xf32>
    %293 = arith.mulf %292, %290 : vector<32x32xf32>
    %c8_174 = arith.constant 8 : index
    %c1_175 = arith.constant 1 : index
    %c0_176 = arith.constant 0 : index
    %c0_177 = arith.constant 0 : index
    %294 = vector.load %arg3[%c8_174, %c1_175, %c0_176, %c0_177] : memref<11x2x32x32xf32, #tpu.memory_space<vmem>>, vector<1x1x32x32xf32>
    %295 = vector.shape_cast %294 : vector<1x1x32x32xf32> to vector<32x32xf32>
    %296 = arith.addf %293, %295 : vector<32x32xf32>
    %297 = math.cos %296 : vector<32x32xf32>
    %c4_178 = arith.constant 4 : index
    %c0_179 = arith.constant 0 : index
    %c0_180 = arith.constant 0 : index
    %c0_181 = arith.constant 0 : index
    %298 = vector.load %arg4[%c4_178, %c0_179, %c0_180, %c0_181] : memref<5x2x32x32xf32, #tpu.memory_space<vmem>>, vector<1x1x32x32xf32>
    %299 = vector.shape_cast %298 : vector<1x1x32x32xf32> to vector<32x32xf32>
    %cst_182 = arith.constant dense<0.000000e+00> : vector<32x32xf32>
    %300 = tpu.matmul %297, %299, %cst_182 {dimension_numbers = #tpu.dot_dimension_numbers<[1], [0], [0], [1], [0, 0, 1, 1], [], []>} : vector<32x32xf32>, vector<32x32xf32>, vector<32x32xf32> -> vector<32x32xf32>
    %c4_183 = arith.constant 4 : index
    %c0_184 = arith.constant 0 : index
    %c0_185 = arith.constant 0 : index
    %301 = vector.load %arg5[%c4_183, %c0_184, %c0_185] : memref<5x2x32xf32, #tpu.memory_space<vmem>>, vector<1x1x32xf32>
    %302 = vector.shape_cast %301 : vector<1x1x32xf32> to vector<32xf32>
    %303 = vector.shape_cast %302 : vector<32xf32> to vector<1x32xf32>
    %304 = vector.broadcast %303 : vector<1x32xf32> to vector<32x32xf32>
    %305 = arith.addf %300, %304 : vector<32x32xf32>
    %cst_186 = arith.constant dense<0.000000e+00> : vector<32xf32>
    %306 = vector.multi_reduction <add>, %305, %cst_186 [0] : vector<32x32xf32> to vector<32xf32>
    %307 = vector.shape_cast %306 : vector<32xf32> to vector<1x32xf32>
    %308 = arith.mulf %305, %305 : vector<32x32xf32>
    %cst_187 = arith.constant dense<0.000000e+00> : vector<32xf32>
    %309 = vector.multi_reduction <add>, %308, %cst_187 [0] : vector<32x32xf32> to vector<32xf32>
    %310 = vector.shape_cast %309 : vector<32xf32> to vector<1x32xf32>
    %cst_188 = arith.constant 3.125000e-02 : f32
    %311 = vector.broadcast %cst_188 : f32 to vector<1x32xf32>
    %312 = arith.mulf %307, %311 : vector<1x32xf32>
    %cst_189 = arith.constant 3.125000e-02 : f32
    %313 = vector.broadcast %cst_189 : f32 to vector<1x32xf32>
    %314 = arith.mulf %310, %313 : vector<1x32xf32>
    %315 = arith.mulf %312, %312 : vector<1x32xf32>
    %316 = arith.subf %314, %315 : vector<1x32xf32>
    %317 = vector.broadcast %312 : vector<1x32xf32> to vector<32x32xf32>
    %318 = arith.subf %305, %317 : vector<32x32xf32>
    %cst_190 = arith.constant 9.99999974E-6 : f32
    %319 = vector.broadcast %cst_190 : f32 to vector<1x32xf32>
    %320 = arith.addf %316, %319 : vector<1x32xf32>
    %321 = math.rsqrt %320 : vector<1x32xf32>
    %322 = vector.broadcast %321 : vector<1x32xf32> to vector<32x32xf32>
    %323 = arith.mulf %318, %322 : vector<32x32xf32>
    %c9 = arith.constant 9 : index
    %c0_191 = arith.constant 0 : index
    %c0_192 = arith.constant 0 : index
    %c0_193 = arith.constant 0 : index
    %324 = vector.load %arg3[%c9, %c0_191, %c0_192, %c0_193] : memref<11x2x32x32xf32, #tpu.memory_space<vmem>>, vector<1x1x32x32xf32>
    %325 = vector.shape_cast %324 : vector<1x1x32x32xf32> to vector<32x32xf32>
    %326 = arith.mulf %325, %323 : vector<32x32xf32>
    %c9_194 = arith.constant 9 : index
    %c1_195 = arith.constant 1 : index
    %c0_196 = arith.constant 0 : index
    %c0_197 = arith.constant 0 : index
    %327 = vector.load %arg3[%c9_194, %c1_195, %c0_196, %c0_197] : memref<11x2x32x32xf32, #tpu.memory_space<vmem>>, vector<1x1x32x32xf32>
    %328 = vector.shape_cast %327 : vector<1x1x32x32xf32> to vector<32x32xf32>
    %329 = arith.addf %326, %328 : vector<32x32xf32>
    %330 = math.cos %329 : vector<32x32xf32>
    %c4_198 = arith.constant 4 : index
    %c1_199 = arith.constant 1 : index
    %c0_200 = arith.constant 0 : index
    %c0_201 = arith.constant 0 : index
    %331 = vector.load %arg4[%c4_198, %c1_199, %c0_200, %c0_201] : memref<5x2x32x32xf32, #tpu.memory_space<vmem>>, vector<1x1x32x32xf32>
    %332 = vector.shape_cast %331 : vector<1x1x32x32xf32> to vector<32x32xf32>
    %cst_202 = arith.constant dense<0.000000e+00> : vector<32x32xf32>
    %333 = tpu.matmul %330, %332, %cst_202 {dimension_numbers = #tpu.dot_dimension_numbers<[1], [0], [0], [1], [0, 0, 1, 1], [], []>} : vector<32x32xf32>, vector<32x32xf32>, vector<32x32xf32> -> vector<32x32xf32>
    %c4_203 = arith.constant 4 : index
    %c1_204 = arith.constant 1 : index
    %c0_205 = arith.constant 0 : index
    %334 = vector.load %arg5[%c4_203, %c1_204, %c0_205] : memref<5x2x32xf32, #tpu.memory_space<vmem>>, vector<1x1x32xf32>
    %335 = vector.shape_cast %334 : vector<1x1x32xf32> to vector<32xf32>
    %336 = vector.shape_cast %335 : vector<32xf32> to vector<1x32xf32>
    %337 = vector.broadcast %336 : vector<1x32xf32> to vector<32x32xf32>
    %338 = arith.addf %333, %337 : vector<32x32xf32>
    %339 = arith.addf %272, %338 : vector<32x32xf32>
    %cst_206 = arith.constant dense<0.000000e+00> : vector<32xf32>
    %340 = vector.multi_reduction <add>, %339, %cst_206 [0] : vector<32x32xf32> to vector<32xf32>
    %341 = vector.shape_cast %340 : vector<32xf32> to vector<1x32xf32>
    %342 = arith.mulf %339, %339 : vector<32x32xf32>
    %cst_207 = arith.constant dense<0.000000e+00> : vector<32xf32>
    %343 = vector.multi_reduction <add>, %342, %cst_207 [0] : vector<32x32xf32> to vector<32xf32>
    %344 = vector.shape_cast %343 : vector<32xf32> to vector<1x32xf32>
    %cst_208 = arith.constant 3.125000e-02 : f32
    %345 = vector.broadcast %cst_208 : f32 to vector<1x32xf32>
    %346 = arith.mulf %341, %345 : vector<1x32xf32>
    %cst_209 = arith.constant 3.125000e-02 : f32
    %347 = vector.broadcast %cst_209 : f32 to vector<1x32xf32>
    %348 = arith.mulf %344, %347 : vector<1x32xf32>
    %349 = arith.mulf %346, %346 : vector<1x32xf32>
    %350 = arith.subf %348, %349 : vector<1x32xf32>
    %351 = vector.broadcast %346 : vector<1x32xf32> to vector<32x32xf32>
    %352 = arith.subf %339, %351 : vector<32x32xf32>
    %cst_210 = arith.constant 9.99999974E-6 : f32
    %353 = vector.broadcast %cst_210 : f32 to vector<1x32xf32>
    %354 = arith.addf %350, %353 : vector<1x32xf32>
    %355 = math.rsqrt %354 : vector<1x32xf32>
    %356 = vector.broadcast %355 : vector<1x32xf32> to vector<32x32xf32>
    %357 = arith.mulf %352, %356 : vector<32x32xf32>
    %c10 = arith.constant 10 : index
    %c0_211 = arith.constant 0 : index
    %c0_212 = arith.constant 0 : index
    %c0_213 = arith.constant 0 : index
    %358 = vector.load %arg3[%c10, %c0_211, %c0_212, %c0_213] : memref<11x2x32x32xf32, #tpu.memory_space<vmem>>, vector<1x1x32x32xf32>
    %359 = vector.shape_cast %358 : vector<1x1x32x32xf32> to vector<32x32xf32>
    %360 = arith.mulf %359, %357 : vector<32x32xf32>
    %c10_214 = arith.constant 10 : index
    %c1_215 = arith.constant 1 : index
    %c0_216 = arith.constant 0 : index
    %c0_217 = arith.constant 0 : index
    %361 = vector.load %arg3[%c10_214, %c1_215, %c0_216, %c0_217] : memref<11x2x32x32xf32, #tpu.memory_space<vmem>>, vector<1x1x32x32xf32>
    %362 = vector.shape_cast %361 : vector<1x1x32x32xf32> to vector<32x32xf32>
    %363 = arith.addf %360, %362 : vector<32x32xf32>
    %364 = math.cos %363 : vector<32x32xf32>
    %c0_218 = arith.constant 0 : index
    %c0_219 = arith.constant 0 : index
    %365 = vector.load %arg6[%c0_218, %c0_219] : memref<1x32xf32, #tpu.memory_space<vmem>>, vector<1x32xf32>
    %366 = vector.broadcast %365 : vector<1x32xf32> to vector<32x32xf32>
    %367 = arith.mulf %364, %366 : vector<32x32xf32>
    %cst_220 = arith.constant dense<0.000000e+00> : vector<32xf32>
    %368 = vector.multi_reduction <add>, %367, %cst_220 [1] : vector<32x32xf32> to vector<32xf32>
    %c0_221 = arith.constant 0 : index
    %369 = memref.load %arg7[%c0_221] : memref<1xf32, #tpu.memory_space<smem>>
    %370 = vector.broadcast %369 : f32 to vector<32xf32>
    %371 = arith.addf %368, %370 : vector<32xf32>
    %372 = vector.shape_cast %371 : vector<32xf32> to vector<1x32xf32>
    %c0_222 = arith.constant 0 : index
    %c0_223 = arith.constant 0 : index
    %373 = vector.load %arg8[%c0_222, %c0_223] : memref<1x32xf32, #tpu.memory_space<vmem>>, vector<1x32xf32>
    tpu.vector_store %arg8[%c0_222, %c0_223], %372 {strides = array<i32>} : memref<1x32xf32, #tpu.memory_space<vmem>>, vector<1x32xf32>,
    return
  }
}

</mosaic_0001>

<bundles_post_ra>
// kernel: tpu_custom_call.1
= control target key start
LH: loop header
LB: loop body
LE: loop exit
PB: predicated region body
PF: predicated region fallthrough
CT: control target
= control target key end

     0   :  { %14 = vsyncpa [#allocation4], 0  ;;  %s11102_s0 = inlined_call_operand.hbm [shape: f32[32,27], index: 0, kind: input, shape index: {}]   ;;  %s11103_s1 = inlined_call_operand.hbm [shape: f32[32,32], index: 1, kind: input, shape index: {}]   ;;  %s11104_s2 = inlined_call_operand.hbm [shape: f32[27,32], index: 2, kind: input, shape index: {}]   ;;  %s11105_s3 = inlined_call_operand.hbm [shape: f32[11,2,32,32], index: 3, kind: input, shape index: {}]   ;;  %s11106_s4 = inlined_call_operand.hbm [shape: f32[5,2,32,32], index: 4, kind: input, shape index: {}]   ;;  %s11107_s5 = inlined_call_operand.vmem [shape: f32[5,2,32], index: 5, kind: input, shape index: {}]   ;;  %s11108_s6 = inlined_call_operand.vmem [shape: f32[1,32], index: 6, kind: input, shape index: {}]   ;;  %s11109_s7 = inlined_call_operand.<no memory space> [shape: f32[1], index: 7, kind: input, shape index: {}]   ;;  %s11110_s8 = inlined_call_operand.hbm [shape: f32[1,32], index: 8, kind: output, shape index: {}]  }
   0x1   :  { %15 = vsyncpa [#allocation7], 0 }
   0x2   :  { %16 = vsyncpa [#allocation10], 0 }
   0x3   :  { %17 = vsyncpa [#allocation5], 0  ;;  %s7606_s27 = smov [#allocation6]   ;;  %s7607_s29 = smov [#allocation9]  }
   0x4   :  { %s35_s28 = sshll.u32 %s7606_s27, 4  ;;  %s59_s30 = sshll.u32 %s7607_s29, 4  ;;  %s36_s28 = int_to_ptr.vmem [resolvable:$true] %s35_s28  ;;  %s60_s30 = int_to_ptr.vmem [resolvable:$true] %s59_s30 }
   0x5   :  { %s7486_s9 = scalar_lea.vmem %s36_s28, 512  ;;  %p7491_p1 = scmp.lt.s32.totalorder %s36_s28, %s36_s28 }
   0x6   :  { %p7487_p0 = scmp.ne.s32.totalorder %s36_s28, %s7486_s9  ;;  %p7492_p2 = scmp.lt.s32.totalorder %s7486_s9, %s7486_s9 }
   0x8   :  { %p7493_p3 = por %p7492_p2, %p7491_p1 }
   0xa   :  { %p7494_p4 = pnand %p7493_p3, %p7487_p0 }
   0xc   :  { %7497 = shalt.err (!%p7494_p4)
}
   0xd   :  { %s7608_s10 = smov 128   ;;  %s7609_s11 = smov 8  }
   0xe   :  { %41 = dma.hbm_to_vmem [thread:$0]  %s11103_s1, 512, %s36_s28, [#allocation7], %s7608_s10, %s7608_s10, %s7609_s11  }
   0xf   :  { %s7506_s14 = scalar_lea.vmem %s60_s30, 11264  ;;  %p7511_p6 = scmp.lt.s32.totalorder %s60_s30, %s60_s30 }
  0x10   :  { %p7507_p5 = scmp.ne.s32.totalorder %s60_s30, %s7506_s14  ;;  %p7512_p7 = scmp.lt.s32.totalorder %s7506_s14, %s7506_s14 }
  0x12   :  { %p7513_p8 = por %p7512_p7, %p7511_p6 }
  0x14   :  { %p7514_p9 = pnand %p7513_p8, %p7507_p5 }
  0x16   :  { %7517 = shalt.err (!%p7514_p9)
}
  0x17   :  { %65 = dma.hbm_to_vmem [thread:$0]  %s11105_s3, 11264, %s60_s30, [#allocation10], %s7608_s10, %s7608_s10, %s7609_s11  }
  0x18   :  { %s7610_s17 = smov [#allocation3]   ;;  %s7611_s19 = smov [#allocation8]  }
  0x19   :  { %s23_s18 = sshll.u32 %s7610_s17, 4  ;;  %s47_s20 = sshll.u32 %s7611_s19, 4  ;;  %s24_s18 = int_to_ptr.vmem [resolvable:$true] %s23_s18  ;;  %s48_s20 = int_to_ptr.vmem [resolvable:$true] %s47_s20 }
  0x1a   :  { %s7526_s1 = scalar_lea.vmem %s24_s18, 512  ;;  %p7531_p11 = scmp.lt.s32.totalorder %s24_s18, %s24_s18 }
  0x1b   :  { %p7527_p10 = scmp.ne.s32.totalorder %s24_s18, %s7526_s1  ;;  %p7532_p12 = scmp.lt.s32.totalorder %s7526_s1, %s7526_s1 }
  0x1d   :  { %p7533_p13 = por %p7532_p12, %p7531_p11 }
  0x1f   :  { %p7534_p0 = pnand %p7533_p13, %p7527_p10 }
  0x21   :  { %7537 = shalt.err (!%p7534_p0)
}
  0x22   :  { %29 = dma.hbm_to_vmem [thread:$0]  %s11102_s0, 512, %s24_s18, [#allocation4], %s7608_s10, %s7608_s10, %s7609_s11  }
  0x23   :  { %s7546_s3 = scalar_lea.vmem %s48_s20, 512  ;;  %p7551_p2 = scmp.lt.s32.totalorder %s48_s20, %s48_s20 }
  0x24   :  { %p7547_p1 = scmp.ne.s32.totalorder %s48_s20, %s7546_s3  ;;  %p7552_p3 = scmp.lt.s32.totalorder %s7546_s3, %s7546_s3 }
  0x26   :  { %p7553_p4 = por %p7552_p3, %p7551_p2 }
  0x28   :  { %p7554_p5 = pnand %p7553_p4, %p7547_p1 }
  0x2a   :  { %7557 = shalt.err (!%p7554_p5)
}
  0x2b   :  { %53 = dma.hbm_to_vmem [thread:$0]  %s11104_s2, 512, %s48_s20, [#allocation7], %s7608_s10, %s7608_s10, %s7609_s11  }
  0x2c   :  { %s7612_s25 = smov [#allocation11]  }
  0x2d   :  { %s71_s26 = sshll.u32 %s7612_s25, 4  ;;  %s72_s26 = int_to_ptr.vmem [resolvable:$true] %s71_s26 }
  0x2e   :  { %s7566_s27 = scalar_lea.vmem %s72_s26, 5120  ;;  %p7571_p7 = scmp.lt.s32.totalorder %s72_s26, %s72_s26 }
  0x2f   :  { %p7567_p6 = scmp.ne.s32.totalorder %s72_s26, %s7566_s27  ;;  %p7572_p8 = scmp.lt.s32.totalorder %s7566_s27, %s7566_s27 }
  0x31   :  { %p7573_p9 = por %p7572_p8, %p7571_p7 }
  0x33   :  { %p7574_p10 = pnand %p7573_p9, %p7567_p6 }
  0x35   :  { %7577 = shalt.err (!%p7574_p10)
}
  0x36   :  { %77 = dma.hbm_to_vmem [thread:$0]  %s11106_s4, 5120, %s72_s26, [#allocation10], %s7608_s10, %s7608_s10, %s7609_s11  }
  0x37   :  { %7598 = dma.done.wait [#allocation4], 512  }
  0x38   :  { %7599 = vsyncadd [#allocation4], 4294966784 }
  0x39   :  { %7600 = dma.done.wait [#allocation7], 1024  }
  0x3a   :  { %7601 = vsyncadd [#allocation7], 4294966272 }
  0x3b   :  { %7602 = dma.done.wait [#allocation10], 16384  }
  0x3c   :  { %7603 = vsyncadd [#allocation10], 4294950912  ;;  %vm124_vm0 = vcmask 1042432   ;;  %vm111_vm1 = vcmask 220160   ;;  %v106_v0 = vld [vmem:[#allocation8 + $0x18] sm:$0x7] }
  0x3d   :  { %v105_v1 = vld [vmem:[#allocation8 + $0x10] sm:$0xff]  ;;  %6928 = vmatprep.subr.msk.mxu0 %vm124_vm0, %v106_v0  ;;  %v99_v2 = vld [vmem:[#allocation3] sm:$0xff]  ;;  %v104_v3 = vld [vmem:[#allocation8 + $0x8] sm:$0xff]  ;;  %vm213_vm2 = vcmask 261120   ;;  %s7619_s25 = smov [#allocation12]  }
  0x3e   :  { %6929 = vmatpush3.msk.msra.mxu0 %vm124_vm0, %v106_v0  ;;  %6936 = vmatprep.mubr.msk.f32.mxu0 %vm111_vm1, %v99_v2  ;;  %v103_v4 = vld [vmem:[#allocation8] sm:$0xff]  ;;  %v100_v5 = vld [vmem:[#allocation3 + $0x8] sm:$0xff]  ;;  %v101_v6 = vld [vmem:[#allocation3 + $0x10] sm:$0xff]  ;;  %s6589_s26 = sshll.u32 %s7619_s25, 4  ;;  %s6590_s26 = int_to_ptr.vmem [resolvable:$true] %s6589_s26 }
  0x3f   :  { %6930 = vmatprep.subr.mxu0 %v105_v1  ;;  %v102_v7 = vld [vmem:[#allocation3 + $0x18] sm:$0xff]  ;;  %v689_v9 = vld [vmem:[#allocation11 + $0x10] sm:$0xff]  ;;  %v688_v10 = vld [vmem:[#allocation11 + $0x8] sm:$0xff]  ;;  %s7582_s27 = scalar_lea.vmem %s6590_s26, 32  ;;  %p7583_p12 = scmp.lt.s32.totalorder %s6590_s26, %s6590_s26 }
  0x40   :  { %6931 = vmatpush3.msra.mxu0 %v105_v1  ;;  %v690_v8 = vld [vmem:[#allocation11 + $0x18] sm:$0xff]  ;;  %v687_v11 = vld [vmem:[#allocation11] sm:$0xff]  ;;  %v108_v12 = vld [vmem:[#allocation6 + $0x8] sm:$0xff] }
  0x41   :  { %6932 = vmatprep.subr.mxu0 %v104_v3  ;;  %6942 = vmatprep.subr.mxu1 %v690_v8  ;;  %v107_v14 = vld [vmem:[#allocation6] sm:$0xff]  ;;  %v110_v17 = vld [vmem:[#allocation6 + $0x18] sm:$0xff]  ;;  %v109_v20 = vld [vmem:[#allocation6 + $0x10] sm:$0xff] }
  0x42   :  { %6933 = vmatpush3.msra.mxu0 %v104_v3  ;;  %6943 = vmatpush3.msra.mxu1 %v690_v8  ;;  %v260_v0 = vld [vmem:[#allocation9 + $0x10] sm:$0xff]  ;;  %v258_v1 = vld [vmem:[#allocation9] sm:$0xff]  ;;  %v259_v2 = vld [vmem:[#allocation9 + $0x8] sm:$0xff] }
  0x43   :  { %6934 = vmatprep.subr.mxu0 %v103_v4  ;;  %6944 = vmatprep.subr.mxu1 %v689_v9  ;;  %v267_v8 = vld [vmem:[#allocation9 + $0x20] sm:$0xff] }
  0x44   :  { %6935 = vmatpush3.msra.mxu0 %v103_v4  ;;  %6945 = vmatpush3.msra.mxu1 %v689_v9  ;;  %v268_v9 = vld [vmem:[#allocation9 + $0x28] sm:$0xff] }
  0x45   :  { %6937 = vmatmul.mubr.msk.f32.vlgmr.msra.gmra.mxu0 %vm111_vm1, %v100_v5  ;;  %6946 = vmatprep.subr.mxu1 %v688_v10 }
  0x46   :  { %6939 = vmatprep.mubr.msk.f32.mxu0 %vm111_vm1, %v101_v6  ;;  %6947 = vmatpush3.msra.mxu1 %v688_v10 }
  0x47   :  { %6948 = vmatprep.subr.mxu1 %v687_v11 }
  0x48   :  { %6949 = vmatpush3.msra.mxu1 %v687_v11 }
  0x49   :  { %6940 = vmatmul.mubr.msk.f32.gmra.mxu0 %vm111_vm1, %v102_v7  ;;  %v269_v7 = vld [vmem:[#allocation9 + $0x30] sm:$0xff] }
 0x105   :  { %v6938_v13 = vpop.f32.mrf.mxu0 }
 0x106   :  { %v7699_v15 = vadd.f32 %v6938_v13, %v108_v12 }
 0x107   :  { %v194_v16 = vpop.f32.mrf.mxu0 }
 0x108   :  { %v7701_v18 = vadd.f32 %v194_v16, %v107_v14  ;;  %v228_v21 = vmul.f32 %v7699_v15, %v7699_v15  ;;  %v215_v26 = vsel %vm213_vm2, %v7699_v15, 0.0 }
 0x109   :  { %v6941_v19 = vpop.f32.mrf.mxu0 }
 0x10a   :  { %v214_v22 = vsel %vm213_vm2, %v7701_v18, 0.0  ;;  %v227_v23 = vmul.f32 %v7701_v18, %v7701_v18  ;;  %v7709_v24 = vadd.f32 %v6941_v19, %v110_v17  ;;  %v232_v30 = vsel %vm213_vm2, %v228_v21, 0.0 }
 0x10b   :  { %v204_v25 = vpop.f32.mrf.mxu0  ;;  %v216_v29 = vadd.f32 %v215_v26, %v214_v22 }
 0x10c   :  { %v231_v27 = vsel %vm213_vm2, %v227_v23, 0.0  ;;  %v7714_v28 = vadd.f32 %v204_v25, %v109_v20  ;;  %v230_v31 = vmul.f32 %v7709_v24, %v7709_v24  ;;  %v219_v36 = vsel %vm213_vm2, %v7709_v24, 0.0 }
 0x10d   :  { %v233_v34 = vadd.f32 %v232_v30, %v231_v27 }
 0x10e   :  { %v217_v32 = vsel %vm213_vm2, %v7714_v28, 0.0  ;;  %v229_v33 = vmul.f32 %v7714_v28, %v7714_v28  ;;  %v236_v40 = vsel %vm213_vm2, %v230_v31, 0.0 }
 0x10f   :  { %v218_v35 = vadd.f32 %v217_v32, %v216_v29 }
 0x110   :  { %v234_v37 = vsel %vm213_vm2, %v229_v33, 0.0 }
 0x111   :  { %v220_v38 = vadd.f32 %v219_v36, %v218_v35  ;;  %v235_v39 = vadd.f32 %v234_v37, %v233_v34 }
 0x113   :  { %v221_v41 = vrot.slane %v220_v38, 4  ;;  %v237_v42 = vadd.f32 %v236_v40, %v235_v39  ;;  %v261_v39 = vld [vmem:[#allocation9 + $0x18] sm:$0xff] }
 0x115   :  { %v222_v43 = vadd.f32 %v221_v41, %v220_v38  ;;  %v238_v44 = vrot.slane %v237_v42, 4 }
 0x117   :  { %v223_v45 = vrot.slane %v222_v43, 2  ;;  %v239_v46 = vadd.f32 %v238_v44, %v237_v42 }
 0x119   :  { %v224_v47 = vadd.f32 %v223_v45, %v222_v43  ;;  %v240_v48 = vrot.slane %v239_v46, 2 }
 0x11b   :  { %v225_v49 = vrot.slane %v224_v47, 1  ;;  %v241_v50 = vadd.f32 %v240_v48, %v239_v46 }
 0x11d   :  { %v226_v51 = vadd.f32 %v225_v49, %v224_v47  ;;  %v242_v52 = vrot.slane %v241_v50, 1 }
 0x11f   :  { %v243_v53 = vadd.f32 %v242_v52, %v241_v50  ;;  %v244_v54 = vmul.f32 0.03125, %v226_v51  ;;  %v7613_v50 = vmov 683565275  }
 0x121   :  { %v245_v55 = vmul.f32 0.03125, %v243_v53  ;;  %v246_v56 = vmul.f32 %v244_v54, %v244_v54  ;;  %v250_v59 = vsub.f32 %v7714_v28, %v244_v54  ;;  %v248_v60 = vsub.f32 %v7701_v18, %v244_v54 }
 0x122   :  { %v249_v61 = vsub.f32 %v7699_v15, %v244_v54  ;;  %v251_v62 = vsub.f32 %v7709_v24, %v244_v54  ;;  %v7614_v53 = vmov 2475754826  }
 0x123   :  { %v247_v57 = vsub.f32 %v245_v55, %v246_v56  ;;  %v7615_v55 = vmov 2131351028  }
 0x125   :  { %v252_v58 = vadd.f32 1e-05, %v247_v57  ;;  %v7616_v57 = vmov 2102212464  }
 0x127   :  { %7280 = vrsqrt.f32 %v252_v58 }
 0x134   :  { %v7281_v63 = vpop.eup %7280 }
 0x135   :  { %v256_v3 = vmul.f32 %v7281_v63, %v250_v59  ;;  %v254_v4 = vmul.f32 %v7281_v63, %v248_v60  ;;  %v255_v5 = vmul.f32 %v7281_v63, %v249_v61  ;;  %v257_v6 = vmul.f32 %v7281_v63, %v251_v62 }
 0x136   :  { %v7617_v59 = vmov 920167782  }
 0x137   :  { %v264_v10 = vmul.f32 %v260_v0, %v256_v3  ;;  %v262_v11 = vmul.f32 %v258_v1, %v254_v4  ;;  %v263_v12 = vmul.f32 %v259_v2, %v255_v5  ;;  %v7757_v47 = vmul.f32 %v261_v39, %v257_v6 }
 0x138   :  { %v7618_v2 = vmov 1326507024  }
 0x139   :  { %v7731_v13 = vadd.f32 %v269_v7, %v264_v10  ;;  %v7733_v14 = vadd.f32 %v267_v8, %v262_v11  ;;  %v7735_v16 = vadd.f32 %v268_v9, %v263_v12 }
 0x13b   :  { %v484_v17 = vand.u32 2139095040, %v7731_v13  ;;  %v275_v19 = vand.u32 2147483647, %v7733_v14  ;;  %v278_v20 = vand.u32 2139095040, %v7733_v14  ;;  %v378_v21 = vand.u32 2147483647, %v7735_v16 }
 0x13c   :  { %v381_v22 = vand.u32 2139095040, %v7735_v16  ;;  %v481_v38 = vand.u32 2147483647, %v7731_v13 }
 0x13d   :  { %v485_v23 = vshrl.u32 %v484_v17, 23  ;;  %v279_v25 = vshrl.u32 %v278_v20, 23  ;;  %v282_v26 = vand.u32 8388607, %v275_v19  ;;  %v385_v29 = vand.u32 8388607, %v378_v21 }
 0x13e   :  { %v382_v27 = vshrl.u32 %v381_v22, 23  ;;  %v7755_v46 = vand.u32 8388607, %v481_v38 }
 0x13f   :  { %v6613_v30 = vadd.s32 4294967169, %v485_v23  ;;  %v6605_v31 = vadd.s32 4294967169, %v279_v25  ;;  %v283_v35 = vor.u32 8388608, %v282_v26  ;;  %v386_v36 = vor.u32 8388608, %v385_v29 }
 0x140   :  { %v6609_v32 = vadd.s32 4294967169, %v382_v27 }
 0x141   :  { %v491_v33 = vadd.s32 1, %v6613_v30  ;;  %v285_v34 = vadd.s32 1, %v6605_v31  ;;  %v7749_v44 = vshll.u32 %v283_v35, 8  ;;  %v7751_v45 = vshll.u32 %v386_v36, 8 }
 0x142   :  { %v388_v37 = vadd.s32 1, %v6609_v32 }
 0x143   :  { %vm492_vm3 = vcmp.gt.s32.totalorder %v491_v33, 0  ;;  %vm286_vm4 = vcmp.gt.s32.totalorder %v285_v34, 0 }
 0x144   :  { %v7747_v40 = vsel %vm492_vm3, %v491_v33, 0  ;;  %v287_v41 = vsel %vm286_vm4, %v285_v34, 0  ;;  %vm389_vm5 = vcmp.gt.s32.totalorder %v388_v37, 0 }
 0x145   :  { %v288_v42 = vshrl.u32 %v287_v41, 5  ;;  %v289_v43 = vand.u32 31, %v287_v41  ;;  %v7760_v48 = vand.u32 31, %v7747_v40  ;;  %v390_v52 = vsel %vm389_vm5, %v388_v37, 0 }
 0x146   :  { %v392_v9 = vand.u32 31, %v390_v52  ;;  %v391_v30 = vshrl.u32 %v390_v52, 5 }
 0x147   :  { %v290_v49 = vsub.s32 32, %v289_v43  ;;  %v292_v51 = vshll.u32 %v7613_v50, %v289_v43  ;;  %v295_v54 = vshll.u32 %v7614_v53, %v289_v43  ;;  %v298_v56 = vshll.u32 %v7615_v55, %v289_v43 }
 0x148   :  { %v301_v58 = vshll.u32 %v7616_v57, %v289_v43  ;;  %v304_v60 = vshll.u32 %v7617_v59, %v289_v43  ;;  %vm307_vm6 = vcmp.lt.s32.totalorder %v288_v42, 1  ;;  %vm308_vm7 = vcmp.lt.s32.totalorder %v288_v42, 2 }
 0x149   :  { %v293_v61 = vshrl.u32 %v7614_v53, %v290_v49  ;;  %v296_v62 = vshrl.u32 %v7615_v55, %v290_v49  ;;  %v299_v63 = vshrl.u32 %v7616_v57, %v290_v49  ;;  %v291_v0 = vshrl.u32 %v7613_v50, %v290_v49 }
 0x14a   :  { %v302_v1 = vshrl.u32 %v7617_v59, %v290_v49  ;;  %v305_v3 = vshrl.u32 %v7618_v2, %v290_v49  ;;  %vm309_vm8 = vcmp.lt.s32.totalorder %v288_v42, 3  ;;  %vm310_vm9 = vcmp.lt.s32.totalorder %v288_v42, 4 }
 0x14b   :  { %v294_v4 = vor.u32 %v293_v61, %v292_v51  ;;  %v297_v5 = vor.u32 %v296_v62, %v295_v54  ;;  %v300_v6 = vor.u32 %v299_v63, %v298_v56  ;;  %v393_v25 = vsub.s32 32, %v392_v9 }
 0x14c   :  { %v303_v7 = vor.u32 %v302_v1, %v301_v58  ;;  %v306_v8 = vor.u32 %v305_v3, %v304_v60  ;;  %v395_v33 = vshll.u32 %v7613_v50, %v392_v9  ;;  %v7781_v34 = vsub.s32 32, %v7760_v48 }
 0x14d   :  { %v311_v10 = vsel %vm307_vm6, %v291_v0, %v294_v4  ;;  %v312_v11 = vsel %vm310_vm9, %v300_v6, 2102212464  ;;  %v315_v12 = vsel %vm307_vm6, %v294_v4, %v297_v5  ;;  %v319_v17 = vsel %vm307_vm6, %v297_v5, %v300_v6 }
 0x14e   :  { %v313_v20 = vsel %vm309_vm8, %v297_v5, %v312_v11  ;;  %v316_v22 = vsel %vm310_vm9, %v303_v7, 920167782  ;;  %v320_v23 = vsel %vm310_vm9, %v306_v8, 1326507024  ;;  %v396_v43 = vshrl.u32 %v7614_v53, %v393_v25 }
 0x14f   :  { %v314_v26 = vsel %vm308_vm7, %v311_v10, %v313_v20  ;;  %v317_v27 = vsel %vm309_vm8, %v300_v6, %v316_v22  ;;  %v321_v29 = vsel %vm309_vm8, %v303_v7, %v320_v23  ;;  %v398_v42 = vshll.u32 %v7614_v53, %v392_v9 }
 0x150   :  { %v318_v31 = vsel %vm308_vm7, %v315_v12, %v317_v27  ;;  %v322_v32 = vsel %vm308_vm7, %v319_v17, %v321_v29  ;;  %v330_v41 = vmul.u32 %v7749_v44, %v314_v26  ;;  %v399_v49 = vshrl.u32 %v7615_v55, %v393_v25 }
 0x151   :  { %v7784_v35 = vmul.u32.u64.low %v7749_v44, %v322_v32  ;;  %v7785_v36 = vmul.u32.u64.high %v7749_v44, %v322_v32, %v7784_v35  ;;  %v7788_v37 = vmul.u32.u64.low %v7749_v44, %v318_v31  ;;  %v7789_v39 = vmul.u32.u64.high %v7749_v44, %v318_v31, %v7788_v37 }
 0x152   :  { %v401_v51 = vshll.u32 %v7615_v55, %v392_v9  ;;  %v402_v52 = vshrl.u32 %v7616_v57, %v393_v25  ;;  %v404_v54 = vshll.u32 %v7616_v57, %v392_v9  ;;  %v405_v56 = vshrl.u32 %v7617_v59, %v393_v25 }
 0x153   :  { %v397_v58 = vor.u32 %v396_v43, %v395_v33  ;;  %v400_v60 = vor.u32 %v399_v49, %v398_v42  ;;  %v407_v61 = vshll.u32 %v7617_v59, %v392_v9  ;;  %v408_v44 = vshrl.u32 %v7618_v2, %v393_v25 }
 0x154   :  { %vm332_vm10 = vc.u32 %v7785_v36, %v7788_v37  ;;  %v333_v62 = vadd.s32 1, %v7789_v39  ;;  %v394_v63 = vshrl.u32 %v7613_v50, %v393_v25  ;;  %v403_v0 = vor.u32 %v402_v52, %v401_v51  ;;  %v270_v25 = vld [vmem:[#allocation9 + $0x38] sm:$0xff] }
 0x155   :  { %v406_v1 = vor.u32 %v405_v56, %v404_v54  ;;  %v409_v3 = vor.u32 %v408_v44, %v407_v61  ;;  %vm410_vm11 = vcmp.lt.s32.totalorder %v391_v30, 1  ;;  %vm412_vm12 = vcmp.lt.s32.totalorder %v391_v30, 3 }
 0x156   :  { %v334_v4 = vsel %vm332_vm10, %v333_v62, %v7789_v39  ;;  %vm413_vm13 = vcmp.lt.s32.totalorder %v391_v30, 4  ;;  %v414_v5 = vsel %vm410_vm11, %v394_v63, %v397_v58  ;;  %v418_v6 = vsel %vm410_vm11, %v397_v58, %v400_v60 }
 0x157   :  { %v335_v7 = vadd.s32 %v334_v4, %v330_v41  ;;  %v415_v8 = vsel %vm413_vm13, %v403_v0, 2102212464  ;;  %v419_v9 = vsel %vm413_vm13, %v406_v1, 920167782  ;;  %v422_v10 = vsel %vm410_vm11, %v400_v60, %v403_v0 }
 0x158   :  { %vm411_vm14 = vcmp.lt.s32.totalorder %v391_v30, 2  ;;  %v416_v11 = vsel %vm412_vm12, %v400_v60, %v415_v8  ;;  %v420_v12 = vsel %vm412_vm12, %v403_v0, %v419_v9  ;;  %v423_v17 = vsel %vm413_vm13, %v409_v3, 1326507024 }
 0x159   :  { %v336_v20 = vadd.s32 536870912, %v335_v7  ;;  %v421_v22 = vsel %vm411_vm14, %v418_v6, %v420_v12  ;;  %v424_v23 = vsel %vm412_vm12, %v406_v1, %v423_v17  ;;  %v417_v26 = vsel %vm411_vm14, %v414_v5, %v416_v11 }
 0x15a   :  { %v425_v27 = vsel %vm411_vm14, %v422_v10, %v424_v23  ;;  %v7808_v29 = vmul.u32.u64.low %v7751_v45, %v421_v22  ;;  %v7809_v31 = vmul.u32.u64.high %v7751_v45, %v421_v22, %v7808_v29  ;;  %v489_v30 = vor.u32 8388608, %v7755_v46 }
 0x15b   :  { %v7812_v32 = vshrl.u32 %v336_v20, 30  ;;  %v7815_v33 = vmul.u32.u64.low %v7751_v45, %v425_v27  ;;  %v7816_v35 = vmul.u32.u64.high %v7751_v45, %v425_v27, %v7815_v33  ;;  %v499_v39 = vshrl.u32 %v7614_v53, %v7781_v34 }
 0x15c   :  { %v502_v41 = vshrl.u32 %v7615_v55, %v7781_v34  ;;  %v7824_v43 = vadd.f32 %v270_v25, %v7757_v47  ;;  %v494_v42 = vshrl.u32 %v7747_v40, 5  ;;  %v433_v51 = vmul.u32 %v7751_v45, %v417_v26 }
 0x15d   :  { %v338_v49 = vshll.u32 %v7812_v32, 30  ;;  %v505_v52 = vshrl.u32 %v7616_v57, %v7781_v34  ;;  %v436_v46 = vadd.s32 1, %v7809_v31  ;;  %v498_v54 = vshll.u32 %v7613_v50, %v7760_v48 }
 0x15e   :  { %v501_v56 = vshll.u32 %v7614_v53, %v7760_v48  ;;  %v508_v47 = vshrl.u32 %v7617_v59, %v7781_v34  ;;  %vm435_vm15 = vc.u32 %v7816_v35, %v7808_v29  ;;  %v504_v40 = vshll.u32 %v7615_v55, %v7760_v48 }
 0x15f   :  { %v339_v58 = vsub.s32 %v335_v7, %v338_v49  ;;  %v507_v45 = vshll.u32 %v7616_v57, %v7760_v48  ;;  %v437_v60 = vsel %vm435_vm15, %v436_v46, %v7809_v31  ;;  %v500_v61 = vor.u32 %v499_v39, %v498_v54 }
 0x160   :  { %v503_v44 = vor.u32 %v502_v41, %v501_v56  ;;  %v438_v63 = vadd.s32 %v437_v60, %v433_v51  ;;  %v506_v0 = vor.u32 %v505_v52, %v504_v40  ;;  %v510_v3 = vshll.u32 %v7617_v59, %v7760_v48 }
 0x161   :  { %v341_v62 = vsub.s32 0, %v339_v58  ;;  %v509_v1 = vor.u32 %v508_v47, %v507_v45  ;;  %v511_v4 = vshrl.u32 %v7618_v2, %v7781_v34  ;;  %v587_v5 = vand.u32 2139095040, %v7824_v43 }
 0x162   :  { %v497_v7 = vshrl.u32 %v7613_v50, %v7781_v34  ;;  %vm513_vm0 = vcmp.lt.s32.totalorder %v494_v42, 1  ;;  %v529_v8 = vshll.u32 %v489_v30, 8  ;;  %v439_v9 = vadd.s32 536870912, %v438_v63 }
 0x163   :  { %v6606_v6 = vmin.u32 %v341_v62, %v339_v58  ;;  %v512_v10 = vor.u32 %v511_v4, %v510_v3  ;;  %vm515_vm1 = vcmp.lt.s32.totalorder %v494_v42, 3  ;;  %vm516_vm3 = vcmp.lt.s32.totalorder %v494_v42, 4 }
 0x164   :  { %v518_v12 = vsel %vm516_vm3, %v506_v0, 2102212464  ;;  %v521_v17 = vsel %vm513_vm0, %v500_v61, %v503_v44  ;;  %v522_v48 = vsel %vm516_vm3, %v509_v1, 920167782  ;;  %v7853_v20 = vshrl.u32 %v439_v9, 30 }
 0x165   :  { %v343_v11 = vclz %v6606_v6  ;;  %vm514_vm4 = vcmp.lt.s32.totalorder %v494_v42, 2  ;;  %v523_v22 = vsel %vm515_vm1, %v506_v0, %v522_v48  ;;  %v525_v23 = vsel %vm513_vm0, %v503_v44, %v506_v0 }
 0x166   :  { %v524_v34 = vsel %vm514_vm4, %v521_v17, %v523_v22  ;;  %v526_v26 = vsel %vm516_vm3, %v512_v10, 1326507024  ;;  %v588_v27 = vshrl.u32 %v587_v5, 23  ;;  %v441_v31 = vshll.u32 %v7853_v20, 30 }
 0x167   :  { %v6607_v25 = vadd.s32 4294967294, %v343_v11  ;;  %v517_v33 = vsel %vm513_vm0, %v497_v7, %v500_v61  ;;  %v519_v30 = vsel %vm515_vm1, %v503_v44, %v518_v12  ;;  %v527_v39 = vsel %vm515_vm1, %v509_v1, %v526_v26 }
 0x168   :  { %v528_v41 = vsel %vm514_vm4, %v525_v23, %v527_v39  ;;  %v7863_v49 = vmul.u32.u64.low %v529_v8, %v524_v34  ;;  %v7864_v51 = vmul.u32.u64.high %v529_v8, %v524_v34, %v7863_v49  ;;  %v331_v52 = vadd.s32 %v7788_v37, %v7785_v36 }
 0x169   :  { %vm6608_vm5 = vcmp.lt.s32.totalorder %v6607_v25, 0  ;;  %v442_v54 = vsub.s32 %v438_v63, %v441_v31  ;;  %v361_v40 = vsub.s32 4, %v7812_v32  ;;  %v6617_v45 = vadd.s32 4294967169, %v588_v27 }
 0x16a   :  { %v346_v46 = vsel %vm6608_vm5, 0, %v6607_v25  ;;  %v520_v61 = vsel %vm514_vm4, %v517_v33, %v519_v30  ;;  %v7871_v44 = vmul.u32.u64.low %v529_v8, %v528_v41  ;;  %v7872_v62 = vmul.u32.u64.high %v529_v8, %v528_v41, %v7871_v44 }
 0x16b   :  { %v347_v56 = vsub.s32 32, %v346_v46  ;;  %v351_v47 = vsub.s32 4294967266, %v346_v46  ;;  %v444_v60 = vsub.s32 0, %v442_v54  ;;  %v348_v0 = vshll.u32 %v339_v58, %v346_v46 }
 0x16c   :  { %v539_v4 = vadd.s32 1, %v7864_v51  ;;  %vm277_vm6 = vcmp.lt.s32.totalorder %v7733_v14, 0  ;;  %v594_v63 = vadd.s32 1, %v6617_v45  ;;  %v536_v7 = vmul.u32 %v529_v8, %v520_v61 }
 0x16d   :  { %v349_v1 = vshrl.u32 %v331_v52, %v347_v56  ;;  %v352_v3 = vadd.s32 127, %v351_v47  ;;  %v6610_v5 = vmin.u32 %v444_v60, %v442_v54  ;;  %vm538_vm7 = vc.u32 %v7872_v62, %v7863_v49 }
 0x16e   :  { %v584_v42 = vand.u32 2147483647, %v7824_v43  ;;  %v362_v58 = vsel %vm277_vm6, %v361_v40, %v7812_v32  ;;  %v540_v10 = vsel %vm538_vm7, %v539_v4, %v7864_v51  ;;  %vm595_vm8 = vcmp.gt.s32.totalorder %v594_v63, 0 }
 0x16f   :  { %v350_v36 = vor.u32 %v349_v1, %v348_v0  ;;  %v353_v37 = vshll.u32 %v352_v3, 23  ;;  %v446_v6 = vclz %v6610_v5  ;;  %v541_v12 = vadd.s32 %v540_v10, %v536_v7 }
 0x170   :  { %v596_v17 = vsel %vm595_vm8, %v594_v63, 0  ;;  %vm7885_vm9 = vcmp.le.f32.partialorder %v275_v19, 0.7853982  ;;  %v591_v27 = vand.u32 8388607, %v584_v42  ;;  %v434_v19 = vadd.s32 %v7808_v29, %v7816_v35 }
 0x171   :  { %v354_v9 = vor.u32 4788187, %v353_v37  ;;  %v6611_v11 = vadd.s32 4294967294, %v446_v6  ;;  %v357_v22 = vcvt.s32.f32 %v350_v36  ;;  %v598_v23 = vand.u32 31, %v596_v17 }
 0x172   :  { %v364_v25 = vsel %vm7885_vm9, 0, %v362_v58  ;;  %v542_v32 = vadd.s32 536870912, %v541_v12  ;;  %v464_v52 = vsub.s32 4, %v7853_v20  ;;  %v592_v60 = vor.u32 8388608, %v591_v27 }
 0x173   :  { %v355_v48 = vand.u32 2147483647, %v354_v9  ;;  %vm6612_vm10 = vcmp.lt.s32.totalorder %v6611_v11, 0  ;;  %v599_v31 = vsub.s32 32, %v598_v23  ;;  %v7897_v51 = vand.u32 3, %v364_v25 }
 0x174   :  { %v449_v26 = vsel %vm6612_vm10, 0, %v6611_v11  ;;  %v7895_v39 = vshrl.u32 %v542_v32, 30  ;;  %vm380_vm11 = vcmp.lt.s32.totalorder %v7735_v16, 0  ;;  %v601_v3 = vshll.u32 %v7613_v50, %v598_v23 }
 0x175   :  { %v358_v34 = vmul.f32 %v357_v22, %v355_v48  ;;  %v450_v33 = vsub.s32 32, %v449_v26  ;;  %v454_v30 = vsub.s32 4294967266, %v449_v26  ;;  %v451_v46 = vshll.u32 %v442_v54, %v449_v26 }
 0x176   :  { %v544_v40 = vshll.u32 %v7895_v39, 30  ;;  %v602_v29 = vshrl.u32 %v7614_v53, %v599_v31  ;;  %v605_v35 = vshrl.u32 %v7615_v55, %v599_v31  ;;  %v7911_v54 = vshrl.u32 %v596_v17, 5 }
 0x177   :  { %v359_v41 = vxor.u32 2147483648, %v358_v34  ;;  %v452_v56 = vshrl.u32 %v434_v19, %v450_v33  ;;  %v455_v47 = vadd.s32 127, %v454_v30  ;;  %v608_v4 = vshrl.u32 %v7616_v57, %v599_v31 }
 0x178   :  { %v7908_v1 = vsub.s32 %v541_v12, %v544_v40  ;;  %vm7917_vm12 = vcmp.le.f32.partialorder %v378_v21, 0.7853982  ;;  %v604_v63 = vshll.u32 %v7614_v53, %v598_v23  ;;  %v603_v6 = vor.u32 %v602_v29, %v601_v3 }
 0x179   :  { %v360_v45 = vsel %vm277_vm6, %v359_v41, %v358_v34  ;;  %v453_v44 = vor.u32 %v452_v56, %v451_v46  ;;  %v456_v0 = vshll.u32 %v455_v47, 23  ;;  %v607_v7 = vshll.u32 %v7615_v55, %v598_v23 }
 0x17a   :  { %v363_v61 = vsel %vm7885_vm9, %v7733_v14, %v360_v45  ;;  %v547_v37 = vsub.s32 0, %v7908_v1  ;;  %v610_v9 = vshll.u32 %v7616_v57, %v598_v23  ;;  %v611_v58 = vshrl.u32 %v7617_v59, %v599_v31 }
 0x17b   :  { %7282 = vcosq.f32 %v363_v61  ;;  %v457_v36 = vor.u32 4788187, %v456_v0  ;;  %v460_v11 = vcvt.s32.f32 %v453_v44  ;;  %v606_v21 = vor.u32 %v605_v35, %v604_v63 }
 0x17c   :  { %7284 = vsinq.f32 %v363_v61  ;;  %v6614_v12 = vmin.u32 %v547_v37, %v7908_v1  ;;  %v609_v17 = vor.u32 %v608_v4, %v607_v7  ;;  %v612_v8 = vor.u32 %v611_v58, %v610_v9 }
 0x17d   :  { %v458_v10 = vand.u32 2147483647, %v457_v36  ;;  %v613_v48 = vshll.u32 %v7617_v59, %v598_v23  ;;  %v614_v22 = vshrl.u32 %v7618_v2, %v599_v31  ;;  %v537_v32 = vadd.s32 %v7863_v49, %v7872_v62 }
 0x17e   :  { %v549_v34 = vclz %v6614_v12  ;;  %v632_v26 = vshll.u32 %v592_v60, 8  ;;  %v600_v27 = vshrl.u32 %v7613_v50, %v599_v31  ;;  %vm616_vm13 = vcmp.lt.s32.totalorder %v7911_v54, 1 }
 0x17f   :  { %v461_v25 = vmul.f32 %v460_v11, %v458_v10  ;;  %v615_v19 = vor.u32 %v614_v22, %v613_v48  ;;  %vm617_vm14 = vcmp.lt.s32.totalorder %v7911_v54, 2  ;;  %vm373_vm15 = vcmp.eq.s32.totalorder %v7897_v51, 2 }
 0x180   :  { %v6615_v30 = vadd.s32 4294967294, %v549_v34  ;;  %vm618_vm0 = vcmp.lt.s32.totalorder %v7911_v54, 3  ;;  %vm619_vm1 = vcmp.lt.s32.totalorder %v7911_v54, 4  ;;  %v620_v23 = vsel %vm616_vm13, %v600_v27, %v603_v6 }
 0x181   :  { %v462_v33 = vxor.u32 2147483648, %v461_v25  ;;  %v621_v41 = vsel %vm619_vm1, %v609_v17, 2102212464  ;;  %v624_v49 = vsel %vm616_vm13, %v603_v6, %v606_v21  ;;  %v625_v62 = vsel %vm619_vm1, %v612_v8, 920167782 }
 0x182   :  { %vm6616_vm3 = vcmp.lt.s32.totalorder %v6615_v30, 0  ;;  %v626_v46 = vsel %vm618_vm0, %v609_v17, %v625_v62  ;;  %v628_v56 = vsel %vm616_vm13, %v606_v21, %v609_v17  ;;  %v629_v60 = vsel %vm619_vm1, %v615_v19, 1326507024 }
 0x183   :  { %v463_v31 = vsel %vm380_vm11, %v462_v33, %v461_v25  ;;  %v552_v40 = vsel %vm6616_vm3, 0, %v6615_v30  ;;  %v627_v45 = vsel %vm617_vm14, %v624_v49, %v626_v46  ;;  %v622_v61 = vsel %vm618_vm0, %v606_v21, %v621_v41 }
 0x184   :  { %v466_v47 = vsel %vm7917_vm12, %v7735_v16, %v463_v31  ;;  %v553_v29 = vsub.s32 32, %v552_v40  ;;  %v557_v35 = vsub.s32 4294967266, %v552_v40  ;;  %v630_v44 = vsel %vm618_vm0, %v612_v8, %v629_v60 }
 0x185   :  { %7286 = vcosq.f32 %v466_v47  ;;  %v7950_v0 = vmul.u32.u64.low %v632_v26, %v627_v45  ;;  %v7951_v3 = vmul.u32.u64.high %v632_v26, %v627_v45, %v7950_v0  ;;  %v554_v36 = vshll.u32 %v7908_v1, %v552_v40 }
 0x186   :  { %7288 = vsinq.f32 %v466_v47  ;;  %v555_v37 = vshrl.u32 %v537_v32, %v553_v29  ;;  %v558_v63 = vadd.s32 127, %v557_v35  ;;  %v631_v6 = vsel %vm617_vm14, %v628_v56, %v630_v44 }
 0x187   :  { %v465_v58 = vsel %vm380_vm11, %v464_v52, %v7853_v20  ;;  %v7962_v10 = vmul.u32.u64.low %v632_v26, %v631_v6  ;;  %v7963_v11 = vmul.u32.u64.high %v632_v26, %v631_v6, %v7962_v10  ;;  %v623_v1 = vsel %vm617_vm14, %v620_v23, %v622_v61 }
 0x188   :  { %v7283_v4 = vpop.eup %7282  ;;  %v556_v21 = vor.u32 %v555_v37, %v554_v36  ;;  %v559_v17 = vshll.u32 %v558_v63, 23  ;;  %vm370_vm4 = vcmp.eq.s32.totalorder %v7897_v51, 0  ;;  %v642_v48 = vadd.s32 1, %v7951_v3 }
 0x189   :  { %v7285_v7 = vpop.eup %7284  ;;  %v374_v9 = vxor.u32 2147483648, %v7283_v4  ;;  %vm367_vm5 = vweird.f32 %v7733_v14  ;;  %vm369_vm6 = vcmp.lt.s32.totalorder %v7897_v51, 2  ;;  %v467_v25 = vsel %vm7917_vm12, 0, %v465_v58 }
 0x18a   :  { %v371_v12 = vxor.u32 2147483648, %v7285_v7  ;;  %v560_v52 = vor.u32 4788187, %v559_v17  ;;  %v639_v32 = vmul.u32 %v632_v26, %v623_v1  ;;  %vm641_vm7 = vc.u32 %v7963_v11, %v7950_v0 }
 0x18b   :  { %v375_v8 = vsel %vm373_vm15, %v374_v9, %v7285_v7  ;;  %v563_v27 = vcvt.s32.f32 %v556_v21  ;;  %v643_v19 = vsel %vm641_vm7, %v642_v48, %v7951_v3  ;;  %v471_v51 = vand.u32 3, %v467_v25 }
 0x18c   :  { %v372_v20 = vsel %vm370_vm4, %v7283_v4, %v371_v12  ;;  %v561_v34 = vand.u32 2147483647, %v560_v52  ;;  %v644_v14 = vadd.s32 %v643_v19, %v639_v32  ;;  %vm483_vm8 = vcmp.lt.s32.totalorder %v7731_v13, 0 }
 0x18d   :  { %v376_v22 = vsel %vm369_vm6, %v372_v20, %v375_v8  ;;  %vm7984_vm9 = vcmp.le.f32.partialorder %v481_v38, 0.7853982  ;;  %vm476_vm10 = vcmp.eq.s32.totalorder %v471_v51, 2  ;;  %vm473_vm11 = vcmp.eq.s32.totalorder %v471_v51, 0 }
 0x18e   :  { %v377_v54 = vsel %vm367_vm5, nan, %v376_v22  ;;  %v564_v33 = vmul.f32 %v563_v27, %v561_v34  ;;  %v645_v30 = vadd.s32 536870912, %v644_v14  ;;  %v567_v45 = vsub.s32 4, %v7895_v39 }
 0x18f   :  { %6950 = vmatprep.mubr.msk.f32.mxu1 %vm213_vm2, %v377_v54  ;;  %vm472_vm12 = vcmp.lt.s32.totalorder %v471_v51, 2  ;;  %vm470_vm13 = vweird.f32 %v7735_v16  ;;  %v640_v16 = vadd.s32 %v7950_v0, %v7963_v11  ;;  %vm573_vm3 = vweird.f32 %v7731_v13 }
 0x190   :  { %v565_v23 = vxor.u32 2147483648, %v564_v33  ;;  %v7980_v5 = vshrl.u32 %v645_v30, 30  ;;  %v568_v44 = vsel %vm483_vm8, %v567_v45, %v7895_v39  ;;  %vm586_vm4 = vcmp.lt.s32.totalorder %v7824_v43, 0 }
 0x191   :  { %v570_v4 = vsel %vm7984_vm9, 0, %v568_v44  ;;  %vm585_vm5 = vcmp.le.f32.partialorder %v584_v42, 0.7853982 }
 0x192   :  { %v7287_v41 = vpop.eup %7286  ;;  %v566_v31 = vsel %vm483_vm8, %v565_v23, %v564_v33  ;;  %v647_v47 = vshll.u32 %v7980_v5, 30  ;;  %v574_v63 = vand.u32 3, %v570_v4 }
 0x193   :  { %v7289_v26 = vpop.eup %7288  ;;  %v477_v49 = vxor.u32 2147483648, %v7287_v41  ;;  %v569_v56 = vsel %vm7984_vm9, %v7731_v13, %v566_v31  ;;  %v670_v13 = vsub.s32 4, %v7980_v5  ;;  %vm676_vm9 = vweird.f32 %v7824_v43 }
 0x194   :  { %v474_v46 = vxor.u32 2147483648, %v7289_v26  ;;  %7290 = vcosq.f32 %v569_v56  ;;  %v648_v60 = vsub.s32 %v644_v14, %v647_v47  ;;  %vm579_vm15 = vcmp.eq.s32.totalorder %v574_v63, 2  ;;  %v1268_v47 = vld [vmem:[#allocation11 + $0x20] sm:$0xff] }
 0x195   :  { %v478_v40 = vsel %vm476_vm10, %v477_v49, %v7289_v26  ;;  %7292 = vsinq.f32 %v569_v56  ;;  %vm576_vm0 = vcmp.eq.s32.totalorder %v574_v63, 0  ;;  %vm575_vm1 = vcmp.lt.s32.totalorder %v574_v63, 2  ;;  %v1270_v56 = vld [vmem:[#allocation11 + $0x30] sm:$0xff] }
 0x196   :  { %v475_v38 = vsel %vm473_vm11, %v7287_v41, %v474_v46  ;;  %v650_v61 = vsub.s32 0, %v648_v60  ;;  %v671_v14 = vsel %vm586_vm4, %v670_v13, %v7980_v5  ;;  %v1271_v46 = vld [vmem:[#allocation11 + $0x38] sm:$0xff]  ;;  %v1269_v5 = vld [vmem:[#allocation11 + $0x28] sm:$0xff] }
 0x197   :  { %v479_v29 = vsel %vm472_vm12, %v475_v38, %v478_v40  ;;  %v673_v33 = vsel %vm585_vm5, 0, %v671_v14  ;;  %6956 = vmatprep.subr.mxu0 %v1271_v46 }
 0x198   :  { %v480_v35 = vsel %vm470_vm13, nan, %v479_v29  ;;  %v6618_v3 = vmin.u32 %v650_v61, %v648_v60  ;;  %v677_v51 = vand.u32 3, %v673_v33  ;;  %6957 = vmatpush3.msra.mxu0 %v1271_v46  ;;  %v838_v46 = vld [vmem:[#allocation9 + $0x40] sm:$0xff] }
 0x199   :  { %6951 = vmatmul.mubr.msk.f32.vlgmr.msra.gmra.mxu1 %vm213_vm2, %v480_v35  ;;  %6958 = vmatprep.subr.mxu0 %v1270_v56 }
 0x19a   :  { %v652_v36 = vclz %v6618_v3  ;;  %vm682_vm6 = vcmp.eq.s32.totalorder %v677_v51, 2  ;;  %vm679_vm7 = vcmp.eq.s32.totalorder %v677_v51, 0  ;;  %vm678_vm8 = vcmp.lt.s32.totalorder %v677_v51, 2  ;;  %6959 = vmatpush3.msra.mxu0 %v1270_v56  ;;  %v839_v56 = vld [vmem:[#allocation9 + $0x48] sm:$0xff] }
 0x19b   :  { %6960 = vmatprep.subr.mxu0 %v1269_v5 }
 0x19c   :  { %v6619_v37 = vadd.s32 4294967294, %v652_v36  ;;  %6961 = vmatpush3.msra.mxu0 %v1269_v5 }
 0x19d   :  { %6962 = vmatprep.subr.mxu0 %v1268_v47 }
 0x19e   :  { %vm6620_vm14 = vcmp.lt.s32.totalorder %v6619_v37, 0  ;;  %6963 = vmatpush3.msra.mxu0 %v1268_v47 }
 0x19f   :  { %v655_v6 = vsel %vm6620_vm14, 0, %v6619_v37 }
 0x1a0   :  { %v656_v9 = vsub.s32 32, %v655_v6  ;;  %v660_v58 = vsub.s32 4294967266, %v655_v6  ;;  %v657_v39 = vshll.u32 %v648_v60, %v655_v6 }
 0x1a1   :  { %v7291_v7 = vpop.eup %7290 }
 0x1a2   :  { %v7293_v10 = vpop.eup %7292  ;;  %v580_v12 = vxor.u32 2147483648, %v7291_v7  ;;  %v658_v17 = vshrl.u32 %v640_v16, %v656_v9  ;;  %v661_v1 = vadd.s32 127, %v660_v58 }
 0x1a3   :  { %v577_v21 = vxor.u32 2147483648, %v7293_v10 }
 0x1a4   :  { %v581_v8 = vsel %vm579_vm15, %v580_v12, %v7293_v10  ;;  %v659_v20 = vor.u32 %v658_v17, %v657_v39  ;;  %v662_v52 = vshll.u32 %v661_v1, 23 }
 0x1a5   :  { %v578_v48 = vsel %vm576_vm0, %v7291_v7, %v577_v21 }
 0x1a6   :  { %v582_v22 = vsel %vm575_vm1, %v578_v48, %v581_v8  ;;  %v663_v0 = vor.u32 4788187, %v662_v52  ;;  %v666_v32 = vcvt.s32.f32 %v659_v20 }
 0x1a7   :  { %v583_v25 = vsel %vm573_vm3, nan, %v582_v22 }
 0x1a8   :  { %6953 = vmatprep.mubr.msk.f32.mxu1 %vm213_vm2, %v583_v25  ;;  %v664_v11 = vand.u32 2147483647, %v663_v0 }
 0x1aa   :  { %v667_v54 = vmul.f32 %v666_v32, %v664_v11 }
 0x1ac   :  { %v668_v34 = vxor.u32 2147483648, %v667_v54 }
 0x1ae   :  { %v669_v27 = vsel %vm586_vm4, %v668_v34, %v667_v54 }
 0x1af   :  { %v672_v19 = vsel %vm585_vm5, %v7824_v43, %v669_v27  ;;  %v6621_v43 = vld [vmem:[%s11107_s5] ss:$0 sm:$0xff] }
 0x1b0   :  { %7294 = vcosq.f32 %v672_v19 }
 0x1b1   :  { %7296 = vsinq.f32 %v672_v19 }
 0x1bd   :  { %v7295_v30 = vpop.eup %7294 }
 0x1be   :  { %v7297_v23 = vpop.eup %7296  ;;  %v683_v41 = vxor.u32 2147483648, %v7295_v30 }
 0x1bf   :  { %v680_v26 = vxor.u32 2147483648, %v7297_v23 }
 0x1c0   :  { %v684_v49 = vsel %vm682_vm6, %v683_v41, %v7297_v23 }
 0x1c1   :  { %v681_v42 = vsel %vm679_vm7, %v7295_v30, %v680_v26 }
 0x1c2   :  { %v685_v62 = vsel %vm678_vm8, %v681_v42, %v684_v49 }
 0x1c3   :  { %v686_v31 = vsel %vm676_vm9, nan, %v685_v62 }
 0x1c4   :  { %6954 = vmatmul.mubr.msk.f32.gmra.mxu1 %vm213_vm2, %v686_v31  ;;  %v840_v31 = vld [vmem:[#allocation9 + $0x50] sm:$0xff] }
 0x259   :  { %v6952_v40 = vpop.f32.mrf.mxu1 }
 0x25a   :  { %v780_v60 = vadd.f32 %v6952_v40, %v6621_v43 }
 0x25b   :  { %v774_v45 = vpop.f32.mrf.mxu1 }
 0x25c   :  { %v775_v38 = vadd.f32 %v6621_v43, %v774_v45  ;;  %v807_v61 = vmul.f32 %v780_v60, %v780_v60  ;;  %v794_v36 = vsel %vm213_vm2, %v780_v60, 0.0 }
 0x25e   :  { %v806_v29 = vmul.f32 %v775_v38, %v775_v38  ;;  %v793_v44 = vsel %vm213_vm2, %v775_v38, 0.0  ;;  %v811_v7 = vsel %vm213_vm2, %v807_v61, 0.0 }
 0x25f   :  { %v795_v6 = vadd.f32 %v794_v36, %v793_v44 }
 0x260   :  { %v810_v37 = vsel %vm213_vm2, %v806_v29, 0.0  ;;  %v847_v29 = vld [vmem:[#allocation9 + $0x60] sm:$0xff] }
 0x261   :  { %v812_v10 = vadd.f32 %v811_v7, %v810_v37 }
 0x284   :  { %v6955_v35 = vpop.f32.mrf.mxu1 }
 0x285   :  { %v790_v3 = vadd.f32 %v6955_v35, %v6621_v43  ;;  %v848_v35 = vld [vmem:[#allocation9 + $0x68] sm:$0xff] }
 0x286   :  { %v784_v4 = vpop.f32.mrf.mxu1 }
 0x287   :  { %v785_v63 = vadd.f32 %v6621_v43, %v784_v4  ;;  %v809_v16 = vmul.f32 %v790_v3, %v790_v3  ;;  %v798_v21 = vsel %vm213_vm2, %v790_v3, 0.0  ;;  %v849_v43 = vld [vmem:[#allocation9 + $0x70] sm:$0xff] }
 0x289   :  { %v796_v9 = vsel %vm213_vm2, %v785_v63, 0.0  ;;  %v808_v58 = vmul.f32 %v785_v63, %v785_v63  ;;  %v815_v8 = vsel %vm213_vm2, %v809_v16, 0.0 }
 0x28a   :  { %v797_v12 = vadd.f32 %v796_v9, %v795_v6 }
 0x28b   :  { %v813_v39 = vsel %vm213_vm2, %v808_v58, 0.0 }
 0x28c   :  { %v799_v17 = vadd.f32 %v798_v21, %v797_v12  ;;  %v814_v1 = vadd.f32 %v813_v39, %v812_v10 }
 0x28e   :  { %v800_v48 = vrot.slane %v799_v17, 4  ;;  %v816_v20 = vadd.f32 %v815_v8, %v814_v1 }
 0x290   :  { %v801_v52 = vadd.f32 %v800_v48, %v799_v17  ;;  %v817_v22 = vrot.slane %v816_v20, 4 }
 0x292   :  { %v802_v25 = vrot.slane %v801_v52, 2  ;;  %v818_v0 = vadd.f32 %v817_v22, %v816_v20 }
 0x294   :  { %v803_v11 = vadd.f32 %v802_v25, %v801_v52  ;;  %v819_v32 = vrot.slane %v818_v0, 2  ;;  %v841_v25 = vld [vmem:[#allocation9 + $0x58] sm:$0xff] }
 0x296   :  { %v804_v54 = vrot.slane %v803_v11, 1  ;;  %v820_v34 = vadd.f32 %v819_v32, %v818_v0 }
 0x298   :  { %v805_v27 = vadd.f32 %v804_v54, %v803_v11  ;;  %v821_v19 = vrot.slane %v820_v34, 1 }
 0x29a   :  { %v822_v13 = vadd.f32 %v821_v19, %v820_v34  ;;  %v823_v14 = vmul.f32 0.03125, %v805_v27 }
 0x29c   :  { %v824_v33 = vmul.f32 0.03125, %v822_v13  ;;  %v825_v51 = vmul.f32 %v823_v14, %v823_v14  ;;  %v830_v30 = vsub.f32 %v790_v3, %v823_v14  ;;  %v828_v26 = vsub.f32 %v780_v60, %v823_v14 }
 0x29d   :  { %v829_v49 = vsub.f32 %v785_v63, %v823_v14  ;;  %v827_v42 = vsub.f32 %v775_v38, %v823_v14 }
 0x29e   :  { %v826_v23 = vsub.f32 %v824_v33, %v825_v51 }
 0x2a0   :  { %v831_v41 = vadd.f32 1e-05, %v826_v23 }
 0x2a2   :  { %7298 = vrsqrt.f32 %v831_v41 }
 0x2af   :  { %v7299_v62 = vpop.eup %7298 }
 0x2b0   :  { %v835_v5 = vmul.f32 %v7299_v62, %v829_v49  ;;  %v833_v47 = vmul.f32 %v7299_v62, %v827_v42  ;;  %v834_v40 = vmul.f32 %v7299_v62, %v828_v26  ;;  %v836_v45 = vmul.f32 %v7299_v62, %v830_v30 }
 0x2b2   :  { %v844_v61 = vmul.f32 %v840_v31, %v835_v5  ;;  %v842_v44 = vmul.f32 %v838_v46, %v833_v47  ;;  %v843_v3 = vmul.f32 %v839_v56, %v834_v40  ;;  %v8051_v13 = vmul.f32 %v841_v25, %v836_v45 }
 0x2b4   :  { %v8025_v4 = vadd.f32 %v849_v43, %v844_v61  ;;  %v8027_v36 = vadd.f32 %v847_v29, %v842_v44  ;;  %v8029_v60 = vadd.f32 %v848_v35, %v843_v3 }
 0x2b6   :  { %v1064_v38 = vand.u32 2139095040, %v8025_v4  ;;  %v855_v37 = vand.u32 2147483647, %v8027_v36  ;;  %v858_v63 = vand.u32 2139095040, %v8027_v36  ;;  %v958_v6 = vand.u32 2147483647, %v8029_v60 }
 0x2b7   :  { %v961_v7 = vand.u32 2139095040, %v8029_v60  ;;  %v1061_v22 = vand.u32 2147483647, %v8025_v4 }
 0x2b8   :  { %v1065_v16 = vshrl.u32 %v1064_v38, 23  ;;  %v859_v9 = vshrl.u32 %v858_v63, 23  ;;  %v862_v58 = vand.u32 8388607, %v855_v37  ;;  %v965_v12 = vand.u32 8388607, %v958_v6 }
 0x2b9   :  { %v962_v10 = vshrl.u32 %v961_v7, 23  ;;  %v8049_v19 = vand.u32 8388607, %v1061_v22 }
 0x2ba   :  { %v6634_v21 = vadd.s32 4294967169, %v1065_v16  ;;  %v6626_v39 = vadd.s32 4294967169, %v859_v9  ;;  %v863_v48 = vor.u32 8388608, %v862_v58  ;;  %v966_v20 = vor.u32 8388608, %v965_v12 }
 0x2bb   :  { %v6630_v17 = vadd.s32 4294967169, %v962_v10 }
 0x2bc   :  { %v1071_v1 = vadd.s32 1, %v6634_v21  ;;  %v865_v8 = vadd.s32 1, %v6626_v39  ;;  %v8043_v34 = vshll.u32 %v863_v48, 8  ;;  %v8045_v27 = vshll.u32 %v966_v20, 8 }
 0x2bd   :  { %v968_v52 = vadd.s32 1, %v6630_v17 }
 0x2be   :  { %vm1072_vm10 = vcmp.gt.s32.totalorder %v1071_v1, 0  ;;  %vm866_vm11 = vcmp.gt.s32.totalorder %v865_v8, 0 }
 0x2bf   :  { %v8041_v0 = vsel %vm1072_vm10, %v1071_v1, 0  ;;  %v867_v11 = vsel %vm866_vm11, %v865_v8, 0  ;;  %vm969_vm12 = vcmp.gt.s32.totalorder %v968_v52, 0 }
 0x2c0   :  { %v868_v32 = vshrl.u32 %v867_v11, 5  ;;  %v869_v54 = vand.u32 31, %v867_v11  ;;  %v8054_v14 = vand.u32 31, %v8041_v0  ;;  %v970_v30 = vsel %vm969_vm12, %v968_v52, 0 }
 0x2c1   :  { %v972_v35 = vand.u32 31, %v970_v30  ;;  %v971_v1 = vshrl.u32 %v970_v30, 5 }
 0x2c2   :  { %v870_v33 = vsub.s32 32, %v869_v54  ;;  %v872_v51 = vshll.u32 %v7613_v50, %v869_v54  ;;  %v875_v23 = vshll.u32 %v7614_v53, %v869_v54  ;;  %v878_v41 = vshll.u32 %v7615_v55, %v869_v54 }
 0x2c3   :  { %v881_v26 = vshll.u32 %v7616_v57, %v869_v54  ;;  %v884_v49 = vshll.u32 %v7617_v59, %v869_v54  ;;  %vm887_vm13 = vcmp.lt.s32.totalorder %v868_v32, 1  ;;  %vm888_vm14 = vcmp.lt.s32.totalorder %v868_v32, 2 }
 0x2c4   :  { %v873_v42 = vshrl.u32 %v7614_v53, %v870_v33  ;;  %v876_v62 = vshrl.u32 %v7615_v55, %v870_v33  ;;  %v879_v31 = vshrl.u32 %v7616_v57, %v870_v33  ;;  %v871_v46 = vshrl.u32 %v7613_v50, %v870_v33 }
 0x2c5   :  { %v882_v56 = vshrl.u32 %v7617_v59, %v870_v33  ;;  %v885_v5 = vshrl.u32 %v7618_v2, %v870_v33  ;;  %vm889_vm15 = vcmp.lt.s32.totalorder %v868_v32, 3  ;;  %vm890_vm0 = vcmp.lt.s32.totalorder %v868_v32, 4 }
 0x2c6   :  { %v874_v47 = vor.u32 %v873_v42, %v872_v51  ;;  %v877_v40 = vor.u32 %v876_v62, %v875_v23  ;;  %v880_v45 = vor.u32 %v879_v31, %v878_v41  ;;  %v973_v9 = vsub.s32 32, %v972_v35 }
 0x2c7   :  { %v883_v43 = vor.u32 %v882_v56, %v881_v26  ;;  %v886_v29 = vor.u32 %v885_v5, %v884_v49  ;;  %v8072_v58 = vsub.s32 32, %v8054_v14  ;;  %v975_v8 = vshll.u32 %v7613_v50, %v972_v35 }
 0x2c8   :  { %v891_v61 = vsel %vm887_vm13, %v871_v46, %v874_v47  ;;  %v892_v44 = vsel %vm890_vm0, %v880_v45, 2102212464  ;;  %v895_v3 = vsel %vm887_vm13, %v874_v47, %v877_v40  ;;  %v899_v38 = vsel %vm887_vm13, %v877_v40, %v880_v45 }
 0x2c9   :  { %v893_v63 = vsel %vm889_vm15, %v877_v40, %v892_v44  ;;  %v896_v7 = vsel %vm890_vm0, %v883_v43, 920167782  ;;  %v900_v16 = vsel %vm890_vm0, %v886_v29, 1326507024  ;;  %v976_v54 = vshrl.u32 %v7614_v53, %v973_v9 }
 0x2ca   :  { %v894_v10 = vsel %vm888_vm14, %v891_v61, %v893_v63  ;;  %v897_v12 = vsel %vm889_vm15, %v880_v45, %v896_v7  ;;  %v901_v21 = vsel %vm889_vm15, %v883_v43, %v900_v16  ;;  %v978_v33 = vshll.u32 %v7614_v53, %v972_v35 }
 0x2cb   :  { %v898_v39 = vsel %vm888_vm14, %v895_v3, %v897_v12  ;;  %v902_v17 = vsel %vm888_vm14, %v899_v38, %v901_v21  ;;  %v910_v11 = vmul.u32 %v8043_v34, %v894_v10  ;;  %v979_v32 = vshrl.u32 %v7615_v55, %v973_v9 }
 0x2cc   :  { %v8081_v48 = vmul.u32.u64.low %v8043_v34, %v902_v17  ;;  %v8082_v20 = vmul.u32.u64.high %v8043_v34, %v902_v17, %v8081_v48  ;;  %v8085_v52 = vmul.u32.u64.low %v8043_v34, %v898_v39  ;;  %v8086_v25 = vmul.u32.u64.high %v8043_v34, %v898_v39, %v8085_v52 }
 0x2cd   :  { %v981_v51 = vshll.u32 %v7615_v55, %v972_v35  ;;  %v982_v30 = vshrl.u32 %v7616_v57, %v973_v9  ;;  %v984_v23 = vshll.u32 %v7616_v57, %v972_v35  ;;  %v985_v41 = vshrl.u32 %v7617_v59, %v973_v9 }
 0x2ce   :  { %v977_v26 = vor.u32 %v976_v54, %v975_v8  ;;  %v980_v49 = vor.u32 %v979_v32, %v978_v33  ;;  %v987_v42 = vshll.u32 %v7617_v59, %v972_v35  ;;  %v988_v34 = vshrl.u32 %v7618_v2, %v973_v9 }
 0x2cf   :  { %vm912_vm1 = vc.u32 %v8082_v20, %v8085_v52  ;;  %v913_v62 = vadd.s32 1, %v8086_v25  ;;  %v974_v31 = vshrl.u32 %v7613_v50, %v973_v9  ;;  %v983_v46 = vor.u32 %v982_v30, %v981_v51  ;;  %v850_v9 = vld [vmem:[#allocation9 + $0x78] sm:$0xff] }
 0x2d0   :  { %v986_v56 = vor.u32 %v985_v41, %v984_v23  ;;  %v989_v5 = vor.u32 %v988_v34, %v987_v42  ;;  %vm990_vm3 = vcmp.lt.s32.totalorder %v971_v1, 1  ;;  %vm992_vm4 = vcmp.lt.s32.totalorder %v971_v1, 3 }
 0x2d1   :  { %v914_v47 = vsel %vm912_vm1, %v913_v62, %v8086_v25  ;;  %vm993_vm5 = vcmp.lt.s32.totalorder %v971_v1, 4  ;;  %v994_v40 = vsel %vm990_vm3, %v974_v31, %v977_v26  ;;  %v998_v45 = vsel %vm990_vm3, %v977_v26, %v980_v49 }
 0x2d2   :  { %v915_v43 = vadd.s32 %v914_v47, %v910_v11  ;;  %v995_v29 = vsel %vm993_vm5, %v983_v46, 2102212464  ;;  %v999_v35 = vsel %vm993_vm5, %v986_v56, 920167782  ;;  %v1002_v61 = vsel %vm990_vm3, %v980_v49, %v983_v46 }
 0x2d3   :  { %vm991_vm6 = vcmp.lt.s32.totalorder %v971_v1, 2  ;;  %v996_v44 = vsel %vm992_vm4, %v980_v49, %v995_v29  ;;  %v1000_v3 = vsel %vm992_vm4, %v983_v46, %v999_v35  ;;  %v1003_v38 = vsel %vm993_vm5, %v989_v5, 1326507024 }
 0x2d4   :  { %v916_v63 = vadd.s32 536870912, %v915_v43  ;;  %v1001_v7 = vsel %vm991_vm6, %v998_v45, %v1000_v3  ;;  %v1004_v16 = vsel %vm992_vm4, %v986_v56, %v1003_v38  ;;  %v997_v10 = vsel %vm991_vm6, %v994_v40, %v996_v44 }
 0x2d5   :  { %v1005_v12 = vsel %vm991_vm6, %v1002_v61, %v1004_v16  ;;  %v8105_v21 = vmul.u32.u64.low %v8045_v27, %v1001_v7  ;;  %v8106_v39 = vmul.u32.u64.high %v8045_v27, %v1001_v7, %v8105_v21  ;;  %v1069_v1 = vor.u32 8388608, %v8049_v19 }
 0x2d6   :  { %v8109_v17 = vshrl.u32 %v916_v63, 30  ;;  %v8112_v8 = vmul.u32.u64.low %v8045_v27, %v1005_v12  ;;  %v8113_v48 = vmul.u32.u64.high %v8045_v27, %v1005_v12, %v8112_v8  ;;  %v1079_v25 = vshrl.u32 %v7614_v53, %v8072_v58 }
 0x2d7   :  { %v1082_v11 = vshrl.u32 %v7615_v55, %v8072_v58  ;;  %v8121_v54 = vadd.f32 %v850_v9, %v8051_v13  ;;  %v1074_v33 = vshrl.u32 %v8041_v0, 5  ;;  %v1013_v51 = vmul.u32 %v8045_v27, %v997_v10 }
 0x2d8   :  { %v918_v32 = vshll.u32 %v8109_v17, 30  ;;  %v1085_v30 = vshrl.u32 %v7616_v57, %v8072_v58  ;;  %v1016_v19 = vadd.s32 1, %v8106_v39  ;;  %v1078_v23 = vshll.u32 %v7613_v50, %v8054_v14 }
 0x2d9   :  { %v1081_v41 = vshll.u32 %v7614_v53, %v8054_v14  ;;  %v1088_v13 = vshrl.u32 %v7617_v59, %v8072_v58  ;;  %vm1015_vm7 = vc.u32 %v8113_v48, %v8105_v21  ;;  %v1084_v0 = vshll.u32 %v7615_v55, %v8054_v14 }
 0x2da   :  { %v919_v26 = vsub.s32 %v915_v43, %v918_v32  ;;  %v1087_v27 = vshll.u32 %v7616_v57, %v8054_v14  ;;  %v1017_v49 = vsel %vm1015_vm7, %v1016_v19, %v8106_v39  ;;  %v1080_v42 = vor.u32 %v1079_v25, %v1078_v23 }
 0x2db   :  { %v1083_v34 = vor.u32 %v1082_v11, %v1081_v41  ;;  %v1018_v31 = vadd.s32 %v1017_v49, %v1013_v51  ;;  %v1086_v46 = vor.u32 %v1085_v30, %v1084_v0  ;;  %v1090_v5 = vshll.u32 %v7617_v59, %v8054_v14 }
 0x2dc   :  { %v921_v62 = vsub.s32 0, %v919_v26  ;;  %v1089_v56 = vor.u32 %v1088_v13, %v1087_v27  ;;  %v1091_v47 = vshrl.u32 %v7618_v2, %v8072_v58  ;;  %v1167_v40 = vand.u32 2139095040, %v8121_v54 }
 0x2dd   :  { %v1077_v43 = vshrl.u32 %v7613_v50, %v8072_v58  ;;  %vm1093_vm8 = vcmp.lt.s32.totalorder %v1074_v33, 1  ;;  %v1109_v29 = vshll.u32 %v1069_v1, 8  ;;  %v1019_v35 = vadd.s32 536870912, %v1018_v31 }
 0x2de   :  { %v6627_v45 = vmin.u32 %v921_v62, %v919_v26  ;;  %v1092_v61 = vor.u32 %v1091_v47, %v1090_v5  ;;  %vm1095_vm9 = vcmp.lt.s32.totalorder %v1074_v33, 3  ;;  %vm1096_vm10 = vcmp.lt.s32.totalorder %v1074_v33, 4 }
 0x2df   :  { %v1098_v3 = vsel %vm1096_vm10, %v1086_v46, 2102212464  ;;  %v1101_v38 = vsel %vm1093_vm8, %v1080_v42, %v1083_v34  ;;  %v1102_v14 = vsel %vm1096_vm10, %v1089_v56, 920167782  ;;  %v8150_v63 = vshrl.u32 %v1019_v35, 30 }
 0x2e0   :  { %v923_v44 = vclz %v6627_v45  ;;  %vm1094_vm11 = vcmp.lt.s32.totalorder %v1074_v33, 2  ;;  %v1103_v7 = vsel %vm1095_vm9, %v1086_v46, %v1102_v14  ;;  %v1105_v16 = vsel %vm1093_vm8, %v1083_v34, %v1086_v46 }
 0x2e1   :  { %v1104_v58 = vsel %vm1094_vm11, %v1101_v38, %v1103_v7  ;;  %v1106_v10 = vsel %vm1096_vm10, %v1092_v61, 1326507024  ;;  %v1168_v12 = vshrl.u32 %v1167_v40, 23  ;;  %v1021_v39 = vshll.u32 %v8150_v63, 30 }
 0x2e2   :  { %v6628_v9 = vadd.s32 4294967294, %v923_v44  ;;  %v1097_v8 = vsel %vm1093_vm8, %v1077_v43, %v1080_v42  ;;  %v1099_v1 = vsel %vm1095_vm9, %v1083_v34, %v1098_v3  ;;  %v1107_v25 = vsel %vm1095_vm9, %v1089_v56, %v1106_v10 }
 0x2e3   :  { %v1108_v11 = vsel %vm1094_vm11, %v1105_v16, %v1107_v25  ;;  %v8160_v32 = vmul.u32.u64.low %v1109_v29, %v1104_v58  ;;  %v8161_v51 = vmul.u32.u64.high %v1109_v29, %v1104_v58, %v8160_v32  ;;  %v911_v30 = vadd.s32 %v8085_v52, %v8082_v20 }
 0x2e4   :  { %vm6629_vm12 = vcmp.lt.s32.totalorder %v6628_v9, 0  ;;  %v1022_v23 = vsub.s32 %v1018_v31, %v1021_v39  ;;  %v941_v0 = vsub.s32 4, %v8109_v17  ;;  %v6638_v27 = vadd.s32 4294967169, %v1168_v12 }
 0x2e5   :  { %v926_v19 = vsel %vm6629_vm12, 0, %v6628_v9  ;;  %v1100_v42 = vsel %vm1094_vm11, %v1097_v8, %v1099_v1  ;;  %v8168_v34 = vmul.u32.u64.low %v1109_v29, %v1108_v11  ;;  %v8169_v62 = vmul.u32.u64.high %v1109_v29, %v1108_v11, %v8168_v34 }
 0x2e6   :  { %v927_v41 = vsub.s32 32, %v926_v19  ;;  %v931_v13 = vsub.s32 4294967266, %v926_v19  ;;  %v1024_v49 = vsub.s32 0, %v1022_v23  ;;  %v928_v46 = vshll.u32 %v919_v26, %v926_v19 }
 0x2e7   :  { %v1119_v47 = vadd.s32 1, %v8161_v51  ;;  %vm857_vm13 = vcmp.lt.s32.totalorder %v8027_v36, 0  ;;  %v1174_v31 = vadd.s32 1, %v6638_v27  ;;  %v1116_v43 = vmul.u32 %v1109_v29, %v1100_v42 }
 0x2e8   :  { %v929_v56 = vshrl.u32 %v911_v30, %v927_v41  ;;  %v932_v5 = vadd.s32 127, %v931_v13  ;;  %v6631_v40 = vmin.u32 %v1024_v49, %v1022_v23  ;;  %vm1118_vm14 = vc.u32 %v8169_v62, %v8160_v32 }
 0x2e9   :  { %v1164_v33 = vand.u32 2147483647, %v8121_v54  ;;  %v942_v26 = vsel %vm857_vm13, %v941_v0, %v8109_v17  ;;  %v1120_v61 = vsel %vm1118_vm14, %v1119_v47, %v8161_v51  ;;  %vm1175_vm15 = vcmp.gt.s32.totalorder %v1174_v31, 0 }
 0x2ea   :  { %v930_v20 = vor.u32 %v929_v56, %v928_v46  ;;  %v933_v52 = vshll.u32 %v932_v5, 23  ;;  %v1026_v45 = vclz %v6631_v40  ;;  %v1121_v3 = vadd.s32 %v1120_v61, %v1116_v43 }
 0x2eb   :  { %v1176_v38 = vsel %vm1175_vm15, %v1174_v31, 0  ;;  %vm8182_vm0 = vcmp.le.f32.partialorder %v855_v37, 0.7853982  ;;  %v1171_v12 = vand.u32 8388607, %v1164_v33  ;;  %v1014_v37 = vadd.s32 %v8105_v21, %v8113_v48 }
 0x2ec   :  { %v934_v35 = vor.u32 4788187, %v933_v52  ;;  %v6632_v44 = vadd.s32 4294967294, %v1026_v45  ;;  %v937_v7 = vcvt.s32.f32 %v930_v20  ;;  %v1178_v16 = vand.u32 31, %v1176_v38 }
 0x2ed   :  { %v944_v9 = vsel %vm8182_vm0, 0, %v942_v26  ;;  %v1122_v17 = vadd.s32 536870912, %v1121_v3  ;;  %v1044_v30 = vsub.s32 4, %v8150_v63  ;;  %v1172_v49 = vor.u32 8388608, %v1171_v12 }
 0x2ee   :  { %v935_v14 = vand.u32 2147483647, %v934_v35  ;;  %vm6633_vm1 = vcmp.lt.s32.totalorder %v6632_v44, 0  ;;  %v1179_v39 = vsub.s32 32, %v1178_v16  ;;  %v8194_v51 = vand.u32 3, %v944_v9 }
 0x2ef   :  { %v1029_v10 = vsel %vm6633_vm1, 0, %v6632_v44  ;;  %v8192_v25 = vshrl.u32 %v1122_v17, 30  ;;  %vm960_vm3 = vcmp.lt.s32.totalorder %v8029_v60, 0  ;;  %v1181_v5 = vshll.u32 %v7613_v50, %v1178_v16 }
 0x2f0   :  { %v938_v58 = vmul.f32 %v937_v7, %v935_v14  ;;  %v1030_v8 = vsub.s32 32, %v1029_v10  ;;  %v1034_v1 = vsub.s32 4294967266, %v1029_v10  ;;  %v1031_v19 = vshll.u32 %v1022_v23, %v1029_v10 }
 0x2f1   :  { %v1124_v0 = vshll.u32 %v8192_v25, 30  ;;  %v1182_v21 = vshrl.u32 %v7614_v53, %v1179_v39  ;;  %v1185_v48 = vshrl.u32 %v7615_v55, %v1179_v39  ;;  %v8208_v23 = vshrl.u32 %v1176_v38, 5 }
 0x2f2   :  { %v939_v11 = vxor.u32 2147483648, %v938_v58  ;;  %v1032_v41 = vshrl.u32 %v1014_v37, %v1030_v8  ;;  %v1035_v13 = vadd.s32 127, %v1034_v1  ;;  %v1188_v47 = vshrl.u32 %v7616_v57, %v1179_v39 }
 0x2f3   :  { %v8205_v56 = vsub.s32 %v1121_v3, %v1124_v0  ;;  %vm8214_vm4 = vcmp.le.f32.partialorder %v958_v6, 0.7853982  ;;  %v1184_v31 = vshll.u32 %v7614_v53, %v1178_v16  ;;  %v1183_v45 = vor.u32 %v1182_v21, %v1181_v5 }
 0x2f4   :  { %v940_v27 = vsel %vm857_vm13, %v939_v11, %v938_v58  ;;  %v1033_v34 = vor.u32 %v1032_v41, %v1031_v19  ;;  %v1036_v46 = vshll.u32 %v1035_v13, 23  ;;  %v1187_v43 = vshll.u32 %v7615_v55, %v1178_v16 }
 0x2f5   :  { %v943_v42 = vsel %vm8182_vm0, %v8027_v36, %v940_v27  ;;  %v1127_v52 = vsub.s32 0, %v8205_v56  ;;  %v1190_v35 = vshll.u32 %v7616_v57, %v1178_v16  ;;  %v1191_v26 = vshrl.u32 %v7617_v59, %v1179_v39 }
 0x2f6   :  { %7300 = vcosq.f32 %v943_v42  ;;  %v1037_v20 = vor.u32 4788187, %v1036_v46  ;;  %v1040_v44 = vcvt.s32.f32 %v1033_v34  ;;  %v1186_v6 = vor.u32 %v1185_v48, %v1184_v31 }
 0x2f7   :  { %7302 = vsinq.f32 %v943_v42  ;;  %v6635_v3 = vmin.u32 %v1127_v52, %v8205_v56  ;;  %v1189_v38 = vor.u32 %v1188_v47, %v1187_v43  ;;  %v1192_v29 = vor.u32 %v1191_v26, %v1190_v35 }
 0x2f8   :  { %v1038_v61 = vand.u32 2147483647, %v1037_v20  ;;  %v1193_v14 = vshll.u32 %v7617_v59, %v1178_v16  ;;  %v1194_v7 = vshrl.u32 %v7618_v2, %v1179_v39  ;;  %v1117_v17 = vadd.s32 %v8160_v32, %v8169_v62 }
 0x2f9   :  { %v1129_v58 = vclz %v6635_v3  ;;  %v1212_v10 = vshll.u32 %v1172_v49, 8  ;;  %v1180_v12 = vshrl.u32 %v7613_v50, %v1179_v39  ;;  %vm1196_vm5 = vcmp.lt.s32.totalorder %v8208_v23, 1 }
 0x2fa   :  { %v1041_v9 = vmul.f32 %v1040_v44, %v1038_v61  ;;  %v1195_v37 = vor.u32 %v1194_v7, %v1193_v14  ;;  %vm1197_vm6 = vcmp.lt.s32.totalorder %v8208_v23, 2  ;;  %vm953_vm7 = vcmp.eq.s32.totalorder %v8194_v51, 2 }
 0x2fb   :  { %v6636_v1 = vadd.s32 4294967294, %v1129_v58  ;;  %vm1198_vm8 = vcmp.lt.s32.totalorder %v8208_v23, 3  ;;  %vm1199_vm9 = vcmp.lt.s32.totalorder %v8208_v23, 4  ;;  %v1200_v16 = vsel %vm1196_vm5, %v1180_v12, %v1183_v45 }
 0x2fc   :  { %v1042_v8 = vxor.u32 2147483648, %v1041_v9  ;;  %v1201_v11 = vsel %vm1199_vm9, %v1189_v38, 2102212464  ;;  %v1204_v32 = vsel %vm1196_vm5, %v1183_v45, %v1186_v6  ;;  %v1205_v62 = vsel %vm1199_vm9, %v1192_v29, 920167782 }
 0x2fd   :  { %vm6637_vm10 = vcmp.lt.s32.totalorder %v6636_v1, 0  ;;  %v1206_v19 = vsel %vm1198_vm8, %v1189_v38, %v1205_v62  ;;  %v1208_v41 = vsel %vm1196_vm5, %v1186_v6, %v1189_v38  ;;  %v1209_v49 = vsel %vm1199_vm9, %v1195_v37, 1326507024 }
 0x2fe   :  { %v1043_v39 = vsel %vm960_vm3, %v1042_v8, %v1041_v9  ;;  %v1132_v0 = vsel %vm6637_vm10, 0, %v6636_v1  ;;  %v1207_v27 = vsel %vm1197_vm6, %v1204_v32, %v1206_v19  ;;  %v1202_v42 = vsel %vm1198_vm8, %v1186_v6, %v1201_v11 }
 0x2ff   :  { %v1046_v13 = vsel %vm8214_vm4, %v8029_v60, %v1043_v39  ;;  %v1133_v21 = vsub.s32 32, %v1132_v0  ;;  %v1137_v48 = vsub.s32 4294967266, %v1132_v0  ;;  %v1210_v34 = vsel %vm1198_vm8, %v1192_v29, %v1209_v49 }
 0x300   :  { %7304 = vcosq.f32 %v1046_v13  ;;  %v8247_v46 = vmul.u32.u64.low %v1212_v10, %v1207_v27  ;;  %v8248_v5 = vmul.u32.u64.high %v1212_v10, %v1207_v27, %v8247_v46  ;;  %v1134_v20 = vshll.u32 %v8205_v56, %v1132_v0 }
 0x301   :  { %7306 = vsinq.f32 %v1046_v13  ;;  %v1135_v52 = vshrl.u32 %v1117_v17, %v1133_v21  ;;  %v1138_v31 = vadd.s32 127, %v1137_v48  ;;  %v1211_v45 = vsel %vm1197_vm6, %v1208_v41, %v1210_v34 }
 0x302   :  { %v1045_v26 = vsel %vm960_vm3, %v1044_v30, %v8150_v63  ;;  %v8259_v61 = vmul.u32.u64.low %v1212_v10, %v1211_v45  ;;  %v8260_v44 = vmul.u32.u64.high %v1212_v10, %v1211_v45, %v8259_v61  ;;  %v1203_v56 = vsel %vm1197_vm6, %v1200_v16, %v1202_v42 }
 0x303   :  { %v7301_v47 = vpop.eup %7300  ;;  %v1136_v6 = vor.u32 %v1135_v52, %v1134_v20  ;;  %v1139_v38 = vshll.u32 %v1138_v31, 23  ;;  %vm950_vm11 = vcmp.eq.s32.totalorder %v8194_v51, 0  ;;  %v1222_v14 = vadd.s32 1, %v8248_v5 }
 0x304   :  { %v7303_v43 = vpop.eup %7302  ;;  %v954_v35 = vxor.u32 2147483648, %v7301_v47  ;;  %vm947_vm12 = vweird.f32 %v8027_v36  ;;  %vm949_vm13 = vcmp.lt.s32.totalorder %v8194_v51, 2  ;;  %v1047_v9 = vsel %vm8214_vm4, 0, %v1045_v26 }
 0x305   :  { %v951_v3 = vxor.u32 2147483648, %v7303_v43  ;;  %v1140_v30 = vor.u32 4788187, %v1139_v38  ;;  %v1219_v17 = vmul.u32 %v1212_v10, %v1203_v56  ;;  %vm1221_vm14 = vc.u32 %v8260_v44, %v8247_v46 }
 0x306   :  { %v955_v29 = vsel %vm953_vm7, %v954_v35, %v7303_v43  ;;  %v1143_v12 = vcvt.s32.f32 %v1136_v6  ;;  %v1223_v37 = vsel %vm1221_vm14, %v1222_v14, %v8248_v5  ;;  %v1051_v51 = vand.u32 3, %v1047_v9 }
 0x307   :  { %v952_v63 = vsel %vm950_vm11, %v7301_v47, %v951_v3  ;;  %v1141_v58 = vand.u32 2147483647, %v1140_v30  ;;  %v1224_v36 = vadd.s32 %v1223_v37, %v1219_v17  ;;  %vm1063_vm15 = vcmp.lt.s32.totalorder %v8025_v4, 0 }
 0x308   :  { %v956_v7 = vsel %vm949_vm13, %v952_v63, %v955_v29  ;;  %vm8281_vm0 = vcmp.le.f32.partialorder %v1061_v22, 0.7853982  ;;  %vm1056_vm1 = vcmp.eq.s32.totalorder %v1051_v51, 2  ;;  %vm1053_vm3 = vcmp.eq.s32.totalorder %v1051_v51, 0 }
 0x309   :  { %v957_v23 = vsel %vm947_vm12, nan, %v956_v7  ;;  %v1144_v8 = vmul.f32 %v1143_v12, %v1141_v58  ;;  %v1225_v1 = vadd.s32 536870912, %v1224_v36  ;;  %v1147_v27 = vsub.s32 4, %v8192_v25 }
 0x30a   :  { %6964 = vmatprep.mubr.msk.f32.mxu0 %vm213_vm2, %v957_v23  ;;  %vm1052_vm4 = vcmp.lt.s32.totalorder %v1051_v51, 2  ;;  %vm1050_vm5 = vweird.f32 %v8029_v60  ;;  %v1220_v60 = vadd.s32 %v8247_v46, %v8260_v44  ;;  %vm1153_vm10 = vweird.f32 %v8025_v4 }
 0x30b   :  { %v1145_v16 = vxor.u32 2147483648, %v1144_v8  ;;  %v8277_v40 = vshrl.u32 %v1225_v1, 30  ;;  %v1148_v34 = vsel %vm1063_vm15, %v1147_v27, %v8192_v25  ;;  %vm1166_vm11 = vcmp.lt.s32.totalorder %v8121_v54, 0 }
 0x30c   :  { %v1150_v47 = vsel %vm8281_vm0, 0, %v1148_v34  ;;  %vm1165_vm12 = vcmp.le.f32.partialorder %v1164_v33, 0.7853982 }
 0x30d   :  { %v7305_v11 = vpop.eup %7304  ;;  %v1146_v39 = vsel %vm1063_vm15, %v1145_v16, %v1144_v8  ;;  %v1227_v13 = vshll.u32 %v8277_v40, 30  ;;  %v1154_v31 = vand.u32 3, %v1150_v47 }
 0x30e   :  { %v7307_v10 = vpop.eup %7306  ;;  %v1057_v32 = vxor.u32 2147483648, %v7305_v11  ;;  %v1149_v41 = vsel %vm8281_vm0, %v8025_v4, %v1146_v39  ;;  %v1250_v4 = vsub.s32 4, %v8277_v40  ;;  %vm1256_vm0 = vweird.f32 %v8121_v54 }
 0x30f   :  { %v1054_v19 = vxor.u32 2147483648, %v7307_v10  ;;  %7308 = vcosq.f32 %v1149_v41  ;;  %v1228_v49 = vsub.s32 %v1224_v36, %v1227_v13  ;;  %vm1159_vm7 = vcmp.eq.s32.totalorder %v1154_v31, 2  ;;  %v1853_v13 = vld [vmem:[#allocation11 + $0x40] sm:$0xff] }
 0x310   :  { %v1058_v0 = vsel %vm1056_vm1, %v1057_v32, %v7307_v10  ;;  %7310 = vsinq.f32 %v1149_v41  ;;  %vm1156_vm8 = vcmp.eq.s32.totalorder %v1154_v31, 0  ;;  %vm1155_vm9 = vcmp.lt.s32.totalorder %v1154_v31, 2  ;;  %v1855_v41 = vld [vmem:[#allocation11 + $0x50] sm:$0xff] }
 0x311   :  { %v1055_v22 = vsel %vm1053_vm3, %v7305_v11, %v1054_v19  ;;  %v1230_v42 = vsub.s32 0, %v1228_v49  ;;  %v1251_v36 = vsel %vm1166_vm11, %v1250_v4, %v8277_v40  ;;  %v1856_v19 = vld [vmem:[#allocation11 + $0x58] sm:$0xff]  ;;  %v1854_v40 = vld [vmem:[#allocation11 + $0x48] sm:$0xff] }
 0x312   :  { %v1059_v21 = vsel %vm1052_vm4, %v1055_v22, %v1058_v0  ;;  %v1253_v8 = vsel %vm1165_vm12, 0, %v1251_v36  ;;  %6970 = vmatprep.subr.mxu1 %v1856_v19 }
 0x313   :  { %v1060_v48 = vsel %vm1050_vm5, nan, %v1059_v21  ;;  %v6639_v5 = vmin.u32 %v1230_v42, %v1228_v49  ;;  %v1257_v51 = vand.u32 3, %v1253_v8  ;;  %6971 = vmatpush3.msra.mxu1 %v1856_v19  ;;  %v1423_v19 = vld [vmem:[#allocation9 + $0x80] sm:$0xff] }
 0x314   :  { %6965 = vmatmul.mubr.msk.f32.vlgmr.msra.gmra.mxu0 %vm213_vm2, %v1060_v48  ;;  %6972 = vmatprep.subr.mxu1 %v1855_v41 }
 0x315   :  { %v1232_v20 = vclz %v6639_v5  ;;  %vm1262_vm13 = vcmp.eq.s32.totalorder %v1257_v51, 2  ;;  %vm1259_vm14 = vcmp.eq.s32.totalorder %v1257_v51, 0  ;;  %vm1258_vm15 = vcmp.lt.s32.totalorder %v1257_v51, 2  ;;  %6973 = vmatpush3.msra.mxu1 %v1855_v41  ;;  %v1424_v41 = vld [vmem:[#allocation9 + $0x88] sm:$0xff] }
 0x316   :  { %6974 = vmatprep.subr.mxu1 %v1854_v40 }
 0x317   :  { %v6640_v52 = vadd.s32 4294967294, %v1232_v20  ;;  %6975 = vmatpush3.msra.mxu1 %v1854_v40 }
 0x318   :  { %6976 = vmatprep.subr.mxu1 %v1853_v13 }
 0x319   :  { %vm6641_vm6 = vcmp.lt.s32.totalorder %v6640_v52, 0  ;;  %6977 = vmatpush3.msra.mxu1 %v1853_v13 }
 0x31a   :  { %v1235_v45 = vsel %vm6641_vm6, 0, %v6640_v52 }
 0x31b   :  { %v1236_v35 = vsub.s32 32, %v1235_v45  ;;  %v1240_v26 = vsub.s32 4294967266, %v1235_v45  ;;  %v1237_v25 = vshll.u32 %v1228_v49, %v1235_v45 }
 0x31c   :  { %v7309_v43 = vpop.eup %7308 }
 0x31d   :  { %v7311_v61 = vpop.eup %7310  ;;  %v1160_v3 = vxor.u32 2147483648, %v7309_v43  ;;  %v1238_v38 = vshrl.u32 %v1220_v60, %v1236_v35  ;;  %v1241_v56 = vadd.s32 127, %v1240_v26 }
 0x31e   :  { %v1157_v6 = vxor.u32 2147483648, %v7311_v61 }
 0x31f   :  { %v1161_v29 = vsel %vm1159_vm7, %v1160_v3, %v7311_v61  ;;  %v1239_v63 = vor.u32 %v1238_v38, %v1237_v25  ;;  %v1242_v30 = vshll.u32 %v1241_v56, 23 }
 0x320   :  { %v1158_v14 = vsel %vm1156_vm8, %v7309_v43, %v1157_v6 }
 0x321   :  { %v1162_v7 = vsel %vm1155_vm9, %v1158_v14, %v1161_v29  ;;  %v1243_v46 = vor.u32 4788187, %v1242_v30  ;;  %v1246_v17 = vcvt.s32.f32 %v1239_v63 }
 0x322   :  { %v1163_v9 = vsel %vm1153_vm10, nan, %v1162_v7 }
 0x323   :  { %6967 = vmatprep.mubr.msk.f32.mxu0 %vm213_vm2, %v1163_v9  ;;  %v1244_v44 = vand.u32 2147483647, %v1243_v46 }
 0x325   :  { %v1247_v23 = vmul.f32 %v1246_v17, %v1244_v44 }
 0x327   :  { %v1248_v58 = vxor.u32 2147483648, %v1247_v23 }
 0x329   :  { %v1249_v12 = vsel %vm1166_vm11, %v1248_v58, %v1247_v23 }
 0x32a   :  { %v1252_v37 = vsel %vm1165_vm12, %v8121_v54, %v1249_v12  ;;  %v6642_v54 = vld [vmem:[%s11107_s5 + $0x1] ss:$0 sm:$0xff] }
 0x32b   :  { %7312 = vcosq.f32 %v1252_v37 }
 0x32c   :  { %7314 = vsinq.f32 %v1252_v37 }
 0x338   :  { %v7313_v1 = vpop.eup %7312 }
 0x339   :  { %v7315_v16 = vpop.eup %7314  ;;  %v1263_v11 = vxor.u32 2147483648, %v7313_v1 }
 0x33a   :  { %v1260_v10 = vxor.u32 2147483648, %v7315_v16 }
 0x33b   :  { %v1264_v32 = vsel %vm1262_vm13, %v1263_v11, %v7315_v16 }
 0x33c   :  { %v1261_v33 = vsel %vm1259_vm14, %v7313_v1, %v1260_v10 }
 0x33d   :  { %v1265_v62 = vsel %vm1258_vm15, %v1261_v33, %v1264_v32 }
 0x33e   :  { %v1266_v39 = vsel %vm1256_vm0, nan, %v1265_v62 }
 0x33f   :  { %6968 = vmatmul.mubr.msk.f32.gmra.mxu0 %vm213_vm2, %v1266_v39  ;;  %v1425_v39 = vld [vmem:[#allocation9 + $0x90] sm:$0xff] }
 0x3d4   :  { %v6966_v0 = vpop.f32.mrf.mxu0 }
 0x3d5   :  { %v1361_v49 = vadd.f32 %v6966_v0, %v6642_v54 }
 0x3d6   :  { %v1355_v27 = vpop.f32.mrf.mxu0 }
 0x3d7   :  { %v1356_v22 = vadd.f32 %v6642_v54, %v1355_v27  ;;  %v8318_v48 = vadd.f32 %v1361_v49, %v7699_v15  ;;  %v1433_v49 = vld [vmem:[#allocation9 + $0xa8] sm:$0xff] }
 0x3d9   :  { %v8315_v21 = vadd.f32 %v1356_v22, %v7701_v18  ;;  %v1392_v20 = vmul.f32 %v8318_v48, %v8318_v48  ;;  %v1379_v15 = vsel %vm213_vm2, %v8318_v48, 0.0  ;;  %v1432_v22 = vld [vmem:[#allocation9 + $0xa0] sm:$0xff] }
 0x3db   :  { %v1391_v34 = vmul.f32 %v8315_v21, %v8315_v21  ;;  %v1378_v52 = vsel %vm213_vm2, %v8315_v21, 0.0  ;;  %v1396_v35 = vsel %vm213_vm2, %v1392_v20, 0.0 }
 0x3dc   :  { %v1380_v60 = vadd.f32 %v1379_v15, %v1378_v52 }
 0x3dd   :  { %v1395_v45 = vsel %vm213_vm2, %v1391_v34, 0.0 }
 0x3de   :  { %v1397_v3 = vadd.f32 %v1396_v35, %v1395_v45 }
 0x3ff   :  { %v6969_v42 = vpop.f32.mrf.mxu0 }
 0x400   :  { %v1371_v5 = vadd.f32 %v6969_v42, %v6642_v54 }
 0x401   :  { %v1365_v47 = vpop.f32.mrf.mxu0 }
 0x402   :  { %v8327_v31 = vadd.f32 %v1371_v5, %v7709_v24  ;;  %v1366_v18 = vadd.f32 %v6642_v54, %v1365_v47  ;;  %v1434_v54 = vld [vmem:[#allocation9 + $0xb0] sm:$0xff] }
 0x404   :  { %v8333_v43 = vadd.f32 %v1366_v18, %v7714_v28  ;;  %v1394_v26 = vmul.f32 %v8327_v31, %v8327_v31  ;;  %v1383_v25 = vsel %vm213_vm2, %v8327_v31, 0.0 }
 0x406   :  { %v1381_v61 = vsel %vm213_vm2, %v8333_v43, 0.0  ;;  %v1393_v24 = vmul.f32 %v8333_v43, %v8333_v43  ;;  %v1400_v29 = vsel %vm213_vm2, %v1394_v26, 0.0 }
 0x407   :  { %v1382_v6 = vadd.f32 %v1381_v61, %v1380_v60 }
 0x408   :  { %v1398_v28 = vsel %vm213_vm2, %v1393_v24, 0.0 }
 0x409   :  { %v1384_v38 = vadd.f32 %v1383_v25, %v1382_v6  ;;  %v1399_v56 = vadd.f32 %v1398_v28, %v1397_v3 }
 0x40b   :  { %v1385_v14 = vrot.slane %v1384_v38, 4  ;;  %v1401_v63 = vadd.f32 %v1400_v29, %v1399_v56 }
 0x40d   :  { %v1386_v30 = vadd.f32 %v1385_v14, %v1384_v38  ;;  %v1402_v7 = vrot.slane %v1401_v63, 4 }
 0x40f   :  { %v1387_v9 = vrot.slane %v1386_v30, 2  ;;  %v1403_v46 = vadd.f32 %v1402_v7, %v1401_v63  ;;  %v1426_v7 = vld [vmem:[#allocation9 + $0x98] sm:$0xff] }
 0x411   :  { %v1388_v44 = vadd.f32 %v1387_v9, %v1386_v30  ;;  %v1404_v17 = vrot.slane %v1403_v46, 2 }
 0x413   :  { %v1389_v23 = vrot.slane %v1388_v44, 1  ;;  %v1405_v58 = vadd.f32 %v1404_v17, %v1403_v46 }
 0x415   :  { %v1390_v12 = vadd.f32 %v1389_v23, %v1388_v44  ;;  %v1406_v37 = vrot.slane %v1405_v58, 1 }
 0x417   :  { %v1407_v4 = vadd.f32 %v1406_v37, %v1405_v58  ;;  %v1408_v36 = vmul.f32 0.03125, %v1390_v12 }
 0x419   :  { %v1409_v8 = vmul.f32 0.03125, %v1407_v4  ;;  %v1410_v51 = vmul.f32 %v1408_v36, %v1408_v36  ;;  %v1414_v11 = vsub.f32 %v8333_v43, %v1408_v36  ;;  %v1412_v10 = vsub.f32 %v8315_v21, %v1408_v36 }
 0x41a   :  { %v1413_v32 = vsub.f32 %v8318_v48, %v1408_v36  ;;  %v1415_v33 = vsub.f32 %v8327_v31, %v1408_v36 }
 0x41b   :  { %v1411_v1 = vsub.f32 %v1409_v8, %v1410_v51 }
 0x41d   :  { %v1416_v16 = vadd.f32 1e-05, %v1411_v1 }
 0x41f   :  { %7316 = vrsqrt.f32 %v1416_v16 }
 0x42c   :  { %v7317_v62 = vpop.eup %7316 }
 0x42d   :  { %v1420_v40 = vmul.f32 %v7317_v62, %v1414_v11  ;;  %v1418_v13 = vmul.f32 %v7317_v62, %v1412_v10  ;;  %v1419_v0 = vmul.f32 %v7317_v62, %v1413_v32  ;;  %v1421_v27 = vmul.f32 %v7317_v62, %v1415_v33 }
 0x42f   :  { %v1429_v42 = vmul.f32 %v1425_v39, %v1420_v40  ;;  %v1427_v34 = vmul.f32 %v1423_v19, %v1418_v13  ;;  %v1428_v5 = vmul.f32 %v1424_v41, %v1419_v0  ;;  %v8365_v23 = vmul.f32 %v1426_v7, %v1421_v27 }
 0x431   :  { %v8350_v47 = vadd.f32 %v1434_v54, %v1429_v42  ;;  %v8352_v20 = vadd.f32 %v1432_v22, %v1427_v34  ;;  %v8354_v52 = vadd.f32 %v1433_v49, %v1428_v5 }
 0x433   :  { %v1649_v18 = vand.u32 2139095040, %v8350_v47  ;;  %v1440_v15 = vand.u32 2147483647, %v8352_v20  ;;  %v1443_v45 = vand.u32 2139095040, %v8352_v20  ;;  %v1543_v60 = vand.u32 2147483647, %v8354_v52 }
 0x434   :  { %v1546_v35 = vand.u32 2139095040, %v8354_v52  ;;  %v1646_v4 = vand.u32 2147483647, %v8350_v47 }
 0x435   :  { %v1650_v26 = vshrl.u32 %v1649_v18, 23  ;;  %v1444_v61 = vshrl.u32 %v1443_v45, 23  ;;  %v1447_v24 = vand.u32 8388607, %v1440_v15  ;;  %v1550_v6 = vand.u32 8388607, %v1543_v60 }
 0x436   :  { %v1547_v3 = vshrl.u32 %v1546_v35, 23 }
 0x437   :  { %v6655_v25 = vadd.s32 4294967169, %v1650_v26  ;;  %v6647_v28 = vadd.s32 4294967169, %v1444_v61  ;;  %v1448_v14 = vor.u32 8388608, %v1447_v24  ;;  %v1551_v63 = vor.u32 8388608, %v1550_v6 }
 0x438   :  { %v6651_v38 = vadd.s32 4294967169, %v1547_v3 }
 0x439   :  { %v1656_v56 = vadd.s32 1, %v6655_v25  ;;  %v1450_v29 = vadd.s32 1, %v6647_v28  ;;  %v8369_v12 = vshll.u32 %v1448_v14, 8  ;;  %v8371_v37 = vshll.u32 %v1551_v63, 8 }
 0x43a   :  { %v1553_v30 = vadd.s32 1, %v6651_v38 }
 0x43b   :  { %vm1657_vm1 = vcmp.gt.s32.totalorder %v1656_v56, 0  ;;  %vm1451_vm3 = vcmp.gt.s32.totalorder %v1450_v29, 0 }
 0x43c   :  { %v1452_v9 = vsel %vm1451_vm3, %v1450_v29, 0  ;;  %vm1554_vm4 = vcmp.gt.s32.totalorder %v1553_v30, 0  ;;  %v8367_v58 = vsel %vm1657_vm1, %v1656_v56, 0 }
 0x43d   :  { %v1453_v46 = vshrl.u32 %v1452_v9, 5  ;;  %v1454_v44 = vand.u32 31, %v1452_v9  ;;  %v1555_v17 = vsel %vm1554_vm4, %v1553_v30, 0 }
 0x43e   :  { %v8375_v51 = vshrl.u32 %v1555_v17, 5  ;;  %v1557_v1 = vand.u32 31, %v1555_v17 }
 0x43f   :  { %v1455_v36 = vsub.s32 32, %v1454_v44  ;;  %v1457_v8 = vshll.u32 %v7613_v50, %v1454_v44  ;;  %v1460_v16 = vshll.u32 %v7614_v53, %v1454_v44  ;;  %v1463_v11 = vshll.u32 %v7615_v55, %v1454_v44 }
 0x440   :  { %v1466_v10 = vshll.u32 %v7616_v57, %v1454_v44  ;;  %v1469_v32 = vshll.u32 %v7617_v59, %v1454_v44  ;;  %vm1472_vm5 = vcmp.lt.s32.totalorder %v1453_v46, 1  ;;  %vm1473_vm6 = vcmp.lt.s32.totalorder %v1453_v46, 2 }
 0x441   :  { %v1458_v33 = vshrl.u32 %v7614_v53, %v1455_v36  ;;  %v1461_v62 = vshrl.u32 %v7615_v55, %v1455_v36  ;;  %v1464_v39 = vshrl.u32 %v7616_v57, %v1455_v36  ;;  %v1456_v19 = vshrl.u32 %v7613_v50, %v1455_v36 }
 0x442   :  { %v1467_v41 = vshrl.u32 %v7617_v59, %v1455_v36  ;;  %v1470_v40 = vshrl.u32 %v7618_v2, %v1455_v36  ;;  %v1558_v54 = vsub.s32 32, %v1557_v1  ;;  %vm1474_vm7 = vcmp.lt.s32.totalorder %v1453_v46, 3 }
 0x443   :  { %v1459_v13 = vor.u32 %v1458_v33, %v1457_v8  ;;  %v1462_v0 = vor.u32 %v1461_v62, %v1460_v16  ;;  %v1465_v27 = vor.u32 %v1464_v39, %v1463_v11  ;;  %vm1475_vm8 = vcmp.lt.s32.totalorder %v1453_v46, 4 }
 0x444   :  { %v1468_v22 = vor.u32 %v1467_v41, %v1466_v10  ;;  %v1471_v49 = vor.u32 %v1470_v40, %v1469_v32  ;;  %v1560_v61 = vshll.u32 %v7613_v50, %v1557_v1  ;;  %v1561_v6 = vshrl.u32 %v7614_v53, %v1558_v54 }
 0x445   :  { %v1476_v42 = vsel %vm1472_vm5, %v1456_v19, %v1459_v13  ;;  %v1477_v34 = vsel %vm1475_vm8, %v1465_v27, 2102212464  ;;  %v1480_v5 = vsel %vm1472_vm5, %v1459_v13, %v1462_v0  ;;  %v1484_v18 = vsel %vm1472_vm5, %v1462_v0, %v1465_v27 }
 0x446   :  { %v1478_v45 = vsel %vm1474_vm7, %v1462_v0, %v1477_v34  ;;  %v1481_v35 = vsel %vm1475_vm8, %v1468_v22, 920167782  ;;  %v1485_v26 = vsel %vm1475_vm8, %v1471_v49, 1326507024  ;;  %v1563_v25 = vshll.u32 %v7614_v53, %v1557_v1 }
 0x447   :  { %v1482_v24 = vsel %vm1474_vm7, %v1465_v27, %v1481_v35  ;;  %v1486_v3 = vsel %vm1474_vm7, %v1468_v22, %v1485_v26  ;;  %v1479_v28 = vsel %vm1473_vm6, %v1476_v42, %v1478_v45  ;;  %v1564_v29 = vshrl.u32 %v7615_v55, %v1558_v54 }
 0x448   :  { %v1483_v38 = vsel %vm1473_vm6, %v1480_v5, %v1482_v24  ;;  %v1487_v56 = vsel %vm1473_vm6, %v1484_v18, %v1486_v3  ;;  %v1562_v9 = vor.u32 %v1561_v6, %v1560_v61  ;;  %v1566_v17 = vshll.u32 %v7615_v55, %v1557_v1  ;;  %v1435_v61 = vld [vmem:[#allocation9 + $0xb8] sm:$0xff] }
 0x449   :  { %v8398_v14 = vmul.u32.u64.low %v8369_v12, %v1487_v56  ;;  %v8399_v63 = vmul.u32.u64.high %v8369_v12, %v1487_v56, %v8398_v14  ;;  %v8402_v30 = vmul.u32.u64.low %v8369_v12, %v1483_v38  ;;  %v8403_v7 = vmul.u32.u64.high %v8369_v12, %v1483_v38, %v8402_v30 }
 0x44a   :  { %v1565_v44 = vor.u32 %v1564_v29, %v1563_v25  ;;  %v1567_v36 = vshrl.u32 %v7616_v57, %v1558_v54  ;;  %v8409_v46 = vand.u32 31, %v8367_v58  ;;  %v1569_v8 = vshll.u32 %v7616_v57, %v1557_v1 }
 0x44b   :  { %v1570_v16 = vshrl.u32 %v7617_v59, %v1558_v54  ;;  %v1573_v11 = vshrl.u32 %v7618_v2, %v1558_v54  ;;  %v1495_v10 = vmul.u32 %v8369_v12, %v1479_v28  ;;  %v1559_v32 = vshrl.u32 %v7613_v50, %v1558_v54 }
 0x44c   :  { %v1568_v33 = vor.u32 %v1567_v36, %v1566_v17  ;;  %v1572_v62 = vshll.u32 %v7617_v59, %v1557_v1  ;;  %vm1497_vm9 = vc.u32 %v8399_v63, %v8402_v30  ;;  %v1498_v39 = vadd.s32 1, %v8403_v7 }
 0x44d   :  { %v1571_v19 = vor.u32 %v1570_v16, %v1569_v8  ;;  %vm1575_vm10 = vcmp.lt.s32.totalorder %v8375_v51, 1  ;;  %vm1577_vm11 = vcmp.lt.s32.totalorder %v8375_v51, 3  ;;  %vm1578_vm12 = vcmp.lt.s32.totalorder %v8375_v51, 4 }
 0x44e   :  { %v1574_v41 = vor.u32 %v1573_v11, %v1572_v62  ;;  %v1583_v40 = vsel %vm1575_vm10, %v1562_v9, %v1565_v44  ;;  %v1499_v12 = vsel %vm1497_vm9, %v1498_v39, %v8403_v7  ;;  %v1580_v13 = vsel %vm1578_vm12, %v1568_v33, 2102212464 }
 0x44f   :  { %v1584_v0 = vsel %vm1578_vm12, %v1571_v19, 920167782  ;;  %v1587_v27 = vsel %vm1575_vm10, %v1565_v44, %v1568_v33  ;;  %v1500_v1 = vadd.s32 %v1499_v12, %v1495_v10  ;;  %vm1576_vm13 = vcmp.lt.s32.totalorder %v8375_v51, 2 }
 0x450   :  { %v1585_v54 = vsel %vm1577_vm11, %v1568_v33, %v1584_v0  ;;  %v1588_v22 = vsel %vm1578_vm12, %v1574_v41, 1326507024  ;;  %v1579_v49 = vsel %vm1575_vm10, %v1559_v32, %v1562_v9  ;;  %v1581_v42 = vsel %vm1577_vm11, %v1565_v44, %v1580_v13 }
 0x451   :  { %v1586_v34 = vsel %vm1576_vm13, %v1583_v40, %v1585_v54  ;;  %v1589_v5 = vsel %vm1577_vm11, %v1571_v19, %v1588_v22  ;;  %v1501_v18 = vadd.s32 536870912, %v1500_v1  ;;  %v1661_v51 = vsub.s32 32, %v8409_v46 }
 0x452   :  { %v1590_v45 = vsel %vm1576_vm13, %v1587_v27, %v1589_v5  ;;  %v8426_v35 = vmul.u32.u64.low %v8371_v37, %v1586_v34  ;;  %v8427_v26 = vmul.u32.u64.high %v8371_v37, %v1586_v34, %v8426_v35  ;;  %v1582_v25 = vsel %vm1576_vm13, %v1579_v49, %v1581_v42 }
 0x453   :  { %v8431_v24 = vmul.u32.u64.low %v8371_v37, %v1590_v45  ;;  %v8432_v3 = vmul.u32.u64.high %v8371_v37, %v1590_v45, %v8431_v24  ;;  %v8435_v6 = vshrl.u32 %v1501_v18, 30  ;;  %v8438_v28 = vadd.f32 %v1435_v61, %v8365_v23 }
 0x454   :  { %v1601_v56 = vadd.s32 1, %v8427_v26  ;;  %v1653_v29 = vand.u32 8388607, %v1646_v4  ;;  %v8445_v14 = vshrl.u32 %v8367_v58, 5  ;;  %v1598_v7 = vmul.u32 %v8371_v37, %v1582_v25 }
 0x455   :  { %v1503_v38 = vshll.u32 %v8435_v6, 30  ;;  %vm1600_vm14 = vc.u32 %v8432_v3, %v8426_v35  ;;  %v1667_v9 = vshrl.u32 %v7615_v55, %v1661_v51  ;;  %v1670_v23 = vshrl.u32 %v7616_v57, %v1661_v51 }
 0x456   :  { %v1602_v17 = vsel %vm1600_vm14, %v1601_v56, %v8427_v26  ;;  %v1672_v36 = vshll.u32 %v7616_v57, %v8409_v46  ;;  %v1673_v8 = vshrl.u32 %v7617_v59, %v1661_v51  ;;  %v1664_v58 = vshrl.u32 %v7614_v53, %v1661_v51 }
 0x457   :  { %v1504_v44 = vsub.s32 %v1500_v1, %v1503_v38  ;;  %v1603_v16 = vadd.s32 %v1602_v17, %v1598_v7  ;;  %v1666_v37 = vshll.u32 %v7614_v53, %v8409_v46  ;;  %v1676_v11 = vshrl.u32 %v7618_v2, %v1661_v51 }
 0x458   :  { %v1669_v32 = vshll.u32 %v7615_v55, %v8409_v46  ;;  %v1674_v33 = vor.u32 %v1673_v8, %v1672_v36  ;;  %v1675_v62 = vshll.u32 %v7617_v59, %v8409_v46  ;;  %v1654_v19 = vor.u32 8388608, %v1653_v29 }
 0x459   :  { %v1506_v10 = vsub.s32 0, %v1504_v44  ;;  %v1604_v39 = vadd.s32 536870912, %v1603_v16  ;;  %v1663_v41 = vshll.u32 %v7613_v50, %v8409_v46  ;;  %v1668_v12 = vor.u32 %v1667_v9, %v1666_v37 }
 0x45a   :  { %v1671_v13 = vor.u32 %v1670_v23, %v1669_v32  ;;  %v1677_v0 = vor.u32 %v1676_v11, %v1675_v62  ;;  %vm1681_vm15 = vcmp.lt.s32.totalorder %v8445_v14, 4  ;;  %v1752_v49 = vand.u32 2139095040, %v8438_v28 }
 0x45b   :  { %v6648_v40 = vmin.u32 %v1506_v10, %v1504_v44  ;;  %v8466_v27 = vshrl.u32 %v1604_v39, 30  ;;  %v1665_v1 = vor.u32 %v1664_v58, %v1663_v41  ;;  %v1687_v22 = vsel %vm1681_vm15, %v1674_v33, 920167782 }
 0x45c   :  { %v1496_v42 = vadd.s32 %v8402_v30, %v8399_v63  ;;  %vm1678_vm0 = vcmp.lt.s32.totalorder %v8445_v14, 1  ;;  %v1694_v34 = vshll.u32 %v1654_v19, 8  ;;  %vm1680_vm1 = vcmp.lt.s32.totalorder %v8445_v14, 3 }
 0x45d   :  { %v1508_v54 = vclz %v6648_v40  ;;  %v1606_v46 = vshll.u32 %v8466_v27, 30  ;;  %v1690_v18 = vsel %vm1678_vm0, %v1668_v12, %v1671_v13  ;;  %v1691_v45 = vsel %vm1681_vm15, %v1677_v0, 1326507024 }
 0x45e   :  { %v1686_v61 = vsel %vm1678_vm0, %v1665_v1, %v1668_v12  ;;  %v1688_v63 = vsel %vm1680_vm1, %v1671_v13, %v1687_v22  ;;  %v1692_v30 = vsel %vm1680_vm1, %v1674_v33, %v1691_v45  ;;  %v1662_v24 = vshrl.u32 %v7613_v50, %v1661_v51 }
 0x45f   :  { %v6649_v5 = vadd.s32 4294967294, %v1508_v54  ;;  %v8481_v26 = vsub.s32 %v1603_v16, %v1606_v46  ;;  %vm1679_vm4 = vcmp.lt.s32.totalorder %v8445_v14, 2  ;;  %v1683_v25 = vsel %vm1681_vm15, %v1671_v13, 2102212464 }
 0x460   :  { %v1693_v29 = vsel %vm1679_vm4, %v1690_v18, %v1692_v30  ;;  %v1753_v7 = vshrl.u32 %v1752_v49, 23  ;;  %v1526_v17 = vsub.s32 4, %v8435_v6  ;;  %v1689_v36 = vsel %vm1679_vm4, %v1686_v61, %v1688_v63 }
 0x461   :  { %vm6650_vm3 = vcmp.lt.s32.totalorder %v6649_v5, 0  ;;  %v1609_v56 = vsub.s32 0, %v8481_v26  ;;  %v1682_v16 = vsel %vm1678_vm0, %v1662_v24, %v1665_v1  ;;  %v1684_v58 = vsel %vm1680_vm1, %v1668_v12, %v1683_v25 }
 0x462   :  { %v1511_v38 = vsel %vm6650_vm3, 0, %v6649_v5  ;;  %v8504_v10 = vmul.u32.u64.low %v1694_v34, %v1693_v29  ;;  %v8505_v32 = vmul.u32.u64.high %v1694_v34, %v1693_v29, %v8504_v10  ;;  %v6659_v19 = vadd.s32 4294967169, %v1753_v7 }
 0x463   :  { %v1512_v9 = vsub.s32 32, %v1511_v38  ;;  %v1516_v23 = vsub.s32 4294967266, %v1511_v38  ;;  %v1513_v51 = vshll.u32 %v1504_v44, %v1511_v38  ;;  %v6652_v8 = vmin.u32 %v1609_v56, %v8481_v26 }
 0x464   :  { %v8507_v62 = vmul.u32.u64.low %v1694_v34, %v1689_v36  ;;  %v8508_v39 = vmul.u32.u64.high %v1694_v34, %v1689_v36, %v8507_v62  ;;  %v1685_v40 = vsel %vm1679_vm4, %v1682_v16, %v1684_v58  ;;  %vm8515_vm5 = vcmp.le.f32.partialorder %v1440_v15, 0.7853982 }
 0x465   :  { %v1514_v37 = vshrl.u32 %v1496_v42, %v1512_v9  ;;  %v1517_v11 = vadd.s32 127, %v1516_v23  ;;  %v1611_v33 = vclz %v6652_v8  ;;  %vm1442_vm6 = vcmp.lt.s32.totalorder %v8352_v20, 0 }
 0x466   :  { %v1759_v0 = vadd.s32 1, %v6659_v19  ;;  %v1527_v54 = vsel %vm1442_vm6, %v1526_v17, %v8435_v6  ;;  %vm1703_vm7 = vc.u32 %v8505_v32, %v8507_v62  ;;  %v1749_v14 = vand.u32 2147483647, %v8438_v28 }
 0x467   :  { %v1515_v44 = vor.u32 %v1514_v37, %v1513_v51  ;;  %v1518_v41 = vshll.u32 %v1517_v11, 23  ;;  %v6653_v13 = vadd.s32 4294967294, %v1611_v33  ;;  %v1701_v22 = vmul.u32 %v1694_v34, %v1685_v40 }
 0x468   :  { %v1704_v15 = vadd.s32 1, %v8508_v39  ;;  %vm1760_vm9 = vcmp.gt.s32.totalorder %v1759_v0, 0  ;;  %v1599_v18 = vadd.s32 %v8426_v35, %v8432_v3  ;;  %v1529_v30 = vsel %vm8515_vm5, 0, %v1527_v54 }
 0x469   :  { %v1519_v1 = vor.u32 4788187, %v1518_v41  ;;  %vm6654_vm8 = vcmp.lt.s32.totalorder %v6653_v13, 0  ;;  %v1522_v42 = vcvt.s32.f32 %v1515_v44  ;;  %v1761_v5 = vsel %vm1760_vm9, %v1759_v0, 0 }
 0x46a   :  { %v1614_v46 = vsel %vm6654_vm8, 0, %v6653_v13  ;;  %v1705_v6 = vsel %vm1703_vm7, %v1704_v15, %v8508_v39  ;;  %v1763_v34 = vand.u32 31, %v1761_v5  ;;  %v1756_v29 = vand.u32 8388607, %v1749_v14 }
 0x46b   :  { %v1520_v49 = vand.u32 2147483647, %v1519_v1  ;;  %v1615_v45 = vsub.s32 32, %v1614_v46  ;;  %v1619_v61 = vsub.s32 4294967266, %v1614_v46  ;;  %v1706_v24 = vadd.s32 %v1705_v6, %v1701_v22 }
 0x46c   :  { %v1616_v25 = vshll.u32 %v8481_v26, %v1614_v46  ;;  %v1764_v35 = vsub.s32 32, %v1763_v34  ;;  %v8537_v36 = vand.u32 3, %v1529_v30  ;;  %vm1545_vm10 = vcmp.lt.s32.totalorder %v8354_v52, 0 }
 0x46d   :  { %v1523_v63 = vmul.f32 %v1522_v42, %v1520_v49  ;;  %v1617_v38 = vshrl.u32 %v1599_v18, %v1615_v45  ;;  %v1620_v56 = vadd.s32 127, %v1619_v61  ;;  %v1707_v9 = vadd.s32 536870912, %v1706_v24 }
 0x46e   :  { %v1757_v16 = vor.u32 8388608, %v1756_v29  ;;  %v1767_v58 = vshrl.u32 %v7614_v53, %v1764_v35  ;;  %v1766_v11 = vshll.u32 %v7613_v50, %v1763_v34  ;;  %v1770_v10 = vshrl.u32 %v7615_v55, %v1764_v35 }
 0x46f   :  { %v1524_v7 = vxor.u32 2147483648, %v1523_v63  ;;  %v1618_v3 = vor.u32 %v1617_v38, %v1616_v25  ;;  %v1621_v23 = vshll.u32 %v1620_v56, 23  ;;  %v8540_v51 = vshrl.u32 %v1707_v9, 30 }
 0x470   :  { %v1773_v19 = vshrl.u32 %v7616_v57, %v1764_v35  ;;  %v1769_v41 = vshll.u32 %v7614_v53, %v1763_v34  ;;  %v1772_v40 = vshll.u32 %v7615_v55, %v1763_v34  ;;  %v1776_v12 = vshrl.u32 %v7617_v59, %v1764_v35 }
 0x471   :  { %v1525_v17 = vsel %vm1442_vm6, %v1524_v7, %v1523_v63  ;;  %v1622_v8 = vor.u32 4788187, %v1621_v23  ;;  %v1709_v37 = vshll.u32 %v8540_v51, 30  ;;  %v1625_v39 = vcvt.s32.f32 %v1618_v3 }
 0x472   :  { %v1528_v26 = vsel %vm8515_vm5, %v8352_v20, %v1525_v17  ;;  %v1762_v0 = vshrl.u32 %v1761_v5, 5  ;;  %v1768_v1 = vor.u32 %v1767_v58, %v1766_v11  ;;  %v1775_v54 = vshll.u32 %v7616_v57, %v1763_v34 }
 0x473   :  { %7318 = vcosq.f32 %v1528_v26  ;;  %v1623_v33 = vand.u32 2147483647, %v1622_v8  ;;  %v8550_v44 = vsub.s32 %v1706_v24, %v1709_v37  ;;  %v1771_v15 = vor.u32 %v1770_v10, %v1769_v41 }
 0x474   :  { %7320 = vsinq.f32 %v1528_v26  ;;  %v1774_v49 = vor.u32 %v1773_v19, %v1772_v40  ;;  %v1779_v42 = vshrl.u32 %v7618_v2, %v1764_v35  ;;  %vm8560_vm11 = vcmp.le.f32.partialorder %v1543_v60, 0.7853982 }
 0x475   :  { %v1626_v13 = vmul.f32 %v1625_v39, %v1623_v33  ;;  %v1712_v22 = vsub.s32 0, %v8550_v44  ;;  %v1777_v45 = vor.u32 %v1776_v12, %v1775_v54  ;;  %v1778_v61 = vshll.u32 %v7617_v59, %v1763_v34 }
 0x476   :  { %v1629_v5 = vsub.s32 4, %v8466_v27  ;;  %v1765_v63 = vshrl.u32 %v7613_v50, %v1764_v35  ;;  %v1797_v30 = vshll.u32 %v1757_v16, 8  ;;  %vm1538_vm12 = vcmp.eq.s32.totalorder %v8537_v36, 2 }
 0x477   :  { %v1627_v18 = vxor.u32 2147483648, %v1626_v13  ;;  %v6656_v6 = vmin.u32 %v1712_v22, %v8550_v44  ;;  %v1780_v60 = vor.u32 %v1779_v42, %v1778_v61  ;;  %vm1781_vm13 = vcmp.lt.s32.totalorder %v1762_v0, 1 }
 0x478   :  { %vm1784_vm14 = vcmp.lt.s32.totalorder %v1762_v0, 4  ;;  %vm1535_vm15 = vcmp.eq.s32.totalorder %v8537_v36, 0  ;;  %v1789_v56 = vsel %vm1781_vm13, %v1768_v1, %v1771_v15  ;;  %vm1782_vm0 = vcmp.lt.s32.totalorder %v1762_v0, 2 }
 0x479   :  { %v1628_v24 = vsel %vm1545_vm10, %v1627_v18, %v1626_v13  ;;  %v1714_v25 = vclz %v6656_v6  ;;  %v1786_v38 = vsel %vm1784_vm14, %v1774_v49, 2102212464  ;;  %vm1783_vm1 = vcmp.lt.s32.totalorder %v1762_v0, 3 }
 0x47a   :  { %v1631_v34 = vsel %vm8560_vm11, %v8354_v52, %v1628_v24  ;;  %v1790_v29 = vsel %vm1784_vm14, %v1777_v45, 920167782  ;;  %v1793_v35 = vsel %vm1781_vm13, %v1771_v15, %v1774_v49  ;;  %v1785_v3 = vsel %vm1781_vm13, %v1765_v63, %v1768_v1 }
 0x47b   :  { %7322 = vcosq.f32 %v1631_v34  ;;  %v6657_v7 = vadd.s32 4294967294, %v1714_v25  ;;  %v1791_v9 = vsel %vm1783_vm1, %v1774_v49, %v1790_v29  ;;  %v1787_v23 = vsel %vm1783_vm1, %v1771_v15, %v1786_v38 }
 0x47c   :  { %7324 = vsinq.f32 %v1631_v34  ;;  %v1792_v17 = vsel %vm1782_vm0, %v1789_v56, %v1791_v9  ;;  %v1794_v26 = vsel %vm1784_vm14, %v1780_v60, 1326507024  ;;  %v1630_v11 = vsel %vm1545_vm10, %v1629_v5, %v8466_v27 }
 0x47d   :  { %vm6658_vm3 = vcmp.lt.s32.totalorder %v6657_v7, 0  ;;  %v1795_v8 = vsel %vm1783_vm1, %v1777_v45, %v1794_v26  ;;  %v8579_v16 = vmul.u32.u64.low %v1797_v30, %v1792_v17  ;;  %v8580_v58 = vmul.u32.u64.high %v1797_v30, %v1792_v17, %v8579_v16 }
 0x47e   :  { %v1702_v10 = vadd.s32 %v8507_v62, %v8505_v32  ;;  %v1717_v33 = vsel %vm6658_vm3, 0, %v6657_v7  ;;  %v1796_v39 = vsel %vm1782_vm0, %v1793_v35, %v1795_v8  ;;  %v1788_v13 = vsel %vm1782_vm0, %v1785_v3, %v1787_v23 }
 0x47f   :  { %v1718_v40 = vsub.s32 32, %v1717_v33  ;;  %v1722_v12 = vsub.s32 4294967266, %v1717_v33  ;;  %v1719_v54 = vshll.u32 %v8550_v44, %v1717_v33  ;;  %v1807_v62 = vadd.s32 1, %v8580_v58 }
 0x480   :  { %v7319_v37 = vpop.eup %7318  ;;  %v8591_v22 = vmul.u32.u64.low %v1797_v30, %v1796_v39  ;;  %v8592_v15 = vmul.u32.u64.high %v1797_v30, %v1796_v39, %v8591_v22  ;;  %vm1534_vm4 = vcmp.lt.s32.totalorder %v8537_v36, 2  ;;  %v1632_v0 = vsel %vm8560_vm11, 0, %v1630_v11 }
 0x481   :  { %v7321_v19 = vpop.eup %7320  ;;  %v1539_v41 = vxor.u32 2147483648, %v7319_v37  ;;  %v1720_v49 = vshrl.u32 %v1702_v10, %v1718_v40  ;;  %v1723_v32 = vadd.s32 127, %v1722_v12  ;;  %vm1532_vm5 = vweird.f32 %v8352_v20 }
 0x482   :  { %v1536_v1 = vxor.u32 2147483648, %v7321_v19  ;;  %v1804_v5 = vmul.u32 %v1797_v30, %v1788_v13  ;;  %vm1806_vm6 = vc.u32 %v8592_v15, %v8579_v16  ;;  %v1636_v6 = vand.u32 3, %v1632_v0 }
 0x483   :  { %v1540_v27 = vsel %vm1538_vm12, %v1539_v41, %v7321_v19  ;;  %v1721_v18 = vor.u32 %v1720_v49, %v1719_v54  ;;  %v1724_v45 = vshll.u32 %v1723_v32, 23  ;;  %v1808_v36 = vsel %vm1806_vm6, %v1807_v62, %v8580_v58 }
 0x484   :  { %v1537_v42 = vsel %vm1535_vm15, %v7319_v37, %v1536_v1  ;;  %v1809_v24 = vadd.s32 %v1808_v36, %v1804_v5  ;;  %vm1641_vm7 = vcmp.eq.s32.totalorder %v1636_v6, 2  ;;  %vm1638_vm8 = vcmp.eq.s32.totalorder %v1636_v6, 0 }
 0x485   :  { %v1541_v44 = vsel %vm1534_vm4, %v1537_v42, %v1540_v27  ;;  %v1725_v63 = vor.u32 4788187, %v1724_v45  ;;  %v1728_v34 = vcvt.s32.f32 %v1721_v18  ;;  %vm1637_vm9 = vcmp.lt.s32.totalorder %v1636_v6, 2 }
 0x486   :  { %v1542_v61 = vsel %vm1532_vm5, nan, %v1541_v44  ;;  %v1810_v38 = vadd.s32 536870912, %v1809_v24  ;;  %vm1635_vm10 = vweird.f32 %v8354_v52  ;;  %vm1648_vm11 = vcmp.lt.s32.totalorder %v8350_v47, 0 }
 0x487   :  { %6978 = vmatprep.mubr.msk.f32.mxu1 %vm213_vm2, %v1542_v61  ;;  %v1726_v46 = vand.u32 2147483647, %v1725_v63  ;;  %vm8611_vm12 = vcmp.le.f32.partialorder %v1646_v4, 0.7853982  ;;  %v1732_v52 = vsub.s32 4, %v8540_v51  ;;  %v1805_v12 = vadd.s32 %v8579_v16, %v8592_v15 }
 0x488   :  { %v7323_v60 = vpop.eup %7322  ;;  %v1811_v7 = vshrl.u32 %v1810_v38, 30  ;;  %vm1738_vm1 = vweird.f32 %v8350_v47  ;;  %vm1751_vm3 = vcmp.lt.s32.totalorder %v8438_v28, 0  ;;  %vm1750_vm4 = vcmp.le.f32.partialorder %v1749_v14, 0.7853982 }
 0x489   :  { %v7325_v25 = vpop.eup %7324  ;;  %v1642_v20 = vxor.u32 2147483648, %v7323_v60  ;;  %v1729_v29 = vmul.f32 %v1728_v34, %v1726_v46  ;;  %v1733_v33 = vsel %vm1648_vm11, %v1732_v52, %v8540_v51 }
 0x48a   :  { %v1639_v56 = vxor.u32 2147483648, %v7325_v25  ;;  %v1812_v23 = vshll.u32 %v1811_v7, 30  ;;  %v1735_v19 = vsel %vm8611_vm12, 0, %v1733_v33 }
 0x48b   :  { %v1643_v30 = vsel %vm1641_vm7, %v1642_v20, %v7325_v25  ;;  %v1730_v35 = vxor.u32 2147483648, %v1729_v29  ;;  %v1739_v40 = vand.u32 3, %v1735_v19 }
 0x48c   :  { %v1640_v9 = vsel %vm1638_vm8, %v7323_v60, %v1639_v56  ;;  %v1813_v37 = vsub.s32 %v1809_v24, %v1812_v23  ;;  %v1835_v60 = vsub.s32 4, %v1811_v7  ;;  %vm1841_vm8 = vweird.f32 %v8438_v28  ;;  %v2435_v23 = vld [vmem:[#allocation11 + $0x60] sm:$0xff] }
 0x48d   :  { %v1644_v3 = vsel %vm1637_vm9, %v1640_v9, %v1643_v30  ;;  %v1731_v8 = vsel %vm1648_vm11, %v1730_v35, %v1729_v29  ;;  %vm1744_vm14 = vcmp.eq.s32.totalorder %v1739_v40, 2  ;;  %vm1741_vm15 = vcmp.eq.s32.totalorder %v1739_v40, 0  ;;  %v2438_v35 = vld [vmem:[#allocation11 + $0x78] sm:$0xff] }
 0x48e   :  { %v1645_v17 = vsel %vm1635_vm10, nan, %v1644_v3  ;;  %v1734_v58 = vsel %vm8611_vm12, %v8350_v47, %v1731_v8  ;;  %v1815_v11 = vsub.s32 0, %v1813_v37  ;;  %vm1740_vm0 = vcmp.lt.s32.totalorder %v1739_v40, 2  ;;  %v2437_v3 = vld [vmem:[#allocation11 + $0x70] sm:$0xff]  ;;  %6984 = vmatprep.subr.mxu0 %v2438_v35 }
 0x48f   :  { %6979 = vmatmul.mubr.msk.f32.vlgmr.msra.gmra.mxu1 %vm213_vm2, %v1645_v17  ;;  %7326 = vcosq.f32 %v1734_v58  ;;  %v1836_v47 = vsel %vm1751_vm3, %v1835_v60, %v1811_v7  ;;  %6985 = vmatpush3.msra.mxu0 %v2438_v35  ;;  %v2436_v7 = vld [vmem:[#allocation11 + $0x68] sm:$0xff]  ;;  %v2005_v35 = vld [vmem:[#allocation9 + $0xc0] sm:$0xff] }
 0x490   :  { %7328 = vsinq.f32 %v1734_v58  ;;  %v6660_v10 = vmin.u32 %v1815_v11, %v1813_v37  ;;  %v1838_v46 = vsel %vm1750_vm4, 0, %v1836_v47  ;;  %6986 = vmatprep.subr.mxu0 %v2437_v3 }
 0x491   :  { %v1842_v34 = vand.u32 3, %v1838_v46  ;;  %6987 = vmatpush3.msra.mxu0 %v2437_v3  ;;  %v2006_v3 = vld [vmem:[#allocation9 + $0xc8] sm:$0xff] }
 0x492   :  { %v1817_v4 = vclz %v6660_v10  ;;  %6988 = vmatprep.subr.mxu0 %v2436_v7 }
 0x493   :  { %vm1847_vm5 = vcmp.eq.s32.totalorder %v1842_v34, 2  ;;  %vm1844_vm6 = vcmp.eq.s32.totalorder %v1842_v34, 0  ;;  %vm1843_vm7 = vcmp.lt.s32.totalorder %v1842_v34, 2  ;;  %6989 = vmatpush3.msra.mxu0 %v2436_v7 }
 0x494   :  { %v6661_v39 = vadd.s32 4294967294, %v1817_v4  ;;  %6990 = vmatprep.subr.mxu0 %v2435_v23 }
 0x495   :  { %6991 = vmatpush3.msra.mxu0 %v2435_v23 }
 0x496   :  { %vm6662_vm13 = vcmp.lt.s32.totalorder %v6661_v39, 0 }
 0x497   :  { %v1820_v41 = vsel %vm6662_vm13, 0, %v6661_v39 }
 0x498   :  { %v1821_v13 = vsub.s32 32, %v1820_v41  ;;  %v1825_v1 = vsub.s32 4294967266, %v1820_v41  ;;  %v1822_v22 = vshll.u32 %v1813_v37, %v1820_v41 }
 0x49a   :  { %v1823_v27 = vshrl.u32 %v1805_v12, %v1821_v13  ;;  %v1826_v49 = vadd.s32 127, %v1825_v1 }
 0x49c   :  { %v7327_v54 = vpop.eup %7326  ;;  %v1824_v42 = vor.u32 %v1823_v27, %v1822_v22  ;;  %v1827_v0 = vshll.u32 %v1826_v49, 23 }
 0x49d   :  { %v7329_v32 = vpop.eup %7328  ;;  %v1745_v62 = vxor.u32 2147483648, %v7327_v54 }
 0x49e   :  { %v1742_v51 = vxor.u32 2147483648, %v7329_v32  ;;  %v1828_v45 = vor.u32 4788187, %v1827_v0  ;;  %v1831_v5 = vcvt.s32.f32 %v1824_v42 }
 0x49f   :  { %v1746_v44 = vsel %vm1744_vm14, %v1745_v62, %v7329_v32 }
 0x4a0   :  { %v1743_v18 = vsel %vm1741_vm15, %v7327_v54, %v1742_v51  ;;  %v1829_v61 = vand.u32 2147483647, %v1828_v45 }
 0x4a1   :  { %v1747_v16 = vsel %vm1740_vm0, %v1743_v18, %v1746_v44 }
 0x4a2   :  { %v1748_v15 = vsel %vm1738_vm1, nan, %v1747_v16  ;;  %v1832_v6 = vmul.f32 %v1831_v5, %v1829_v61 }
 0x4a3   :  { %6981 = vmatprep.mubr.msk.f32.mxu1 %vm213_vm2, %v1748_v15 }
 0x4a4   :  { %v1833_v63 = vxor.u32 2147483648, %v1832_v6 }
 0x4a6   :  { %v1834_v36 = vsel %vm1751_vm3, %v1833_v63, %v1832_v6 }
 0x4a7   :  { %v1837_v24 = vsel %vm1750_vm4, %v8438_v28, %v1834_v36  ;;  %v6664_v28 = vld [vmem:[%s11107_s5 + $0x2] ss:$0 sm:$0xff] }
 0x4a8   :  { %7330 = vcosq.f32 %v1837_v24 }
 0x4a9   :  { %7332 = vsinq.f32 %v1837_v24 }
 0x4b5   :  { %v7331_v25 = vpop.eup %7330 }
 0x4b6   :  { %v7333_v20 = vpop.eup %7332  ;;  %v1848_v38 = vxor.u32 2147483648, %v7331_v25 }
 0x4b7   :  { %v1845_v56 = vxor.u32 2147483648, %v7333_v20 }
 0x4b8   :  { %v1849_v29 = vsel %vm1847_vm5, %v1848_v38, %v7333_v20 }
 0x4b9   :  { %v1846_v30 = vsel %vm1844_vm6, %v7331_v25, %v1845_v56 }
 0x4ba   :  { %v1850_v14 = vsel %vm1843_vm7, %v1846_v30, %v1849_v29 }
 0x4bb   :  { %v1851_v9 = vsel %vm1841_vm8, nan, %v1850_v14 }
 0x4bc   :  { %6982 = vmatmul.mubr.msk.f32.gmra.mxu1 %vm213_vm2, %v1851_v9  ;;  %v2007_v9 = vld [vmem:[#allocation9 + $0xd0] sm:$0xff] }
 0x54f   :  { %v6980_v17 = vpop.f32.mrf.mxu1 }
 0x550   :  { %v1947_v58 = vadd.f32 %v6980_v17, %v6664_v28 }
 0x551   :  { %v1941_v26 = vpop.f32.mrf.mxu1 }
 0x552   :  { %v1942_v8 = vadd.f32 %v6664_v28, %v1941_v26  ;;  %v1974_v11 = vmul.f32 %v1947_v58, %v1947_v58  ;;  %v1961_v39 = vsel %vm213_vm2, %v1947_v58, 0.0 }
 0x554   :  { %v1973_v37 = vmul.f32 %v1942_v8, %v1942_v8  ;;  %v1960_v10 = vsel %vm213_vm2, %v1942_v8, 0.0  ;;  %v1978_v12 = vsel %vm213_vm2, %v1974_v11, 0.0 }
 0x555   :  { %v1962_v40 = vadd.f32 %v1961_v39, %v1960_v10 }
 0x556   :  { %v1977_v19 = vsel %vm213_vm2, %v1973_v37, 0.0  ;;  %v2014_v37 = vld [vmem:[#allocation9 + $0xe0] sm:$0xff] }
 0x557   :  { %v1979_v22 = vadd.f32 %v1978_v12, %v1977_v19 }
 0x57c   :  { %v6983_v52 = vpop.f32.mrf.mxu1 }
 0x57d   :  { %v1957_v33 = vadd.f32 %v6983_v52, %v6664_v28  ;;  %v2015_v52 = vld [vmem:[#allocation9 + $0xe8] sm:$0xff] }
 0x57e   :  { %v1951_v4 = vpop.f32.mrf.mxu1 }
 0x57f   :  { %v1952_v41 = vadd.f32 %v6664_v28, %v1951_v4  ;;  %v1976_v13 = vmul.f32 %v1957_v33, %v1957_v33  ;;  %v1965_v49 = vsel %vm213_vm2, %v1957_v33, 0.0  ;;  %v2016_v28 = vld [vmem:[#allocation9 + $0xf0] sm:$0xff] }
 0x581   :  { %v1963_v1 = vsel %vm213_vm2, %v1952_v41, 0.0  ;;  %v1975_v54 = vmul.f32 %v1952_v41, %v1952_v41  ;;  %v1982_v42 = vsel %vm213_vm2, %v1976_v13, 0.0 }
 0x582   :  { %v1964_v27 = vadd.f32 %v1963_v1, %v1962_v40 }
 0x583   :  { %v1980_v32 = vsel %vm213_vm2, %v1975_v54, 0.0 }
 0x584   :  { %v1966_v62 = vadd.f32 %v1965_v49, %v1964_v27  ;;  %v1981_v51 = vadd.f32 %v1980_v32, %v1979_v22 }
 0x586   :  { %v1967_v0 = vrot.slane %v1966_v62, 4  ;;  %v1983_v44 = vadd.f32 %v1982_v42, %v1981_v51 }
 0x588   :  { %v1968_v18 = vadd.f32 %v1967_v0, %v1966_v62  ;;  %v1984_v45 = vrot.slane %v1983_v44, 4 }
 0x58a   :  { %v1969_v16 = vrot.slane %v1968_v18, 2  ;;  %v1985_v15 = vadd.f32 %v1984_v45, %v1983_v44 }
 0x58c   :  { %v1970_v61 = vadd.f32 %v1969_v16, %v1968_v18  ;;  %v1986_v5 = vrot.slane %v1985_v15, 2  ;;  %v2008_v16 = vld [vmem:[#allocation9 + $0xd8] sm:$0xff] }
 0x58e   :  { %v1971_v6 = vrot.slane %v1970_v61, 1  ;;  %v1987_v63 = vadd.f32 %v1986_v5, %v1985_v15 }
 0x590   :  { %v1972_v36 = vadd.f32 %v1971_v6, %v1970_v61  ;;  %v1988_v24 = vrot.slane %v1987_v63, 1 }
 0x592   :  { %v1989_v60 = vadd.f32 %v1988_v24, %v1987_v63  ;;  %v1990_v47 = vmul.f32 0.03125, %v1972_v36 }
 0x594   :  { %v1991_v46 = vmul.f32 0.03125, %v1989_v60  ;;  %v1992_v34 = vmul.f32 %v1990_v47, %v1990_v47  ;;  %v1997_v25 = vsub.f32 %v1957_v33, %v1990_v47  ;;  %v1995_v56 = vsub.f32 %v1947_v58, %v1990_v47 }
 0x595   :  { %v1996_v29 = vsub.f32 %v1952_v41, %v1990_v47  ;;  %v1994_v30 = vsub.f32 %v1942_v8, %v1990_v47 }
 0x596   :  { %v1993_v20 = vsub.f32 %v1991_v46, %v1992_v34 }
 0x598   :  { %v1998_v38 = vadd.f32 1e-05, %v1993_v20 }
 0x59a   :  { %7334 = vrsqrt.f32 %v1998_v38 }
 0x5a7   :  { %v7335_v14 = vpop.eup %7334 }
 0x5a8   :  { %v2002_v7 = vmul.f32 %v7335_v14, %v1996_v29  ;;  %v2000_v23 = vmul.f32 %v7335_v14, %v1994_v30  ;;  %v2001_v17 = vmul.f32 %v7335_v14, %v1995_v56  ;;  %v2003_v26 = vmul.f32 %v7335_v14, %v1997_v25 }
 0x5aa   :  { %v2011_v11 = vmul.f32 %v2007_v9, %v2002_v7  ;;  %v2009_v10 = vmul.f32 %v2005_v35, %v2000_v23  ;;  %v2010_v33 = vmul.f32 %v2006_v3, %v2001_v17  ;;  %v8670_v60 = vmul.f32 %v2008_v16, %v2003_v26 }
 0x5ac   :  { %v8644_v4 = vadd.f32 %v2016_v28, %v2011_v11  ;;  %v8646_v39 = vadd.f32 %v2014_v37, %v2009_v10  ;;  %v8648_v58 = vadd.f32 %v2015_v52, %v2010_v33 }
 0x5ae   :  { %v2231_v8 = vand.u32 2139095040, %v8644_v4  ;;  %v2022_v19 = vand.u32 2147483647, %v8646_v39  ;;  %v2025_v41 = vand.u32 2139095040, %v8646_v39  ;;  %v2125_v40 = vand.u32 2147483647, %v8648_v58 }
 0x5af   :  { %v2128_v12 = vand.u32 2139095040, %v8648_v58  ;;  %v2228_v45 = vand.u32 2147483647, %v8644_v4 }
 0x5b0   :  { %v2232_v13 = vshrl.u32 %v2231_v8, 23  ;;  %v2026_v1 = vshrl.u32 %v2025_v41, 23  ;;  %v2029_v54 = vand.u32 8388607, %v2022_v19  ;;  %v2132_v27 = vand.u32 8388607, %v2125_v40 }
 0x5b1   :  { %v2129_v22 = vshrl.u32 %v2128_v12, 23  ;;  %v8668_v24 = vand.u32 8388607, %v2228_v45 }
 0x5b2   :  { %v6677_v49 = vadd.s32 4294967169, %v2232_v13  ;;  %v6669_v32 = vadd.s32 4294967169, %v2026_v1  ;;  %v2030_v0 = vor.u32 8388608, %v2029_v54  ;;  %v2133_v44 = vor.u32 8388608, %v2132_v27 }
 0x5b3   :  { %v6673_v62 = vadd.s32 4294967169, %v2129_v22 }
 0x5b4   :  { %v2238_v51 = vadd.s32 1, %v6677_v49  ;;  %v2032_v42 = vadd.s32 1, %v6669_v32  ;;  %v8662_v63 = vshll.u32 %v2030_v0, 8  ;;  %v8664_v36 = vshll.u32 %v2133_v44, 8 }
 0x5b5   :  { %v2135_v18 = vadd.s32 1, %v6673_v62 }
 0x5b6   :  { %vm2239_vm9 = vcmp.gt.s32.totalorder %v2238_v51, 0  ;;  %vm2033_vm10 = vcmp.gt.s32.totalorder %v2032_v42, 0 }
 0x5b7   :  { %v8660_v15 = vsel %vm2239_vm9, %v2238_v51, 0  ;;  %v2034_v61 = vsel %vm2033_vm10, %v2032_v42, 0  ;;  %vm2136_vm11 = vcmp.gt.s32.totalorder %v2135_v18, 0 }
 0x5b8   :  { %v2035_v5 = vshrl.u32 %v2034_v61, 5  ;;  %v2036_v6 = vand.u32 31, %v2034_v61  ;;  %v8673_v47 = vand.u32 31, %v8660_v15  ;;  %v2137_v25 = vsel %vm2136_vm11, %v2135_v18, 0 }
 0x5b9   :  { %v2139_v52 = vand.u32 31, %v2137_v25  ;;  %v2138_v51 = vshrl.u32 %v2137_v25, 5 }
 0x5ba   :  { %v2037_v46 = vsub.s32 32, %v2036_v6  ;;  %v2039_v34 = vshll.u32 %v7613_v50, %v2036_v6  ;;  %v2042_v20 = vshll.u32 %v7614_v53, %v2036_v6  ;;  %v2045_v38 = vshll.u32 %v7615_v55, %v2036_v6 }
 0x5bb   :  { %v2048_v56 = vshll.u32 %v7616_v57, %v2036_v6  ;;  %v2051_v29 = vshll.u32 %v7617_v59, %v2036_v6  ;;  %vm2054_vm12 = vcmp.lt.s32.totalorder %v2035_v5, 1  ;;  %vm2055_vm13 = vcmp.lt.s32.totalorder %v2035_v5, 2 }
 0x5bc   :  { %v2040_v30 = vshrl.u32 %v7614_v53, %v2037_v46  ;;  %v2043_v14 = vshrl.u32 %v7615_v55, %v2037_v46  ;;  %v2046_v9 = vshrl.u32 %v7616_v57, %v2037_v46  ;;  %v2038_v35 = vshrl.u32 %v7613_v50, %v2037_v46 }
 0x5bd   :  { %v2049_v3 = vshrl.u32 %v7617_v59, %v2037_v46  ;;  %v2052_v7 = vshrl.u32 %v7618_v2, %v2037_v46  ;;  %vm2056_vm14 = vcmp.lt.s32.totalorder %v2035_v5, 3  ;;  %vm2057_vm15 = vcmp.lt.s32.totalorder %v2035_v5, 4 }
 0x5be   :  { %v2041_v23 = vor.u32 %v2040_v30, %v2039_v34  ;;  %v2044_v17 = vor.u32 %v2043_v14, %v2042_v20  ;;  %v2047_v26 = vor.u32 %v2046_v9, %v2045_v38  ;;  %v2140_v1 = vsub.s32 32, %v2139_v52 }
 0x5bf   :  { %v2050_v28 = vor.u32 %v2049_v3, %v2048_v56  ;;  %v2053_v37 = vor.u32 %v2052_v7, %v2051_v29  ;;  %v8691_v54 = vsub.s32 32, %v8673_v47  ;;  %v2142_v42 = vshll.u32 %v7613_v50, %v2139_v52 }
 0x5c0   :  { %v2058_v11 = vsel %vm2054_vm12, %v2038_v35, %v2041_v23  ;;  %v2059_v10 = vsel %vm2057_vm15, %v2047_v26, 2102212464  ;;  %v2062_v33 = vsel %vm2054_vm12, %v2041_v23, %v2044_v17  ;;  %v2066_v8 = vsel %vm2054_vm12, %v2044_v17, %v2047_v26 }
 0x5c1   :  { %v2060_v41 = vsel %vm2056_vm14, %v2044_v17, %v2059_v10  ;;  %v2063_v12 = vsel %vm2057_vm15, %v2050_v28, 920167782  ;;  %v2067_v13 = vsel %vm2057_vm15, %v2053_v37, 1326507024  ;;  %v2143_v6 = vshrl.u32 %v7614_v53, %v2140_v1 }
 0x5c2   :  { %v2061_v22 = vsel %vm2055_vm13, %v2058_v11, %v2060_v41  ;;  %v2064_v27 = vsel %vm2056_vm14, %v2047_v26, %v2063_v12  ;;  %v2068_v49 = vsel %vm2056_vm14, %v2050_v28, %v2067_v13  ;;  %v2145_v46 = vshll.u32 %v7614_v53, %v2139_v52 }
 0x5c3   :  { %v2065_v32 = vsel %vm2055_vm13, %v2062_v33, %v2064_v27  ;;  %v2069_v62 = vsel %vm2055_vm13, %v2066_v8, %v2068_v49  ;;  %v2077_v61 = vmul.u32 %v8662_v63, %v2061_v22  ;;  %v2146_v5 = vshrl.u32 %v7615_v55, %v2140_v1 }
 0x5c4   :  { %v8700_v0 = vmul.u32.u64.low %v8662_v63, %v2069_v62  ;;  %v8701_v44 = vmul.u32.u64.high %v8662_v63, %v2069_v62, %v8700_v0  ;;  %v8704_v18 = vmul.u32.u64.low %v8662_v63, %v2065_v32  ;;  %v8705_v16 = vmul.u32.u64.high %v8662_v63, %v2065_v32, %v8704_v18 }
 0x5c5   :  { %v2148_v34 = vshll.u32 %v7615_v55, %v2139_v52  ;;  %v2149_v25 = vshrl.u32 %v7616_v57, %v2140_v1  ;;  %v2151_v20 = vshll.u32 %v7616_v57, %v2139_v52  ;;  %v2152_v38 = vshrl.u32 %v7617_v59, %v2140_v1 }
 0x5c6   :  { %v2144_v56 = vor.u32 %v2143_v6, %v2142_v42  ;;  %v2147_v29 = vor.u32 %v2146_v5, %v2145_v46  ;;  %v2154_v30 = vshll.u32 %v7617_v59, %v2139_v52  ;;  %v2155_v63 = vshrl.u32 %v7618_v2, %v2140_v1 }
 0x5c7   :  { %vm2079_vm0 = vc.u32 %v8701_v44, %v8704_v18  ;;  %v2080_v14 = vadd.s32 1, %v8705_v16  ;;  %v2141_v9 = vshrl.u32 %v7613_v50, %v2140_v1  ;;  %v2150_v35 = vor.u32 %v2149_v25, %v2148_v34  ;;  %v2017_v1 = vld [vmem:[#allocation9 + $0xf8] sm:$0xff] }
 0x5c8   :  { %v2153_v3 = vor.u32 %v2152_v38, %v2151_v20  ;;  %v2156_v7 = vor.u32 %v2155_v63, %v2154_v30  ;;  %vm2157_vm1 = vcmp.lt.s32.totalorder %v2138_v51, 1  ;;  %vm2159_vm3 = vcmp.lt.s32.totalorder %v2138_v51, 3 }
 0x5c9   :  { %v2081_v23 = vsel %vm2079_vm0, %v2080_v14, %v8705_v16  ;;  %vm2160_vm4 = vcmp.lt.s32.totalorder %v2138_v51, 4  ;;  %v2161_v17 = vsel %vm2157_vm1, %v2141_v9, %v2144_v56  ;;  %v2165_v26 = vsel %vm2157_vm1, %v2144_v56, %v2147_v29 }
 0x5ca   :  { %v2082_v28 = vadd.s32 %v2081_v23, %v2077_v61  ;;  %v2162_v37 = vsel %vm2160_vm4, %v2150_v35, 2102212464  ;;  %v2166_v52 = vsel %vm2160_vm4, %v2153_v3, 920167782  ;;  %v2169_v11 = vsel %vm2157_vm1, %v2147_v29, %v2150_v35 }
 0x5cb   :  { %vm2158_vm5 = vcmp.lt.s32.totalorder %v2138_v51, 2  ;;  %v2163_v10 = vsel %vm2159_vm3, %v2147_v29, %v2162_v37  ;;  %v2167_v33 = vsel %vm2159_vm3, %v2150_v35, %v2166_v52  ;;  %v2170_v8 = vsel %vm2160_vm4, %v2156_v7, 1326507024 }
 0x5cc   :  { %v2083_v41 = vadd.s32 536870912, %v2082_v28  ;;  %v2168_v12 = vsel %vm2158_vm5, %v2165_v26, %v2167_v33  ;;  %v2171_v13 = vsel %vm2159_vm3, %v2153_v3, %v2170_v8  ;;  %v2164_v22 = vsel %vm2158_vm5, %v2161_v17, %v2163_v10 }
 0x5cd   :  { %v2172_v27 = vsel %vm2158_vm5, %v2169_v11, %v2171_v13  ;;  %v8724_v49 = vmul.u32.u64.low %v8664_v36, %v2168_v12  ;;  %v8725_v32 = vmul.u32.u64.high %v8664_v36, %v2168_v12, %v8724_v49  ;;  %v2236_v51 = vor.u32 8388608, %v8668_v24 }
 0x5ce   :  { %v8728_v62 = vshrl.u32 %v2083_v41, 30  ;;  %v8731_v42 = vmul.u32.u64.low %v8664_v36, %v2172_v27  ;;  %v8732_v0 = vmul.u32.u64.high %v8664_v36, %v2172_v27, %v8731_v42  ;;  %v2246_v16 = vshrl.u32 %v7614_v53, %v8691_v54 }
 0x5cf   :  { %v2249_v61 = vshrl.u32 %v7615_v55, %v8691_v54  ;;  %v8740_v6 = vadd.f32 %v2017_v1, %v8670_v60  ;;  %v2241_v46 = vshrl.u32 %v8660_v15, 5  ;;  %v2180_v34 = vmul.u32 %v8664_v36, %v2164_v22 }
 0x5d0   :  { %v2085_v5 = vshll.u32 %v8728_v62, 30  ;;  %v2252_v25 = vshrl.u32 %v7616_v57, %v8691_v54  ;;  %v2183_v24 = vadd.s32 1, %v8725_v32  ;;  %v2245_v20 = vshll.u32 %v7613_v50, %v8673_v47 }
 0x5d1   :  { %v2248_v38 = vshll.u32 %v7614_v53, %v8673_v47  ;;  %v2255_v60 = vshrl.u32 %v7617_v59, %v8691_v54  ;;  %vm2182_vm6 = vc.u32 %v8732_v0, %v8724_v49  ;;  %v2251_v15 = vshll.u32 %v7615_v55, %v8673_v47 }
 0x5d2   :  { %v2086_v56 = vsub.s32 %v2082_v28, %v2085_v5  ;;  %v2254_v36 = vshll.u32 %v7616_v57, %v8673_v47  ;;  %v2184_v29 = vsel %vm2182_vm6, %v2183_v24, %v8725_v32  ;;  %v2247_v30 = vor.u32 %v2246_v16, %v2245_v20 }
 0x5d3   :  { %v2250_v63 = vor.u32 %v2249_v61, %v2248_v38  ;;  %v2185_v9 = vadd.s32 %v2184_v29, %v2180_v34  ;;  %v2253_v35 = vor.u32 %v2252_v25, %v2251_v15  ;;  %v2257_v7 = vshll.u32 %v7617_v59, %v8673_v47 }
 0x5d4   :  { %v2088_v14 = vsub.s32 0, %v2086_v56  ;;  %v2256_v3 = vor.u32 %v2255_v60, %v2254_v36  ;;  %v2258_v23 = vshrl.u32 %v7618_v2, %v8691_v54  ;;  %v2334_v17 = vand.u32 2139095040, %v8740_v6 }
 0x5d5   :  { %v2244_v28 = vshrl.u32 %v7613_v50, %v8691_v54  ;;  %vm2260_vm7 = vcmp.lt.s32.totalorder %v2241_v46, 1  ;;  %v2276_v37 = vshll.u32 %v2236_v51, 8  ;;  %v2186_v52 = vadd.s32 536870912, %v2185_v9 }
 0x5d6   :  { %v6670_v26 = vmin.u32 %v2088_v14, %v2086_v56  ;;  %v2259_v11 = vor.u32 %v2258_v23, %v2257_v7  ;;  %vm2262_vm8 = vcmp.lt.s32.totalorder %v2241_v46, 3  ;;  %vm2263_vm9 = vcmp.lt.s32.totalorder %v2241_v46, 4 }
 0x5d7   :  { %v2265_v33 = vsel %vm2263_vm9, %v2253_v35, 2102212464  ;;  %v2268_v8 = vsel %vm2260_vm7, %v2247_v30, %v2250_v63  ;;  %v2269_v47 = vsel %vm2263_vm9, %v2256_v3, 920167782  ;;  %v8769_v41 = vshrl.u32 %v2186_v52, 30 }
 0x5d8   :  { %v2090_v10 = vclz %v6670_v26  ;;  %vm2261_vm10 = vcmp.lt.s32.totalorder %v2241_v46, 2  ;;  %v2270_v12 = vsel %vm2262_vm8, %v2253_v35, %v2269_v47  ;;  %v2272_v13 = vsel %vm2260_vm7, %v2250_v63, %v2253_v35 }
 0x5d9   :  { %v2271_v54 = vsel %vm2261_vm10, %v2268_v8, %v2270_v12  ;;  %v2273_v22 = vsel %vm2263_vm9, %v2259_v11, 1326507024  ;;  %v2335_v27 = vshrl.u32 %v2334_v17, 23  ;;  %v2188_v32 = vshll.u32 %v8769_v41, 30 }
 0x5da   :  { %v6671_v1 = vadd.s32 4294967294, %v2090_v10  ;;  %v2264_v42 = vsel %vm2260_vm7, %v2244_v28, %v2247_v30  ;;  %v2266_v51 = vsel %vm2262_vm8, %v2250_v63, %v2265_v33  ;;  %v2274_v16 = vsel %vm2262_vm8, %v2256_v3, %v2273_v22 }
 0x5db   :  { %v2275_v61 = vsel %vm2261_vm10, %v2272_v13, %v2274_v16  ;;  %v8779_v5 = vmul.u32.u64.low %v2276_v37, %v2271_v54  ;;  %v8780_v34 = vmul.u32.u64.high %v2276_v37, %v2271_v54, %v8779_v5  ;;  %v2078_v25 = vadd.s32 %v8704_v18, %v8701_v44 }
 0x5dc   :  { %vm6672_vm11 = vcmp.lt.s32.totalorder %v6671_v1, 0  ;;  %v2189_v20 = vsub.s32 %v2185_v9, %v2188_v32  ;;  %v2108_v15 = vsub.s32 4, %v8728_v62  ;;  %v6681_v36 = vadd.s32 4294967169, %v2335_v27 }
 0x5dd   :  { %v2093_v24 = vsel %vm6672_vm11, 0, %v6671_v1  ;;  %v2267_v30 = vsel %vm2261_vm10, %v2264_v42, %v2266_v51  ;;  %v8787_v63 = vmul.u32.u64.low %v2276_v37, %v2275_v61  ;;  %v8788_v14 = vmul.u32.u64.high %v2276_v37, %v2275_v61, %v8787_v63 }
 0x5de   :  { %v2094_v38 = vsub.s32 32, %v2093_v24  ;;  %v2098_v60 = vsub.s32 4294967266, %v2093_v24  ;;  %v2191_v29 = vsub.s32 0, %v2189_v20  ;;  %v2095_v35 = vshll.u32 %v2086_v56, %v2093_v24 }
 0x5df   :  { %v2286_v23 = vadd.s32 1, %v8780_v34  ;;  %vm2024_vm12 = vcmp.lt.s32.totalorder %v8646_v39, 0  ;;  %v2341_v9 = vadd.s32 1, %v6681_v36  ;;  %v2283_v28 = vmul.u32 %v2276_v37, %v2267_v30 }
 0x5e0   :  { %v2096_v3 = vshrl.u32 %v2078_v25, %v2094_v38  ;;  %v2099_v7 = vadd.s32 127, %v2098_v60  ;;  %v6674_v17 = vmin.u32 %v2191_v29, %v2189_v20  ;;  %vm2285_vm13 = vc.u32 %v8788_v14, %v8779_v5 }
 0x5e1   :  { %v2331_v46 = vand.u32 2147483647, %v8740_v6  ;;  %v2109_v56 = vsel %vm2024_vm12, %v2108_v15, %v8728_v62  ;;  %v2287_v11 = vsel %vm2285_vm13, %v2286_v23, %v8780_v34  ;;  %vm2342_vm14 = vcmp.gt.s32.totalorder %v2341_v9, 0 }
 0x5e2   :  { %v2097_v44 = vor.u32 %v2096_v3, %v2095_v35  ;;  %v2100_v18 = vshll.u32 %v2099_v7, 23  ;;  %v2193_v26 = vclz %v6674_v17  ;;  %v2288_v33 = vadd.s32 %v2287_v11, %v2283_v28 }
 0x5e3   :  { %v2343_v8 = vsel %vm2342_vm14, %v2341_v9, 0  ;;  %vm8801_vm15 = vcmp.le.f32.partialorder %v2022_v19, 0.7853982  ;;  %v2338_v27 = vand.u32 8388607, %v2331_v46  ;;  %v2181_v19 = vadd.s32 %v8724_v49, %v8732_v0 }
 0x5e4   :  { %v2101_v52 = vor.u32 4788187, %v2100_v18  ;;  %v6675_v10 = vadd.s32 4294967294, %v2193_v26  ;;  %v2104_v12 = vcvt.s32.f32 %v2097_v44  ;;  %v2345_v13 = vand.u32 31, %v2343_v8 }
 0x5e5   :  { %v2111_v1 = vsel %vm8801_vm15, 0, %v2109_v56  ;;  %v2289_v62 = vadd.s32 536870912, %v2288_v33  ;;  %v2211_v25 = vsub.s32 4, %v8769_v41  ;;  %v2339_v29 = vor.u32 8388608, %v2338_v27 }
 0x5e6   :  { %v2102_v47 = vand.u32 2147483647, %v2101_v52  ;;  %vm6676_vm0 = vcmp.lt.s32.totalorder %v6675_v10, 0  ;;  %v2346_v32 = vsub.s32 32, %v2345_v13  ;;  %v8813_v34 = vand.u32 3, %v2111_v1 }
 0x5e7   :  { %v2196_v22 = vsel %vm6676_vm0, 0, %v6675_v10  ;;  %v8811_v16 = vshrl.u32 %v2289_v62, 30  ;;  %vm2127_vm1 = vcmp.lt.s32.totalorder %v8648_v58, 0  ;;  %v2348_v7 = vshll.u32 %v7613_v50, %v2345_v13 }
 0x5e8   :  { %v2105_v54 = vmul.f32 %v2104_v12, %v2102_v47  ;;  %v2197_v42 = vsub.s32 32, %v2196_v22  ;;  %v2201_v51 = vsub.s32 4294967266, %v2196_v22  ;;  %v2198_v24 = vshll.u32 %v2189_v20, %v2196_v22 }
 0x5e9   :  { %v2291_v15 = vshll.u32 %v8811_v16, 30  ;;  %v2349_v49 = vshrl.u32 %v7614_v53, %v2346_v32  ;;  %v2352_v0 = vshrl.u32 %v7615_v55, %v2346_v32  ;;  %v8827_v20 = vshrl.u32 %v2343_v8, 5 }
 0x5ea   :  { %v2106_v61 = vxor.u32 2147483648, %v2105_v54  ;;  %v2199_v38 = vshrl.u32 %v2181_v19, %v2197_v42  ;;  %v2202_v60 = vadd.s32 127, %v2201_v51  ;;  %v2355_v23 = vshrl.u32 %v7616_v57, %v2346_v32 }
 0x5eb   :  { %v8824_v3 = vsub.s32 %v2288_v33, %v2291_v15  ;;  %vm8833_vm3 = vcmp.le.f32.partialorder %v2125_v40, 0.7853982  ;;  %v2351_v9 = vshll.u32 %v7614_v53, %v2345_v13  ;;  %v2350_v26 = vor.u32 %v2349_v49, %v2348_v7 }
 0x5ec   :  { %v2107_v36 = vsel %vm2024_vm12, %v2106_v61, %v2105_v54  ;;  %v2200_v63 = vor.u32 %v2199_v38, %v2198_v24  ;;  %v2203_v35 = vshll.u32 %v2202_v60, 23  ;;  %v2354_v28 = vshll.u32 %v7615_v55, %v2345_v13 }
 0x5ed   :  { %v2110_v30 = vsel %vm8801_vm15, %v8646_v39, %v2107_v36  ;;  %v2294_v18 = vsub.s32 0, %v8824_v3  ;;  %v2357_v52 = vshll.u32 %v7616_v57, %v2345_v13  ;;  %v2358_v56 = vshrl.u32 %v7617_v59, %v2346_v32 }
 0x5ee   :  { %7336 = vcosq.f32 %v2110_v30  ;;  %v2204_v44 = vor.u32 4788187, %v2203_v35  ;;  %v2207_v10 = vcvt.s32.f32 %v2200_v63  ;;  %v2353_v40 = vor.u32 %v2352_v0, %v2351_v9 }
 0x5ef   :  { %7338 = vsinq.f32 %v2110_v30  ;;  %v6678_v33 = vmin.u32 %v2294_v18, %v8824_v3  ;;  %v2356_v8 = vor.u32 %v2355_v23, %v2354_v28  ;;  %v2359_v37 = vor.u32 %v2358_v56, %v2357_v52 }
 0x5f0   :  { %v2205_v11 = vand.u32 2147483647, %v2204_v44  ;;  %v2360_v47 = vshll.u32 %v7617_v59, %v2345_v13  ;;  %v2361_v12 = vshrl.u32 %v7618_v2, %v2346_v32  ;;  %v2284_v62 = vadd.s32 %v8779_v5, %v8788_v14 }
 0x5f1   :  { %v2296_v54 = vclz %v6678_v33  ;;  %v2379_v22 = vshll.u32 %v2339_v29, 8  ;;  %v2347_v27 = vshrl.u32 %v7613_v50, %v2346_v32  ;;  %vm2363_vm4 = vcmp.lt.s32.totalorder %v8827_v20, 1 }
 0x5f2   :  { %v2208_v1 = vmul.f32 %v2207_v10, %v2205_v11  ;;  %v2362_v19 = vor.u32 %v2361_v12, %v2360_v47  ;;  %vm2364_vm5 = vcmp.lt.s32.totalorder %v8827_v20, 2  ;;  %vm2120_vm6 = vcmp.eq.s32.totalorder %v8813_v34, 2 }
 0x5f3   :  { %v6679_v51 = vadd.s32 4294967294, %v2296_v54  ;;  %vm2365_vm7 = vcmp.lt.s32.totalorder %v8827_v20, 3  ;;  %vm2366_vm8 = vcmp.lt.s32.totalorder %v8827_v20, 4  ;;  %v2367_v13 = vsel %vm2363_vm4, %v2347_v27, %v2350_v26 }
 0x5f4   :  { %v2209_v42 = vxor.u32 2147483648, %v2208_v1  ;;  %v2368_v61 = vsel %vm2366_vm8, %v2356_v8, 2102212464  ;;  %v2371_v5 = vsel %vm2363_vm4, %v2350_v26, %v2353_v40  ;;  %v2372_v14 = vsel %vm2366_vm8, %v2359_v37, 920167782 }
 0x5f5   :  { %vm6680_vm9 = vcmp.lt.s32.totalorder %v6679_v51, 0  ;;  %v2373_v24 = vsel %vm2365_vm7, %v2356_v8, %v2372_v14  ;;  %v2375_v38 = vsel %vm2363_vm4, %v2353_v40, %v2356_v8  ;;  %v2376_v29 = vsel %vm2366_vm8, %v2362_v19, 1326507024 }
 0x5f6   :  { %v2210_v32 = vsel %vm2127_vm1, %v2209_v42, %v2208_v1  ;;  %v2299_v15 = vsel %vm6680_vm9, 0, %v6679_v51  ;;  %v2374_v36 = vsel %vm2364_vm5, %v2371_v5, %v2373_v24  ;;  %v2369_v30 = vsel %vm2365_vm7, %v2353_v40, %v2368_v61 }
 0x5f7   :  { %v2213_v60 = vsel %vm8833_vm3, %v8648_v58, %v2210_v32  ;;  %v2300_v49 = vsub.s32 32, %v2299_v15  ;;  %v2304_v0 = vsub.s32 4294967266, %v2299_v15  ;;  %v2377_v63 = vsel %vm2365_vm7, %v2359_v37, %v2376_v29 }
 0x5f8   :  { %7340 = vcosq.f32 %v2213_v60  ;;  %v8866_v35 = vmul.u32.u64.low %v2379_v22, %v2374_v36  ;;  %v8867_v7 = vmul.u32.u64.high %v2379_v22, %v2374_v36, %v8866_v35  ;;  %v2301_v44 = vshll.u32 %v8824_v3, %v2299_v15 }
 0x5f9   :  { %7342 = vsinq.f32 %v2213_v60  ;;  %v2302_v18 = vshrl.u32 %v2284_v62, %v2300_v49  ;;  %v2305_v9 = vadd.s32 127, %v2304_v0  ;;  %v2378_v26 = vsel %vm2364_vm5, %v2375_v38, %v2377_v63 }
 0x5fa   :  { %v2212_v56 = vsel %vm2127_vm1, %v2211_v25, %v8769_v41  ;;  %v8878_v11 = vmul.u32.u64.low %v2379_v22, %v2378_v26  ;;  %v8879_v10 = vmul.u32.u64.high %v2379_v22, %v2378_v26, %v8878_v11  ;;  %v2370_v3 = vsel %vm2364_vm5, %v2367_v13, %v2369_v30 }
 0x5fb   :  { %v7337_v23 = vpop.eup %7336  ;;  %v2303_v40 = vor.u32 %v2302_v18, %v2301_v44  ;;  %v2306_v8 = vshll.u32 %v2305_v9, 23  ;;  %vm2117_vm10 = vcmp.eq.s32.totalorder %v8813_v34, 0  ;;  %v2389_v47 = vadd.s32 1, %v8867_v7 }
 0x5fc   :  { %v7339_v28 = vpop.eup %7338  ;;  %v2121_v52 = vxor.u32 2147483648, %v7337_v23  ;;  %vm2114_vm11 = vweird.f32 %v8646_v39  ;;  %vm2116_vm12 = vcmp.lt.s32.totalorder %v8813_v34, 2  ;;  %v2214_v1 = vsel %vm8833_vm3, 0, %v2212_v56 }
 0x5fd   :  { %v2118_v33 = vxor.u32 2147483648, %v7339_v28  ;;  %v2307_v25 = vor.u32 4788187, %v2306_v8  ;;  %v2386_v62 = vmul.u32 %v2379_v22, %v2370_v3  ;;  %vm2388_vm13 = vc.u32 %v8879_v10, %v8866_v35 }
 0x5fe   :  { %v2122_v37 = vsel %vm2120_vm6, %v2121_v52, %v7339_v28  ;;  %v2310_v27 = vcvt.s32.f32 %v2303_v40  ;;  %v2390_v19 = vsel %vm2388_vm13, %v2389_v47, %v8867_v7  ;;  %v2218_v34 = vand.u32 3, %v2214_v1 }
 0x5ff   :  { %v2119_v41 = vsel %vm2117_vm10, %v7337_v23, %v2118_v33  ;;  %v2308_v54 = vand.u32 2147483647, %v2307_v25  ;;  %v2391_v39 = vadd.s32 %v2390_v19, %v2386_v62  ;;  %vm2230_vm14 = vcmp.lt.s32.totalorder %v8644_v4, 0 }
 0x600   :  { %v2123_v12 = vsel %vm2116_vm12, %v2119_v41, %v2122_v37  ;;  %vm8900_vm15 = vcmp.le.f32.partialorder %v2228_v45, 0.7853982  ;;  %vm2223_vm0 = vcmp.eq.s32.totalorder %v2218_v34, 2  ;;  %vm2220_vm1 = vcmp.eq.s32.totalorder %v2218_v34, 0 }
 0x601   :  { %v2124_v20 = vsel %vm2114_vm11, nan, %v2123_v12  ;;  %v2311_v42 = vmul.f32 %v2310_v27, %v2308_v54  ;;  %v2392_v51 = vadd.s32 536870912, %v2391_v39  ;;  %v2314_v36 = vsub.s32 4, %v8811_v16 }
 0x602   :  { %6992 = vmatprep.mubr.msk.f32.mxu0 %vm213_vm2, %v2124_v20  ;;  %vm2219_vm3 = vcmp.lt.s32.totalorder %v2218_v34, 2  ;;  %vm2217_vm4 = vweird.f32 %v8648_v58  ;;  %v2387_v58 = vadd.s32 %v8866_v35, %v8879_v10  ;;  %vm2320_vm9 = vweird.f32 %v8644_v4 }
 0x603   :  { %v2312_v13 = vxor.u32 2147483648, %v2311_v42  ;;  %v8896_v17 = vshrl.u32 %v2392_v51, 30  ;;  %v2315_v63 = vsel %vm2230_vm14, %v2314_v36, %v8811_v16  ;;  %vm2333_vm10 = vcmp.lt.s32.totalorder %v8740_v6, 0 }
 0x604   :  { %v2317_v23 = vsel %vm8900_vm15, 0, %v2315_v63  ;;  %vm2332_vm11 = vcmp.le.f32.partialorder %v2331_v46, 0.7853982 }
 0x605   :  { %v7341_v61 = vpop.eup %7340  ;;  %v2313_v32 = vsel %vm2230_vm14, %v2312_v13, %v2311_v42  ;;  %v2394_v60 = vshll.u32 %v8896_v17, 30  ;;  %v2321_v9 = vand.u32 3, %v2317_v23 }
 0x606   :  { %v7343_v22 = vpop.eup %7342  ;;  %v2224_v5 = vxor.u32 2147483648, %v7341_v61  ;;  %v2316_v38 = vsel %vm8900_vm15, %v8644_v4, %v2313_v32  ;;  %v2417_v4 = vsub.s32 4, %v8896_v17  ;;  %vm2423_vm15 = vweird.f32 %v8740_v6 }
 0x607   :  { %v2221_v24 = vxor.u32 2147483648, %v7343_v22  ;;  %7344 = vcosq.f32 %v2316_v38  ;;  %v2395_v29 = vsub.s32 %v2391_v39, %v2394_v60  ;;  %vm2326_vm6 = vcmp.eq.s32.totalorder %v2321_v9, 2  ;;  %v3020_v60 = vld [vmem:[#allocation11 + $0x80] sm:$0xff] }
 0x608   :  { %v2225_v15 = vsel %vm2223_vm0, %v2224_v5, %v7343_v22  ;;  %7346 = vsinq.f32 %v2316_v38  ;;  %vm2323_vm7 = vcmp.eq.s32.totalorder %v2321_v9, 0  ;;  %vm2322_vm8 = vcmp.lt.s32.totalorder %v2321_v9, 2  ;;  %v3022_v38 = vld [vmem:[#allocation11 + $0x90] sm:$0xff] }
 0x609   :  { %v2222_v45 = vsel %vm2220_vm1, %v7341_v61, %v2221_v24  ;;  %v2397_v30 = vsub.s32 0, %v2395_v29  ;;  %v2418_v39 = vsel %vm2333_vm10, %v2417_v4, %v8896_v17  ;;  %v3023_v24 = vld [vmem:[#allocation11 + $0x98] sm:$0xff]  ;;  %v3021_v17 = vld [vmem:[#allocation11 + $0x88] sm:$0xff] }
 0x60a   :  { %v2226_v49 = vsel %vm2219_vm3, %v2222_v45, %v2225_v15  ;;  %v2420_v42 = vsel %vm2332_vm11, 0, %v2418_v39  ;;  %6998 = vmatprep.subr.mxu1 %v3023_v24 }
 0x60b   :  { %v2227_v0 = vsel %vm2217_vm4, nan, %v2226_v49  ;;  %v6682_v7 = vmin.u32 %v2397_v30, %v2395_v29  ;;  %v2424_v34 = vand.u32 3, %v2420_v42  ;;  %6999 = vmatpush3.msra.mxu1 %v3023_v24  ;;  %v2590_v24 = vld [vmem:[#allocation9 + $0x100] sm:$0xff] }
 0x60c   :  { %6993 = vmatmul.mubr.msk.f32.vlgmr.msra.gmra.mxu0 %vm213_vm2, %v2227_v0  ;;  %7000 = vmatprep.subr.mxu1 %v3022_v38 }
 0x60d   :  { %v2399_v44 = vclz %v6682_v7  ;;  %vm2429_vm12 = vcmp.eq.s32.totalorder %v2424_v34, 2  ;;  %vm2426_vm13 = vcmp.eq.s32.totalorder %v2424_v34, 0  ;;  %vm2425_vm14 = vcmp.lt.s32.totalorder %v2424_v34, 2  ;;  %7001 = vmatpush3.msra.mxu1 %v3022_v38  ;;  %v2591_v38 = vld [vmem:[#allocation9 + $0x108] sm:$0xff] }
 0x60e   :  { %7002 = vmatprep.subr.mxu1 %v3021_v17 }
 0x60f   :  { %v6683_v18 = vadd.s32 4294967294, %v2399_v44  ;;  %7003 = vmatpush3.msra.mxu1 %v3021_v17 }
 0x610   :  { %7004 = vmatprep.subr.mxu1 %v3020_v60 }
 0x611   :  { %vm6684_vm5 = vcmp.lt.s32.totalorder %v6683_v18, 0  ;;  %7005 = vmatpush3.msra.mxu1 %v3020_v60 }
 0x612   :  { %v2402_v26 = vsel %vm6684_vm5, 0, %v6683_v18 }
 0x613   :  { %v2403_v52 = vsub.s32 32, %v2402_v26  ;;  %v2407_v56 = vsub.s32 4294967266, %v2402_v26  ;;  %v2404_v16 = vshll.u32 %v2395_v29, %v2402_v26 }
 0x614   :  { %v7345_v28 = vpop.eup %7344 }
 0x615   :  { %v7347_v11 = vpop.eup %7346  ;;  %v2327_v33 = vxor.u32 2147483648, %v7345_v28  ;;  %v2405_v8 = vshrl.u32 %v2387_v58, %v2403_v52  ;;  %v2408_v3 = vadd.s32 127, %v2407_v56 }
 0x616   :  { %v2324_v40 = vxor.u32 2147483648, %v7347_v11 }
 0x617   :  { %v2328_v37 = vsel %vm2326_vm6, %v2327_v33, %v7347_v11  ;;  %v2406_v41 = vor.u32 %v2405_v8, %v2404_v16  ;;  %v2409_v25 = vshll.u32 %v2408_v3, 23 }
 0x618   :  { %v2325_v47 = vsel %vm2323_vm7, %v7345_v28, %v2324_v40 }
 0x619   :  { %v2329_v12 = vsel %vm2322_vm8, %v2325_v47, %v2328_v37  ;;  %v2410_v35 = vor.u32 4788187, %v2409_v25  ;;  %v2413_v62 = vcvt.s32.f32 %v2406_v41 }
 0x61a   :  { %v2330_v1 = vsel %vm2320_vm9, nan, %v2329_v12 }
 0x61b   :  { %6995 = vmatprep.mubr.msk.f32.mxu0 %vm213_vm2, %v2330_v1  ;;  %v2411_v10 = vand.u32 2147483647, %v2410_v35 }
 0x61d   :  { %v2414_v20 = vmul.f32 %v2413_v62, %v2411_v10 }
 0x61f   :  { %v2415_v54 = vxor.u32 2147483648, %v2414_v20 }
 0x621   :  { %v2416_v27 = vsel %vm2333_vm10, %v2415_v54, %v2414_v20 }
 0x622   :  { %v2419_v19 = vsel %vm2332_vm11, %v8740_v6, %v2416_v27  ;;  %v6686_v6 = vld [vmem:[%s11107_s5 + $0x3] ss:$0 sm:$0xff] }
 0x623   :  { %7348 = vcosq.f32 %v2419_v19 }
 0x624   :  { %7350 = vsinq.f32 %v2419_v19 }
 0x630   :  { %v7349_v51 = vpop.eup %7348 }
 0x631   :  { %v7351_v13 = vpop.eup %7350  ;;  %v2430_v61 = vxor.u32 2147483648, %v7349_v51 }
 0x632   :  { %v2427_v22 = vxor.u32 2147483648, %v7351_v13 }
 0x633   :  { %v2431_v5 = vsel %vm2429_vm12, %v2430_v61, %v7351_v13 }
 0x634   :  { %v2428_v46 = vsel %vm2426_vm13, %v7349_v51, %v2427_v22 }
 0x635   :  { %v2432_v14 = vsel %vm2425_vm14, %v2428_v46, %v2431_v5 }
 0x636   :  { %v2433_v32 = vsel %vm2423_vm15, nan, %v2432_v14 }
 0x637   :  { %6996 = vmatmul.mubr.msk.f32.gmra.mxu0 %vm213_vm2, %v2433_v32  ;;  %v2592_v32 = vld [vmem:[#allocation9 + $0x110] sm:$0xff] }
 0x6cc   :  { %v6994_v15 = vpop.f32.mrf.mxu0 }
 0x6cd   :  { %v2528_v29 = vadd.f32 %v6994_v15, %v6686_v6 }
 0x6ce   :  { %v2522_v36 = vpop.f32.mrf.mxu0 }
 0x6cf   :  { %v2523_v45 = vadd.f32 %v6686_v6, %v2522_v36  ;;  %v8937_v0 = vadd.f32 %v2528_v29, %v8318_v48  ;;  %v2600_v29 = vld [vmem:[#allocation9 + $0x128] sm:$0xff] }
 0x6d1   :  { %v8934_v49 = vadd.f32 %v2523_v45, %v8315_v21  ;;  %v2559_v44 = vmul.f32 %v8937_v0, %v8937_v0  ;;  %v2546_v48 = vsel %vm213_vm2, %v8937_v0, 0.0  ;;  %v2599_v45 = vld [vmem:[#allocation9 + $0x120] sm:$0xff] }
 0x6d3   :  { %v2558_v63 = vmul.f32 %v8934_v49, %v8934_v49  ;;  %v2545_v18 = vsel %vm213_vm2, %v8934_v49, 0.0  ;;  %v2563_v52 = vsel %vm213_vm2, %v2559_v44, 0.0 }
 0x6d4   :  { %v2547_v58 = vadd.f32 %v2546_v48, %v2545_v18 }
 0x6d5   :  { %v2562_v26 = vsel %vm213_vm2, %v2558_v63, 0.0 }
 0x6d6   :  { %v2564_v33 = vadd.f32 %v2563_v52, %v2562_v26 }
 0x6f7   :  { %v6997_v30 = vpop.f32.mrf.mxu0 }
 0x6f8   :  { %v2538_v7 = vadd.f32 %v6997_v30, %v6686_v6 }
 0x6f9   :  { %v2532_v23 = vpop.f32.mrf.mxu0 }
 0x6fa   :  { %v8946_v9 = vadd.f32 %v2538_v7, %v8327_v31  ;;  %v2533_v21 = vadd.f32 %v6686_v6, %v2532_v23  ;;  %v2601_v6 = vld [vmem:[#allocation9 + $0x130] sm:$0xff] }
 0x6fc   :  { %v8952_v28 = vadd.f32 %v2533_v21, %v8333_v43  ;;  %v2561_v56 = vmul.f32 %v8946_v9, %v8946_v9  ;;  %v2550_v16 = vsel %vm213_vm2, %v8946_v9, 0.0 }
 0x6fe   :  { %v2548_v11 = vsel %vm213_vm2, %v8952_v28, 0.0  ;;  %v2560_v31 = vmul.f32 %v8952_v28, %v8952_v28  ;;  %v2567_v37 = vsel %vm213_vm2, %v2561_v56, 0.0 }
 0x6ff   :  { %v2549_v40 = vadd.f32 %v2548_v11, %v2547_v58 }
 0x700   :  { %v2565_v43 = vsel %vm213_vm2, %v2560_v31, 0.0 }
 0x701   :  { %v2551_v8 = vadd.f32 %v2550_v16, %v2549_v40  ;;  %v2566_v3 = vadd.f32 %v2565_v43, %v2564_v33 }
 0x703   :  { %v2552_v47 = vrot.slane %v2551_v8, 4  ;;  %v2568_v41 = vadd.f32 %v2567_v37, %v2566_v3 }
 0x705   :  { %v2553_v25 = vadd.f32 %v2552_v47, %v2551_v8  ;;  %v2569_v12 = vrot.slane %v2568_v41, 4 }
 0x707   :  { %v2554_v1 = vrot.slane %v2553_v25, 2  ;;  %v2570_v35 = vadd.f32 %v2569_v12, %v2568_v41  ;;  %v2593_v12 = vld [vmem:[#allocation9 + $0x118] sm:$0xff] }
 0x709   :  { %v2555_v10 = vadd.f32 %v2554_v1, %v2553_v25  ;;  %v2571_v62 = vrot.slane %v2570_v35, 2 }
 0x70b   :  { %v2556_v20 = vrot.slane %v2555_v10, 1  ;;  %v2572_v54 = vadd.f32 %v2571_v62, %v2570_v35 }
 0x70d   :  { %v2557_v27 = vadd.f32 %v2556_v20, %v2555_v10  ;;  %v2573_v19 = vrot.slane %v2572_v54, 1 }
 0x70f   :  { %v2574_v4 = vadd.f32 %v2573_v19, %v2572_v54  ;;  %v2575_v39 = vmul.f32 0.03125, %v2557_v27 }
 0x711   :  { %v2576_v42 = vmul.f32 0.03125, %v2574_v4  ;;  %v2577_v34 = vmul.f32 %v2575_v39, %v2575_v39  ;;  %v2581_v61 = vsub.f32 %v8952_v28, %v2575_v39  ;;  %v2579_v22 = vsub.f32 %v8934_v49, %v2575_v39 }
 0x712   :  { %v2580_v5 = vsub.f32 %v8937_v0, %v2575_v39  ;;  %v2582_v46 = vsub.f32 %v8946_v9, %v2575_v39 }
 0x713   :  { %v2578_v51 = vsub.f32 %v2576_v42, %v2577_v34 }
 0x715   :  { %v2583_v13 = vadd.f32 1e-05, %v2578_v51 }
 0x717   :  { %7352 = vrsqrt.f32 %v2583_v13 }
 0x724   :  { %v7353_v14 = vpop.eup %7352 }
 0x725   :  { %v2587_v17 = vmul.f32 %v7353_v14, %v2581_v61  ;;  %v2585_v60 = vmul.f32 %v7353_v14, %v2579_v22  ;;  %v2586_v15 = vmul.f32 %v7353_v14, %v2580_v5  ;;  %v2588_v36 = vmul.f32 %v7353_v14, %v2582_v46 }
 0x727   :  { %v2596_v30 = vmul.f32 %v2592_v32, %v2587_v17  ;;  %v2594_v63 = vmul.f32 %v2590_v24, %v2585_v60  ;;  %v2595_v7 = vmul.f32 %v2591_v38, %v2586_v15  ;;  %v8984_v20 = vmul.f32 %v2593_v12, %v2588_v36 }
 0x729   :  { %v8969_v23 = vadd.f32 %v2601_v6, %v2596_v30  ;;  %v8971_v44 = vadd.f32 %v2599_v45, %v2594_v63  ;;  %v8973_v18 = vadd.f32 %v2600_v29, %v2595_v7 }
 0x72b   :  { %v2816_v21 = vand.u32 2139095040, %v8969_v23  ;;  %v2607_v48 = vand.u32 2147483647, %v8971_v44  ;;  %v2610_v26 = vand.u32 2139095040, %v8971_v44  ;;  %v2710_v58 = vand.u32 2147483647, %v8973_v18 }
 0x72c   :  { %v2713_v52 = vand.u32 2139095040, %v8973_v18  ;;  %v2813_v4 = vand.u32 2147483647, %v8969_v23 }
 0x72d   :  { %v2817_v56 = vshrl.u32 %v2816_v21, 23  ;;  %v2611_v11 = vshrl.u32 %v2610_v26, 23  ;;  %v2614_v31 = vand.u32 8388607, %v2607_v48  ;;  %v2717_v40 = vand.u32 8388607, %v2710_v58 }
 0x72e   :  { %v2714_v33 = vshrl.u32 %v2713_v52, 23 }
 0x72f   :  { %v6699_v16 = vadd.s32 4294967169, %v2817_v56  ;;  %v6691_v43 = vadd.s32 4294967169, %v2611_v11  ;;  %v2615_v47 = vor.u32 8388608, %v2614_v31  ;;  %v2718_v41 = vor.u32 8388608, %v2717_v40 }
 0x730   :  { %v6695_v8 = vadd.s32 4294967169, %v2714_v33 }
 0x731   :  { %v2823_v3 = vadd.s32 1, %v6699_v16  ;;  %v2617_v37 = vadd.s32 1, %v6691_v43  ;;  %v8988_v27 = vshll.u32 %v2615_v47, 8  ;;  %v8990_v19 = vshll.u32 %v2718_v41, 8 }
 0x732   :  { %v2720_v25 = vadd.s32 1, %v6695_v8 }
 0x733   :  { %vm2824_vm0 = vcmp.gt.s32.totalorder %v2823_v3, 0  ;;  %vm2618_vm1 = vcmp.gt.s32.totalorder %v2617_v37, 0 }
 0x734   :  { %v2619_v1 = vsel %vm2618_vm1, %v2617_v37, 0  ;;  %vm2721_vm3 = vcmp.gt.s32.totalorder %v2720_v25, 0  ;;  %v8986_v54 = vsel %vm2824_vm0, %v2823_v3, 0 }
 0x735   :  { %v2620_v35 = vshrl.u32 %v2619_v1, 5  ;;  %v2621_v10 = vand.u32 31, %v2619_v1  ;;  %v2722_v62 = vsel %vm2721_vm3, %v2720_v25, 0 }
 0x736   :  { %v8994_v34 = vshrl.u32 %v2722_v62, 5  ;;  %v2724_v51 = vand.u32 31, %v2722_v62 }
 0x737   :  { %v2622_v39 = vsub.s32 32, %v2621_v10  ;;  %v2624_v42 = vshll.u32 %v7613_v50, %v2621_v10  ;;  %v2627_v13 = vshll.u32 %v7614_v53, %v2621_v10  ;;  %v2630_v61 = vshll.u32 %v7615_v55, %v2621_v10 }
 0x738   :  { %v2633_v22 = vshll.u32 %v7616_v57, %v2621_v10  ;;  %v2636_v5 = vshll.u32 %v7617_v59, %v2621_v10  ;;  %vm2639_vm4 = vcmp.lt.s32.totalorder %v2620_v35, 1  ;;  %vm2640_vm5 = vcmp.lt.s32.totalorder %v2620_v35, 2 }
 0x739   :  { %v2625_v46 = vshrl.u32 %v7614_v53, %v2622_v39  ;;  %v2628_v14 = vshrl.u32 %v7615_v55, %v2622_v39  ;;  %v2631_v32 = vshrl.u32 %v7616_v57, %v2622_v39  ;;  %v2623_v24 = vshrl.u32 %v7613_v50, %v2622_v39 }
 0x73a   :  { %v2634_v38 = vshrl.u32 %v7617_v59, %v2622_v39  ;;  %v2637_v17 = vshrl.u32 %v7618_v2, %v2622_v39  ;;  %v2725_v6 = vsub.s32 32, %v2724_v51  ;;  %vm2641_vm6 = vcmp.lt.s32.totalorder %v2620_v35, 3 }
 0x73b   :  { %v2626_v60 = vor.u32 %v2625_v46, %v2624_v42  ;;  %v2629_v15 = vor.u32 %v2628_v14, %v2627_v13  ;;  %v2632_v36 = vor.u32 %v2631_v32, %v2630_v61  ;;  %vm2642_vm7 = vcmp.lt.s32.totalorder %v2620_v35, 4 }
 0x73c   :  { %v2635_v45 = vor.u32 %v2634_v38, %v2633_v22  ;;  %v2638_v29 = vor.u32 %v2637_v17, %v2636_v5  ;;  %v2727_v11 = vshll.u32 %v7613_v50, %v2724_v51  ;;  %v2728_v40 = vshrl.u32 %v7614_v53, %v2725_v6 }
 0x73d   :  { %v2643_v30 = vsel %vm2639_vm4, %v2623_v24, %v2626_v60  ;;  %v2644_v63 = vsel %vm2642_vm7, %v2632_v36, 2102212464  ;;  %v2647_v7 = vsel %vm2639_vm4, %v2626_v60, %v2629_v15  ;;  %v2651_v21 = vsel %vm2639_vm4, %v2629_v15, %v2632_v36 }
 0x73e   :  { %v2645_v26 = vsel %vm2641_vm6, %v2629_v15, %v2644_v63  ;;  %v2648_v52 = vsel %vm2642_vm7, %v2635_v45, 920167782  ;;  %v2652_v56 = vsel %vm2642_vm7, %v2638_v29, 1326507024  ;;  %v2730_v16 = vshll.u32 %v7614_v53, %v2724_v51 }
 0x73f   :  { %v2649_v31 = vsel %vm2641_vm6, %v2632_v36, %v2648_v52  ;;  %v2653_v33 = vsel %vm2641_vm6, %v2635_v45, %v2652_v56  ;;  %v2646_v43 = vsel %vm2640_vm5, %v2643_v30, %v2645_v26  ;;  %v2731_v37 = vshrl.u32 %v7615_v55, %v2725_v6 }
 0x740   :  { %v2650_v8 = vsel %vm2640_vm5, %v2647_v7, %v2649_v31  ;;  %v2654_v3 = vsel %vm2640_vm5, %v2651_v21, %v2653_v33  ;;  %v2729_v1 = vor.u32 %v2728_v40, %v2727_v11  ;;  %v2733_v62 = vshll.u32 %v7615_v55, %v2724_v51  ;;  %v2602_v11 = vld [vmem:[#allocation9 + $0x138] sm:$0xff] }
 0x741   :  { %v9017_v47 = vmul.u32.u64.low %v8988_v27, %v2654_v3  ;;  %v9018_v41 = vmul.u32.u64.high %v8988_v27, %v2654_v3, %v9017_v47  ;;  %v9021_v25 = vmul.u32.u64.low %v8988_v27, %v2650_v8  ;;  %v9022_v12 = vmul.u32.u64.high %v8988_v27, %v2650_v8, %v9021_v25 }
 0x742   :  { %v2732_v10 = vor.u32 %v2731_v37, %v2730_v16  ;;  %v2734_v39 = vshrl.u32 %v7616_v57, %v2725_v6  ;;  %v9028_v35 = vand.u32 31, %v8986_v54  ;;  %v2736_v42 = vshll.u32 %v7616_v57, %v2724_v51 }
 0x743   :  { %v2737_v13 = vshrl.u32 %v7617_v59, %v2725_v6  ;;  %v2740_v61 = vshrl.u32 %v7618_v2, %v2725_v6  ;;  %v2662_v22 = vmul.u32 %v8988_v27, %v2646_v43  ;;  %v2726_v5 = vshrl.u32 %v7613_v50, %v2725_v6 }
 0x744   :  { %v2735_v46 = vor.u32 %v2734_v39, %v2733_v62  ;;  %v2739_v14 = vshll.u32 %v7617_v59, %v2724_v51  ;;  %vm2664_vm8 = vc.u32 %v9018_v41, %v9021_v25  ;;  %v2665_v32 = vadd.s32 1, %v9022_v12 }
 0x745   :  { %v2738_v24 = vor.u32 %v2737_v13, %v2736_v42  ;;  %vm2742_vm9 = vcmp.lt.s32.totalorder %v8994_v34, 1  ;;  %vm2744_vm10 = vcmp.lt.s32.totalorder %v8994_v34, 3  ;;  %vm2745_vm11 = vcmp.lt.s32.totalorder %v8994_v34, 4 }
 0x746   :  { %v2741_v38 = vor.u32 %v2740_v61, %v2739_v14  ;;  %v2750_v17 = vsel %vm2742_vm9, %v2729_v1, %v2732_v10  ;;  %v2666_v27 = vsel %vm2664_vm8, %v2665_v32, %v9022_v12  ;;  %v2747_v60 = vsel %vm2745_vm11, %v2735_v46, 2102212464 }
 0x747   :  { %v2751_v15 = vsel %vm2745_vm11, %v2738_v24, 920167782  ;;  %v2754_v36 = vsel %vm2742_vm9, %v2732_v10, %v2735_v46  ;;  %v2667_v51 = vadd.s32 %v2666_v27, %v2662_v22  ;;  %vm2743_vm12 = vcmp.lt.s32.totalorder %v8994_v34, 2 }
 0x748   :  { %v2752_v6 = vsel %vm2744_vm10, %v2735_v46, %v2751_v15  ;;  %v2755_v45 = vsel %vm2745_vm11, %v2741_v38, 1326507024  ;;  %v2746_v29 = vsel %vm2742_vm9, %v2726_v5, %v2729_v1  ;;  %v2748_v30 = vsel %vm2744_vm10, %v2732_v10, %v2747_v60 }
 0x749   :  { %v2753_v63 = vsel %vm2743_vm12, %v2750_v17, %v2752_v6  ;;  %v2756_v7 = vsel %vm2744_vm10, %v2738_v24, %v2755_v45  ;;  %v2668_v21 = vadd.s32 536870912, %v2667_v51  ;;  %v2828_v34 = vsub.s32 32, %v9028_v35 }
 0x74a   :  { %v2757_v26 = vsel %vm2743_vm12, %v2754_v36, %v2756_v7  ;;  %v9045_v52 = vmul.u32.u64.low %v8990_v19, %v2753_v63  ;;  %v9046_v56 = vmul.u32.u64.high %v8990_v19, %v2753_v63, %v9045_v52  ;;  %v2749_v16 = vsel %vm2743_vm12, %v2746_v29, %v2748_v30 }
 0x74b   :  { %v9050_v31 = vmul.u32.u64.low %v8990_v19, %v2757_v26  ;;  %v9051_v33 = vmul.u32.u64.high %v8990_v19, %v2757_v26, %v9050_v31  ;;  %v9054_v40 = vshrl.u32 %v2668_v21, 30  ;;  %v9057_v43 = vadd.f32 %v2602_v11, %v8984_v20 }
 0x74c   :  { %v2768_v3 = vadd.s32 1, %v9046_v56  ;;  %v2820_v37 = vand.u32 8388607, %v2813_v4  ;;  %v9064_v47 = vshrl.u32 %v8986_v54, 5  ;;  %v2765_v12 = vmul.u32 %v8990_v19, %v2749_v16 }
 0x74d   :  { %v2670_v8 = vshll.u32 %v9054_v40, 30  ;;  %vm2767_vm13 = vc.u32 %v9051_v33, %v9045_v52  ;;  %v2834_v1 = vshrl.u32 %v7615_v55, %v2828_v34  ;;  %v2837_v20 = vshrl.u32 %v7616_v57, %v2828_v34 }
 0x74e   :  { %v2769_v62 = vsel %vm2767_vm13, %v2768_v3, %v9046_v56  ;;  %v2839_v39 = vshll.u32 %v7616_v57, %v9028_v35  ;;  %v2840_v42 = vshrl.u32 %v7617_v59, %v2828_v34  ;;  %v2831_v54 = vshrl.u32 %v7614_v53, %v2828_v34 }
 0x74f   :  { %v2671_v10 = vsub.s32 %v2667_v51, %v2670_v8  ;;  %v2770_v13 = vadd.s32 %v2769_v62, %v2765_v12  ;;  %v2833_v19 = vshll.u32 %v7614_v53, %v9028_v35  ;;  %v2843_v61 = vshrl.u32 %v7618_v2, %v2828_v34 }
 0x750   :  { %v2836_v5 = vshll.u32 %v7615_v55, %v9028_v35  ;;  %v2841_v46 = vor.u32 %v2840_v42, %v2839_v39  ;;  %v2842_v14 = vshll.u32 %v7617_v59, %v9028_v35  ;;  %v2821_v24 = vor.u32 8388608, %v2820_v37 }
 0x751   :  { %v2673_v22 = vsub.s32 0, %v2671_v10  ;;  %v2771_v32 = vadd.s32 536870912, %v2770_v13  ;;  %v2830_v38 = vshll.u32 %v7613_v50, %v9028_v35  ;;  %v2835_v27 = vor.u32 %v2834_v1, %v2833_v19 }
 0x752   :  { %v2838_v60 = vor.u32 %v2837_v20, %v2836_v5  ;;  %v2844_v15 = vor.u32 %v2843_v61, %v2842_v14  ;;  %vm2848_vm14 = vcmp.lt.s32.totalorder %v9064_v47, 4  ;;  %v2919_v29 = vand.u32 2139095040, %v9057_v43 }
 0x753   :  { %v6692_v17 = vmin.u32 %v2673_v22, %v2671_v10  ;;  %v9085_v36 = vshrl.u32 %v2771_v32, 30  ;;  %v2832_v51 = vor.u32 %v2831_v54, %v2830_v38  ;;  %v2854_v45 = vsel %vm2848_vm14, %v2841_v46, 920167782 }
 0x754   :  { %v2663_v30 = vadd.s32 %v9021_v25, %v9018_v41  ;;  %vm2845_vm15 = vcmp.lt.s32.totalorder %v9064_v47, 1  ;;  %v2861_v63 = vshll.u32 %v2821_v24, 8  ;;  %vm2847_vm0 = vcmp.lt.s32.totalorder %v9064_v47, 3 }
 0x755   :  { %v2675_v6 = vclz %v6692_v17  ;;  %v2773_v35 = vshll.u32 %v9085_v36, 30  ;;  %v2857_v21 = vsel %vm2845_vm15, %v2835_v27, %v2838_v60  ;;  %v2858_v26 = vsel %vm2848_vm14, %v2844_v15, 1326507024 }
 0x756   :  { %v2853_v11 = vsel %vm2845_vm15, %v2832_v51, %v2835_v27  ;;  %v2855_v41 = vsel %vm2847_vm0, %v2838_v60, %v2854_v45  ;;  %v2859_v25 = vsel %vm2847_vm0, %v2841_v46, %v2858_v26  ;;  %v2829_v31 = vshrl.u32 %v7613_v50, %v2828_v34 }
 0x757   :  { %v6693_v7 = vadd.s32 4294967294, %v2675_v6  ;;  %v9100_v56 = vsub.s32 %v2770_v13, %v2773_v35  ;;  %vm2846_vm3 = vcmp.lt.s32.totalorder %v9064_v47, 2  ;;  %v2850_v16 = vsel %vm2848_vm14, %v2838_v60, 2102212464 }
 0x758   :  { %v2860_v37 = vsel %vm2846_vm3, %v2857_v21, %v2859_v25  ;;  %v2920_v12 = vshrl.u32 %v2919_v29, 23  ;;  %v2693_v62 = vsub.s32 4, %v9054_v40  ;;  %v2856_v39 = vsel %vm2846_vm3, %v2853_v11, %v2855_v41 }
 0x759   :  { %vm6694_vm1 = vcmp.lt.s32.totalorder %v6693_v7, 0  ;;  %v2776_v3 = vsub.s32 0, %v9100_v56  ;;  %v2849_v13 = vsel %vm2845_vm15, %v2829_v31, %v2832_v51  ;;  %v2851_v54 = vsel %vm2847_vm0, %v2835_v27, %v2850_v16 }
 0x75a   :  { %v2678_v8 = vsel %vm6694_vm1, 0, %v6693_v7  ;;  %v9123_v22 = vmul.u32.u64.low %v2861_v63, %v2860_v37  ;;  %v9124_v5 = vmul.u32.u64.high %v2861_v63, %v2860_v37, %v9123_v22  ;;  %v6703_v24 = vadd.s32 4294967169, %v2920_v12 }
 0x75b   :  { %v2679_v1 = vsub.s32 32, %v2678_v8  ;;  %v2683_v20 = vsub.s32 4294967266, %v2678_v8  ;;  %v2680_v34 = vshll.u32 %v2671_v10, %v2678_v8  ;;  %v6696_v42 = vmin.u32 %v2776_v3, %v9100_v56 }
 0x75c   :  { %v9126_v14 = vmul.u32.u64.low %v2861_v63, %v2856_v39  ;;  %v9127_v32 = vmul.u32.u64.high %v2861_v63, %v2856_v39, %v9126_v14  ;;  %v2852_v17 = vsel %vm2846_vm3, %v2849_v13, %v2851_v54  ;;  %vm9134_vm4 = vcmp.le.f32.partialorder %v2607_v48, 0.7853982 }
 0x75d   :  { %v2681_v19 = vshrl.u32 %v2663_v30, %v2679_v1  ;;  %v2684_v61 = vadd.s32 127, %v2683_v20  ;;  %v2778_v46 = vclz %v6696_v42  ;;  %vm2609_vm5 = vcmp.lt.s32.totalorder %v8971_v44, 0 }
 0x75e   :  { %v2926_v15 = vadd.s32 1, %v6703_v24  ;;  %v2694_v6 = vsel %vm2609_vm5, %v2693_v62, %v9054_v40  ;;  %vm2870_vm6 = vc.u32 %v9124_v5, %v9126_v14  ;;  %v2916_v47 = vand.u32 2147483647, %v9057_v43 }
 0x75f   :  { %v2682_v10 = vor.u32 %v2681_v19, %v2680_v34  ;;  %v2685_v38 = vshll.u32 %v2684_v61, 23  ;;  %v6697_v60 = vadd.s32 4294967294, %v2778_v46  ;;  %v2868_v45 = vmul.u32 %v2861_v63, %v2852_v17 }
 0x760   :  { %v2871_v48 = vadd.s32 1, %v9127_v32  ;;  %vm2927_vm8 = vcmp.gt.s32.totalorder %v2926_v15, 0  ;;  %v2766_v21 = vadd.s32 %v9045_v52, %v9051_v33  ;;  %v2696_v25 = vsel %vm9134_vm4, 0, %v2694_v6 }
 0x761   :  { %v2686_v51 = vor.u32 4788187, %v2685_v38  ;;  %vm6698_vm7 = vcmp.lt.s32.totalorder %v6697_v60, 0  ;;  %v2689_v30 = vcvt.s32.f32 %v2682_v10  ;;  %v2928_v7 = vsel %vm2927_vm8, %v2926_v15, 0 }
 0x762   :  { %v2781_v35 = vsel %vm6698_vm7, 0, %v6697_v60  ;;  %v2872_v40 = vsel %vm2870_vm6, %v2871_v48, %v9127_v32  ;;  %v2930_v63 = vand.u32 31, %v2928_v7  ;;  %v2923_v37 = vand.u32 8388607, %v2916_v47 }
 0x763   :  { %v2687_v29 = vand.u32 2147483647, %v2686_v51  ;;  %v2782_v26 = vsub.s32 32, %v2781_v35  ;;  %v2786_v11 = vsub.s32 4294967266, %v2781_v35  ;;  %v2873_v31 = vadd.s32 %v2872_v40, %v2868_v45 }
 0x764   :  { %v2783_v16 = vshll.u32 %v9100_v56, %v2781_v35  ;;  %v2931_v52 = vsub.s32 32, %v2930_v63  ;;  %v9156_v39 = vand.u32 3, %v2696_v25  ;;  %vm2712_vm9 = vcmp.lt.s32.totalorder %v8973_v18, 0 }
 0x765   :  { %v2690_v41 = vmul.f32 %v2689_v30, %v2687_v29  ;;  %v2784_v8 = vshrl.u32 %v2766_v21, %v2782_v26  ;;  %v2787_v3 = vadd.s32 127, %v2786_v11  ;;  %v2874_v1 = vadd.s32 536870912, %v2873_v31 }
 0x766   :  { %v2924_v13 = vor.u32 8388608, %v2923_v37  ;;  %v2934_v54 = vshrl.u32 %v7614_v53, %v2931_v52  ;;  %v2933_v61 = vshll.u32 %v7613_v50, %v2930_v63  ;;  %v2937_v22 = vshrl.u32 %v7615_v55, %v2931_v52 }
 0x767   :  { %v2691_v12 = vxor.u32 2147483648, %v2690_v41  ;;  %v2785_v33 = vor.u32 %v2784_v8, %v2783_v16  ;;  %v2788_v20 = vshll.u32 %v2787_v3, 23  ;;  %v9159_v34 = vshrl.u32 %v2874_v1, 30 }
 0x768   :  { %v2940_v24 = vshrl.u32 %v7616_v57, %v2931_v52  ;;  %v2936_v38 = vshll.u32 %v7614_v53, %v2930_v63  ;;  %v2939_v17 = vshll.u32 %v7615_v55, %v2930_v63  ;;  %v2943_v27 = vshrl.u32 %v7617_v59, %v2931_v52 }
 0x769   :  { %v2692_v62 = vsel %vm2609_vm5, %v2691_v12, %v2690_v41  ;;  %v2789_v42 = vor.u32 4788187, %v2788_v20  ;;  %v2876_v19 = vshll.u32 %v9159_v34, 30  ;;  %v2792_v32 = vcvt.s32.f32 %v2785_v33 }
 0x76a   :  { %v2695_v56 = vsel %vm9134_vm4, %v8971_v44, %v2692_v62  ;;  %v2929_v15 = vshrl.u32 %v2928_v7, 5  ;;  %v2935_v51 = vor.u32 %v2934_v54, %v2933_v61  ;;  %v2942_v6 = vshll.u32 %v7616_v57, %v2930_v63 }
 0x76b   :  { %7354 = vcosq.f32 %v2695_v56  ;;  %v2790_v46 = vand.u32 2147483647, %v2789_v42  ;;  %v9169_v10 = vsub.s32 %v2873_v31, %v2876_v19  ;;  %v2938_v48 = vor.u32 %v2937_v22, %v2936_v38 }
 0x76c   :  { %7356 = vsinq.f32 %v2695_v56  ;;  %v2941_v29 = vor.u32 %v2940_v24, %v2939_v17  ;;  %v2946_v30 = vshrl.u32 %v7618_v2, %v2931_v52  ;;  %vm9179_vm10 = vcmp.le.f32.partialorder %v2710_v58, 0.7853982 }
 0x76d   :  { %v2793_v60 = vmul.f32 %v2792_v32, %v2790_v46  ;;  %v2879_v45 = vsub.s32 0, %v9169_v10  ;;  %v2944_v26 = vor.u32 %v2943_v27, %v2942_v6  ;;  %v2945_v11 = vshll.u32 %v7617_v59, %v2930_v63 }
 0x76e   :  { %v2796_v7 = vsub.s32 4, %v9085_v36  ;;  %v2932_v41 = vshrl.u32 %v7613_v50, %v2931_v52  ;;  %v2964_v25 = vshll.u32 %v2924_v13, 8  ;;  %vm2705_vm11 = vcmp.eq.s32.totalorder %v9156_v39, 2 }
 0x76f   :  { %v2794_v21 = vxor.u32 2147483648, %v2793_v60  ;;  %v6700_v40 = vmin.u32 %v2879_v45, %v9169_v10  ;;  %v2947_v58 = vor.u32 %v2946_v30, %v2945_v11  ;;  %vm2948_vm12 = vcmp.lt.s32.totalorder %v2929_v15, 1 }
 0x770   :  { %vm2951_vm13 = vcmp.lt.s32.totalorder %v2929_v15, 4  ;;  %vm2702_vm14 = vcmp.eq.s32.totalorder %v9156_v39, 0  ;;  %v2956_v3 = vsel %vm2948_vm12, %v2935_v51, %v2938_v48  ;;  %vm2949_vm15 = vcmp.lt.s32.totalorder %v2929_v15, 2 }
 0x771   :  { %v2795_v31 = vsel %vm2712_vm9, %v2794_v21, %v2793_v60  ;;  %v2881_v16 = vclz %v6700_v40  ;;  %v2953_v8 = vsel %vm2951_vm13, %v2941_v29, 2102212464  ;;  %vm2950_vm0 = vcmp.lt.s32.totalorder %v2929_v15, 3 }
 0x772   :  { %v2798_v63 = vsel %vm9179_vm10, %v8973_v18, %v2795_v31  ;;  %v2957_v37 = vsel %vm2951_vm13, %v2944_v26, 920167782  ;;  %v2960_v52 = vsel %vm2948_vm12, %v2938_v48, %v2941_v29  ;;  %v2952_v33 = vsel %vm2948_vm12, %v2932_v41, %v2935_v51 }
 0x773   :  { %7358 = vcosq.f32 %v2798_v63  ;;  %v6701_v12 = vadd.s32 4294967294, %v2881_v16  ;;  %v2958_v1 = vsel %vm2950_vm0, %v2941_v29, %v2957_v37  ;;  %v2954_v20 = vsel %vm2950_vm0, %v2938_v48, %v2953_v8 }
 0x774   :  { %7360 = vsinq.f32 %v2798_v63  ;;  %v2959_v62 = vsel %vm2949_vm15, %v2956_v3, %v2958_v1  ;;  %v2961_v56 = vsel %vm2951_vm13, %v2947_v58, 1326507024  ;;  %v2797_v61 = vsel %vm2712_vm9, %v2796_v7, %v9085_v36 }
 0x775   :  { %vm6702_vm1 = vcmp.lt.s32.totalorder %v6701_v12, 0  ;;  %v2962_v42 = vsel %vm2950_vm0, %v2944_v26, %v2961_v56  ;;  %v9198_v13 = vmul.u32.u64.low %v2964_v25, %v2959_v62  ;;  %v9199_v54 = vmul.u32.u64.high %v2964_v25, %v2959_v62, %v9198_v13 }
 0x776   :  { %v2869_v22 = vadd.s32 %v9126_v14, %v9124_v5  ;;  %v2884_v46 = vsel %vm6702_vm1, 0, %v6701_v12  ;;  %v2963_v32 = vsel %vm2949_vm15, %v2960_v52, %v2962_v42  ;;  %v2955_v60 = vsel %vm2949_vm15, %v2952_v33, %v2954_v20 }
 0x777   :  { %v2885_v17 = vsub.s32 32, %v2884_v46  ;;  %v2889_v27 = vsub.s32 4294967266, %v2884_v46  ;;  %v2886_v6 = vshll.u32 %v9169_v10, %v2884_v46  ;;  %v2974_v14 = vadd.s32 1, %v9199_v54 }
 0x778   :  { %v7355_v19 = vpop.eup %7354  ;;  %v9210_v45 = vmul.u32.u64.low %v2964_v25, %v2963_v32  ;;  %v9211_v48 = vmul.u32.u64.high %v2964_v25, %v2963_v32, %v9210_v45  ;;  %vm2701_vm3 = vcmp.lt.s32.totalorder %v9156_v39, 2  ;;  %v2799_v15 = vsel %vm9179_vm10, 0, %v2797_v61 }
 0x779   :  { %v7357_v24 = vpop.eup %7356  ;;  %v2706_v38 = vxor.u32 2147483648, %v7355_v19  ;;  %v2887_v29 = vshrl.u32 %v2869_v22, %v2885_v17  ;;  %v2890_v5 = vadd.s32 127, %v2889_v27  ;;  %vm2699_vm4 = vweird.f32 %v8971_v44 }
 0x77a   :  { %v2703_v51 = vxor.u32 2147483648, %v7357_v24  ;;  %v2971_v7 = vmul.u32 %v2964_v25, %v2955_v60  ;;  %vm2973_vm5 = vc.u32 %v9211_v48, %v9198_v13  ;;  %v2803_v40 = vand.u32 3, %v2799_v15 }
 0x77b   :  { %v2707_v36 = vsel %vm2705_vm11, %v2706_v38, %v7357_v24  ;;  %v2888_v21 = vor.u32 %v2887_v29, %v2886_v6  ;;  %v2891_v26 = vshll.u32 %v2890_v5, 23  ;;  %v2975_v39 = vsel %vm2973_vm5, %v2974_v14, %v9199_v54 }
 0x77c   :  { %v2704_v30 = vsel %vm2702_vm14, %v7355_v19, %v2703_v51  ;;  %v2976_v31 = vadd.s32 %v2975_v39, %v2971_v7  ;;  %vm2808_vm6 = vcmp.eq.s32.totalorder %v2803_v40, 2  ;;  %vm2805_vm7 = vcmp.eq.s32.totalorder %v2803_v40, 0 }
 0x77d   :  { %v2708_v10 = vsel %vm2701_vm3, %v2704_v30, %v2707_v36  ;;  %v2892_v41 = vor.u32 4788187, %v2891_v26  ;;  %v2895_v63 = vcvt.s32.f32 %v2888_v21  ;;  %vm2804_vm8 = vcmp.lt.s32.totalorder %v2803_v40, 2 }
 0x77e   :  { %v2709_v11 = vsel %vm2699_vm4, nan, %v2708_v10  ;;  %v2977_v8 = vadd.s32 536870912, %v2976_v31  ;;  %vm2802_vm9 = vweird.f32 %v8973_v18  ;;  %vm2815_vm10 = vcmp.lt.s32.totalorder %v8969_v23, 0 }
 0x77f   :  { %7006 = vmatprep.mubr.msk.f32.mxu1 %vm213_vm2, %v2709_v11  ;;  %v2893_v35 = vand.u32 2147483647, %v2892_v41  ;;  %vm9230_vm11 = vcmp.le.f32.partialorder %v2813_v4, 0.7853982  ;;  %v2899_v18 = vsub.s32 4, %v9159_v34  ;;  %v2972_v27 = vadd.s32 %v9198_v13, %v9211_v48 }
 0x780   :  { %v7359_v58 = vpop.eup %7358  ;;  %v2978_v12 = vshrl.u32 %v2977_v8, 30  ;;  %vm2905_vm0 = vweird.f32 %v8969_v23  ;;  %vm2918_vm1 = vcmp.lt.s32.totalorder %v9057_v43, 0  ;;  %vm2917_vm3 = vcmp.le.f32.partialorder %v2916_v47, 0.7853982 }
 0x781   :  { %v7361_v16 = vpop.eup %7360  ;;  %v2809_v44 = vxor.u32 2147483648, %v7359_v58  ;;  %v2896_v37 = vmul.f32 %v2895_v63, %v2893_v35  ;;  %v2900_v46 = vsel %vm2815_vm10, %v2899_v18, %v9159_v34 }
 0x782   :  { %v2806_v3 = vxor.u32 2147483648, %v7361_v16  ;;  %v2979_v20 = vshll.u32 %v2978_v12, 30  ;;  %v2902_v24 = vsel %vm9230_vm11, 0, %v2900_v46 }
 0x783   :  { %v2810_v25 = vsel %vm2808_vm6, %v2809_v44, %v7361_v16  ;;  %v2897_v52 = vxor.u32 2147483648, %v2896_v37  ;;  %v2906_v17 = vand.u32 3, %v2902_v24 }
 0x784   :  { %v2807_v1 = vsel %vm2805_vm7, %v7359_v58, %v2806_v3  ;;  %v2980_v19 = vsub.s32 %v2976_v31, %v2979_v20  ;;  %v3002_v58 = vsub.s32 4, %v2978_v12  ;;  %vm3008_vm7 = vweird.f32 %v9057_v43  ;;  %v3602_v20 = vld [vmem:[#allocation11 + $0xa0] sm:$0xff] }
 0x785   :  { %v2811_v33 = vsel %vm2804_vm8, %v2807_v1, %v2810_v25  ;;  %v2898_v42 = vsel %vm2815_vm10, %v2897_v52, %v2896_v37  ;;  %vm2911_vm13 = vcmp.eq.s32.totalorder %v2906_v17, 2  ;;  %vm2908_vm14 = vcmp.eq.s32.totalorder %v2906_v17, 0  ;;  %v3605_v52 = vld [vmem:[#allocation11 + $0xb8] sm:$0xff] }
 0x786   :  { %v2812_v62 = vsel %vm2802_vm9, nan, %v2811_v33  ;;  %v2901_v54 = vsel %vm9230_vm11, %v8969_v23, %v2898_v42  ;;  %v2982_v61 = vsub.s32 0, %v2980_v19  ;;  %vm2907_vm15 = vcmp.lt.s32.totalorder %v2906_v17, 2  ;;  %v3604_v33 = vld [vmem:[#allocation11 + $0xb0] sm:$0xff]  ;;  %7012 = vmatprep.subr.mxu0 %v3605_v52 }
 0x787   :  { %7007 = vmatmul.mubr.msk.f32.vlgmr.msra.gmra.mxu1 %vm213_vm2, %v2812_v62  ;;  %7362 = vcosq.f32 %v2901_v54  ;;  %v3003_v23 = vsel %vm2918_vm1, %v3002_v58, %v2978_v12  ;;  %7013 = vmatpush3.msra.mxu0 %v3605_v52  ;;  %v3603_v12 = vld [vmem:[#allocation11 + $0xa8] sm:$0xff]  ;;  %v3172_v52 = vld [vmem:[#allocation9 + $0x140] sm:$0xff] }
 0x788   :  { %7364 = vsinq.f32 %v2901_v54  ;;  %v6704_v22 = vmin.u32 %v2982_v61, %v2980_v19  ;;  %v3005_v35 = vsel %vm2917_vm3, 0, %v3003_v23  ;;  %7014 = vmatprep.subr.mxu0 %v3604_v33 }
 0x789   :  { %v3009_v63 = vand.u32 3, %v3005_v35  ;;  %7015 = vmatpush3.msra.mxu0 %v3604_v33  ;;  %v3173_v33 = vld [vmem:[#allocation9 + $0x148] sm:$0xff] }
 0x78a   :  { %v2984_v4 = vclz %v6704_v22  ;;  %7016 = vmatprep.subr.mxu0 %v3603_v12 }
 0x78b   :  { %vm3014_vm4 = vcmp.eq.s32.totalorder %v3009_v63, 2  ;;  %vm3011_vm5 = vcmp.eq.s32.totalorder %v3009_v63, 0  ;;  %vm3010_vm6 = vcmp.lt.s32.totalorder %v3009_v63, 2  ;;  %7017 = vmatpush3.msra.mxu0 %v3603_v12 }
 0x78c   :  { %v6705_v32 = vadd.s32 4294967294, %v2984_v4  ;;  %7018 = vmatprep.subr.mxu0 %v3602_v20 }
 0x78d   :  { %7019 = vmatpush3.msra.mxu0 %v3602_v20 }
 0x78e   :  { %vm6706_vm12 = vcmp.lt.s32.totalorder %v6705_v32, 0 }
 0x78f   :  { %v2987_v38 = vsel %vm6706_vm12, 0, %v6705_v32 }
 0x790   :  { %v2988_v60 = vsub.s32 32, %v2987_v38  ;;  %v2992_v51 = vsub.s32 4294967266, %v2987_v38  ;;  %v2989_v45 = vshll.u32 %v2980_v19, %v2987_v38 }
 0x792   :  { %v2990_v36 = vshrl.u32 %v2972_v27, %v2988_v60  ;;  %v2993_v29 = vadd.s32 127, %v2992_v51 }
 0x794   :  { %v7363_v6 = vpop.eup %7362  ;;  %v2991_v30 = vor.u32 %v2990_v36, %v2989_v45  ;;  %v2994_v15 = vshll.u32 %v2993_v29, 23 }
 0x795   :  { %v7365_v5 = vpop.eup %7364  ;;  %v2912_v14 = vxor.u32 2147483648, %v7363_v6 }
 0x796   :  { %v2909_v34 = vxor.u32 2147483648, %v7365_v5  ;;  %v2995_v26 = vor.u32 4788187, %v2994_v15  ;;  %v2998_v7 = vcvt.s32.f32 %v2991_v30 }
 0x797   :  { %v2913_v10 = vsel %vm2911_vm13, %v2912_v14, %v7365_v5 }
 0x798   :  { %v2910_v21 = vsel %vm2908_vm14, %v7363_v6, %v2909_v34  ;;  %v2996_v11 = vand.u32 2147483647, %v2995_v26 }
 0x799   :  { %v2914_v13 = vsel %vm2907_vm15, %v2910_v21, %v2913_v10 }
 0x79a   :  { %v2915_v48 = vsel %vm2905_vm0, nan, %v2914_v13  ;;  %v2999_v40 = vmul.f32 %v2998_v7, %v2996_v11 }
 0x79b   :  { %7009 = vmatprep.mubr.msk.f32.mxu1 %vm213_vm2, %v2915_v48 }
 0x79c   :  { %v3000_v41 = vxor.u32 2147483648, %v2999_v40 }
 0x79e   :  { %v3001_v39 = vsel %vm2918_vm1, %v3000_v41, %v2999_v40 }
 0x79f   :  { %v3004_v31 = vsel %vm2917_vm3, %v9057_v43, %v3001_v39  ;;  %v6708_v43 = vld [vmem:[%s11107_s5 + $0x4] ss:$0 sm:$0xff] }
 0x7a0   :  { %7366 = vcosq.f32 %v3004_v31 }
 0x7a1   :  { %7368 = vsinq.f32 %v3004_v31 }
 0x7ad   :  { %v7367_v16 = vpop.eup %7366 }
 0x7ae   :  { %v7369_v44 = vpop.eup %7368  ;;  %v3015_v8 = vxor.u32 2147483648, %v7367_v16 }
 0x7af   :  { %v3012_v3 = vxor.u32 2147483648, %v7369_v44 }
 0x7b0   :  { %v3016_v37 = vsel %vm3014_vm4, %v3015_v8, %v7369_v44 }
 0x7b1   :  { %v3013_v25 = vsel %vm3011_vm5, %v7367_v16, %v3012_v3 }
 0x7b2   :  { %v3017_v47 = vsel %vm3010_vm6, %v3013_v25, %v3016_v37 }
 0x7b3   :  { %v3018_v1 = vsel %vm3008_vm7, nan, %v3017_v47 }
 0x7b4   :  { %7010 = vmatmul.mubr.msk.f32.gmra.mxu1 %vm213_vm2, %v3018_v1  ;;  %v3174_v1 = vld [vmem:[#allocation9 + $0x150] sm:$0xff] }
 0x847   :  { %v7008_v62 = vpop.f32.mrf.mxu1 }
 0x848   :  { %v3114_v54 = vadd.f32 %v7008_v62, %v6708_v43 }
 0x849   :  { %v3108_v56 = vpop.f32.mrf.mxu1 }
 0x84a   :  { %v3109_v42 = vadd.f32 %v6708_v43, %v3108_v56  ;;  %v3141_v61 = vmul.f32 %v3114_v54, %v3114_v54  ;;  %v3128_v32 = vsel %vm213_vm2, %v3114_v54, 0.0 }
 0x84c   :  { %v3140_v19 = vmul.f32 %v3109_v42, %v3109_v42  ;;  %v3127_v22 = vsel %vm213_vm2, %v3109_v42, 0.0  ;;  %v3145_v27 = vsel %vm213_vm2, %v3141_v61, 0.0 }
 0x84d   :  { %v3129_v17 = vadd.f32 %v3128_v32, %v3127_v22 }
 0x84e   :  { %v3144_v24 = vsel %vm213_vm2, %v3140_v19, 0.0  ;;  %v3181_v19 = vld [vmem:[#allocation9 + $0x160] sm:$0xff] }
 0x84f   :  { %v3146_v45 = vadd.f32 %v3145_v27, %v3144_v24 }
 0x874   :  { %v7011_v18 = vpop.f32.mrf.mxu1 }
 0x875   :  { %v3124_v46 = vadd.f32 %v7011_v18, %v6708_v43  ;;  %v3182_v18 = vld [vmem:[#allocation9 + $0x168] sm:$0xff] }
 0x876   :  { %v3118_v4 = vpop.f32.mrf.mxu1 }
 0x877   :  { %v3119_v38 = vadd.f32 %v6708_v43, %v3118_v4  ;;  %v3143_v60 = vmul.f32 %v3124_v46, %v3124_v46  ;;  %v3132_v29 = vsel %vm213_vm2, %v3124_v46, 0.0  ;;  %v3183_v43 = vld [vmem:[#allocation9 + $0x170] sm:$0xff] }
 0x879   :  { %v3130_v51 = vsel %vm213_vm2, %v3119_v38, 0.0  ;;  %v3142_v6 = vmul.f32 %v3119_v38, %v3119_v38  ;;  %v3149_v30 = vsel %vm213_vm2, %v3143_v60, 0.0 }
 0x87a   :  { %v3131_v36 = vadd.f32 %v3130_v51, %v3129_v17 }
 0x87b   :  { %v3147_v5 = vsel %vm213_vm2, %v3142_v6, 0.0 }
 0x87c   :  { %v3133_v14 = vadd.f32 %v3132_v29, %v3131_v36  ;;  %v3148_v34 = vadd.f32 %v3147_v5, %v3146_v45 }
 0x87e   :  { %v3134_v15 = vrot.slane %v3133_v14, 4  ;;  %v3150_v10 = vadd.f32 %v3149_v30, %v3148_v34 }
 0x880   :  { %v3135_v21 = vadd.f32 %v3134_v15, %v3133_v14  ;;  %v3151_v26 = vrot.slane %v3150_v10, 4 }
 0x882   :  { %v3136_v13 = vrot.slane %v3135_v21, 2  ;;  %v3152_v48 = vadd.f32 %v3151_v26, %v3150_v10 }
 0x884   :  { %v3137_v11 = vadd.f32 %v3136_v13, %v3135_v21  ;;  %v3153_v7 = vrot.slane %v3152_v48, 2  ;;  %v3175_v13 = vld [vmem:[#allocation9 + $0x158] sm:$0xff] }
 0x886   :  { %v3138_v40 = vrot.slane %v3137_v11, 1  ;;  %v3154_v41 = vadd.f32 %v3153_v7, %v3152_v48 }
 0x888   :  { %v3139_v39 = vadd.f32 %v3138_v40, %v3137_v11  ;;  %v3155_v31 = vrot.slane %v3154_v41, 1 }
 0x88a   :  { %v3156_v58 = vadd.f32 %v3155_v31, %v3154_v41  ;;  %v3157_v23 = vmul.f32 0.03125, %v3139_v39 }
 0x88c   :  { %v3158_v35 = vmul.f32 0.03125, %v3156_v58  ;;  %v3159_v63 = vmul.f32 %v3157_v23, %v3157_v23  ;;  %v3164_v16 = vsub.f32 %v3124_v46, %v3157_v23  ;;  %v3162_v3 = vsub.f32 %v3114_v54, %v3157_v23 }
 0x88d   :  { %v3163_v37 = vsub.f32 %v3119_v38, %v3157_v23  ;;  %v3161_v25 = vsub.f32 %v3109_v42, %v3157_v23 }
 0x88e   :  { %v3160_v44 = vsub.f32 %v3158_v35, %v3159_v63 }
 0x890   :  { %v3165_v8 = vadd.f32 1e-05, %v3160_v44 }
 0x892   :  { %7370 = vrsqrt.f32 %v3165_v8 }
 0x89f   :  { %v7371_v47 = vpop.eup %7370 }
 0x8a0   :  { %v3169_v12 = vmul.f32 %v7371_v47, %v3163_v37  ;;  %v3167_v20 = vmul.f32 %v7371_v47, %v3161_v25  ;;  %v3168_v62 = vmul.f32 %v7371_v47, %v3162_v3  ;;  %v3170_v56 = vmul.f32 %v7371_v47, %v3164_v16 }
 0x8a2   :  { %v3178_v61 = vmul.f32 %v3174_v1, %v3169_v12  ;;  %v3176_v22 = vmul.f32 %v3172_v52, %v3167_v20  ;;  %v3177_v46 = vmul.f32 %v3173_v33, %v3168_v62  ;;  %v9289_v58 = vmul.f32 %v3175_v13, %v3170_v56 }
 0x8a4   :  { %v9263_v4 = vadd.f32 %v3183_v43, %v3178_v61  ;;  %v9265_v32 = vadd.f32 %v3181_v19, %v3176_v22  ;;  %v9267_v54 = vadd.f32 %v3182_v18, %v3177_v46 }
 0x8a6   :  { %v3398_v42 = vand.u32 2139095040, %v9263_v4  ;;  %v3189_v24 = vand.u32 2147483647, %v9265_v32  ;;  %v3192_v38 = vand.u32 2139095040, %v9265_v32  ;;  %v3292_v17 = vand.u32 2147483647, %v9267_v54 }
 0x8a7   :  { %v3295_v27 = vand.u32 2139095040, %v9267_v54  ;;  %v3395_v26 = vand.u32 2147483647, %v9263_v4 }
 0x8a8   :  { %v3399_v60 = vshrl.u32 %v3398_v42, 23  ;;  %v3193_v51 = vshrl.u32 %v3192_v38, 23  ;;  %v3196_v6 = vand.u32 8388607, %v3189_v24  ;;  %v3299_v36 = vand.u32 8388607, %v3292_v17 }
 0x8a9   :  { %v3296_v45 = vshrl.u32 %v3295_v27, 23  ;;  %v9287_v31 = vand.u32 8388607, %v3395_v26 }
 0x8aa   :  { %v6721_v29 = vadd.s32 4294967169, %v3399_v60  ;;  %v6713_v5 = vadd.s32 4294967169, %v3193_v51  ;;  %v3197_v15 = vor.u32 8388608, %v3196_v6  ;;  %v3300_v10 = vor.u32 8388608, %v3299_v36 }
 0x8ab   :  { %v6717_v14 = vadd.s32 4294967169, %v3296_v45 }
 0x8ac   :  { %v3405_v34 = vadd.s32 1, %v6721_v29  ;;  %v3199_v30 = vadd.s32 1, %v6713_v5  ;;  %v9281_v41 = vshll.u32 %v3197_v15, 8  ;;  %v9283_v39 = vshll.u32 %v3300_v10, 8 }
 0x8ad   :  { %v3302_v21 = vadd.s32 1, %v6717_v14 }
 0x8ae   :  { %vm3406_vm8 = vcmp.gt.s32.totalorder %v3405_v34, 0  ;;  %vm3200_vm9 = vcmp.gt.s32.totalorder %v3199_v30, 0 }
 0x8af   :  { %v9279_v48 = vsel %vm3406_vm8, %v3405_v34, 0  ;;  %v3201_v11 = vsel %vm3200_vm9, %v3199_v30, 0  ;;  %vm3303_vm10 = vcmp.gt.s32.totalorder %v3302_v21, 0 }
 0x8b0   :  { %v3202_v7 = vshrl.u32 %v3201_v11, 5  ;;  %v3203_v40 = vand.u32 31, %v3201_v11  ;;  %v9292_v23 = vand.u32 31, %v9279_v48  ;;  %v3304_v16 = vsel %vm3303_vm10, %v3302_v21, 0 }
 0x8b1   :  { %v3306_v18 = vand.u32 31, %v3304_v16  ;;  %v3305_v34 = vshrl.u32 %v3304_v16, 5 }
 0x8b2   :  { %v3204_v35 = vsub.s32 32, %v3203_v40  ;;  %v3206_v63 = vshll.u32 %v7613_v50, %v3203_v40  ;;  %v3209_v44 = vshll.u32 %v7614_v53, %v3203_v40  ;;  %v3212_v8 = vshll.u32 %v7615_v55, %v3203_v40 }
 0x8b3   :  { %v3215_v3 = vshll.u32 %v7616_v57, %v3203_v40  ;;  %v3218_v37 = vshll.u32 %v7617_v59, %v3203_v40  ;;  %vm3221_vm11 = vcmp.lt.s32.totalorder %v3202_v7, 1  ;;  %vm3222_vm12 = vcmp.lt.s32.totalorder %v3202_v7, 2 }
 0x8b4   :  { %v3207_v25 = vshrl.u32 %v7614_v53, %v3204_v35  ;;  %v3210_v47 = vshrl.u32 %v7615_v55, %v3204_v35  ;;  %v3213_v1 = vshrl.u32 %v7616_v57, %v3204_v35  ;;  %v3205_v52 = vshrl.u32 %v7613_v50, %v3204_v35 }
 0x8b5   :  { %v3216_v33 = vshrl.u32 %v7617_v59, %v3204_v35  ;;  %v3219_v12 = vshrl.u32 %v7618_v2, %v3204_v35  ;;  %vm3223_vm13 = vcmp.lt.s32.totalorder %v3202_v7, 3  ;;  %vm3224_vm14 = vcmp.lt.s32.totalorder %v3202_v7, 4 }
 0x8b6   :  { %v3208_v20 = vor.u32 %v3207_v25, %v3206_v63  ;;  %v3211_v62 = vor.u32 %v3210_v47, %v3209_v44  ;;  %v3214_v56 = vor.u32 %v3213_v1, %v3212_v8  ;;  %v3307_v51 = vsub.s32 32, %v3306_v18 }
 0x8b7   :  { %v3217_v43 = vor.u32 %v3216_v33, %v3215_v3  ;;  %v3220_v19 = vor.u32 %v3219_v12, %v3218_v37  ;;  %v9310_v6 = vsub.s32 32, %v9292_v23  ;;  %v3309_v30 = vshll.u32 %v7613_v50, %v3306_v18 }
 0x8b8   :  { %v3225_v61 = vsel %vm3221_vm11, %v3205_v52, %v3208_v20  ;;  %v3226_v22 = vsel %vm3224_vm14, %v3214_v56, 2102212464  ;;  %v3229_v46 = vsel %vm3221_vm11, %v3208_v20, %v3211_v62  ;;  %v3233_v42 = vsel %vm3221_vm11, %v3211_v62, %v3214_v56 }
 0x8b9   :  { %v3227_v38 = vsel %vm3223_vm13, %v3211_v62, %v3226_v22  ;;  %v3230_v27 = vsel %vm3224_vm14, %v3217_v43, 920167782  ;;  %v3234_v60 = vsel %vm3224_vm14, %v3220_v19, 1326507024  ;;  %v3310_v40 = vshrl.u32 %v7614_v53, %v3307_v51 }
 0x8ba   :  { %v3228_v45 = vsel %vm3222_vm12, %v3225_v61, %v3227_v38  ;;  %v3231_v36 = vsel %vm3223_vm13, %v3214_v56, %v3230_v27  ;;  %v3235_v29 = vsel %vm3223_vm13, %v3217_v43, %v3234_v60  ;;  %v3312_v35 = vshll.u32 %v7614_v53, %v3306_v18 }
 0x8bb   :  { %v3232_v5 = vsel %vm3222_vm12, %v3229_v46, %v3231_v36  ;;  %v3236_v14 = vsel %vm3222_vm12, %v3233_v42, %v3235_v29  ;;  %v3244_v11 = vmul.u32 %v9281_v41, %v3228_v45  ;;  %v3313_v7 = vshrl.u32 %v7615_v55, %v3307_v51 }
 0x8bc   :  { %v9319_v15 = vmul.u32.u64.low %v9281_v41, %v3236_v14  ;;  %v9320_v10 = vmul.u32.u64.high %v9281_v41, %v3236_v14, %v9319_v15  ;;  %v9323_v21 = vmul.u32.u64.low %v9281_v41, %v3232_v5  ;;  %v9324_v13 = vmul.u32.u64.high %v9281_v41, %v3232_v5, %v9323_v21 }
 0x8bd   :  { %v3315_v63 = vshll.u32 %v7615_v55, %v3306_v18  ;;  %v3316_v16 = vshrl.u32 %v7616_v57, %v3307_v51  ;;  %v3318_v44 = vshll.u32 %v7616_v57, %v3306_v18  ;;  %v3319_v8 = vshrl.u32 %v7617_v59, %v3307_v51 }
 0x8be   :  { %v3311_v3 = vor.u32 %v3310_v40, %v3309_v30  ;;  %v3314_v37 = vor.u32 %v3313_v7, %v3312_v35  ;;  %v3321_v25 = vshll.u32 %v7617_v59, %v3306_v18  ;;  %v3322_v41 = vshrl.u32 %v7618_v2, %v3307_v51 }
 0x8bf   :  { %vm3246_vm15 = vc.u32 %v9320_v10, %v9323_v21  ;;  %v3247_v47 = vadd.s32 1, %v9324_v13  ;;  %v3308_v1 = vshrl.u32 %v7613_v50, %v3307_v51  ;;  %v3317_v52 = vor.u32 %v3316_v16, %v3315_v63  ;;  %v3184_v51 = vld [vmem:[#allocation9 + $0x178] sm:$0xff] }
 0x8c0   :  { %v3320_v33 = vor.u32 %v3319_v8, %v3318_v44  ;;  %v3323_v12 = vor.u32 %v3322_v41, %v3321_v25  ;;  %vm3324_vm0 = vcmp.lt.s32.totalorder %v3305_v34, 1  ;;  %vm3326_vm1 = vcmp.lt.s32.totalorder %v3305_v34, 3 }
 0x8c1   :  { %v3248_v20 = vsel %vm3246_vm15, %v3247_v47, %v9324_v13  ;;  %vm3327_vm3 = vcmp.lt.s32.totalorder %v3305_v34, 4  ;;  %v3328_v62 = vsel %vm3324_vm0, %v3308_v1, %v3311_v3  ;;  %v3332_v56 = vsel %vm3324_vm0, %v3311_v3, %v3314_v37 }
 0x8c2   :  { %v3249_v43 = vadd.s32 %v3248_v20, %v3244_v11  ;;  %v3329_v19 = vsel %vm3327_vm3, %v3317_v52, 2102212464  ;;  %v3333_v18 = vsel %vm3327_vm3, %v3320_v33, 920167782  ;;  %v3336_v61 = vsel %vm3324_vm0, %v3314_v37, %v3317_v52 }
 0x8c3   :  { %vm3325_vm4 = vcmp.lt.s32.totalorder %v3305_v34, 2  ;;  %v3330_v22 = vsel %vm3326_vm1, %v3314_v37, %v3329_v19  ;;  %v3334_v46 = vsel %vm3326_vm1, %v3317_v52, %v3333_v18  ;;  %v3337_v42 = vsel %vm3327_vm3, %v3323_v12, 1326507024 }
 0x8c4   :  { %v3250_v38 = vadd.s32 536870912, %v3249_v43  ;;  %v3335_v27 = vsel %vm3325_vm4, %v3332_v56, %v3334_v46  ;;  %v3338_v60 = vsel %vm3326_vm1, %v3320_v33, %v3337_v42  ;;  %v3331_v45 = vsel %vm3325_vm4, %v3328_v62, %v3330_v22 }
 0x8c5   :  { %v3339_v36 = vsel %vm3325_vm4, %v3336_v61, %v3338_v60  ;;  %v9343_v29 = vmul.u32.u64.low %v9283_v39, %v3335_v27  ;;  %v9344_v5 = vmul.u32.u64.high %v9283_v39, %v3335_v27, %v9343_v29  ;;  %v3403_v34 = vor.u32 8388608, %v9287_v31 }
 0x8c6   :  { %v9347_v14 = vshrl.u32 %v3250_v38, 30  ;;  %v9350_v30 = vmul.u32.u64.low %v9283_v39, %v3339_v36  ;;  %v9351_v15 = vmul.u32.u64.high %v9283_v39, %v3339_v36, %v9350_v30  ;;  %v3413_v13 = vshrl.u32 %v7614_v53, %v9310_v6 }
 0x8c7   :  { %v3416_v11 = vshrl.u32 %v7615_v55, %v9310_v6  ;;  %v9359_v40 = vadd.f32 %v3184_v51, %v9289_v58  ;;  %v3408_v35 = vshrl.u32 %v9279_v48, 5  ;;  %v3347_v63 = vmul.u32 %v9283_v39, %v3331_v45 }
 0x8c8   :  { %v3252_v7 = vshll.u32 %v9347_v14, 30  ;;  %v3419_v16 = vshrl.u32 %v7616_v57, %v9310_v6  ;;  %v3350_v31 = vadd.s32 1, %v9344_v5  ;;  %v3412_v44 = vshll.u32 %v7613_v50, %v9292_v23 }
 0x8c9   :  { %v3415_v8 = vshll.u32 %v7614_v53, %v9292_v23  ;;  %v3422_v58 = vshrl.u32 %v7617_v59, %v9310_v6  ;;  %vm3349_vm5 = vc.u32 %v9351_v15, %v9343_v29  ;;  %v3418_v48 = vshll.u32 %v7615_v55, %v9292_v23 }
 0x8ca   :  { %v3253_v3 = vsub.s32 %v3249_v43, %v3252_v7  ;;  %v3421_v39 = vshll.u32 %v7616_v57, %v9292_v23  ;;  %v3351_v37 = vsel %vm3349_vm5, %v3350_v31, %v9344_v5  ;;  %v3414_v25 = vor.u32 %v3413_v13, %v3412_v44 }
 0x8cb   :  { %v3417_v41 = vor.u32 %v3416_v11, %v3415_v8  ;;  %v3352_v1 = vadd.s32 %v3351_v37, %v3347_v63  ;;  %v3420_v52 = vor.u32 %v3419_v16, %v3418_v48  ;;  %v3424_v12 = vshll.u32 %v7617_v59, %v9292_v23 }
 0x8cc   :  { %v3255_v47 = vsub.s32 0, %v3253_v3  ;;  %v3423_v33 = vor.u32 %v3422_v58, %v3421_v39  ;;  %v3425_v20 = vshrl.u32 %v7618_v2, %v9310_v6  ;;  %v3501_v62 = vand.u32 2139095040, %v9359_v40 }
 0x8cd   :  { %v3411_v43 = vshrl.u32 %v7613_v50, %v9310_v6  ;;  %vm3427_vm6 = vcmp.lt.s32.totalorder %v3408_v35, 1  ;;  %v3443_v19 = vshll.u32 %v3403_v34, 8  ;;  %v3353_v18 = vadd.s32 536870912, %v3352_v1 }
 0x8ce   :  { %v6714_v56 = vmin.u32 %v3255_v47, %v3253_v3  ;;  %v3426_v61 = vor.u32 %v3425_v20, %v3424_v12  ;;  %vm3429_vm7 = vcmp.lt.s32.totalorder %v3408_v35, 3  ;;  %vm3430_vm8 = vcmp.lt.s32.totalorder %v3408_v35, 4 }
 0x8cf   :  { %v3432_v46 = vsel %vm3430_vm8, %v3420_v52, 2102212464  ;;  %v3435_v42 = vsel %vm3427_vm6, %v3414_v25, %v3417_v41  ;;  %v3436_v23 = vsel %vm3430_vm8, %v3423_v33, 920167782  ;;  %v9388_v38 = vshrl.u32 %v3353_v18, 30 }
 0x8d0   :  { %v3257_v22 = vclz %v6714_v56  ;;  %vm3428_vm9 = vcmp.lt.s32.totalorder %v3408_v35, 2  ;;  %v3437_v27 = vsel %vm3429_vm7, %v3420_v52, %v3436_v23  ;;  %v3439_v60 = vsel %vm3427_vm6, %v3417_v41, %v3420_v52 }
 0x8d1   :  { %v3438_v6 = vsel %vm3428_vm9, %v3435_v42, %v3437_v27  ;;  %v3440_v45 = vsel %vm3430_vm8, %v3426_v61, 1326507024  ;;  %v3502_v36 = vshrl.u32 %v3501_v62, 23  ;;  %v3355_v5 = vshll.u32 %v9388_v38, 30 }
 0x8d2   :  { %v6715_v51 = vadd.s32 4294967294, %v3257_v22  ;;  %v3431_v30 = vsel %vm3427_vm6, %v3411_v43, %v3414_v25  ;;  %v3433_v34 = vsel %vm3429_vm7, %v3417_v41, %v3432_v46  ;;  %v3441_v13 = vsel %vm3429_vm7, %v3423_v33, %v3440_v45 }
 0x8d3   :  { %v3442_v11 = vsel %vm3428_vm9, %v3439_v60, %v3441_v13  ;;  %v9398_v7 = vmul.u32.u64.low %v3443_v19, %v3438_v6  ;;  %v9399_v63 = vmul.u32.u64.high %v3443_v19, %v3438_v6, %v9398_v7  ;;  %v3245_v16 = vadd.s32 %v9323_v21, %v9320_v10 }
 0x8d4   :  { %vm6716_vm10 = vcmp.lt.s32.totalorder %v6715_v51, 0  ;;  %v3356_v44 = vsub.s32 %v3352_v1, %v3355_v5  ;;  %v3275_v48 = vsub.s32 4, %v9347_v14  ;;  %v6725_v39 = vadd.s32 4294967169, %v3502_v36 }
 0x8d5   :  { %v3260_v31 = vsel %vm6716_vm10, 0, %v6715_v51  ;;  %v3434_v25 = vsel %vm3428_vm9, %v3431_v30, %v3433_v34  ;;  %v9406_v41 = vmul.u32.u64.low %v3443_v19, %v3442_v11  ;;  %v9407_v47 = vmul.u32.u64.high %v3443_v19, %v3442_v11, %v9406_v41 }
 0x8d6   :  { %v3261_v8 = vsub.s32 32, %v3260_v31  ;;  %v3265_v58 = vsub.s32 4294967266, %v3260_v31  ;;  %v3358_v37 = vsub.s32 0, %v3356_v44  ;;  %v3262_v52 = vshll.u32 %v3253_v3, %v3260_v31 }
 0x8d7   :  { %v3453_v20 = vadd.s32 1, %v9399_v63  ;;  %vm3191_vm11 = vcmp.lt.s32.totalorder %v9265_v32, 0  ;;  %v3508_v1 = vadd.s32 1, %v6725_v39  ;;  %v3450_v43 = vmul.u32 %v3443_v19, %v3434_v25 }
 0x8d8   :  { %v3263_v33 = vshrl.u32 %v3245_v16, %v3261_v8  ;;  %v3266_v12 = vadd.s32 127, %v3265_v58  ;;  %v6718_v62 = vmin.u32 %v3358_v37, %v3356_v44  ;;  %vm3452_vm12 = vc.u32 %v9407_v47, %v9398_v7 }
 0x8d9   :  { %v3498_v35 = vand.u32 2147483647, %v9359_v40  ;;  %v3276_v3 = vsel %vm3191_vm11, %v3275_v48, %v9347_v14  ;;  %v3454_v61 = vsel %vm3452_vm12, %v3453_v20, %v9399_v63  ;;  %vm3509_vm13 = vcmp.gt.s32.totalorder %v3508_v1, 0 }
 0x8da   :  { %v3264_v10 = vor.u32 %v3263_v33, %v3262_v52  ;;  %v3267_v21 = vshll.u32 %v3266_v12, 23  ;;  %v3360_v56 = vclz %v6718_v62  ;;  %v3455_v46 = vadd.s32 %v3454_v61, %v3450_v43 }
 0x8db   :  { %v3510_v42 = vsel %vm3509_vm13, %v3508_v1, 0  ;;  %vm9420_vm14 = vcmp.le.f32.partialorder %v3189_v24, 0.7853982  ;;  %v3505_v36 = vand.u32 8388607, %v3498_v35  ;;  %v3348_v24 = vadd.s32 %v9343_v29, %v9351_v15 }
 0x8dc   :  { %v3268_v18 = vor.u32 4788187, %v3267_v21  ;;  %v6719_v22 = vadd.s32 4294967294, %v3360_v56  ;;  %v3271_v27 = vcvt.s32.f32 %v3264_v10  ;;  %v3512_v60 = vand.u32 31, %v3510_v42 }
 0x8dd   :  { %v3278_v51 = vsel %vm9420_vm14, 0, %v3276_v3  ;;  %v3456_v14 = vadd.s32 536870912, %v3455_v46  ;;  %v3378_v16 = vsub.s32 4, %v9388_v38  ;;  %v3506_v37 = vor.u32 8388608, %v3505_v36 }
 0x8de   :  { %v3269_v23 = vand.u32 2147483647, %v3268_v18  ;;  %vm6720_vm15 = vcmp.lt.s32.totalorder %v6719_v22, 0  ;;  %v3513_v5 = vsub.s32 32, %v3512_v60  ;;  %v9432_v63 = vand.u32 3, %v3278_v51 }
 0x8df   :  { %v3363_v45 = vsel %vm6720_vm15, 0, %v6719_v22  ;;  %v9430_v13 = vshrl.u32 %v3456_v14, 30  ;;  %vm3294_vm0 = vcmp.lt.s32.totalorder %v9267_v54, 0  ;;  %v3515_v12 = vshll.u32 %v7613_v50, %v3512_v60 }
 0x8e0   :  { %v3272_v6 = vmul.f32 %v3271_v27, %v3269_v23  ;;  %v3364_v30 = vsub.s32 32, %v3363_v45  ;;  %v3368_v34 = vsub.s32 4294967266, %v3363_v45  ;;  %v3365_v31 = vshll.u32 %v3356_v44, %v3363_v45 }
 0x8e1   :  { %v3458_v48 = vshll.u32 %v9430_v13, 30  ;;  %v3516_v29 = vshrl.u32 %v7614_v53, %v3513_v5  ;;  %v3519_v15 = vshrl.u32 %v7615_v55, %v3513_v5  ;;  %v9446_v44 = vshrl.u32 %v3510_v42, 5 }
 0x8e2   :  { %v3273_v11 = vxor.u32 2147483648, %v3272_v6  ;;  %v3366_v8 = vshrl.u32 %v3348_v24, %v3364_v30  ;;  %v3369_v58 = vadd.s32 127, %v3368_v34  ;;  %v3522_v20 = vshrl.u32 %v7616_v57, %v3513_v5 }
 0x8e3   :  { %v9443_v33 = vsub.s32 %v3455_v46, %v3458_v48  ;;  %vm9452_vm1 = vcmp.le.f32.partialorder %v3292_v17, 0.7853982  ;;  %v3518_v1 = vshll.u32 %v7614_v53, %v3512_v60  ;;  %v3517_v56 = vor.u32 %v3516_v29, %v3515_v12 }
 0x8e4   :  { %v3274_v39 = vsel %vm3191_vm11, %v3273_v11, %v3272_v6  ;;  %v3367_v41 = vor.u32 %v3366_v8, %v3365_v31  ;;  %v3370_v52 = vshll.u32 %v3369_v58, 23  ;;  %v3521_v43 = vshll.u32 %v7615_v55, %v3512_v60 }
 0x8e5   :  { %v3277_v25 = vsel %vm9420_vm14, %v9265_v32, %v3274_v39  ;;  %v3461_v21 = vsub.s32 0, %v9443_v33  ;;  %v3524_v18 = vshll.u32 %v7616_v57, %v3512_v60  ;;  %v3525_v3 = vshrl.u32 %v7617_v59, %v3513_v5 }
 0x8e6   :  { %7372 = vcosq.f32 %v3277_v25  ;;  %v3371_v10 = vor.u32 4788187, %v3370_v52  ;;  %v3374_v22 = vcvt.s32.f32 %v3367_v41  ;;  %v3520_v17 = vor.u32 %v3519_v15, %v3518_v1 }
 0x8e7   :  { %7374 = vsinq.f32 %v3277_v25  ;;  %v6722_v46 = vmin.u32 %v3461_v21, %v9443_v33  ;;  %v3523_v42 = vor.u32 %v3522_v20, %v3521_v43  ;;  %v3526_v19 = vor.u32 %v3525_v3, %v3524_v18 }
 0x8e8   :  { %v3372_v61 = vand.u32 2147483647, %v3371_v10  ;;  %v3527_v23 = vshll.u32 %v7617_v59, %v3512_v60  ;;  %v3528_v27 = vshrl.u32 %v7618_v2, %v3513_v5  ;;  %v3451_v14 = vadd.s32 %v9398_v7, %v9407_v47 }
 0x8e9   :  { %v3463_v6 = vclz %v6722_v46  ;;  %v3546_v45 = vshll.u32 %v3506_v37, 8  ;;  %v3514_v36 = vshrl.u32 %v7613_v50, %v3513_v5  ;;  %vm3530_vm3 = vcmp.lt.s32.totalorder %v9446_v44, 1 }
 0x8ea   :  { %v3375_v51 = vmul.f32 %v3374_v22, %v3372_v61  ;;  %v3529_v24 = vor.u32 %v3528_v27, %v3527_v23  ;;  %vm3531_vm4 = vcmp.lt.s32.totalorder %v9446_v44, 2  ;;  %vm3287_vm5 = vcmp.eq.s32.totalorder %v9432_v63, 2 }
 0x8eb   :  { %v6723_v34 = vadd.s32 4294967294, %v3463_v6  ;;  %vm3532_vm6 = vcmp.lt.s32.totalorder %v9446_v44, 3  ;;  %vm3533_vm7 = vcmp.lt.s32.totalorder %v9446_v44, 4  ;;  %v3534_v60 = vsel %vm3530_vm3, %v3514_v36, %v3517_v56 }
 0x8ec   :  { %v3376_v30 = vxor.u32 2147483648, %v3375_v51  ;;  %v3535_v11 = vsel %vm3533_vm7, %v3523_v42, 2102212464  ;;  %v3538_v7 = vsel %vm3530_vm3, %v3517_v56, %v3520_v17  ;;  %v3539_v47 = vsel %vm3533_vm7, %v3526_v19, 920167782 }
 0x8ed   :  { %vm6724_vm8 = vcmp.lt.s32.totalorder %v6723_v34, 0  ;;  %v3540_v31 = vsel %vm3532_vm6, %v3523_v42, %v3539_v47  ;;  %v3542_v8 = vsel %vm3530_vm3, %v3520_v17, %v3523_v42  ;;  %v3543_v37 = vsel %vm3533_vm7, %v3529_v24, 1326507024 }
 0x8ee   :  { %v3377_v5 = vsel %vm3294_vm0, %v3376_v30, %v3375_v51  ;;  %v3466_v48 = vsel %vm6724_vm8, 0, %v6723_v34  ;;  %v3541_v39 = vsel %vm3531_vm4, %v3538_v7, %v3540_v31  ;;  %v3536_v25 = vsel %vm3532_vm6, %v3520_v17, %v3535_v11 }
 0x8ef   :  { %v3380_v58 = vsel %vm9452_vm1, %v9267_v54, %v3377_v5  ;;  %v3467_v29 = vsub.s32 32, %v3466_v48  ;;  %v3471_v15 = vsub.s32 4294967266, %v3466_v48  ;;  %v3544_v41 = vsel %vm3532_vm6, %v3526_v19, %v3543_v37 }
 0x8f0   :  { %7376 = vcosq.f32 %v3380_v58  ;;  %v9485_v52 = vmul.u32.u64.low %v3546_v45, %v3541_v39  ;;  %v9486_v12 = vmul.u32.u64.high %v3546_v45, %v3541_v39, %v9485_v52  ;;  %v3468_v10 = vshll.u32 %v9443_v33, %v3466_v48 }
 0x8f1   :  { %7378 = vsinq.f32 %v3380_v58  ;;  %v3469_v21 = vshrl.u32 %v3451_v14, %v3467_v29  ;;  %v3472_v1 = vadd.s32 127, %v3471_v15  ;;  %v3545_v56 = vsel %vm3531_vm4, %v3542_v8, %v3544_v41 }
 0x8f2   :  { %v3379_v3 = vsel %vm3294_vm0, %v3378_v16, %v9388_v38  ;;  %v9497_v61 = vmul.u32.u64.low %v3546_v45, %v3545_v56  ;;  %v9498_v22 = vmul.u32.u64.high %v3546_v45, %v3545_v56, %v9497_v61  ;;  %v3537_v33 = vsel %vm3531_vm4, %v3534_v60, %v3536_v25 }
 0x8f3   :  { %v7373_v20 = vpop.eup %7372  ;;  %v3470_v17 = vor.u32 %v3469_v21, %v3468_v10  ;;  %v3473_v42 = vshll.u32 %v3472_v1, 23  ;;  %vm3284_vm9 = vcmp.eq.s32.totalorder %v9432_v63, 0  ;;  %v3556_v23 = vadd.s32 1, %v9486_v12 }
 0x8f4   :  { %v7375_v43 = vpop.eup %7374  ;;  %v3288_v18 = vxor.u32 2147483648, %v7373_v20  ;;  %vm3281_vm10 = vweird.f32 %v9265_v32  ;;  %vm3283_vm11 = vcmp.lt.s32.totalorder %v9432_v63, 2  ;;  %v3381_v51 = vsel %vm9452_vm1, 0, %v3379_v3 }
 0x8f5   :  { %v3285_v46 = vxor.u32 2147483648, %v7375_v43  ;;  %v3474_v16 = vor.u32 4788187, %v3473_v42  ;;  %v3553_v14 = vmul.u32 %v3546_v45, %v3537_v33  ;;  %vm3555_vm12 = vc.u32 %v9498_v22, %v9485_v52 }
 0x8f6   :  { %v3289_v19 = vsel %vm3287_vm5, %v3288_v18, %v7375_v43  ;;  %v3477_v36 = vcvt.s32.f32 %v3470_v17  ;;  %v3557_v24 = vsel %vm3555_vm12, %v3556_v23, %v9486_v12  ;;  %v3385_v63 = vand.u32 3, %v3381_v51 }
 0x8f7   :  { %v3286_v38 = vsel %vm3284_vm9, %v7373_v20, %v3285_v46  ;;  %v3475_v6 = vand.u32 2147483647, %v3474_v16  ;;  %v3558_v32 = vadd.s32 %v3557_v24, %v3553_v14  ;;  %vm3397_vm13 = vcmp.lt.s32.totalorder %v9263_v4, 0 }
 0x8f8   :  { %v3290_v27 = vsel %vm3283_vm11, %v3286_v38, %v3289_v19  ;;  %vm9519_vm14 = vcmp.le.f32.partialorder %v3395_v26, 0.7853982  ;;  %vm3390_vm15 = vcmp.eq.s32.totalorder %v3385_v63, 2  ;;  %vm3387_vm0 = vcmp.eq.s32.totalorder %v3385_v63, 0 }
 0x8f9   :  { %v3291_v44 = vsel %vm3281_vm10, nan, %v3290_v27  ;;  %v3478_v30 = vmul.f32 %v3477_v36, %v3475_v6  ;;  %v3559_v34 = vadd.s32 536870912, %v3558_v32  ;;  %v3481_v39 = vsub.s32 4, %v9430_v13 }
 0x8fa   :  { %7020 = vmatprep.mubr.msk.f32.mxu0 %vm213_vm2, %v3291_v44  ;;  %vm3386_vm1 = vcmp.lt.s32.totalorder %v3385_v63, 2  ;;  %vm3384_vm3 = vweird.f32 %v9267_v54  ;;  %v3554_v54 = vadd.s32 %v9485_v52, %v9498_v22  ;;  %vm3487_vm8 = vweird.f32 %v9263_v4 }
 0x8fb   :  { %v3479_v60 = vxor.u32 2147483648, %v3478_v30  ;;  %v9515_v62 = vshrl.u32 %v3559_v34, 30  ;;  %v3482_v41 = vsel %vm3397_vm13, %v3481_v39, %v9430_v13  ;;  %vm3500_vm9 = vcmp.lt.s32.totalorder %v9359_v40, 0 }
 0x8fc   :  { %v3484_v20 = vsel %vm9519_vm14, 0, %v3482_v41  ;;  %vm3499_vm10 = vcmp.le.f32.partialorder %v3498_v35, 0.7853982 }
 0x8fd   :  { %v7377_v11 = vpop.eup %7376  ;;  %v3480_v5 = vsel %vm3397_vm13, %v3479_v60, %v3478_v30  ;;  %v3561_v58 = vshll.u32 %v9515_v62, 30  ;;  %v3488_v1 = vand.u32 3, %v3484_v20 }
 0x8fe   :  { %v7379_v45 = vpop.eup %7378  ;;  %v3391_v7 = vxor.u32 2147483648, %v7377_v11  ;;  %v3483_v8 = vsel %vm9519_vm14, %v9263_v4, %v3480_v5  ;;  %v3584_v4 = vsub.s32 4, %v9515_v62  ;;  %vm3590_vm14 = vweird.f32 %v9359_v40 }
 0x8ff   :  { %v3388_v31 = vxor.u32 2147483648, %v7379_v45  ;;  %7380 = vcosq.f32 %v3483_v8  ;;  %v3562_v37 = vsub.s32 %v3558_v32, %v3561_v58  ;;  %vm3493_vm5 = vcmp.eq.s32.totalorder %v3488_v1, 2  ;;  %v4187_v58 = vld [vmem:[#allocation11 + $0xc0] sm:$0xff] }
 0x900   :  { %v3392_v48 = vsel %vm3390_vm15, %v3391_v7, %v7379_v45  ;;  %7382 = vsinq.f32 %v3483_v8  ;;  %vm3490_vm6 = vcmp.eq.s32.totalorder %v3488_v1, 0  ;;  %vm3489_vm7 = vcmp.lt.s32.totalorder %v3488_v1, 2  ;;  %v4189_v8 = vld [vmem:[#allocation11 + $0xd0] sm:$0xff] }
 0x901   :  { %v3389_v26 = vsel %vm3387_vm0, %v7377_v11, %v3388_v31  ;;  %v3564_v25 = vsub.s32 0, %v3562_v37  ;;  %v3585_v32 = vsel %vm3500_vm9, %v3584_v4, %v9515_v62  ;;  %v4190_v31 = vld [vmem:[#allocation11 + $0xd8] sm:$0xff]  ;;  %v4188_v62 = vld [vmem:[#allocation11 + $0xc8] sm:$0xff] }
 0x902   :  { %v3393_v29 = vsel %vm3386_vm1, %v3389_v26, %v3392_v48  ;;  %v3587_v30 = vsel %vm3499_vm10, 0, %v3585_v32  ;;  %7026 = vmatprep.subr.mxu1 %v4190_v31 }
 0x903   :  { %v3394_v15 = vsel %vm3384_vm3, nan, %v3393_v29  ;;  %v6726_v12 = vmin.u32 %v3564_v25, %v3562_v37  ;;  %v3591_v63 = vand.u32 3, %v3587_v30  ;;  %7027 = vmatpush3.msra.mxu1 %v4190_v31  ;;  %v3757_v31 = vld [vmem:[#allocation9 + $0x180] sm:$0xff] }
 0x904   :  { %7021 = vmatmul.mubr.msk.f32.vlgmr.msra.gmra.mxu0 %vm213_vm2, %v3394_v15  ;;  %7028 = vmatprep.subr.mxu1 %v4189_v8 }
 0x905   :  { %v3566_v10 = vclz %v6726_v12  ;;  %vm3596_vm11 = vcmp.eq.s32.totalorder %v3591_v63, 2  ;;  %vm3593_vm12 = vcmp.eq.s32.totalorder %v3591_v63, 0  ;;  %vm3592_vm13 = vcmp.lt.s32.totalorder %v3591_v63, 2  ;;  %7029 = vmatpush3.msra.mxu1 %v4189_v8  ;;  %v3758_v8 = vld [vmem:[#allocation9 + $0x188] sm:$0xff] }
 0x906   :  { %7030 = vmatprep.subr.mxu1 %v4188_v62 }
 0x907   :  { %v6727_v21 = vadd.s32 4294967294, %v3566_v10  ;;  %7031 = vmatpush3.msra.mxu1 %v4188_v62 }
 0x908   :  { %7032 = vmatprep.subr.mxu1 %v4187_v58 }
 0x909   :  { %vm6728_vm4 = vcmp.lt.s32.totalorder %v6727_v21, 0  ;;  %7033 = vmatpush3.msra.mxu1 %v4187_v58 }
 0x90a   :  { %v3569_v56 = vsel %vm6728_vm4, 0, %v6727_v21 }
 0x90b   :  { %v3570_v18 = vsub.s32 32, %v3569_v56  ;;  %v3574_v3 = vsub.s32 4294967266, %v3569_v56  ;;  %v3571_v13 = vshll.u32 %v3562_v37, %v3569_v56 }
 0x90c   :  { %v7381_v43 = vpop.eup %7380 }
 0x90d   :  { %v7383_v61 = vpop.eup %7382  ;;  %v3494_v46 = vxor.u32 2147483648, %v7381_v43  ;;  %v3572_v42 = vshrl.u32 %v3554_v54, %v3570_v18  ;;  %v3575_v33 = vadd.s32 127, %v3574_v3 }
 0x90e   :  { %v3491_v17 = vxor.u32 2147483648, %v7383_v61 }
 0x90f   :  { %v3495_v19 = vsel %vm3493_vm5, %v3494_v46, %v7383_v61  ;;  %v3573_v38 = vor.u32 %v3572_v42, %v3571_v13  ;;  %v3576_v16 = vshll.u32 %v3575_v33, 23 }
 0x910   :  { %v3492_v23 = vsel %vm3490_vm6, %v7381_v43, %v3491_v17 }
 0x911   :  { %v3496_v27 = vsel %vm3489_vm7, %v3492_v23, %v3495_v19  ;;  %v3577_v52 = vor.u32 4788187, %v3576_v16  ;;  %v3580_v14 = vcvt.s32.f32 %v3573_v38 }
 0x912   :  { %v3497_v51 = vsel %vm3487_vm8, nan, %v3496_v27 }
 0x913   :  { %7023 = vmatprep.mubr.msk.f32.mxu0 %vm213_vm2, %v3497_v51  ;;  %v3578_v22 = vand.u32 2147483647, %v3577_v52 }
 0x915   :  { %v3581_v44 = vmul.f32 %v3580_v14, %v3578_v22 }
 0x917   :  { %v3582_v6 = vxor.u32 2147483648, %v3581_v44 }
 0x919   :  { %v3583_v36 = vsel %vm3500_vm9, %v3582_v6, %v3581_v44 }
 0x91a   :  { %v3586_v24 = vsel %vm3499_vm10, %v9359_v40, %v3583_v36  ;;  %v6730_v40 = vld [vmem:[%s11107_s5 + $0x5] ss:$0 sm:$0xff] }
 0x91b   :  { %7384 = vcosq.f32 %v3586_v24 }
 0x91c   :  { %7386 = vsinq.f32 %v3586_v24 }
 0x928   :  { %v7385_v34 = vpop.eup %7384 }
 0x929   :  { %v7387_v60 = vpop.eup %7386  ;;  %v3597_v11 = vxor.u32 2147483648, %v7385_v34 }
 0x92a   :  { %v3594_v45 = vxor.u32 2147483648, %v7387_v60 }
 0x92b   :  { %v3598_v7 = vsel %vm3596_vm11, %v3597_v11, %v7387_v60 }
 0x92c   :  { %v3595_v35 = vsel %vm3593_vm12, %v7385_v34, %v3594_v45 }
 0x92d   :  { %v3599_v47 = vsel %vm3592_vm13, %v3595_v35, %v3598_v7 }
 0x92e   :  { %v3600_v5 = vsel %vm3590_vm14, nan, %v3599_v47 }
 0x92f   :  { %7024 = vmatmul.mubr.msk.f32.gmra.mxu0 %vm213_vm2, %v3600_v5  ;;  %v3759_v5 = vld [vmem:[#allocation9 + $0x190] sm:$0xff] }
 0x9c4   :  { %v7022_v48 = vpop.f32.mrf.mxu0 }
 0x9c5   :  { %v3695_v37 = vadd.f32 %v7022_v48, %v6730_v40 }
 0x9c6   :  { %v3689_v39 = vpop.f32.mrf.mxu0 }
 0x9c7   :  { %v3690_v26 = vadd.f32 %v6730_v40, %v3689_v39  ;;  %v9556_v15 = vadd.f32 %v3695_v37, %v8937_v0  ;;  %v3767_v37 = vld [vmem:[#allocation9 + $0x1a8] sm:$0xff] }
 0x9c9   :  { %v9553_v29 = vadd.f32 %v3690_v26, %v8934_v49  ;;  %v3726_v10 = vmul.f32 %v9556_v15, %v9556_v15  ;;  %v3713_v0 = vsel %vm213_vm2, %v9556_v15, 0.0  ;;  %v3766_v26 = vld [vmem:[#allocation9 + $0x1a0] sm:$0xff] }
 0x9cb   :  { %v3725_v41 = vmul.f32 %v9553_v29, %v9553_v29  ;;  %v3712_v21 = vsel %vm213_vm2, %v9553_v29, 0.0  ;;  %v3730_v18 = vsel %vm213_vm2, %v3726_v10, 0.0 }
 0x9cc   :  { %v3714_v54 = vadd.f32 %v3713_v0, %v3712_v21 }
 0x9cd   :  { %v3729_v56 = vsel %vm213_vm2, %v3725_v41, 0.0 }
 0x9ce   :  { %v3731_v46 = vadd.f32 %v3730_v18, %v3729_v56 }
 0x9ef   :  { %v7025_v25 = vpop.f32.mrf.mxu0 }
 0x9f0   :  { %v3705_v12 = vadd.f32 %v7025_v25, %v6730_v40 }
 0x9f1   :  { %v3699_v20 = vpop.f32.mrf.mxu0 }
 0x9f2   :  { %v9565_v1 = vadd.f32 %v3705_v12, %v8946_v9  ;;  %v3700_v49 = vadd.f32 %v6730_v40, %v3699_v20  ;;  %v3768_v40 = vld [vmem:[#allocation9 + $0x1b0] sm:$0xff] }
 0x9f4   :  { %v9571_v43 = vadd.f32 %v3700_v49, %v8952_v28  ;;  %v3728_v3 = vmul.f32 %v9565_v1, %v9565_v1  ;;  %v3717_v13 = vsel %vm213_vm2, %v9565_v1, 0.0 }
 0x9f6   :  { %v3715_v61 = vsel %vm213_vm2, %v9571_v43, 0.0  ;;  %v3727_v9 = vmul.f32 %v9571_v43, %v9571_v43  ;;  %v3734_v19 = vsel %vm213_vm2, %v3728_v3, 0.0 }
 0x9f7   :  { %v3716_v17 = vadd.f32 %v3715_v61, %v3714_v54 }
 0x9f8   :  { %v3732_v28 = vsel %vm213_vm2, %v3727_v9, 0.0 }
 0x9f9   :  { %v3718_v42 = vadd.f32 %v3717_v13, %v3716_v17  ;;  %v3733_v33 = vadd.f32 %v3732_v28, %v3731_v46 }
 0x9fb   :  { %v3719_v23 = vrot.slane %v3718_v42, 4  ;;  %v3735_v38 = vadd.f32 %v3734_v19, %v3733_v33 }
 0x9fd   :  { %v3720_v16 = vadd.f32 %v3719_v23, %v3718_v42  ;;  %v3736_v27 = vrot.slane %v3735_v38, 4 }
 0x9ff   :  { %v3721_v51 = vrot.slane %v3720_v16, 2  ;;  %v3737_v52 = vadd.f32 %v3736_v27, %v3735_v38  ;;  %v3760_v27 = vld [vmem:[#allocation9 + $0x198] sm:$0xff] }
 0xa01   :  { %v3722_v22 = vadd.f32 %v3721_v51, %v3720_v16  ;;  %v3738_v14 = vrot.slane %v3737_v52, 2 }
 0xa03   :  { %v3723_v44 = vrot.slane %v3722_v22, 1  ;;  %v3739_v6 = vadd.f32 %v3738_v14, %v3737_v52 }
 0xa05   :  { %v3724_v36 = vadd.f32 %v3723_v44, %v3722_v22  ;;  %v3740_v24 = vrot.slane %v3739_v6, 1 }
 0xa07   :  { %v3741_v4 = vadd.f32 %v3740_v24, %v3739_v6  ;;  %v3742_v32 = vmul.f32 0.03125, %v3724_v36 }
 0xa09   :  { %v3743_v30 = vmul.f32 0.03125, %v3741_v4  ;;  %v3744_v63 = vmul.f32 %v3742_v32, %v3742_v32  ;;  %v3748_v11 = vsub.f32 %v9571_v43, %v3742_v32  ;;  %v3746_v45 = vsub.f32 %v9553_v29, %v3742_v32 }
 0xa0a   :  { %v3747_v7 = vsub.f32 %v9556_v15, %v3742_v32  ;;  %v3749_v35 = vsub.f32 %v9565_v1, %v3742_v32 }
 0xa0b   :  { %v3745_v34 = vsub.f32 %v3743_v30, %v3744_v63 }
 0xa0d   :  { %v3750_v60 = vadd.f32 1e-05, %v3745_v34 }
 0xa0f   :  { %7388 = vrsqrt.f32 %v3750_v60 }
 0xa1c   :  { %v7389_v47 = vpop.eup %7388 }
 0xa1d   :  { %v3754_v62 = vmul.f32 %v7389_v47, %v3748_v11  ;;  %v3752_v58 = vmul.f32 %v7389_v47, %v3746_v45  ;;  %v3753_v48 = vmul.f32 %v7389_v47, %v3747_v7  ;;  %v3755_v39 = vmul.f32 %v7389_v47, %v3749_v35 }
 0xa1f   :  { %v3763_v25 = vmul.f32 %v3759_v5, %v3754_v62  ;;  %v3761_v41 = vmul.f32 %v3757_v31, %v3752_v58  ;;  %v3762_v12 = vmul.f32 %v3758_v8, %v3753_v48  ;;  %v9603_v44 = vmul.f32 %v3760_v27, %v3755_v39 }
 0xa21   :  { %v9588_v20 = vadd.f32 %v3768_v40, %v3763_v25  ;;  %v9590_v10 = vadd.f32 %v3766_v26, %v3761_v41  ;;  %v9592_v21 = vadd.f32 %v3767_v37, %v3762_v12 }
 0xa23   :  { %v3983_v49 = vand.u32 2139095040, %v9588_v20  ;;  %v3774_v0 = vand.u32 2147483647, %v9590_v10  ;;  %v3777_v56 = vand.u32 2139095040, %v9590_v10  ;;  %v3877_v54 = vand.u32 2147483647, %v9592_v21 }
 0xa24   :  { %v3880_v18 = vand.u32 2139095040, %v9592_v21  ;;  %v3980_v4 = vand.u32 2147483647, %v9588_v20 }
 0xa25   :  { %v3984_v3 = vshrl.u32 %v3983_v49, 23  ;;  %v3778_v61 = vshrl.u32 %v3777_v56, 23  ;;  %v3781_v9 = vand.u32 8388607, %v3774_v0  ;;  %v3884_v17 = vand.u32 8388607, %v3877_v54 }
 0xa26   :  { %v3881_v46 = vshrl.u32 %v3880_v18, 23 }
 0xa27   :  { %v6743_v13 = vadd.s32 4294967169, %v3984_v3  ;;  %v6735_v28 = vadd.s32 4294967169, %v3778_v61  ;;  %v3782_v23 = vor.u32 8388608, %v3781_v9  ;;  %v3885_v38 = vor.u32 8388608, %v3884_v17 }
 0xa28   :  { %v6739_v42 = vadd.s32 4294967169, %v3881_v46 }
 0xa29   :  { %v3990_v33 = vadd.s32 1, %v6743_v13  ;;  %v3784_v19 = vadd.s32 1, %v6735_v28  ;;  %v9607_v36 = vshll.u32 %v3782_v23, 8  ;;  %v9609_v24 = vshll.u32 %v3885_v38, 8 }
 0xa2a   :  { %v3887_v16 = vadd.s32 1, %v6739_v42 }
 0xa2b   :  { %vm3991_vm15 = vcmp.gt.s32.totalorder %v3990_v33, 0  ;;  %vm3785_vm0 = vcmp.gt.s32.totalorder %v3784_v19, 0 }
 0xa2c   :  { %v3786_v51 = vsel %vm3785_vm0, %v3784_v19, 0  ;;  %vm3888_vm1 = vcmp.gt.s32.totalorder %v3887_v16, 0  ;;  %v9605_v6 = vsel %vm3991_vm15, %v3990_v33, 0 }
 0xa2d   :  { %v3787_v52 = vshrl.u32 %v3786_v51, 5  ;;  %v3788_v22 = vand.u32 31, %v3786_v51  ;;  %v3889_v14 = vsel %vm3888_vm1, %v3887_v16, 0 }
 0xa2e   :  { %v9613_v63 = vshrl.u32 %v3889_v14, 5  ;;  %v3891_v34 = vand.u32 31, %v3889_v14 }
 0xa2f   :  { %v3789_v32 = vsub.s32 32, %v3788_v22  ;;  %v3791_v30 = vshll.u32 %v7613_v50, %v3788_v22  ;;  %v3794_v60 = vshll.u32 %v7614_v53, %v3788_v22  ;;  %v3797_v11 = vshll.u32 %v7615_v55, %v3788_v22 }
 0xa30   :  { %v3800_v45 = vshll.u32 %v7616_v57, %v3788_v22  ;;  %v3803_v7 = vshll.u32 %v7617_v59, %v3788_v22  ;;  %vm3806_vm3 = vcmp.lt.s32.totalorder %v3787_v52, 1  ;;  %vm3807_vm4 = vcmp.lt.s32.totalorder %v3787_v52, 2 }
 0xa31   :  { %v3792_v35 = vshrl.u32 %v7614_v53, %v3789_v32  ;;  %v3795_v47 = vshrl.u32 %v7615_v55, %v3789_v32  ;;  %v3798_v5 = vshrl.u32 %v7616_v57, %v3789_v32  ;;  %v3790_v31 = vshrl.u32 %v7613_v50, %v3789_v32 }
 0xa32   :  { %v3801_v8 = vshrl.u32 %v7617_v59, %v3789_v32  ;;  %v3804_v62 = vshrl.u32 %v7618_v2, %v3789_v32  ;;  %v3892_v40 = vsub.s32 32, %v3891_v34  ;;  %vm3808_vm5 = vcmp.lt.s32.totalorder %v3787_v52, 3 }
 0xa33   :  { %v3793_v58 = vor.u32 %v3792_v35, %v3791_v30  ;;  %v3796_v48 = vor.u32 %v3795_v47, %v3794_v60  ;;  %v3799_v39 = vor.u32 %v3798_v5, %v3797_v11  ;;  %vm3809_vm6 = vcmp.lt.s32.totalorder %v3787_v52, 4 }
 0xa34   :  { %v3802_v26 = vor.u32 %v3801_v8, %v3800_v45  ;;  %v3805_v37 = vor.u32 %v3804_v62, %v3803_v7  ;;  %v3894_v61 = vshll.u32 %v7613_v50, %v3891_v34  ;;  %v3895_v17 = vshrl.u32 %v7614_v53, %v3892_v40 }
 0xa35   :  { %v3810_v25 = vsel %vm3806_vm3, %v3790_v31, %v3793_v58  ;;  %v3811_v41 = vsel %vm3809_vm6, %v3799_v39, 2102212464  ;;  %v3814_v12 = vsel %vm3806_vm3, %v3793_v58, %v3796_v48  ;;  %v3818_v49 = vsel %vm3806_vm3, %v3796_v48, %v3799_v39 }
 0xa36   :  { %v3812_v56 = vsel %vm3808_vm5, %v3796_v48, %v3811_v41  ;;  %v3815_v18 = vsel %vm3809_vm6, %v3802_v26, 920167782  ;;  %v3819_v3 = vsel %vm3809_vm6, %v3805_v37, 1326507024  ;;  %v3897_v13 = vshll.u32 %v7614_v53, %v3891_v34 }
 0xa37   :  { %v3816_v9 = vsel %vm3808_vm5, %v3799_v39, %v3815_v18  ;;  %v3820_v46 = vsel %vm3808_vm5, %v3802_v26, %v3819_v3  ;;  %v3813_v28 = vsel %vm3807_vm4, %v3810_v25, %v3812_v56  ;;  %v3898_v19 = vshrl.u32 %v7615_v55, %v3892_v40 }
 0xa38   :  { %v3817_v42 = vsel %vm3807_vm4, %v3814_v12, %v3816_v9  ;;  %v3821_v33 = vsel %vm3807_vm4, %v3818_v49, %v3820_v46  ;;  %v3896_v51 = vor.u32 %v3895_v17, %v3894_v61  ;;  %v3900_v14 = vshll.u32 %v7615_v55, %v3891_v34  ;;  %v3769_v61 = vld [vmem:[#allocation9 + $0x1b8] sm:$0xff] }
 0xa39   :  { %v9636_v23 = vmul.u32.u64.low %v9607_v36, %v3821_v33  ;;  %v9637_v38 = vmul.u32.u64.high %v9607_v36, %v3821_v33, %v9636_v23  ;;  %v9640_v16 = vmul.u32.u64.low %v9607_v36, %v3817_v42  ;;  %v9641_v27 = vmul.u32.u64.high %v9607_v36, %v3817_v42, %v9640_v16 }
 0xa3a   :  { %v3899_v22 = vor.u32 %v3898_v19, %v3897_v13  ;;  %v3901_v32 = vshrl.u32 %v7616_v57, %v3892_v40  ;;  %v9647_v52 = vand.u32 31, %v9605_v6  ;;  %v3903_v30 = vshll.u32 %v7616_v57, %v3891_v34 }
 0xa3b   :  { %v3904_v60 = vshrl.u32 %v7617_v59, %v3892_v40  ;;  %v3907_v11 = vshrl.u32 %v7618_v2, %v3892_v40  ;;  %v3829_v45 = vmul.u32 %v9607_v36, %v3813_v28  ;;  %v3893_v7 = vshrl.u32 %v7613_v50, %v3892_v40 }
 0xa3c   :  { %v3902_v35 = vor.u32 %v3901_v32, %v3900_v14  ;;  %v3906_v47 = vshll.u32 %v7617_v59, %v3891_v34  ;;  %vm3831_vm7 = vc.u32 %v9637_v38, %v9640_v16  ;;  %v3832_v5 = vadd.s32 1, %v9641_v27 }
 0xa3d   :  { %v3905_v31 = vor.u32 %v3904_v60, %v3903_v30  ;;  %vm3909_vm8 = vcmp.lt.s32.totalorder %v9613_v63, 1  ;;  %vm3911_vm9 = vcmp.lt.s32.totalorder %v9613_v63, 3  ;;  %vm3912_vm10 = vcmp.lt.s32.totalorder %v9613_v63, 4 }
 0xa3e   :  { %v3908_v8 = vor.u32 %v3907_v11, %v3906_v47  ;;  %v3917_v62 = vsel %vm3909_vm8, %v3896_v51, %v3899_v22  ;;  %v3833_v36 = vsel %vm3831_vm7, %v3832_v5, %v9641_v27  ;;  %v3914_v58 = vsel %vm3912_vm10, %v3902_v35, 2102212464 }
 0xa3f   :  { %v3918_v48 = vsel %vm3912_vm10, %v3905_v31, 920167782  ;;  %v3921_v39 = vsel %vm3909_vm8, %v3899_v22, %v3902_v35  ;;  %v3834_v34 = vadd.s32 %v3833_v36, %v3829_v45  ;;  %vm3910_vm11 = vcmp.lt.s32.totalorder %v9613_v63, 2 }
 0xa40   :  { %v3919_v40 = vsel %vm3911_vm9, %v3902_v35, %v3918_v48  ;;  %v3922_v26 = vsel %vm3912_vm10, %v3908_v8, 1326507024  ;;  %v3913_v37 = vsel %vm3909_vm8, %v3893_v7, %v3896_v51  ;;  %v3915_v25 = vsel %vm3911_vm9, %v3899_v22, %v3914_v58 }
 0xa41   :  { %v3920_v41 = vsel %vm3910_vm11, %v3917_v62, %v3919_v40  ;;  %v3923_v12 = vsel %vm3911_vm9, %v3905_v31, %v3922_v26  ;;  %v3835_v49 = vadd.s32 536870912, %v3834_v34  ;;  %v3995_v63 = vsub.s32 32, %v9647_v52 }
 0xa42   :  { %v3924_v56 = vsel %vm3910_vm11, %v3921_v39, %v3923_v12  ;;  %v9664_v18 = vmul.u32.u64.low %v9609_v24, %v3920_v41  ;;  %v9665_v3 = vmul.u32.u64.high %v9609_v24, %v3920_v41, %v9664_v18  ;;  %v3916_v13 = vsel %vm3910_vm11, %v3913_v37, %v3915_v25 }
 0xa43   :  { %v9669_v9 = vmul.u32.u64.low %v9609_v24, %v3924_v56  ;;  %v9670_v46 = vmul.u32.u64.high %v9609_v24, %v3924_v56, %v9669_v9  ;;  %v9673_v17 = vshrl.u32 %v3835_v49, 30  ;;  %v9676_v28 = vadd.f32 %v3769_v61, %v9603_v44 }
 0xa44   :  { %v3935_v33 = vadd.s32 1, %v9665_v3  ;;  %v3987_v19 = vand.u32 8388607, %v3980_v4  ;;  %v9683_v23 = vshrl.u32 %v9605_v6, 5  ;;  %v3932_v27 = vmul.u32 %v9609_v24, %v3916_v13 }
 0xa45   :  { %v3837_v42 = vshll.u32 %v9673_v17, 30  ;;  %vm3934_vm12 = vc.u32 %v9670_v46, %v9664_v18  ;;  %v4001_v51 = vshrl.u32 %v7615_v55, %v3995_v63  ;;  %v4004_v44 = vshrl.u32 %v7616_v57, %v3995_v63 }
 0xa46   :  { %v3936_v14 = vsel %vm3934_vm12, %v3935_v33, %v9665_v3  ;;  %v4006_v32 = vshll.u32 %v7616_v57, %v9647_v52  ;;  %v4007_v30 = vshrl.u32 %v7617_v59, %v3995_v63  ;;  %v3998_v6 = vshrl.u32 %v7614_v53, %v3995_v63 }
 0xa47   :  { %v3838_v22 = vsub.s32 %v3834_v34, %v3837_v42  ;;  %v3937_v60 = vadd.s32 %v3936_v14, %v3932_v27  ;;  %v4000_v24 = vshll.u32 %v7614_v53, %v9647_v52  ;;  %v4010_v11 = vshrl.u32 %v7618_v2, %v3995_v63 }
 0xa48   :  { %v4003_v7 = vshll.u32 %v7615_v55, %v9647_v52  ;;  %v4008_v35 = vor.u32 %v4007_v30, %v4006_v32  ;;  %v4009_v47 = vshll.u32 %v7617_v59, %v9647_v52  ;;  %v3988_v31 = vor.u32 8388608, %v3987_v19 }
 0xa49   :  { %v3840_v45 = vsub.s32 0, %v3838_v22  ;;  %v3938_v5 = vadd.s32 536870912, %v3937_v60  ;;  %v3997_v8 = vshll.u32 %v7613_v50, %v9647_v52  ;;  %v4002_v36 = vor.u32 %v4001_v51, %v4000_v24 }
 0xa4a   :  { %v4005_v58 = vor.u32 %v4004_v44, %v4003_v7  ;;  %v4011_v48 = vor.u32 %v4010_v11, %v4009_v47  ;;  %vm4015_vm13 = vcmp.lt.s32.totalorder %v9683_v23, 4  ;;  %v4086_v37 = vand.u32 2139095040, %v9676_v28 }
 0xa4b   :  { %v6736_v62 = vmin.u32 %v3840_v45, %v3838_v22  ;;  %v9704_v39 = vshrl.u32 %v3938_v5, 30  ;;  %v3999_v34 = vor.u32 %v3998_v6, %v3997_v8  ;;  %v4021_v26 = vsel %vm4015_vm13, %v4008_v35, 920167782 }
 0xa4c   :  { %v3830_v25 = vadd.s32 %v9640_v16, %v9637_v38  ;;  %vm4012_vm14 = vcmp.lt.s32.totalorder %v9683_v23, 1  ;;  %v4028_v41 = vshll.u32 %v3988_v31, 8  ;;  %vm4014_vm15 = vcmp.lt.s32.totalorder %v9683_v23, 3 }
 0xa4d   :  { %v3842_v40 = vclz %v6736_v62  ;;  %v3940_v52 = vshll.u32 %v9704_v39, 30  ;;  %v4024_v49 = vsel %vm4012_vm14, %v4002_v36, %v4005_v58  ;;  %v4025_v56 = vsel %vm4015_vm13, %v4011_v48, 1326507024 }
 0xa4e   :  { %v4020_v61 = vsel %vm4012_vm14, %v3999_v34, %v4002_v36  ;;  %v4022_v38 = vsel %vm4014_vm15, %v4005_v58, %v4021_v26  ;;  %v4026_v16 = vsel %vm4014_vm15, %v4008_v35, %v4025_v56  ;;  %v3996_v9 = vshrl.u32 %v7613_v50, %v3995_v63 }
 0xa4f   :  { %v6737_v12 = vadd.s32 4294967294, %v3842_v40  ;;  %v9719_v3 = vsub.s32 %v3937_v60, %v3940_v52  ;;  %vm4013_vm1 = vcmp.lt.s32.totalorder %v9683_v23, 2  ;;  %v4017_v13 = vsel %vm4015_vm13, %v4005_v58, 2102212464 }
 0xa50   :  { %v4027_v19 = vsel %vm4013_vm1, %v4024_v49, %v4026_v16  ;;  %v4087_v27 = vshrl.u32 %v4086_v37, 23  ;;  %v3860_v14 = vsub.s32 4, %v9673_v17  ;;  %v4023_v32 = vsel %vm4013_vm1, %v4020_v61, %v4022_v38 }
 0xa51   :  { %vm6738_vm0 = vcmp.lt.s32.totalorder %v6737_v12, 0  ;;  %v3943_v33 = vsub.s32 0, %v9719_v3  ;;  %v4016_v60 = vsel %vm4012_vm14, %v3996_v9, %v3999_v34  ;;  %v4018_v6 = vsel %vm4014_vm15, %v4002_v36, %v4017_v13 }
 0xa52   :  { %v3845_v42 = vsel %vm6738_vm0, 0, %v6737_v12  ;;  %v9742_v45 = vmul.u32.u64.low %v4028_v41, %v4027_v19  ;;  %v9743_v7 = vmul.u32.u64.high %v4028_v41, %v4027_v19, %v9742_v45  ;;  %v6747_v31 = vadd.s32 4294967169, %v4087_v27 }
 0xa53   :  { %v3846_v51 = vsub.s32 32, %v3845_v42  ;;  %v3850_v44 = vsub.s32 4294967266, %v3845_v42  ;;  %v3847_v63 = vshll.u32 %v3838_v22, %v3845_v42  ;;  %v6740_v30 = vmin.u32 %v3943_v33, %v9719_v3 }
 0xa54   :  { %v9745_v47 = vmul.u32.u64.low %v4028_v41, %v4023_v32  ;;  %v9746_v5 = vmul.u32.u64.high %v4028_v41, %v4023_v32, %v9745_v47  ;;  %v4019_v62 = vsel %vm4013_vm1, %v4016_v60, %v4018_v6  ;;  %vm9753_vm3 = vcmp.le.f32.partialorder %v3774_v0, 0.7853982 }
 0xa55   :  { %v3848_v24 = vshrl.u32 %v3830_v25, %v3846_v51  ;;  %v3851_v11 = vadd.s32 127, %v3850_v44  ;;  %v3945_v35 = vclz %v6740_v30  ;;  %vm3776_vm4 = vcmp.lt.s32.totalorder %v9590_v10, 0 }
 0xa56   :  { %v4093_v48 = vadd.s32 1, %v6747_v31  ;;  %v3861_v40 = vsel %vm3776_vm4, %v3860_v14, %v9673_v17  ;;  %vm4037_vm5 = vc.u32 %v9743_v7, %v9745_v47  ;;  %v4083_v23 = vand.u32 2147483647, %v9676_v28 }
 0xa57   :  { %v3849_v22 = vor.u32 %v3848_v24, %v3847_v63  ;;  %v3852_v8 = vshll.u32 %v3851_v11, 23  ;;  %v6741_v58 = vadd.s32 4294967294, %v3945_v35  ;;  %v4035_v26 = vmul.u32 %v4028_v41, %v4019_v62 }
 0xa58   :  { %v4038_v0 = vadd.s32 1, %v9746_v5  ;;  %vm4094_vm7 = vcmp.gt.s32.totalorder %v4093_v48, 0  ;;  %v3933_v49 = vadd.s32 %v9664_v18, %v9670_v46  ;;  %v3863_v16 = vsel %vm9753_vm3, 0, %v3861_v40 }
 0xa59   :  { %v3853_v34 = vor.u32 4788187, %v3852_v8  ;;  %vm6742_vm6 = vcmp.lt.s32.totalorder %v6741_v58, 0  ;;  %v3856_v25 = vcvt.s32.f32 %v3849_v22  ;;  %v4095_v12 = vsel %vm4094_vm7, %v4093_v48, 0 }
 0xa5a   :  { %v3948_v52 = vsel %vm6742_vm6, 0, %v6741_v58  ;;  %v4039_v17 = vsel %vm4037_vm5, %v4038_v0, %v9746_v5  ;;  %v4097_v41 = vand.u32 31, %v4095_v12  ;;  %v4090_v19 = vand.u32 8388607, %v4083_v23 }
 0xa5b   :  { %v3854_v37 = vand.u32 2147483647, %v3853_v34  ;;  %v3949_v56 = vsub.s32 32, %v3948_v52  ;;  %v3953_v61 = vsub.s32 4294967266, %v3948_v52  ;;  %v4040_v9 = vadd.s32 %v4039_v17, %v4035_v26 }
 0xa5c   :  { %v3950_v13 = vshll.u32 %v9719_v3, %v3948_v52  ;;  %v4098_v18 = vsub.s32 32, %v4097_v41  ;;  %v9775_v32 = vand.u32 3, %v3863_v16  ;;  %vm3879_vm8 = vcmp.lt.s32.totalorder %v9592_v21, 0 }
 0xa5d   :  { %v3857_v38 = vmul.f32 %v3856_v25, %v3854_v37  ;;  %v3951_v42 = vshrl.u32 %v3933_v49, %v3949_v56  ;;  %v3954_v33 = vadd.s32 127, %v3953_v61  ;;  %v4041_v51 = vadd.s32 536870912, %v4040_v9 }
 0xa5e   :  { %v4091_v60 = vor.u32 8388608, %v4090_v19  ;;  %v4101_v6 = vshrl.u32 %v7614_v53, %v4098_v18  ;;  %v4100_v11 = vshll.u32 %v7613_v50, %v4097_v41  ;;  %v4104_v45 = vshrl.u32 %v7615_v55, %v4098_v18 }
 0xa5f   :  { %v3858_v27 = vxor.u32 2147483648, %v3857_v38  ;;  %v3952_v46 = vor.u32 %v3951_v42, %v3950_v13  ;;  %v3955_v44 = vshll.u32 %v3954_v33, 23  ;;  %v9778_v63 = vshrl.u32 %v4041_v51, 30 }
 0xa60   :  { %v4107_v31 = vshrl.u32 %v7616_v57, %v4098_v18  ;;  %v4103_v8 = vshll.u32 %v7614_v53, %v4097_v41  ;;  %v4106_v62 = vshll.u32 %v7615_v55, %v4097_v41  ;;  %v4110_v36 = vshrl.u32 %v7617_v59, %v4098_v18 }
 0xa61   :  { %v3859_v14 = vsel %vm3776_vm4, %v3858_v27, %v3857_v38  ;;  %v3956_v30 = vor.u32 4788187, %v3955_v44  ;;  %v4043_v24 = vshll.u32 %v9778_v63, 30  ;;  %v3959_v5 = vcvt.s32.f32 %v3952_v46 }
 0xa62   :  { %v3862_v3 = vsel %vm9753_vm3, %v9590_v10, %v3859_v14  ;;  %v4096_v48 = vshrl.u32 %v4095_v12, 5  ;;  %v4102_v34 = vor.u32 %v4101_v6, %v4100_v11  ;;  %v4109_v40 = vshll.u32 %v7616_v57, %v4097_v41 }
 0xa63   :  { %7390 = vcosq.f32 %v3862_v3  ;;  %v3957_v35 = vand.u32 2147483647, %v3956_v30  ;;  %v9788_v22 = vsub.s32 %v4040_v9, %v4043_v24  ;;  %v4105_v0 = vor.u32 %v4104_v45, %v4103_v8 }
 0xa64   :  { %7392 = vsinq.f32 %v3862_v3  ;;  %v4108_v37 = vor.u32 %v4107_v31, %v4106_v62  ;;  %v4113_v25 = vshrl.u32 %v7618_v2, %v4098_v18  ;;  %vm9798_vm9 = vcmp.le.f32.partialorder %v3877_v54, 0.7853982 }
 0xa65   :  { %v3960_v58 = vmul.f32 %v3959_v5, %v3957_v35  ;;  %v4046_v26 = vsub.s32 0, %v9788_v22  ;;  %v4111_v56 = vor.u32 %v4110_v36, %v4109_v40  ;;  %v4112_v61 = vshll.u32 %v7617_v59, %v4097_v41 }
 0xa66   :  { %v3963_v12 = vsub.s32 4, %v9704_v39  ;;  %v4099_v38 = vshrl.u32 %v7613_v50, %v4098_v18  ;;  %v4131_v16 = vshll.u32 %v4091_v60, 8  ;;  %vm3872_vm10 = vcmp.eq.s32.totalorder %v9775_v32, 2 }
 0xa67   :  { %v3961_v49 = vxor.u32 2147483648, %v3960_v58  ;;  %v6744_v17 = vmin.u32 %v4046_v26, %v9788_v22  ;;  %v4114_v54 = vor.u32 %v4113_v25, %v4112_v61  ;;  %vm4115_vm11 = vcmp.lt.s32.totalorder %v4096_v48, 1 }
 0xa68   :  { %vm4118_vm12 = vcmp.lt.s32.totalorder %v4096_v48, 4  ;;  %vm3869_vm13 = vcmp.eq.s32.totalorder %v9775_v32, 0  ;;  %v4123_v33 = vsel %vm4115_vm11, %v4102_v34, %v4105_v0  ;;  %vm4116_vm14 = vcmp.lt.s32.totalorder %v4096_v48, 2 }
 0xa69   :  { %v3962_v9 = vsel %vm3879_vm8, %v3961_v49, %v3960_v58  ;;  %v4048_v13 = vclz %v6744_v17  ;;  %v4120_v42 = vsel %vm4118_vm12, %v4108_v37, 2102212464  ;;  %vm4117_vm15 = vcmp.lt.s32.totalorder %v4096_v48, 3 }
 0xa6a   :  { %v3965_v41 = vsel %vm9798_vm9, %v9592_v21, %v3962_v9  ;;  %v4124_v19 = vsel %vm4118_vm12, %v4111_v56, 920167782  ;;  %v4127_v18 = vsel %vm4115_vm11, %v4105_v0, %v4108_v37  ;;  %v4119_v46 = vsel %vm4115_vm11, %v4099_v38, %v4102_v34 }
 0xa6b   :  { %7394 = vcosq.f32 %v3965_v41  ;;  %v6745_v27 = vadd.s32 4294967294, %v4048_v13  ;;  %v4125_v51 = vsel %vm4117_vm15, %v4108_v37, %v4124_v19  ;;  %v4121_v44 = vsel %vm4117_vm15, %v4105_v0, %v4120_v42 }
 0xa6c   :  { %7396 = vsinq.f32 %v3965_v41  ;;  %v4126_v14 = vsel %vm4116_vm14, %v4123_v33, %v4125_v51  ;;  %v4128_v3 = vsel %vm4118_vm12, %v4114_v54, 1326507024  ;;  %v3964_v11 = vsel %vm3879_vm8, %v3963_v12, %v9704_v39 }
 0xa6d   :  { %vm6746_vm0 = vcmp.lt.s32.totalorder %v6745_v27, 0  ;;  %v4129_v30 = vsel %vm4117_vm15, %v4111_v56, %v4128_v3  ;;  %v9817_v60 = vmul.u32.u64.low %v4131_v16, %v4126_v14  ;;  %v9818_v6 = vmul.u32.u64.high %v4131_v16, %v4126_v14, %v9817_v60 }
 0xa6e   :  { %v4036_v45 = vadd.s32 %v9745_v47, %v9743_v7  ;;  %v4051_v35 = vsel %vm6746_vm0, 0, %v6745_v27  ;;  %v4130_v5 = vsel %vm4116_vm14, %v4127_v18, %v4129_v30  ;;  %v4122_v58 = vsel %vm4116_vm14, %v4119_v46, %v4121_v44 }
 0xa6f   :  { %v4052_v62 = vsub.s32 32, %v4051_v35  ;;  %v4056_v36 = vsub.s32 4294967266, %v4051_v35  ;;  %v4053_v40 = vshll.u32 %v9788_v22, %v4051_v35  ;;  %v4141_v47 = vadd.s32 1, %v9818_v6 }
 0xa70   :  { %v7391_v24 = vpop.eup %7390  ;;  %v9829_v26 = vmul.u32.u64.low %v4131_v16, %v4130_v5  ;;  %v9830_v0 = vmul.u32.u64.high %v4131_v16, %v4130_v5, %v9829_v26  ;;  %vm3868_vm1 = vcmp.lt.s32.totalorder %v9775_v32, 2  ;;  %v3966_v48 = vsel %vm9798_vm9, 0, %v3964_v11 }
 0xa71   :  { %v7393_v31 = vpop.eup %7392  ;;  %v3873_v8 = vxor.u32 2147483648, %v7391_v24  ;;  %v4054_v37 = vshrl.u32 %v4036_v45, %v4052_v62  ;;  %v4057_v7 = vadd.s32 127, %v4056_v36  ;;  %vm3866_vm3 = vweird.f32 %v9590_v10 }
 0xa72   :  { %v3870_v34 = vxor.u32 2147483648, %v7393_v31  ;;  %v4138_v12 = vmul.u32 %v4131_v16, %v4122_v58  ;;  %vm4140_vm4 = vc.u32 %v9830_v0, %v9817_v60  ;;  %v3970_v17 = vand.u32 3, %v3966_v48 }
 0xa73   :  { %v3874_v39 = vsel %vm3872_vm10, %v3873_v8, %v7393_v31  ;;  %v4055_v49 = vor.u32 %v4054_v37, %v4053_v40  ;;  %v4058_v56 = vshll.u32 %v4057_v7, 23  ;;  %v4142_v32 = vsel %vm4140_vm4, %v4141_v47, %v9818_v6 }
 0xa74   :  { %v3871_v25 = vsel %vm3869_vm13, %v7391_v24, %v3870_v34  ;;  %v4143_v9 = vadd.s32 %v4142_v32, %v4138_v12  ;;  %vm3975_vm5 = vcmp.eq.s32.totalorder %v3970_v17, 2  ;;  %vm3972_vm6 = vcmp.eq.s32.totalorder %v3970_v17, 0 }
 0xa75   :  { %v3875_v22 = vsel %vm3868_vm1, %v3871_v25, %v3874_v39  ;;  %v4059_v38 = vor.u32 4788187, %v4058_v56  ;;  %v4062_v41 = vcvt.s32.f32 %v4055_v49  ;;  %vm3971_vm7 = vcmp.lt.s32.totalorder %v3970_v17, 2 }
 0xa76   :  { %v3876_v61 = vsel %vm3866_vm3, nan, %v3875_v22  ;;  %v4144_v42 = vadd.s32 536870912, %v4143_v9  ;;  %vm3969_vm8 = vweird.f32 %v9592_v21  ;;  %vm3982_vm9 = vcmp.lt.s32.totalorder %v9588_v20, 0 }
 0xa77   :  { %7034 = vmatprep.mubr.msk.f32.mxu1 %vm213_vm2, %v3876_v61  ;;  %v4060_v52 = vand.u32 2147483647, %v4059_v38  ;;  %vm9849_vm10 = vcmp.le.f32.partialorder %v3980_v4, 0.7853982  ;;  %v4066_v21 = vsub.s32 4, %v9778_v63  ;;  %v4139_v36 = vadd.s32 %v9817_v60, %v9830_v0 }
 0xa78   :  { %v7395_v54 = vpop.eup %7394  ;;  %v4145_v27 = vshrl.u32 %v4144_v42, 30  ;;  %vm4072_vm15 = vweird.f32 %v9588_v20  ;;  %vm4085_vm0 = vcmp.lt.s32.totalorder %v9676_v28, 0  ;;  %vm4084_vm1 = vcmp.le.f32.partialorder %v4083_v23, 0.7853982 }
 0xa79   :  { %v7397_v13 = vpop.eup %7396  ;;  %v3976_v10 = vxor.u32 2147483648, %v7395_v54  ;;  %v4063_v19 = vmul.f32 %v4062_v41, %v4060_v52  ;;  %v4067_v35 = vsel %vm3982_vm9, %v4066_v21, %v9778_v63 }
 0xa7a   :  { %v3973_v33 = vxor.u32 2147483648, %v7397_v13  ;;  %v4146_v44 = vshll.u32 %v4145_v27, 30  ;;  %v4069_v31 = vsel %vm9849_vm10, 0, %v4067_v35 }
 0xa7b   :  { %v3977_v16 = vsel %vm3975_vm5, %v3976_v10, %v7397_v13  ;;  %v4064_v18 = vxor.u32 2147483648, %v4063_v19  ;;  %v4073_v62 = vand.u32 3, %v4069_v31 }
 0xa7c   :  { %v3974_v51 = vsel %vm3972_vm6, %v7395_v54, %v3973_v33  ;;  %v4147_v24 = vsub.s32 %v4143_v9, %v4146_v44  ;;  %v4169_v54 = vsub.s32 4, %v4145_v27  ;;  %vm4175_vm6 = vweird.f32 %v9676_v28  ;;  %v4769_v44 = vld [vmem:[#allocation11 + $0xe0] sm:$0xff] }
 0xa7d   :  { %v3978_v46 = vsel %vm3971_vm7, %v3974_v51, %v3977_v16  ;;  %v4065_v30 = vsel %vm3982_vm9, %v4064_v18, %v4063_v19  ;;  %vm4078_vm12 = vcmp.eq.s32.totalorder %v4073_v62, 2  ;;  %vm4075_vm13 = vcmp.eq.s32.totalorder %v4073_v62, 0  ;;  %v4772_v18 = vld [vmem:[#allocation11 + $0xf8] sm:$0xff] }
 0xa7e   :  { %v3979_v14 = vsel %vm3969_vm8, nan, %v3978_v46  ;;  %v4068_v6 = vsel %vm9849_vm10, %v9588_v20, %v4065_v30  ;;  %v4149_v11 = vsub.s32 0, %v4147_v24  ;;  %vm4074_vm14 = vcmp.lt.s32.totalorder %v4073_v62, 2  ;;  %v4771_v46 = vld [vmem:[#allocation11 + $0xf0] sm:$0xff]  ;;  %7040 = vmatprep.subr.mxu0 %v4772_v18 }
 0xa7f   :  { %7035 = vmatmul.mubr.msk.f32.vlgmr.msra.gmra.mxu1 %vm213_vm2, %v3979_v14  ;;  %7398 = vcosq.f32 %v4068_v6  ;;  %v4170_v20 = vsel %vm4085_vm0, %v4169_v54, %v4145_v27  ;;  %7041 = vmatpush3.msra.mxu0 %v4772_v18  ;;  %v4770_v27 = vld [vmem:[#allocation11 + $0xe8] sm:$0xff]  ;;  %v4339_v18 = vld [vmem:[#allocation9 + $0x1c0] sm:$0xff] }
 0xa80   :  { %7400 = vsinq.f32 %v4068_v6  ;;  %v6748_v45 = vmin.u32 %v4149_v11, %v4147_v24  ;;  %v4172_v52 = vsel %vm4084_vm1, 0, %v4170_v20  ;;  %7042 = vmatprep.subr.mxu0 %v4771_v46 }
 0xa81   :  { %v4176_v41 = vand.u32 3, %v4172_v52  ;;  %7043 = vmatpush3.msra.mxu0 %v4771_v46  ;;  %v4340_v46 = vld [vmem:[#allocation9 + $0x1c8] sm:$0xff] }
 0xa82   :  { %v4151_v4 = vclz %v6748_v45  ;;  %7044 = vmatprep.subr.mxu0 %v4770_v27 }
 0xa83   :  { %vm4181_vm3 = vcmp.eq.s32.totalorder %v4176_v41, 2  ;;  %vm4178_vm4 = vcmp.eq.s32.totalorder %v4176_v41, 0  ;;  %vm4177_vm5 = vcmp.lt.s32.totalorder %v4176_v41, 2  ;;  %7045 = vmatpush3.msra.mxu0 %v4770_v27 }
 0xa84   :  { %v6749_v5 = vadd.s32 4294967294, %v4151_v4  ;;  %7046 = vmatprep.subr.mxu0 %v4769_v44 }
 0xa85   :  { %7047 = vmatpush3.msra.mxu0 %v4769_v44 }
 0xa86   :  { %vm6750_vm11 = vcmp.lt.s32.totalorder %v6749_v5, 0 }
 0xa87   :  { %v4154_v8 = vsel %vm6750_vm11, 0, %v6749_v5 }
 0xa88   :  { %v4155_v58 = vsub.s32 32, %v4154_v8  ;;  %v4159_v34 = vsub.s32 4294967266, %v4154_v8  ;;  %v4156_v26 = vshll.u32 %v4147_v24, %v4154_v8 }
 0xa8a   :  { %v4157_v39 = vshrl.u32 %v4139_v36, %v4155_v58  ;;  %v4160_v37 = vadd.s32 127, %v4159_v34 }
 0xa8c   :  { %v7399_v40 = vpop.eup %7398  ;;  %v4158_v25 = vor.u32 %v4157_v39, %v4156_v26  ;;  %v4161_v48 = vshll.u32 %v4160_v37, 23 }
 0xa8d   :  { %v7401_v7 = vpop.eup %7400  ;;  %v4079_v47 = vxor.u32 2147483648, %v7399_v40 }
 0xa8e   :  { %v4076_v63 = vxor.u32 2147483648, %v7401_v7  ;;  %v4162_v56 = vor.u32 4788187, %v4161_v48  ;;  %v4165_v12 = vcvt.s32.f32 %v4158_v25 }
 0xa8f   :  { %v4080_v22 = vsel %vm4078_vm12, %v4079_v47, %v7401_v7 }
 0xa90   :  { %v4077_v49 = vsel %vm4075_vm13, %v7399_v40, %v4076_v63  ;;  %v4163_v61 = vand.u32 2147483647, %v4162_v56 }
 0xa91   :  { %v4081_v60 = vsel %vm4074_vm14, %v4077_v49, %v4080_v22 }
 0xa92   :  { %v4082_v0 = vsel %vm4072_vm15, nan, %v4081_v60  ;;  %v4166_v17 = vmul.f32 %v4165_v12, %v4163_v61 }
 0xa93   :  { %7037 = vmatprep.mubr.msk.f32.mxu1 %vm213_vm2, %v4082_v0 }
 0xa94   :  { %v4167_v38 = vxor.u32 2147483648, %v4166_v17 }
 0xa96   :  { %v4168_v32 = vsel %vm4085_vm0, %v4167_v38, %v4166_v17 }
 0xa97   :  { %v4171_v9 = vsel %vm4084_vm1, %v9676_v28, %v4168_v32  ;;  %v6752_v28 = vld [vmem:[%s11107_s5 + $0x6] ss:$0 sm:$0xff] }
 0xa98   :  { %7402 = vcosq.f32 %v4171_v9 }
 0xa99   :  { %7404 = vsinq.f32 %v4171_v9 }
 0xaa5   :  { %v7403_v13 = vpop.eup %7402 }
 0xaa6   :  { %v7405_v10 = vpop.eup %7404  ;;  %v4182_v42 = vxor.u32 2147483648, %v7403_v13 }
 0xaa7   :  { %v4179_v33 = vxor.u32 2147483648, %v7405_v10 }
 0xaa8   :  { %v4183_v19 = vsel %vm4181_vm3, %v4182_v42, %v7405_v10 }
 0xaa9   :  { %v4180_v16 = vsel %vm4178_vm4, %v7403_v13, %v4179_v33 }
 0xaaa   :  { %v4184_v23 = vsel %vm4177_vm5, %v4180_v16, %v4183_v19 }
 0xaab   :  { %v4185_v51 = vsel %vm4175_vm6, nan, %v4184_v23 }
 0xaac   :  { %7038 = vmatmul.mubr.msk.f32.gmra.mxu1 %vm213_vm2, %v4185_v51  ;;  %v4341_v51 = vld [vmem:[#allocation9 + $0x1d0] sm:$0xff] }
 0xb3f   :  { %v7036_v14 = vpop.f32.mrf.mxu1 }
 0xb40   :  { %v4281_v6 = vadd.f32 %v7036_v14, %v6752_v28 }
 0xb41   :  { %v4275_v3 = vpop.f32.mrf.mxu1 }
 0xb42   :  { %v4276_v30 = vadd.f32 %v6752_v28, %v4275_v3  ;;  %v4308_v11 = vmul.f32 %v4281_v6, %v4281_v6  ;;  %v4295_v5 = vsel %vm213_vm2, %v4281_v6, 0.0 }
 0xb44   :  { %v4307_v24 = vmul.f32 %v4276_v30, %v4276_v30  ;;  %v4294_v45 = vsel %vm213_vm2, %v4276_v30, 0.0  ;;  %v4312_v36 = vsel %vm213_vm2, %v4308_v11, 0.0 }
 0xb45   :  { %v4296_v62 = vadd.f32 %v4295_v5, %v4294_v45 }
 0xb46   :  { %v4311_v31 = vsel %vm213_vm2, %v4307_v24, 0.0  ;;  %v4348_v24 = vld [vmem:[#allocation9 + $0x1e0] sm:$0xff] }
 0xb47   :  { %v4313_v26 = vadd.f32 %v4312_v36, %v4311_v31 }
 0xb6c   :  { %v7039_v21 = vpop.f32.mrf.mxu1 }
 0xb6d   :  { %v4291_v35 = vadd.f32 %v7039_v21, %v6752_v28  ;;  %v4349_v21 = vld [vmem:[#allocation9 + $0x1e8] sm:$0xff] }
 0xb6e   :  { %v4285_v4 = vpop.f32.mrf.mxu1 }
 0xb6f   :  { %v4286_v8 = vadd.f32 %v6752_v28, %v4285_v4  ;;  %v4310_v58 = vmul.f32 %v4291_v35, %v4291_v35  ;;  %v4299_v37 = vsel %vm213_vm2, %v4291_v35, 0.0  ;;  %v4350_v28 = vld [vmem:[#allocation9 + $0x1f0] sm:$0xff] }
 0xb71   :  { %v4297_v34 = vsel %vm213_vm2, %v4286_v8, 0.0  ;;  %v4309_v40 = vmul.f32 %v4286_v8, %v4286_v8  ;;  %v4316_v25 = vsel %vm213_vm2, %v4310_v58, 0.0 }
 0xb72   :  { %v4298_v39 = vadd.f32 %v4297_v34, %v4296_v62 }
 0xb73   :  { %v4314_v7 = vsel %vm213_vm2, %v4309_v40, 0.0 }
 0xb74   :  { %v4300_v47 = vadd.f32 %v4299_v37, %v4298_v39  ;;  %v4315_v63 = vadd.f32 %v4314_v7, %v4313_v26 }
 0xb76   :  { %v4301_v48 = vrot.slane %v4300_v47, 4  ;;  %v4317_v22 = vadd.f32 %v4316_v25, %v4315_v63 }
 0xb78   :  { %v4302_v49 = vadd.f32 %v4301_v48, %v4300_v47  ;;  %v4318_v56 = vrot.slane %v4317_v22, 4 }
 0xb7a   :  { %v4303_v60 = vrot.slane %v4302_v49, 2  ;;  %v4319_v0 = vadd.f32 %v4318_v56, %v4317_v22 }
 0xb7c   :  { %v4304_v61 = vadd.f32 %v4303_v60, %v4302_v49  ;;  %v4320_v12 = vrot.slane %v4319_v0, 2  ;;  %v4342_v60 = vld [vmem:[#allocation9 + $0x1d8] sm:$0xff] }
 0xb7e   :  { %v4305_v17 = vrot.slane %v4304_v61, 1  ;;  %v4321_v38 = vadd.f32 %v4320_v12, %v4319_v0 }
 0xb80   :  { %v4306_v32 = vadd.f32 %v4305_v17, %v4304_v61  ;;  %v4322_v9 = vrot.slane %v4321_v38, 1 }
 0xb82   :  { %v4323_v54 = vadd.f32 %v4322_v9, %v4321_v38  ;;  %v4324_v20 = vmul.f32 0.03125, %v4306_v32 }
 0xb84   :  { %v4325_v52 = vmul.f32 0.03125, %v4323_v54  ;;  %v4326_v41 = vmul.f32 %v4324_v20, %v4324_v20  ;;  %v4331_v13 = vsub.f32 %v4291_v35, %v4324_v20  ;;  %v4329_v33 = vsub.f32 %v4281_v6, %v4324_v20 }
 0xb85   :  { %v4330_v19 = vsub.f32 %v4286_v8, %v4324_v20  ;;  %v4328_v16 = vsub.f32 %v4276_v30, %v4324_v20 }
 0xb86   :  { %v4327_v10 = vsub.f32 %v4325_v52, %v4326_v41 }
 0xb88   :  { %v4332_v42 = vadd.f32 1e-05, %v4327_v10 }
 0xb8a   :  { %7406 = vrsqrt.f32 %v4332_v42 }
 0xb97   :  { %v7407_v23 = vpop.eup %7406 }
 0xb98   :  { %v4336_v27 = vmul.f32 %v7407_v23, %v4330_v19  ;;  %v4334_v44 = vmul.f32 %v7407_v23, %v4328_v16  ;;  %v4335_v14 = vmul.f32 %v7407_v23, %v4329_v33  ;;  %v4337_v3 = vmul.f32 %v7407_v23, %v4331_v13 }
 0xb9a   :  { %v4345_v11 = vmul.f32 %v4341_v51, %v4336_v27  ;;  %v4343_v45 = vmul.f32 %v4339_v18, %v4334_v44  ;;  %v4344_v35 = vmul.f32 %v4340_v46, %v4335_v14  ;;  %v9908_v54 = vmul.f32 %v4342_v60, %v4337_v3 }
 0xb9c   :  { %v9882_v4 = vadd.f32 %v4350_v28, %v4345_v11  ;;  %v9884_v5 = vadd.f32 %v4348_v24, %v4343_v45  ;;  %v9886_v6 = vadd.f32 %v4349_v21, %v4344_v35 }
 0xb9e   :  { %v4565_v30 = vand.u32 2139095040, %v9882_v4  ;;  %v4356_v31 = vand.u32 2147483647, %v9884_v5  ;;  %v4359_v8 = vand.u32 2139095040, %v9884_v5  ;;  %v4459_v62 = vand.u32 2147483647, %v9886_v6 }
 0xb9f   :  { %v4462_v36 = vand.u32 2139095040, %v9886_v6  ;;  %v4562_v56 = vand.u32 2147483647, %v9882_v4 }
 0xba0   :  { %v4566_v58 = vshrl.u32 %v4565_v30, 23  ;;  %v4360_v34 = vshrl.u32 %v4359_v8, 23  ;;  %v4363_v40 = vand.u32 8388607, %v4356_v31  ;;  %v4466_v39 = vand.u32 8388607, %v4459_v62 }
 0xba1   :  { %v4463_v26 = vshrl.u32 %v4462_v36, 23  ;;  %v9906_v9 = vand.u32 8388607, %v4562_v56 }
 0xba2   :  { %v6765_v37 = vadd.s32 4294967169, %v4566_v58  ;;  %v6757_v7 = vadd.s32 4294967169, %v4360_v34  ;;  %v4364_v48 = vor.u32 8388608, %v4363_v40  ;;  %v4467_v22 = vor.u32 8388608, %v4466_v39 }
 0xba3   :  { %v6761_v47 = vadd.s32 4294967169, %v4463_v26 }
 0xba4   :  { %v4572_v63 = vadd.s32 1, %v6765_v37  ;;  %v4366_v25 = vadd.s32 1, %v6757_v7  ;;  %v9900_v38 = vshll.u32 %v4364_v48, 8  ;;  %v9902_v32 = vshll.u32 %v4467_v22, 8 }
 0xba5   :  { %v4469_v49 = vadd.s32 1, %v6761_v47 }
 0xba6   :  { %vm4573_vm7 = vcmp.gt.s32.totalorder %v4572_v63, 0  ;;  %vm4367_vm8 = vcmp.gt.s32.totalorder %v4366_v25, 0 }
 0xba7   :  { %v9898_v0 = vsel %vm4573_vm7, %v4572_v63, 0  ;;  %v4368_v61 = vsel %vm4367_vm8, %v4366_v25, 0  ;;  %vm4470_vm9 = vcmp.gt.s32.totalorder %v4469_v49, 0 }
 0xba8   :  { %v4369_v12 = vshrl.u32 %v4368_v61, 5  ;;  %v4370_v17 = vand.u32 31, %v4368_v61  ;;  %v9911_v20 = vand.u32 31, %v9898_v0  ;;  %v4471_v13 = vsel %vm4470_vm9, %v4469_v49, 0 }
 0xba9   :  { %v4473_v21 = vand.u32 31, %v4471_v13  ;;  %v4472_v63 = vshrl.u32 %v4471_v13, 5 }
 0xbaa   :  { %v4371_v52 = vsub.s32 32, %v4370_v17  ;;  %v4373_v41 = vshll.u32 %v7613_v50, %v4370_v17  ;;  %v4376_v10 = vshll.u32 %v7614_v53, %v4370_v17  ;;  %v4379_v42 = vshll.u32 %v7615_v55, %v4370_v17 }
 0xbab   :  { %v4382_v33 = vshll.u32 %v7616_v57, %v4370_v17  ;;  %v4385_v19 = vshll.u32 %v7617_v59, %v4370_v17  ;;  %vm4388_vm10 = vcmp.lt.s32.totalorder %v4369_v12, 1  ;;  %vm4389_vm11 = vcmp.lt.s32.totalorder %v4369_v12, 2 }
 0xbac   :  { %v4374_v16 = vshrl.u32 %v7614_v53, %v4371_v52  ;;  %v4377_v23 = vshrl.u32 %v7615_v55, %v4371_v52  ;;  %v4380_v51 = vshrl.u32 %v7616_v57, %v4371_v52  ;;  %v4372_v18 = vshrl.u32 %v7613_v50, %v4371_v52 }
 0xbad   :  { %v4383_v46 = vshrl.u32 %v7617_v59, %v4371_v52  ;;  %v4386_v27 = vshrl.u32 %v7618_v2, %v4371_v52  ;;  %vm4390_vm12 = vcmp.lt.s32.totalorder %v4369_v12, 3  ;;  %vm4391_vm13 = vcmp.lt.s32.totalorder %v4369_v12, 4 }
 0xbae   :  { %v4375_v44 = vor.u32 %v4374_v16, %v4373_v41  ;;  %v4378_v14 = vor.u32 %v4377_v23, %v4376_v10  ;;  %v4381_v3 = vor.u32 %v4380_v51, %v4379_v42  ;;  %v4474_v34 = vsub.s32 32, %v4473_v21 }
 0xbaf   :  { %v4384_v28 = vor.u32 %v4383_v46, %v4382_v33  ;;  %v4387_v24 = vor.u32 %v4386_v27, %v4385_v19  ;;  %v9929_v40 = vsub.s32 32, %v9911_v20  ;;  %v4476_v25 = vshll.u32 %v7613_v50, %v4473_v21 }
 0xbb0   :  { %v4392_v11 = vsel %vm4388_vm10, %v4372_v18, %v4375_v44  ;;  %v4393_v45 = vsel %vm4391_vm13, %v4381_v3, 2102212464  ;;  %v4396_v35 = vsel %vm4388_vm10, %v4375_v44, %v4378_v14  ;;  %v4400_v30 = vsel %vm4388_vm10, %v4378_v14, %v4381_v3 }
 0xbb1   :  { %v4394_v8 = vsel %vm4390_vm12, %v4378_v14, %v4393_v45  ;;  %v4397_v36 = vsel %vm4391_vm13, %v4384_v28, 920167782  ;;  %v4401_v58 = vsel %vm4391_vm13, %v4387_v24, 1326507024  ;;  %v4477_v17 = vshrl.u32 %v7614_v53, %v4474_v34 }
 0xbb2   :  { %v4395_v26 = vsel %vm4389_vm11, %v4392_v11, %v4394_v8  ;;  %v4398_v39 = vsel %vm4390_vm12, %v4381_v3, %v4397_v36  ;;  %v4402_v37 = vsel %vm4390_vm12, %v4384_v28, %v4401_v58  ;;  %v4479_v52 = vshll.u32 %v7614_v53, %v4473_v21 }
 0xbb3   :  { %v4399_v7 = vsel %vm4389_vm11, %v4396_v35, %v4398_v39  ;;  %v4403_v47 = vsel %vm4389_vm11, %v4400_v30, %v4402_v37  ;;  %v4411_v61 = vmul.u32 %v9900_v38, %v4395_v26  ;;  %v4480_v12 = vshrl.u32 %v7615_v55, %v4474_v34 }
 0xbb4   :  { %v9938_v48 = vmul.u32.u64.low %v9900_v38, %v4403_v47  ;;  %v9939_v22 = vmul.u32.u64.high %v9900_v38, %v4403_v47, %v9938_v48  ;;  %v9942_v49 = vmul.u32.u64.low %v9900_v38, %v4399_v7  ;;  %v9943_v60 = vmul.u32.u64.high %v9900_v38, %v4399_v7, %v9942_v49 }
 0xbb5   :  { %v4482_v41 = vshll.u32 %v7615_v55, %v4473_v21  ;;  %v4483_v13 = vshrl.u32 %v7616_v57, %v4474_v34  ;;  %v4485_v10 = vshll.u32 %v7616_v57, %v4473_v21  ;;  %v4486_v42 = vshrl.u32 %v7617_v59, %v4474_v34 }
 0xbb6   :  { %v4478_v33 = vor.u32 %v4477_v17, %v4476_v25  ;;  %v4481_v19 = vor.u32 %v4480_v12, %v4479_v52  ;;  %v4488_v16 = vshll.u32 %v7617_v59, %v4473_v21  ;;  %v4489_v38 = vshrl.u32 %v7618_v2, %v4474_v34 }
 0xbb7   :  { %vm4413_vm14 = vc.u32 %v9939_v22, %v9942_v49  ;;  %v4414_v23 = vadd.s32 1, %v9943_v60  ;;  %v4475_v51 = vshrl.u32 %v7613_v50, %v4474_v34  ;;  %v4484_v18 = vor.u32 %v4483_v13, %v4482_v41  ;;  %v4351_v34 = vld [vmem:[#allocation9 + $0x1f8] sm:$0xff] }
 0xbb8   :  { %v4487_v46 = vor.u32 %v4486_v42, %v4485_v10  ;;  %v4490_v27 = vor.u32 %v4489_v38, %v4488_v16  ;;  %vm4491_vm15 = vcmp.lt.s32.totalorder %v4472_v63, 1  ;;  %vm4493_vm0 = vcmp.lt.s32.totalorder %v4472_v63, 3 }
 0xbb9   :  { %v4415_v44 = vsel %vm4413_vm14, %v4414_v23, %v9943_v60  ;;  %vm4494_vm1 = vcmp.lt.s32.totalorder %v4472_v63, 4  ;;  %v4495_v14 = vsel %vm4491_vm15, %v4475_v51, %v4478_v33  ;;  %v4499_v3 = vsel %vm4491_vm15, %v4478_v33, %v4481_v19 }
 0xbba   :  { %v4416_v28 = vadd.s32 %v4415_v44, %v4411_v61  ;;  %v4496_v24 = vsel %vm4494_vm1, %v4484_v18, 2102212464  ;;  %v4500_v21 = vsel %vm4494_vm1, %v4487_v46, 920167782  ;;  %v4503_v11 = vsel %vm4491_vm15, %v4481_v19, %v4484_v18 }
 0xbbb   :  { %vm4492_vm3 = vcmp.lt.s32.totalorder %v4472_v63, 2  ;;  %v4497_v45 = vsel %vm4493_vm0, %v4481_v19, %v4496_v24  ;;  %v4501_v35 = vsel %vm4493_vm0, %v4484_v18, %v4500_v21  ;;  %v4504_v30 = vsel %vm4494_vm1, %v4490_v27, 1326507024 }
 0xbbc   :  { %v4417_v8 = vadd.s32 536870912, %v4416_v28  ;;  %v4502_v36 = vsel %vm4492_vm3, %v4499_v3, %v4501_v35  ;;  %v4505_v58 = vsel %vm4493_vm0, %v4487_v46, %v4504_v30  ;;  %v4498_v26 = vsel %vm4492_vm3, %v4495_v14, %v4497_v45 }
 0xbbd   :  { %v4506_v39 = vsel %vm4492_vm3, %v4503_v11, %v4505_v58  ;;  %v9962_v37 = vmul.u32.u64.low %v9902_v32, %v4502_v36  ;;  %v9963_v7 = vmul.u32.u64.high %v9902_v32, %v4502_v36, %v9962_v37  ;;  %v4570_v63 = vor.u32 8388608, %v9906_v9 }
 0xbbe   :  { %v9966_v47 = vshrl.u32 %v4417_v8, 30  ;;  %v9969_v25 = vmul.u32.u64.low %v9902_v32, %v4506_v39  ;;  %v9970_v48 = vmul.u32.u64.high %v9902_v32, %v4506_v39, %v9969_v25  ;;  %v4580_v60 = vshrl.u32 %v7614_v53, %v9929_v40 }
 0xbbf   :  { %v4583_v61 = vshrl.u32 %v7615_v55, %v9929_v40  ;;  %v9978_v17 = vadd.f32 %v4351_v34, %v9908_v54  ;;  %v4575_v52 = vshrl.u32 %v9898_v0, 5  ;;  %v4514_v41 = vmul.u32 %v9902_v32, %v4498_v26 }
 0xbc0   :  { %v4419_v12 = vshll.u32 %v9966_v47, 30  ;;  %v4586_v13 = vshrl.u32 %v7616_v57, %v9929_v40  ;;  %v4517_v9 = vadd.s32 1, %v9963_v7  ;;  %v4579_v10 = vshll.u32 %v7613_v50, %v9911_v20 }
 0xbc1   :  { %v4582_v42 = vshll.u32 %v7614_v53, %v9911_v20  ;;  %v4589_v54 = vshrl.u32 %v7617_v59, %v9929_v40  ;;  %vm4516_vm4 = vc.u32 %v9970_v48, %v9962_v37  ;;  %v4585_v0 = vshll.u32 %v7615_v55, %v9911_v20 }
 0xbc2   :  { %v4420_v33 = vsub.s32 %v4416_v28, %v4419_v12  ;;  %v4588_v32 = vshll.u32 %v7616_v57, %v9911_v20  ;;  %v4518_v19 = vsel %vm4516_vm4, %v4517_v9, %v9963_v7  ;;  %v4581_v16 = vor.u32 %v4580_v60, %v4579_v10 }
 0xbc3   :  { %v4584_v38 = vor.u32 %v4583_v61, %v4582_v42  ;;  %v4519_v51 = vadd.s32 %v4518_v19, %v4514_v41  ;;  %v4587_v18 = vor.u32 %v4586_v13, %v4585_v0  ;;  %v4591_v27 = vshll.u32 %v7617_v59, %v9911_v20 }
 0xbc4   :  { %v4422_v23 = vsub.s32 0, %v4420_v33  ;;  %v4590_v46 = vor.u32 %v4589_v54, %v4588_v32  ;;  %v4592_v44 = vshrl.u32 %v7618_v2, %v9929_v40  ;;  %v4668_v14 = vand.u32 2139095040, %v9978_v17 }
 0xbc5   :  { %v4578_v28 = vshrl.u32 %v7613_v50, %v9929_v40  ;;  %vm4594_vm5 = vcmp.lt.s32.totalorder %v4575_v52, 1  ;;  %v4610_v24 = vshll.u32 %v4570_v63, 8  ;;  %v4520_v21 = vadd.s32 536870912, %v4519_v51 }
 0xbc6   :  { %v6758_v3 = vmin.u32 %v4422_v23, %v4420_v33  ;;  %v4593_v11 = vor.u32 %v4592_v44, %v4591_v27  ;;  %vm4596_vm6 = vcmp.lt.s32.totalorder %v4575_v52, 3  ;;  %vm4597_vm7 = vcmp.lt.s32.totalorder %v4575_v52, 4 }
 0xbc7   :  { %v4599_v35 = vsel %vm4597_vm7, %v4587_v18, 2102212464  ;;  %v4602_v30 = vsel %vm4594_vm5, %v4581_v16, %v4584_v38  ;;  %v4603_v20 = vsel %vm4597_vm7, %v4590_v46, 920167782  ;;  %v10007_v8 = vshrl.u32 %v4520_v21, 30 }
 0xbc8   :  { %v4424_v45 = vclz %v6758_v3  ;;  %vm4595_vm8 = vcmp.lt.s32.totalorder %v4575_v52, 2  ;;  %v4604_v36 = vsel %vm4596_vm6, %v4587_v18, %v4603_v20  ;;  %v4606_v58 = vsel %vm4594_vm5, %v4584_v38, %v4587_v18 }
 0xbc9   :  { %v4605_v40 = vsel %vm4595_vm8, %v4602_v30, %v4604_v36  ;;  %v4607_v26 = vsel %vm4597_vm7, %v4593_v11, 1326507024  ;;  %v4669_v39 = vshrl.u32 %v4668_v14, 23  ;;  %v4522_v7 = vshll.u32 %v10007_v8, 30 }
 0xbca   :  { %v6759_v34 = vadd.s32 4294967294, %v4424_v45  ;;  %v4598_v25 = vsel %vm4594_vm5, %v4578_v28, %v4581_v16  ;;  %v4600_v63 = vsel %vm4596_vm6, %v4584_v38, %v4599_v35  ;;  %v4608_v60 = vsel %vm4596_vm6, %v4590_v46, %v4607_v26 }
 0xbcb   :  { %v4609_v61 = vsel %vm4595_vm8, %v4606_v58, %v4608_v60  ;;  %v10017_v12 = vmul.u32.u64.low %v4610_v24, %v4605_v40  ;;  %v10018_v41 = vmul.u32.u64.high %v4610_v24, %v4605_v40, %v10017_v12  ;;  %v4412_v13 = vadd.s32 %v9942_v49, %v9939_v22 }
 0xbcc   :  { %vm6760_vm9 = vcmp.lt.s32.totalorder %v6759_v34, 0  ;;  %v4523_v10 = vsub.s32 %v4519_v51, %v4522_v7  ;;  %v4442_v0 = vsub.s32 4, %v9966_v47  ;;  %v6769_v32 = vadd.s32 4294967169, %v4669_v39 }
 0xbcd   :  { %v4427_v9 = vsel %vm6760_vm9, 0, %v6759_v34  ;;  %v4601_v16 = vsel %vm4595_vm8, %v4598_v25, %v4600_v63  ;;  %v10025_v38 = vmul.u32.u64.low %v4610_v24, %v4609_v61  ;;  %v10026_v23 = vmul.u32.u64.high %v4610_v24, %v4609_v61, %v10025_v38 }
 0xbce   :  { %v4428_v42 = vsub.s32 32, %v4427_v9  ;;  %v4432_v54 = vsub.s32 4294967266, %v4427_v9  ;;  %v4525_v19 = vsub.s32 0, %v4523_v10  ;;  %v4429_v18 = vshll.u32 %v4420_v33, %v4427_v9 }
 0xbcf   :  { %v4620_v44 = vadd.s32 1, %v10018_v41  ;;  %vm4358_vm10 = vcmp.lt.s32.totalorder %v9884_v5, 0  ;;  %v4675_v51 = vadd.s32 1, %v6769_v32  ;;  %v4617_v28 = vmul.u32 %v4610_v24, %v4601_v16 }
 0xbd0   :  { %v4430_v46 = vshrl.u32 %v4412_v13, %v4428_v42  ;;  %v4433_v27 = vadd.s32 127, %v4432_v54  ;;  %v6762_v14 = vmin.u32 %v4525_v19, %v4523_v10  ;;  %vm4619_vm11 = vc.u32 %v10026_v23, %v10017_v12 }
 0xbd1   :  { %v4665_v52 = vand.u32 2147483647, %v9978_v17  ;;  %v4443_v33 = vsel %vm4358_vm10, %v4442_v0, %v9966_v47  ;;  %v4621_v11 = vsel %vm4619_vm11, %v4620_v44, %v10018_v41  ;;  %vm4676_vm12 = vcmp.gt.s32.totalorder %v4675_v51, 0 }
 0xbd2   :  { %v4431_v22 = vor.u32 %v4430_v46, %v4429_v18  ;;  %v4434_v49 = vshll.u32 %v4433_v27, 23  ;;  %v4527_v3 = vclz %v6762_v14  ;;  %v4622_v35 = vadd.s32 %v4621_v11, %v4617_v28 }
 0xbd3   :  { %v4677_v30 = vsel %vm4676_vm12, %v4675_v51, 0  ;;  %vm10039_vm13 = vcmp.le.f32.partialorder %v4356_v31, 0.7853982  ;;  %v4672_v39 = vand.u32 8388607, %v4665_v52  ;;  %v4515_v31 = vadd.s32 %v9962_v37, %v9970_v48 }
 0xbd4   :  { %v4435_v21 = vor.u32 4788187, %v4434_v49  ;;  %v6763_v45 = vadd.s32 4294967294, %v4527_v3  ;;  %v4438_v36 = vcvt.s32.f32 %v4431_v22  ;;  %v4679_v58 = vand.u32 31, %v4677_v30 }
 0xbd5   :  { %v4445_v34 = vsel %vm10039_vm13, 0, %v4443_v33  ;;  %v4623_v47 = vadd.s32 536870912, %v4622_v35  ;;  %v4545_v13 = vsub.s32 4, %v10007_v8  ;;  %v4673_v19 = vor.u32 8388608, %v4672_v39 }
 0xbd6   :  { %v4436_v20 = vand.u32 2147483647, %v4435_v21  ;;  %vm6764_vm14 = vcmp.lt.s32.totalorder %v6763_v45, 0  ;;  %v4680_v7 = vsub.s32 32, %v4679_v58  ;;  %v10051_v41 = vand.u32 3, %v4445_v34 }
 0xbd7   :  { %v4530_v26 = vsel %vm6764_vm14, 0, %v6763_v45  ;;  %v10049_v60 = vshrl.u32 %v4623_v47, 30  ;;  %vm4461_vm15 = vcmp.lt.s32.totalorder %v9886_v6, 0  ;;  %v4682_v27 = vshll.u32 %v7613_v50, %v4679_v58 }
 0xbd8   :  { %v4439_v40 = vmul.f32 %v4438_v36, %v4436_v20  ;;  %v4531_v25 = vsub.s32 32, %v4530_v26  ;;  %v4535_v63 = vsub.s32 4294967266, %v4530_v26  ;;  %v4532_v9 = vshll.u32 %v4523_v10, %v4530_v26 }
 0xbd9   :  { %v4625_v0 = vshll.u32 %v10049_v60, 30  ;;  %v4683_v37 = vshrl.u32 %v7614_v53, %v4680_v7  ;;  %v4686_v48 = vshrl.u32 %v7615_v55, %v4680_v7  ;;  %v10065_v10 = vshrl.u32 %v4677_v30, 5 }
 0xbda   :  { %v4440_v61 = vxor.u32 2147483648, %v4439_v40  ;;  %v4533_v42 = vshrl.u32 %v4515_v31, %v4531_v25  ;;  %v4536_v54 = vadd.s32 127, %v4535_v63  ;;  %v4689_v44 = vshrl.u32 %v7616_v57, %v4680_v7 }
 0xbdb   :  { %v10062_v46 = vsub.s32 %v4622_v35, %v4625_v0  ;;  %vm10071_vm0 = vcmp.le.f32.partialorder %v4459_v62, 0.7853982  ;;  %v4685_v51 = vshll.u32 %v7614_v53, %v4679_v58  ;;  %v4684_v3 = vor.u32 %v4683_v37, %v4682_v27 }
 0xbdc   :  { %v4441_v32 = vsel %vm4358_vm10, %v4440_v61, %v4439_v40  ;;  %v4534_v38 = vor.u32 %v4533_v42, %v4532_v9  ;;  %v4537_v18 = vshll.u32 %v4536_v54, 23  ;;  %v4688_v28 = vshll.u32 %v7615_v55, %v4679_v58 }
 0xbdd   :  { %v4444_v16 = vsel %vm10039_vm13, %v9884_v5, %v4441_v32  ;;  %v4628_v49 = vsub.s32 0, %v10062_v46  ;;  %v4691_v21 = vshll.u32 %v7616_v57, %v4679_v58  ;;  %v4692_v33 = vshrl.u32 %v7617_v59, %v4680_v7 }
 0xbde   :  { %7408 = vcosq.f32 %v4444_v16  ;;  %v4538_v22 = vor.u32 4788187, %v4537_v18  ;;  %v4541_v45 = vcvt.s32.f32 %v4534_v38  ;;  %v4687_v62 = vor.u32 %v4686_v48, %v4685_v51 }
 0xbdf   :  { %7410 = vsinq.f32 %v4444_v16  ;;  %v6766_v35 = vmin.u32 %v4628_v49, %v10062_v46  ;;  %v4690_v30 = vor.u32 %v4689_v44, %v4688_v28  ;;  %v4693_v24 = vor.u32 %v4692_v33, %v4691_v21 }
 0xbe0   :  { %v4539_v11 = vand.u32 2147483647, %v4538_v22  ;;  %v4694_v20 = vshll.u32 %v7617_v59, %v4679_v58  ;;  %v4695_v36 = vshrl.u32 %v7618_v2, %v4680_v7  ;;  %v4618_v47 = vadd.s32 %v10017_v12, %v10026_v23 }
 0xbe1   :  { %v4630_v40 = vclz %v6766_v35  ;;  %v4713_v26 = vshll.u32 %v4673_v19, 8  ;;  %v4681_v39 = vshrl.u32 %v7613_v50, %v4680_v7  ;;  %vm4697_vm1 = vcmp.lt.s32.totalorder %v10065_v10, 1 }
 0xbe2   :  { %v4542_v34 = vmul.f32 %v4541_v45, %v4539_v11  ;;  %v4696_v31 = vor.u32 %v4695_v36, %v4694_v20  ;;  %vm4698_vm3 = vcmp.lt.s32.totalorder %v10065_v10, 2  ;;  %vm4454_vm4 = vcmp.eq.s32.totalorder %v10051_v41, 2 }
 0xbe3   :  { %v6767_v63 = vadd.s32 4294967294, %v4630_v40  ;;  %vm4699_vm5 = vcmp.lt.s32.totalorder %v10065_v10, 3  ;;  %vm4700_vm6 = vcmp.lt.s32.totalorder %v10065_v10, 4  ;;  %v4701_v58 = vsel %vm4697_vm1, %v4681_v39, %v4684_v3 }
 0xbe4   :  { %v4543_v25 = vxor.u32 2147483648, %v4542_v34  ;;  %v4702_v61 = vsel %vm4700_vm6, %v4690_v30, 2102212464  ;;  %v4705_v12 = vsel %vm4697_vm1, %v4684_v3, %v4687_v62  ;;  %v4706_v23 = vsel %vm4700_vm6, %v4693_v24, 920167782 }
 0xbe5   :  { %vm6768_vm7 = vcmp.lt.s32.totalorder %v6767_v63, 0  ;;  %v4707_v9 = vsel %vm4699_vm5, %v4690_v30, %v4706_v23  ;;  %v4709_v42 = vsel %vm4697_vm1, %v4687_v62, %v4690_v30  ;;  %v4710_v19 = vsel %vm4700_vm6, %v4696_v31, 1326507024 }
 0xbe6   :  { %v4544_v7 = vsel %vm4461_vm15, %v4543_v25, %v4542_v34  ;;  %v4633_v0 = vsel %vm6768_vm7, 0, %v6767_v63  ;;  %v4708_v32 = vsel %vm4698_vm3, %v4705_v12, %v4707_v9  ;;  %v4703_v16 = vsel %vm4699_vm5, %v4687_v62, %v4702_v61 }
 0xbe7   :  { %v4547_v54 = vsel %vm10071_vm0, %v9886_v6, %v4544_v7  ;;  %v4634_v37 = vsub.s32 32, %v4633_v0  ;;  %v4638_v48 = vsub.s32 4294967266, %v4633_v0  ;;  %v4711_v38 = vsel %vm4699_vm5, %v4693_v24, %v4710_v19 }
 0xbe8   :  { %7412 = vcosq.f32 %v4547_v54  ;;  %v10104_v18 = vmul.u32.u64.low %v4713_v26, %v4708_v32  ;;  %v10105_v27 = vmul.u32.u64.high %v4713_v26, %v4708_v32, %v10104_v18  ;;  %v4635_v22 = vshll.u32 %v10062_v46, %v4633_v0 }
 0xbe9   :  { %7414 = vsinq.f32 %v4547_v54  ;;  %v4636_v49 = vshrl.u32 %v4618_v47, %v4634_v37  ;;  %v4639_v51 = vadd.s32 127, %v4638_v48  ;;  %v4712_v3 = vsel %vm4698_vm3, %v4709_v42, %v4711_v38 }
 0xbea   :  { %v4546_v33 = vsel %vm4461_vm15, %v4545_v13, %v10007_v8  ;;  %v10116_v11 = vmul.u32.u64.low %v4713_v26, %v4712_v3  ;;  %v10117_v45 = vmul.u32.u64.high %v4713_v26, %v4712_v3, %v10116_v11  ;;  %v4704_v46 = vsel %vm4698_vm3, %v4701_v58, %v4703_v16 }
 0xbeb   :  { %v7409_v44 = vpop.eup %7408  ;;  %v4637_v62 = vor.u32 %v4636_v49, %v4635_v22  ;;  %v4640_v30 = vshll.u32 %v4639_v51, 23  ;;  %vm4451_vm8 = vcmp.eq.s32.totalorder %v10051_v41, 0  ;;  %v4723_v20 = vadd.s32 1, %v10105_v27 }
 0xbec   :  { %v7411_v28 = vpop.eup %7410  ;;  %v4455_v21 = vxor.u32 2147483648, %v7409_v44  ;;  %vm4448_vm9 = vweird.f32 %v9884_v5  ;;  %vm4450_vm10 = vcmp.lt.s32.totalorder %v10051_v41, 2  ;;  %v4548_v34 = vsel %vm10071_vm0, 0, %v4546_v33 }
 0xbed   :  { %v4452_v35 = vxor.u32 2147483648, %v7411_v28  ;;  %v4641_v13 = vor.u32 4788187, %v4640_v30  ;;  %v4720_v47 = vmul.u32 %v4713_v26, %v4704_v46  ;;  %vm4722_vm11 = vc.u32 %v10117_v45, %v10104_v18 }
 0xbee   :  { %v4456_v24 = vsel %vm4454_vm4, %v4455_v21, %v7411_v28  ;;  %v4644_v39 = vcvt.s32.f32 %v4637_v62  ;;  %v4724_v31 = vsel %vm4722_vm11, %v4723_v20, %v10105_v27  ;;  %v4552_v41 = vand.u32 3, %v4548_v34 }
 0xbef   :  { %v4453_v8 = vsel %vm4451_vm8, %v7409_v44, %v4452_v35  ;;  %v4642_v40 = vand.u32 2147483647, %v4641_v13  ;;  %v4725_v5 = vadd.s32 %v4724_v31, %v4720_v47  ;;  %vm4564_vm12 = vcmp.lt.s32.totalorder %v9882_v4, 0 }
 0xbf0   :  { %v4457_v36 = vsel %vm4450_vm10, %v4453_v8, %v4456_v24  ;;  %vm10138_vm13 = vcmp.le.f32.partialorder %v4562_v56, 0.7853982  ;;  %vm4557_vm14 = vcmp.eq.s32.totalorder %v4552_v41, 2  ;;  %vm4554_vm15 = vcmp.eq.s32.totalorder %v4552_v41, 0 }
 0xbf1   :  { %v4458_v10 = vsel %vm4448_vm9, nan, %v4457_v36  ;;  %v4645_v25 = vmul.f32 %v4644_v39, %v4642_v40  ;;  %v4726_v63 = vadd.s32 536870912, %v4725_v5  ;;  %v4648_v32 = vsub.s32 4, %v10049_v60 }
 0xbf2   :  { %7048 = vmatprep.mubr.msk.f32.mxu0 %vm213_vm2, %v4458_v10  ;;  %vm4553_vm0 = vcmp.lt.s32.totalorder %v4552_v41, 2  ;;  %vm4551_vm1 = vweird.f32 %v9886_v6  ;;  %v4721_v6 = vadd.s32 %v10104_v18, %v10117_v45  ;;  %vm4654_vm7 = vweird.f32 %v9882_v4 }
 0xbf3   :  { %v4646_v58 = vxor.u32 2147483648, %v4645_v25  ;;  %v10134_v14 = vshrl.u32 %v4726_v63, 30  ;;  %v4649_v38 = vsel %vm4564_vm12, %v4648_v32, %v10049_v60  ;;  %vm4667_vm8 = vcmp.lt.s32.totalorder %v9978_v17, 0 }
 0xbf4   :  { %v4651_v44 = vsel %vm10138_vm13, 0, %v4649_v38  ;;  %vm4666_vm9 = vcmp.le.f32.partialorder %v4665_v52, 0.7853982 }
 0xbf5   :  { %v7413_v61 = vpop.eup %7412  ;;  %v4647_v7 = vsel %vm4564_vm12, %v4646_v58, %v4645_v25  ;;  %v4728_v54 = vshll.u32 %v10134_v14, 30  ;;  %v4655_v51 = vand.u32 3, %v4651_v44 }
 0xbf6   :  { %v7415_v26 = vpop.eup %7414  ;;  %v4558_v12 = vxor.u32 2147483648, %v7413_v61  ;;  %v4650_v42 = vsel %vm10138_vm13, %v9882_v4, %v4647_v7  ;;  %v4751_v4 = vsub.s32 4, %v10134_v14  ;;  %vm4757_vm13 = vweird.f32 %v9978_v17 }
 0xbf7   :  { %v4555_v9 = vxor.u32 2147483648, %v7415_v26  ;;  %7416 = vcosq.f32 %v4650_v42  ;;  %v4729_v19 = vsub.s32 %v4725_v5, %v4728_v54  ;;  %vm4660_vm4 = vcmp.eq.s32.totalorder %v4655_v51, 2  ;;  %v5354_v54 = vld [vmem:[#allocation11 + $0x100] sm:$0xff] }
 0xbf8   :  { %v4559_v0 = vsel %vm4557_vm14, %v4558_v12, %v7415_v26  ;;  %7418 = vsinq.f32 %v4650_v42  ;;  %vm4657_vm5 = vcmp.eq.s32.totalorder %v4655_v51, 0  ;;  %vm4656_vm6 = vcmp.lt.s32.totalorder %v4655_v51, 2  ;;  %v5356_v42 = vld [vmem:[#allocation11 + $0x110] sm:$0xff] }
 0xbf9   :  { %v4556_v56 = vsel %vm4554_vm15, %v7413_v61, %v4555_v9  ;;  %v4731_v16 = vsub.s32 0, %v4729_v19  ;;  %v4752_v5 = vsel %vm4667_vm8, %v4751_v4, %v10134_v14  ;;  %v5357_v9 = vld [vmem:[#allocation11 + $0x118] sm:$0xff]  ;;  %v5355_v14 = vld [vmem:[#allocation11 + $0x108] sm:$0xff] }
 0xbfa   :  { %v4560_v37 = vsel %vm4553_vm0, %v4556_v56, %v4559_v0  ;;  %v4754_v25 = vsel %vm4666_vm9, 0, %v4752_v5  ;;  %7054 = vmatprep.subr.mxu1 %v5357_v9 }
 0xbfb   :  { %v4561_v48 = vsel %vm4551_vm1, nan, %v4560_v37  ;;  %v6770_v27 = vmin.u32 %v4731_v16, %v4729_v19  ;;  %v4758_v41 = vand.u32 3, %v4754_v25  ;;  %7055 = vmatpush3.msra.mxu1 %v5357_v9  ;;  %v4924_v9 = vld [vmem:[#allocation9 + $0x200] sm:$0xff] }
 0xbfc   :  { %7049 = vmatmul.mubr.msk.f32.vlgmr.msra.gmra.mxu0 %vm213_vm2, %v4561_v48  ;;  %7056 = vmatprep.subr.mxu1 %v5356_v42 }
 0xbfd   :  { %v4733_v22 = vclz %v6770_v27  ;;  %vm4763_vm10 = vcmp.eq.s32.totalorder %v4758_v41, 2  ;;  %vm4760_vm11 = vcmp.eq.s32.totalorder %v4758_v41, 0  ;;  %vm4759_vm12 = vcmp.lt.s32.totalorder %v4758_v41, 2  ;;  %7057 = vmatpush3.msra.mxu1 %v5356_v42  ;;  %v4925_v42 = vld [vmem:[#allocation9 + $0x208] sm:$0xff] }
 0xbfe   :  { %7058 = vmatprep.subr.mxu1 %v5355_v14 }
 0xbff   :  { %v6771_v49 = vadd.s32 4294967294, %v4733_v22  ;;  %7059 = vmatpush3.msra.mxu1 %v5355_v14 }
 0xc00   :  { %7060 = vmatprep.subr.mxu1 %v5354_v54 }
 0xc01   :  { %vm6772_vm3 = vcmp.lt.s32.totalorder %v6771_v49, 0  ;;  %7061 = vmatpush3.msra.mxu1 %v5354_v54 }
 0xc02   :  { %v4736_v3 = vsel %vm6772_vm3, 0, %v6771_v49 }
 0xc03   :  { %v4737_v21 = vsub.s32 32, %v4736_v3  ;;  %v4741_v33 = vsub.s32 4294967266, %v4736_v3  ;;  %v4738_v60 = vshll.u32 %v4729_v19, %v4736_v3 }
 0xc04   :  { %v7417_v28 = vpop.eup %7416 }
 0xc05   :  { %v7419_v11 = vpop.eup %7418  ;;  %v4661_v35 = vxor.u32 2147483648, %v7417_v28  ;;  %v4739_v30 = vshrl.u32 %v4721_v6, %v4737_v21  ;;  %v4742_v46 = vadd.s32 127, %v4741_v33 }
 0xc06   :  { %v4658_v62 = vxor.u32 2147483648, %v7419_v11 }
 0xc07   :  { %v4662_v24 = vsel %vm4660_vm4, %v4661_v35, %v7419_v11  ;;  %v4740_v8 = vor.u32 %v4739_v30, %v4738_v60  ;;  %v4743_v13 = vshll.u32 %v4742_v46, 23 }
 0xc08   :  { %v4659_v20 = vsel %vm4657_vm5, %v7417_v28, %v4658_v62 }
 0xc09   :  { %v4663_v36 = vsel %vm4656_vm6, %v4659_v20, %v4662_v24  ;;  %v4744_v18 = vor.u32 4788187, %v4743_v13  ;;  %v4747_v47 = vcvt.s32.f32 %v4740_v8 }
 0xc0a   :  { %v4664_v34 = vsel %vm4654_vm7, nan, %v4663_v36 }
 0xc0b   :  { %7051 = vmatprep.mubr.msk.f32.mxu0 %vm213_vm2, %v4664_v34  ;;  %v4745_v45 = vand.u32 2147483647, %v4744_v18 }
 0xc0d   :  { %v4748_v10 = vmul.f32 %v4747_v47, %v4745_v45 }
 0xc0f   :  { %v4749_v40 = vxor.u32 2147483648, %v4748_v10 }
 0xc11   :  { %v4750_v39 = vsel %vm4667_vm8, %v4749_v40, %v4748_v10 }
 0xc12   :  { %v4753_v31 = vsel %vm4666_vm9, %v9978_v17, %v4750_v39  ;;  %v6774_v17 = vld [vmem:[%s11107_s5 + $0x7] ss:$0 sm:$0xff] }
 0xc13   :  { %7420 = vcosq.f32 %v4753_v31 }
 0xc14   :  { %7422 = vsinq.f32 %v4753_v31 }
 0xc20   :  { %v7421_v63 = vpop.eup %7420 }
 0xc21   :  { %v7423_v58 = vpop.eup %7422  ;;  %v4764_v61 = vxor.u32 2147483648, %v7421_v63 }
 0xc22   :  { %v4761_v26 = vxor.u32 2147483648, %v7423_v58 }
 0xc23   :  { %v4765_v12 = vsel %vm4763_vm10, %v4764_v61, %v7423_v58 }
 0xc24   :  { %v4762_v52 = vsel %vm4760_vm11, %v7421_v63, %v4761_v26 }
 0xc25   :  { %v4766_v23 = vsel %vm4759_vm12, %v4762_v52, %v4765_v12 }
 0xc26   :  { %v4767_v7 = vsel %vm4757_vm13, nan, %v4766_v23 }
 0xc27   :  { %7052 = vmatmul.mubr.msk.f32.gmra.mxu0 %vm213_vm2, %v4767_v7  ;;  %v4926_v7 = vld [vmem:[#allocation9 + $0x210] sm:$0xff] }
 0xcbc   :  { %v7050_v0 = vpop.f32.mrf.mxu0 }
 0xcbd   :  { %v4862_v19 = vadd.f32 %v7050_v0, %v6774_v17 }
 0xcbe   :  { %v4856_v32 = vpop.f32.mrf.mxu0 }
 0xcbf   :  { %v4857_v56 = vadd.f32 %v6774_v17, %v4856_v32  ;;  %v10175_v48 = vadd.f32 %v4862_v19, %v9556_v15  ;;  %v4934_v19 = vld [vmem:[#allocation9 + $0x228] sm:$0xff] }
 0xcc1   :  { %v10172_v37 = vadd.f32 %v4857_v56, %v9553_v29  ;;  %v4893_v22 = vmul.f32 %v10175_v48, %v10175_v48  ;;  %v4880_v15 = vsel %vm213_vm2, %v10175_v48, 0.0  ;;  %v4933_v56 = vld [vmem:[#allocation9 + $0x220] sm:$0xff] }
 0xcc3   :  { %v4892_v38 = vmul.f32 %v10172_v37, %v10172_v37  ;;  %v4879_v49 = vsel %vm213_vm2, %v10172_v37, 0.0  ;;  %v4897_v21 = vsel %vm213_vm2, %v4893_v22, 0.0 }
 0xcc4   :  { %v4881_v6 = vadd.f32 %v4880_v15, %v4879_v49 }
 0xcc5   :  { %v4896_v3 = vsel %vm213_vm2, %v4892_v38, 0.0 }
 0xcc6   :  { %v4898_v35 = vadd.f32 %v4897_v21, %v4896_v3 }
 0xce7   :  { %v7053_v16 = vpop.f32.mrf.mxu0 }
 0xce8   :  { %v4872_v27 = vadd.f32 %v7053_v16, %v6774_v17 }
 0xce9   :  { %v4866_v44 = vpop.f32.mrf.mxu0 }
 0xcea   :  { %v10184_v51 = vadd.f32 %v4872_v27, %v9565_v1  ;;  %v4867_v29 = vadd.f32 %v6774_v17, %v4866_v44  ;;  %v4935_v17 = vld [vmem:[#allocation9 + $0x230] sm:$0xff] }
 0xcec   :  { %v10190_v28 = vadd.f32 %v4867_v29, %v9571_v43  ;;  %v4895_v33 = vmul.f32 %v10184_v51, %v10184_v51  ;;  %v4884_v60 = vsel %vm213_vm2, %v10184_v51, 0.0 }
 0xcee   :  { %v4882_v11 = vsel %vm213_vm2, %v10190_v28, 0.0  ;;  %v4894_v1 = vmul.f32 %v10190_v28, %v10190_v28  ;;  %v4901_v24 = vsel %vm213_vm2, %v4895_v33, 0.0 }
 0xcef   :  { %v4883_v62 = vadd.f32 %v4882_v11, %v4881_v6 }
 0xcf0   :  { %v4899_v43 = vsel %vm213_vm2, %v4894_v1, 0.0 }
 0xcf1   :  { %v4885_v30 = vadd.f32 %v4884_v60, %v4883_v62  ;;  %v4900_v46 = vadd.f32 %v4899_v43, %v4898_v35 }
 0xcf3   :  { %v4886_v20 = vrot.slane %v4885_v30, 4  ;;  %v4902_v8 = vadd.f32 %v4901_v24, %v4900_v46 }
 0xcf5   :  { %v4887_v13 = vadd.f32 %v4886_v20, %v4885_v30  ;;  %v4903_v36 = vrot.slane %v4902_v8, 4 }
 0xcf7   :  { %v4888_v34 = vrot.slane %v4887_v13, 2  ;;  %v4904_v18 = vadd.f32 %v4903_v36, %v4902_v8  ;;  %v4927_v36 = vld [vmem:[#allocation9 + $0x218] sm:$0xff] }
 0xcf9   :  { %v4889_v45 = vadd.f32 %v4888_v34, %v4887_v13  ;;  %v4905_v47 = vrot.slane %v4904_v18, 2 }
 0xcfb   :  { %v4890_v10 = vrot.slane %v4889_v45, 1  ;;  %v4906_v40 = vadd.f32 %v4905_v47, %v4904_v18 }
 0xcfd   :  { %v4891_v39 = vadd.f32 %v4890_v10, %v4889_v45  ;;  %v4907_v31 = vrot.slane %v4906_v40, 1 }
 0xcff   :  { %v4908_v4 = vadd.f32 %v4907_v31, %v4906_v40  ;;  %v4909_v5 = vmul.f32 0.03125, %v4891_v39 }
 0xd01   :  { %v4910_v25 = vmul.f32 0.03125, %v4908_v4  ;;  %v4911_v41 = vmul.f32 %v4909_v5, %v4909_v5  ;;  %v4915_v61 = vsub.f32 %v10190_v28, %v4909_v5  ;;  %v4913_v26 = vsub.f32 %v10172_v37, %v4909_v5 }
 0xd02   :  { %v4914_v12 = vsub.f32 %v10175_v48, %v4909_v5  ;;  %v4916_v52 = vsub.f32 %v10184_v51, %v4909_v5 }
 0xd03   :  { %v4912_v63 = vsub.f32 %v4910_v25, %v4911_v41 }
 0xd05   :  { %v4917_v58 = vadd.f32 1e-05, %v4912_v63 }
 0xd07   :  { %7424 = vrsqrt.f32 %v4917_v58 }
 0xd14   :  { %v7425_v23 = vpop.eup %7424 }
 0xd15   :  { %v4921_v14 = vmul.f32 %v7425_v23, %v4915_v61  ;;  %v4919_v54 = vmul.f32 %v7425_v23, %v4913_v26  ;;  %v4920_v0 = vmul.f32 %v7425_v23, %v4914_v12  ;;  %v4922_v32 = vmul.f32 %v7425_v23, %v4916_v52 }
 0xd17   :  { %v4930_v16 = vmul.f32 %v4926_v7, %v4921_v14  ;;  %v4928_v38 = vmul.f32 %v4924_v9, %v4919_v54  ;;  %v4929_v27 = vmul.f32 %v4925_v42, %v4920_v0  ;;  %v10222_v10 = vmul.f32 %v4927_v36, %v4922_v32 }
 0xd19   :  { %v10207_v44 = vadd.f32 %v4935_v17, %v4930_v16  ;;  %v10209_v22 = vadd.f32 %v4933_v56, %v4928_v38  ;;  %v10211_v49 = vadd.f32 %v4934_v19, %v4929_v27 }
 0xd1b   :  { %v5150_v29 = vand.u32 2139095040, %v10207_v44  ;;  %v4941_v15 = vand.u32 2147483647, %v10209_v22  ;;  %v4944_v3 = vand.u32 2139095040, %v10209_v22  ;;  %v5044_v6 = vand.u32 2147483647, %v10211_v49 }
 0xd1c   :  { %v5047_v21 = vand.u32 2139095040, %v10211_v49  ;;  %v5147_v4 = vand.u32 2147483647, %v10207_v44 }
 0xd1d   :  { %v5151_v33 = vshrl.u32 %v5150_v29, 23  ;;  %v4945_v11 = vshrl.u32 %v4944_v3, 23  ;;  %v4948_v1 = vand.u32 8388607, %v4941_v15  ;;  %v5051_v62 = vand.u32 8388607, %v5044_v6 }
 0xd1e   :  { %v5048_v35 = vshrl.u32 %v5047_v21, 23 }
 0xd1f   :  { %v6787_v60 = vadd.s32 4294967169, %v5151_v33  ;;  %v6779_v43 = vadd.s32 4294967169, %v4945_v11  ;;  %v4949_v20 = vor.u32 8388608, %v4948_v1  ;;  %v5052_v8 = vor.u32 8388608, %v5051_v62 }
 0xd20   :  { %v6783_v30 = vadd.s32 4294967169, %v5048_v35 }
 0xd21   :  { %v5157_v46 = vadd.s32 1, %v6787_v60  ;;  %v4951_v24 = vadd.s32 1, %v6779_v43  ;;  %v10226_v39 = vshll.u32 %v4949_v20, 8  ;;  %v10228_v31 = vshll.u32 %v5052_v8, 8 }
 0xd22   :  { %v5054_v13 = vadd.s32 1, %v6783_v30 }
 0xd23   :  { %vm5158_vm14 = vcmp.gt.s32.totalorder %v5157_v46, 0  ;;  %vm4952_vm15 = vcmp.gt.s32.totalorder %v4951_v24, 0 }
 0xd24   :  { %v4953_v34 = vsel %vm4952_vm15, %v4951_v24, 0  ;;  %vm5055_vm0 = vcmp.gt.s32.totalorder %v5054_v13, 0  ;;  %v10224_v40 = vsel %vm5158_vm14, %v5157_v46, 0 }
 0xd25   :  { %v4954_v18 = vshrl.u32 %v4953_v34, 5  ;;  %v4955_v45 = vand.u32 31, %v4953_v34  ;;  %v5056_v47 = vsel %vm5055_vm0, %v5054_v13, 0 }
 0xd26   :  { %v10232_v41 = vshrl.u32 %v5056_v47, 5  ;;  %v5058_v63 = vand.u32 31, %v5056_v47 }
 0xd27   :  { %v4956_v5 = vsub.s32 32, %v4955_v45  ;;  %v4958_v25 = vshll.u32 %v7613_v50, %v4955_v45  ;;  %v4961_v58 = vshll.u32 %v7614_v53, %v4955_v45  ;;  %v4964_v61 = vshll.u32 %v7615_v55, %v4955_v45 }
 0xd28   :  { %v4967_v26 = vshll.u32 %v7616_v57, %v4955_v45  ;;  %v4970_v12 = vshll.u32 %v7617_v59, %v4955_v45  ;;  %vm4973_vm1 = vcmp.lt.s32.totalorder %v4954_v18, 1  ;;  %vm4974_vm3 = vcmp.lt.s32.totalorder %v4954_v18, 2 }
 0xd29   :  { %v4959_v52 = vshrl.u32 %v7614_v53, %v4956_v5  ;;  %v4962_v23 = vshrl.u32 %v7615_v55, %v4956_v5  ;;  %v4965_v7 = vshrl.u32 %v7616_v57, %v4956_v5  ;;  %v4957_v9 = vshrl.u32 %v7613_v50, %v4956_v5 }
 0xd2a   :  { %v4968_v42 = vshrl.u32 %v7617_v59, %v4956_v5  ;;  %v4971_v14 = vshrl.u32 %v7618_v2, %v4956_v5  ;;  %v5059_v17 = vsub.s32 32, %v5058_v63  ;;  %vm4975_vm4 = vcmp.lt.s32.totalorder %v4954_v18, 3 }
 0xd2b   :  { %v4960_v54 = vor.u32 %v4959_v52, %v4958_v25  ;;  %v4963_v0 = vor.u32 %v4962_v23, %v4961_v58  ;;  %v4966_v32 = vor.u32 %v4965_v7, %v4964_v61  ;;  %vm4976_vm5 = vcmp.lt.s32.totalorder %v4954_v18, 4 }
 0xd2c   :  { %v4969_v56 = vor.u32 %v4968_v42, %v4967_v26  ;;  %v4972_v19 = vor.u32 %v4971_v14, %v4970_v12  ;;  %v5061_v11 = vshll.u32 %v7613_v50, %v5058_v63  ;;  %v5062_v62 = vshrl.u32 %v7614_v53, %v5059_v17 }
 0xd2d   :  { %v4977_v16 = vsel %vm4973_vm1, %v4957_v9, %v4960_v54  ;;  %v4978_v38 = vsel %vm4976_vm5, %v4966_v32, 2102212464  ;;  %v4981_v27 = vsel %vm4973_vm1, %v4960_v54, %v4963_v0  ;;  %v4985_v29 = vsel %vm4973_vm1, %v4963_v0, %v4966_v32 }
 0xd2e   :  { %v4979_v3 = vsel %vm4975_vm4, %v4963_v0, %v4978_v38  ;;  %v4982_v21 = vsel %vm4976_vm5, %v4969_v56, 920167782  ;;  %v4986_v33 = vsel %vm4976_vm5, %v4972_v19, 1326507024  ;;  %v5064_v60 = vshll.u32 %v7614_v53, %v5058_v63 }
 0xd2f   :  { %v4983_v1 = vsel %vm4975_vm4, %v4966_v32, %v4982_v21  ;;  %v4987_v35 = vsel %vm4975_vm4, %v4969_v56, %v4986_v33  ;;  %v4980_v43 = vsel %vm4974_vm3, %v4977_v16, %v4979_v3  ;;  %v5065_v24 = vshrl.u32 %v7615_v55, %v5059_v17 }
 0xd30   :  { %v4984_v30 = vsel %vm4974_vm3, %v4981_v27, %v4983_v1  ;;  %v4988_v46 = vsel %vm4974_vm3, %v4985_v29, %v4987_v35  ;;  %v5063_v34 = vor.u32 %v5062_v62, %v5061_v11  ;;  %v5067_v47 = vshll.u32 %v7615_v55, %v5058_v63  ;;  %v4936_v11 = vld [vmem:[#allocation9 + $0x238] sm:$0xff] }
 0xd31   :  { %v10255_v20 = vmul.u32.u64.low %v10226_v39, %v4988_v46  ;;  %v10256_v8 = vmul.u32.u64.high %v10226_v39, %v4988_v46, %v10255_v20  ;;  %v10259_v13 = vmul.u32.u64.low %v10226_v39, %v4984_v30  ;;  %v10260_v36 = vmul.u32.u64.high %v10226_v39, %v4984_v30, %v10259_v13 }
 0xd32   :  { %v5066_v45 = vor.u32 %v5065_v24, %v5064_v60  ;;  %v5068_v5 = vshrl.u32 %v7616_v57, %v5059_v17  ;;  %v10266_v18 = vand.u32 31, %v10224_v40  ;;  %v5070_v25 = vshll.u32 %v7616_v57, %v5058_v63 }
 0xd33   :  { %v5071_v58 = vshrl.u32 %v7617_v59, %v5059_v17  ;;  %v5074_v61 = vshrl.u32 %v7618_v2, %v5059_v17  ;;  %v4996_v26 = vmul.u32 %v10226_v39, %v4980_v43  ;;  %v5060_v12 = vshrl.u32 %v7613_v50, %v5059_v17 }
 0xd34   :  { %v5069_v52 = vor.u32 %v5068_v5, %v5067_v47  ;;  %v5073_v23 = vshll.u32 %v7617_v59, %v5058_v63  ;;  %vm4998_vm6 = vc.u32 %v10256_v8, %v10259_v13  ;;  %v4999_v7 = vadd.s32 1, %v10260_v36 }
 0xd35   :  { %v5072_v9 = vor.u32 %v5071_v58, %v5070_v25  ;;  %vm5076_vm7 = vcmp.lt.s32.totalorder %v10232_v41, 1  ;;  %vm5078_vm8 = vcmp.lt.s32.totalorder %v10232_v41, 3  ;;  %vm5079_vm9 = vcmp.lt.s32.totalorder %v10232_v41, 4 }
 0xd36   :  { %v5075_v42 = vor.u32 %v5074_v61, %v5073_v23  ;;  %v5084_v14 = vsel %vm5076_vm7, %v5063_v34, %v5066_v45  ;;  %v5000_v39 = vsel %vm4998_vm6, %v4999_v7, %v10260_v36  ;;  %v5081_v54 = vsel %vm5079_vm9, %v5069_v52, 2102212464 }
 0xd37   :  { %v5085_v0 = vsel %vm5079_vm9, %v5072_v9, 920167782  ;;  %v5088_v32 = vsel %vm5076_vm7, %v5066_v45, %v5069_v52  ;;  %v5001_v63 = vadd.s32 %v5000_v39, %v4996_v26  ;;  %vm5077_vm10 = vcmp.lt.s32.totalorder %v10232_v41, 2 }
 0xd38   :  { %v5086_v17 = vsel %vm5078_vm8, %v5069_v52, %v5085_v0  ;;  %v5089_v56 = vsel %vm5079_vm9, %v5075_v42, 1326507024  ;;  %v5080_v19 = vsel %vm5076_vm7, %v5060_v12, %v5063_v34  ;;  %v5082_v16 = vsel %vm5078_vm8, %v5066_v45, %v5081_v54 }
 0xd39   :  { %v5087_v38 = vsel %vm5077_vm10, %v5084_v14, %v5086_v17  ;;  %v5090_v27 = vsel %vm5078_vm8, %v5072_v9, %v5089_v56  ;;  %v5002_v29 = vadd.s32 536870912, %v5001_v63  ;;  %v5162_v41 = vsub.s32 32, %v10266_v18 }
 0xd3a   :  { %v5091_v3 = vsel %vm5077_vm10, %v5088_v32, %v5090_v27  ;;  %v10283_v21 = vmul.u32.u64.low %v10228_v31, %v5087_v38  ;;  %v10284_v33 = vmul.u32.u64.high %v10228_v31, %v5087_v38, %v10283_v21  ;;  %v5083_v60 = vsel %vm5077_vm10, %v5080_v19, %v5082_v16 }
 0xd3b   :  { %v10288_v1 = vmul.u32.u64.low %v10228_v31, %v5091_v3  ;;  %v10289_v35 = vmul.u32.u64.high %v10228_v31, %v5091_v3, %v10288_v1  ;;  %v10292_v62 = vshrl.u32 %v5002_v29, 30  ;;  %v10295_v43 = vadd.f32 %v4936_v11, %v10222_v10 }
 0xd3c   :  { %v5102_v46 = vadd.s32 1, %v10284_v33  ;;  %v5154_v24 = vand.u32 8388607, %v5147_v4  ;;  %v10302_v20 = vshrl.u32 %v10224_v40, 5  ;;  %v5099_v36 = vmul.u32 %v10228_v31, %v5083_v60 }
 0xd3d   :  { %v5004_v30 = vshll.u32 %v10292_v62, 30  ;;  %vm5101_vm11 = vc.u32 %v10289_v35, %v10283_v21  ;;  %v5168_v34 = vshrl.u32 %v7615_v55, %v5162_v41  ;;  %v5171_v10 = vshrl.u32 %v7616_v57, %v5162_v41 }
 0xd3e   :  { %v5103_v47 = vsel %vm5101_vm11, %v5102_v46, %v10284_v33  ;;  %v5173_v5 = vshll.u32 %v7616_v57, %v10266_v18  ;;  %v5174_v25 = vshrl.u32 %v7617_v59, %v5162_v41  ;;  %v5165_v40 = vshrl.u32 %v7614_v53, %v5162_v41 }
 0xd3f   :  { %v5005_v45 = vsub.s32 %v5001_v63, %v5004_v30  ;;  %v5104_v58 = vadd.s32 %v5103_v47, %v5099_v36  ;;  %v5167_v31 = vshll.u32 %v7614_v53, %v10266_v18  ;;  %v5177_v61 = vshrl.u32 %v7618_v2, %v5162_v41 }
 0xd40   :  { %v5170_v12 = vshll.u32 %v7615_v55, %v10266_v18  ;;  %v5175_v52 = vor.u32 %v5174_v25, %v5173_v5  ;;  %v5176_v23 = vshll.u32 %v7617_v59, %v10266_v18  ;;  %v5155_v9 = vor.u32 8388608, %v5154_v24 }
 0xd41   :  { %v5007_v26 = vsub.s32 0, %v5005_v45  ;;  %v5105_v7 = vadd.s32 536870912, %v5104_v58  ;;  %v5164_v42 = vshll.u32 %v7613_v50, %v10266_v18  ;;  %v5169_v39 = vor.u32 %v5168_v34, %v5167_v31 }
 0xd42   :  { %v5172_v54 = vor.u32 %v5171_v10, %v5170_v12  ;;  %v5178_v0 = vor.u32 %v5177_v61, %v5176_v23  ;;  %vm5182_vm12 = vcmp.lt.s32.totalorder %v10302_v20, 4  ;;  %v5253_v19 = vand.u32 2139095040, %v10295_v43 }
 0xd43   :  { %v6780_v14 = vmin.u32 %v5007_v26, %v5005_v45  ;;  %v10323_v32 = vshrl.u32 %v5105_v7, 30  ;;  %v5166_v63 = vor.u32 %v5165_v40, %v5164_v42  ;;  %v5188_v56 = vsel %vm5182_vm12, %v5175_v52, 920167782 }
 0xd44   :  { %v4997_v16 = vadd.s32 %v10259_v13, %v10256_v8  ;;  %vm5179_vm13 = vcmp.lt.s32.totalorder %v10302_v20, 1  ;;  %v5195_v38 = vshll.u32 %v5155_v9, 8  ;;  %vm5181_vm14 = vcmp.lt.s32.totalorder %v10302_v20, 3 }
 0xd45   :  { %v5009_v17 = vclz %v6780_v14  ;;  %v5107_v18 = vshll.u32 %v10323_v32, 30  ;;  %v5191_v29 = vsel %vm5179_vm13, %v5169_v39, %v5172_v54  ;;  %v5192_v3 = vsel %vm5182_vm12, %v5178_v0, 1326507024 }
 0xd46   :  { %v5187_v11 = vsel %vm5179_vm13, %v5166_v63, %v5169_v39  ;;  %v5189_v8 = vsel %vm5181_vm14, %v5172_v54, %v5188_v56  ;;  %v5193_v13 = vsel %vm5181_vm14, %v5175_v52, %v5192_v3  ;;  %v5163_v1 = vshrl.u32 %v7613_v50, %v5162_v41 }
 0xd47   :  { %v6781_v27 = vadd.s32 4294967294, %v5009_v17  ;;  %v10338_v33 = vsub.s32 %v5104_v58, %v5107_v18  ;;  %vm5180_vm0 = vcmp.lt.s32.totalorder %v10302_v20, 2  ;;  %v5184_v60 = vsel %vm5182_vm12, %v5172_v54, 2102212464 }
 0xd48   :  { %v5194_v24 = vsel %vm5180_vm0, %v5191_v29, %v5193_v13  ;;  %v5254_v36 = vshrl.u32 %v5253_v19, 23  ;;  %v5027_v47 = vsub.s32 4, %v10292_v62  ;;  %v5190_v5 = vsel %vm5180_vm0, %v5187_v11, %v5189_v8 }
 0xd49   :  { %vm6782_vm15 = vcmp.lt.s32.totalorder %v6781_v27, 0  ;;  %v5110_v46 = vsub.s32 0, %v10338_v33  ;;  %v5183_v58 = vsel %vm5179_vm13, %v5163_v1, %v5166_v63  ;;  %v5185_v40 = vsel %vm5181_vm14, %v5169_v39, %v5184_v60 }
 0xd4a   :  { %v5012_v30 = vsel %vm6782_vm15, 0, %v6781_v27  ;;  %v10361_v26 = vmul.u32.u64.low %v5195_v38, %v5194_v24  ;;  %v10362_v12 = vmul.u32.u64.high %v5195_v38, %v5194_v24, %v10361_v26  ;;  %v6791_v9 = vadd.s32 4294967169, %v5254_v36 }
 0xd4b   :  { %v5013_v34 = vsub.s32 32, %v5012_v30  ;;  %v5017_v10 = vsub.s32 4294967266, %v5012_v30  ;;  %v5014_v41 = vshll.u32 %v5005_v45, %v5012_v30  ;;  %v6784_v25 = vmin.u32 %v5110_v46, %v10338_v33 }
 0xd4c   :  { %v10364_v23 = vmul.u32.u64.low %v5195_v38, %v5190_v5  ;;  %v10365_v7 = vmul.u32.u64.high %v5195_v38, %v5190_v5, %v10364_v23  ;;  %v5186_v14 = vsel %vm5180_vm0, %v5183_v58, %v5185_v40  ;;  %vm10372_vm1 = vcmp.le.f32.partialorder %v4941_v15, 0.7853982 }
 0xd4d   :  { %v5015_v31 = vshrl.u32 %v4997_v16, %v5013_v34  ;;  %v5018_v61 = vadd.s32 127, %v5017_v10  ;;  %v5112_v52 = vclz %v6784_v25  ;;  %vm4943_vm3 = vcmp.lt.s32.totalorder %v10209_v22, 0 }
 0xd4e   :  { %v5260_v0 = vadd.s32 1, %v6791_v9  ;;  %v5028_v17 = vsel %vm4943_vm3, %v5027_v47, %v10292_v62  ;;  %vm5204_vm4 = vc.u32 %v10362_v12, %v10364_v23  ;;  %v5250_v20 = vand.u32 2147483647, %v10295_v43 }
 0xd4f   :  { %v5016_v45 = vor.u32 %v5015_v31, %v5014_v41  ;;  %v5019_v42 = vshll.u32 %v5018_v61, 23  ;;  %v6785_v54 = vadd.s32 4294967294, %v5112_v52  ;;  %v5202_v56 = vmul.u32 %v5195_v38, %v5186_v14 }
 0xd50   :  { %v5205_v15 = vadd.s32 1, %v10365_v7  ;;  %vm5261_vm6 = vcmp.gt.s32.totalorder %v5260_v0, 0  ;;  %v5100_v29 = vadd.s32 %v10283_v21, %v10289_v35  ;;  %v5030_v13 = vsel %vm10372_vm1, 0, %v5028_v17 }
 0xd51   :  { %v5020_v63 = vor.u32 4788187, %v5019_v42  ;;  %vm6786_vm5 = vcmp.lt.s32.totalorder %v6785_v54, 0  ;;  %v5023_v16 = vcvt.s32.f32 %v5016_v45  ;;  %v5262_v27 = vsel %vm5261_vm6, %v5260_v0, 0 }
 0xd52   :  { %v5115_v18 = vsel %vm6786_vm5, 0, %v6785_v54  ;;  %v5206_v62 = vsel %vm5204_vm4, %v5205_v15, %v10365_v7  ;;  %v5264_v38 = vand.u32 31, %v5262_v27  ;;  %v5257_v24 = vand.u32 8388607, %v5250_v20 }
 0xd53   :  { %v5021_v19 = vand.u32 2147483647, %v5020_v63  ;;  %v5116_v3 = vsub.s32 32, %v5115_v18  ;;  %v5120_v11 = vsub.s32 4294967266, %v5115_v18  ;;  %v5207_v1 = vadd.s32 %v5206_v62, %v5202_v56 }
 0xd54   :  { %v5117_v60 = vshll.u32 %v10338_v33, %v5115_v18  ;;  %v5265_v21 = vsub.s32 32, %v5264_v38  ;;  %v10394_v5 = vand.u32 3, %v5030_v13  ;;  %vm5046_vm7 = vcmp.lt.s32.totalorder %v10211_v49, 0 }
 0xd55   :  { %v5024_v8 = vmul.f32 %v5023_v16, %v5021_v19  ;;  %v5118_v30 = vshrl.u32 %v5100_v29, %v5116_v3  ;;  %v5121_v46 = vadd.s32 127, %v5120_v11  ;;  %v5208_v34 = vadd.s32 536870912, %v5207_v1 }
 0xd56   :  { %v5258_v58 = vor.u32 8388608, %v5257_v24  ;;  %v5268_v40 = vshrl.u32 %v7614_v53, %v5265_v21  ;;  %v5267_v61 = vshll.u32 %v7613_v50, %v5264_v38  ;;  %v5271_v26 = vshrl.u32 %v7615_v55, %v5265_v21 }
 0xd57   :  { %v5025_v36 = vxor.u32 2147483648, %v5024_v8  ;;  %v5119_v35 = vor.u32 %v5118_v30, %v5117_v60  ;;  %v5122_v10 = vshll.u32 %v5121_v46, 23  ;;  %v10397_v41 = vshrl.u32 %v5208_v34, 30 }
 0xd58   :  { %v5274_v9 = vshrl.u32 %v7616_v57, %v5265_v21  ;;  %v5270_v42 = vshll.u32 %v7614_v53, %v5264_v38  ;;  %v5273_v14 = vshll.u32 %v7615_v55, %v5264_v38  ;;  %v5277_v39 = vshrl.u32 %v7617_v59, %v5265_v21 }
 0xd59   :  { %v5026_v47 = vsel %vm4943_vm3, %v5025_v36, %v5024_v8  ;;  %v5123_v25 = vor.u32 4788187, %v5122_v10  ;;  %v5210_v31 = vshll.u32 %v10397_v41, 30  ;;  %v5126_v7 = vcvt.s32.f32 %v5119_v35 }
 0xd5a   :  { %v5029_v33 = vsel %vm10372_vm1, %v10209_v22, %v5026_v47  ;;  %v5263_v0 = vshrl.u32 %v5262_v27, 5  ;;  %v5269_v63 = vor.u32 %v5268_v40, %v5267_v61  ;;  %v5276_v17 = vshll.u32 %v7616_v57, %v5264_v38 }
 0xd5b   :  { %7426 = vcosq.f32 %v5029_v33  ;;  %v5124_v52 = vand.u32 2147483647, %v5123_v25  ;;  %v10407_v45 = vsub.s32 %v5207_v1, %v5210_v31  ;;  %v5272_v15 = vor.u32 %v5271_v26, %v5270_v42 }
 0xd5c   :  { %7428 = vsinq.f32 %v5029_v33  ;;  %v5275_v19 = vor.u32 %v5274_v9, %v5273_v14  ;;  %v5280_v16 = vshrl.u32 %v7618_v2, %v5265_v21  ;;  %vm10417_vm8 = vcmp.le.f32.partialorder %v5044_v6, 0.7853982 }
 0xd5d   :  { %v5127_v54 = vmul.f32 %v5126_v7, %v5124_v52  ;;  %v5213_v56 = vsub.s32 0, %v10407_v45  ;;  %v5278_v3 = vor.u32 %v5277_v39, %v5276_v17  ;;  %v5279_v11 = vshll.u32 %v7617_v59, %v5264_v38 }
 0xd5e   :  { %v5130_v27 = vsub.s32 4, %v10323_v32  ;;  %v5266_v8 = vshrl.u32 %v7613_v50, %v5265_v21  ;;  %v5298_v13 = vshll.u32 %v5258_v58, 8  ;;  %vm5039_vm9 = vcmp.eq.s32.totalorder %v10394_v5, 2 }
 0xd5f   :  { %v5128_v29 = vxor.u32 2147483648, %v5127_v54  ;;  %v6788_v62 = vmin.u32 %v5213_v56, %v10407_v45  ;;  %v5281_v6 = vor.u32 %v5280_v16, %v5279_v11  ;;  %vm5282_vm10 = vcmp.lt.s32.totalorder %v5263_v0, 1 }
 0xd60   :  { %vm5285_vm11 = vcmp.lt.s32.totalorder %v5263_v0, 4  ;;  %vm5036_vm12 = vcmp.eq.s32.totalorder %v10394_v5, 0  ;;  %v5290_v46 = vsel %vm5282_vm10, %v5269_v63, %v5272_v15  ;;  %vm5283_vm13 = vcmp.lt.s32.totalorder %v5263_v0, 2 }
 0xd61   :  { %v5129_v1 = vsel %vm5046_vm7, %v5128_v29, %v5127_v54  ;;  %v5215_v60 = vclz %v6788_v62  ;;  %v5287_v30 = vsel %vm5285_vm11, %v5275_v19, 2102212464  ;;  %vm5284_vm14 = vcmp.lt.s32.totalorder %v5263_v0, 3 }
 0xd62   :  { %v5132_v38 = vsel %vm10417_vm8, %v10211_v49, %v5129_v1  ;;  %v5291_v24 = vsel %vm5285_vm11, %v5278_v3, 920167782  ;;  %v5294_v21 = vsel %vm5282_vm10, %v5272_v15, %v5275_v19  ;;  %v5286_v35 = vsel %vm5282_vm10, %v5266_v8, %v5269_v63 }
 0xd63   :  { %7430 = vcosq.f32 %v5132_v38  ;;  %v6789_v36 = vadd.s32 4294967294, %v5215_v60  ;;  %v5292_v34 = vsel %vm5284_vm14, %v5275_v19, %v5291_v24  ;;  %v5288_v10 = vsel %vm5284_vm14, %v5272_v15, %v5287_v30 }
 0xd64   :  { %7432 = vsinq.f32 %v5132_v38  ;;  %v5293_v47 = vsel %vm5283_vm13, %v5290_v46, %v5292_v34  ;;  %v5295_v33 = vsel %vm5285_vm11, %v5281_v6, 1326507024  ;;  %v5131_v61 = vsel %vm5046_vm7, %v5130_v27, %v10323_v32 }
 0xd65   :  { %vm6790_vm15 = vcmp.lt.s32.totalorder %v6789_v36, 0  ;;  %v5296_v25 = vsel %vm5284_vm14, %v5278_v3, %v5295_v33  ;;  %v10436_v58 = vmul.u32.u64.low %v5298_v13, %v5293_v47  ;;  %v10437_v40 = vmul.u32.u64.high %v5298_v13, %v5293_v47, %v10436_v58  ;;  %v6796_v33 = vld [vmem:[%s11107_s5 + $0x8] ss:$0 sm:$0xff] }
 0xd66   :  { %v5203_v26 = vadd.s32 %v10364_v23, %v10362_v12  ;;  %v5218_v52 = vsel %vm6790_vm15, 0, %v6789_v36  ;;  %v5297_v7 = vsel %vm5283_vm13, %v5294_v21, %v5296_v25  ;;  %v5289_v54 = vsel %vm5283_vm13, %v5286_v35, %v5288_v10 }
 0xd67   :  { %v5219_v14 = vsub.s32 32, %v5218_v52  ;;  %v5223_v39 = vsub.s32 4294967266, %v5218_v52  ;;  %v5220_v17 = vshll.u32 %v10407_v45, %v5218_v52  ;;  %v5308_v23 = vadd.s32 1, %v10437_v40 }
 0xd68   :  { %v7427_v31 = vpop.eup %7426  ;;  %v10448_v56 = vmul.u32.u64.low %v5298_v13, %v5297_v7  ;;  %v10449_v15 = vmul.u32.u64.high %v5298_v13, %v5297_v7, %v10448_v56  ;;  %vm5035_vm0 = vcmp.lt.s32.totalorder %v10394_v5, 2  ;;  %v5133_v0 = vsel %vm10417_vm8, 0, %v5131_v61 }
 0xd69   :  { %v7429_v9 = vpop.eup %7428  ;;  %v5040_v42 = vxor.u32 2147483648, %v7427_v31  ;;  %v5221_v19 = vshrl.u32 %v5203_v26, %v5219_v14  ;;  %v5224_v12 = vadd.s32 127, %v5223_v39  ;;  %vm5033_vm1 = vweird.f32 %v10209_v22 }
 0xd6a   :  { %v5037_v63 = vxor.u32 2147483648, %v7429_v9  ;;  %v5305_v27 = vmul.u32 %v5298_v13, %v5289_v54  ;;  %vm5307_vm3 = vc.u32 %v10449_v15, %v10436_v58  ;;  %v5137_v62 = vand.u32 3, %v5133_v0 }
 0xd6b   :  { %v5041_v32 = vsel %vm5039_vm9, %v5040_v42, %v7429_v9  ;;  %v5222_v29 = vor.u32 %v5221_v19, %v5220_v17  ;;  %v5225_v3 = vshll.u32 %v5224_v12, 23  ;;  %v5309_v5 = vsel %vm5307_vm3, %v5308_v23, %v10437_v40 }
 0xd6c   :  { %v5038_v16 = vsel %vm5036_vm12, %v7427_v31, %v5037_v63  ;;  %v5310_v1 = vadd.s32 %v5309_v5, %v5305_v27  ;;  %vm5142_vm4 = vcmp.eq.s32.totalorder %v5137_v62, 2  ;;  %vm5139_vm5 = vcmp.eq.s32.totalorder %v5137_v62, 0 }
 0xd6d   :  { %v5042_v45 = vsel %vm5035_vm0, %v5038_v16, %v5041_v32  ;;  %v5226_v8 = vor.u32 4788187, %v5225_v3  ;;  %v5229_v38 = vcvt.s32.f32 %v5222_v29  ;;  %vm5138_vm6 = vcmp.lt.s32.totalorder %v5137_v62, 2 }
 0xd6e   :  { %v5043_v11 = vsel %vm5033_vm1, nan, %v5042_v45  ;;  %v5311_v30 = vadd.s32 536870912, %v5310_v1  ;;  %vm5136_vm7 = vweird.f32 %v10211_v49  ;;  %vm5149_vm8 = vcmp.lt.s32.totalorder %v10207_v44, 0 }
 0xd6f   :  { %7062 = vmatprep.mubr.msk.f32.mxu1 %vm213_vm2, %v5043_v11  ;;  %v5227_v18 = vand.u32 2147483647, %v5226_v8  ;;  %vm10468_vm9 = vcmp.le.f32.partialorder %v5147_v4, 0.7853982  ;;  %v5233_v49 = vsub.s32 4, %v10397_v41  ;;  %v5306_v39 = vadd.s32 %v10436_v58, %v10449_v15 }
 0xd70   :  { %v7431_v6 = vpop.eup %7430  ;;  %v5312_v36 = vshrl.u32 %v5311_v30, 30  ;;  %vm5239_vm14 = vweird.f32 %v10207_v44  ;;  %vm5252_vm15 = vcmp.lt.s32.totalorder %v10295_v43, 0  ;;  %vm5251_vm0 = vcmp.le.f32.partialorder %v5250_v20, 0.7853982 }
 0xd71   :  { %v7433_v60 = vpop.eup %7432  ;;  %v5143_v22 = vxor.u32 2147483648, %v7431_v6  ;;  %v5230_v24 = vmul.f32 %v5229_v38, %v5227_v18  ;;  %v5234_v52 = vsel %vm5149_vm8, %v5233_v49, %v10397_v41 }
 0xd72   :  { %v5140_v46 = vxor.u32 2147483648, %v7433_v60  ;;  %v5313_v10 = vshll.u32 %v5312_v36, 30  ;;  %v5236_v9 = vsel %vm10468_vm9, 0, %v5234_v52 }
 0xd73   :  { %v5144_v13 = vsel %vm5142_vm4, %v5143_v22, %v7433_v60  ;;  %v5231_v21 = vxor.u32 2147483648, %v5230_v24  ;;  %v5240_v14 = vand.u32 3, %v5236_v9 }
 0xd74   :  { %v5141_v34 = vsel %vm5139_vm5, %v7431_v6, %v5140_v46  ;;  %v5314_v31 = vsub.s32 %v5310_v1, %v5313_v10  ;;  %v5336_v6 = vsub.s32 4, %v5312_v36  ;;  %vm5342_vm5 = vweird.f32 %v10295_v43  ;;  %v5936_v10 = vld [vmem:[#allocation11 + $0x120] sm:$0xff] }
 0xd75   :  { %v5145_v35 = vsel %vm5138_vm6, %v5141_v34, %v5144_v13  ;;  %v5232_v25 = vsel %vm5149_vm8, %v5231_v21, %v5230_v24  ;;  %vm5245_vm11 = vcmp.eq.s32.totalorder %v5240_v14, 2  ;;  %vm5242_vm12 = vcmp.eq.s32.totalorder %v5240_v14, 0  ;;  %v5939_v21 = vld [vmem:[#allocation11 + $0x138] sm:$0xff] }
 0xd76   :  { %v5146_v47 = vsel %vm5136_vm7, nan, %v5145_v35  ;;  %v5235_v40 = vsel %vm10468_vm9, %v10207_v44, %v5232_v25  ;;  %v5316_v61 = vsub.s32 0, %v5314_v31  ;;  %vm5241_vm13 = vcmp.lt.s32.totalorder %v5240_v14, 2  ;;  %v5938_v35 = vld [vmem:[#allocation11 + $0x130] sm:$0xff]  ;;  %7068 = vmatprep.subr.mxu0 %v5939_v21  ;;  %7082 = vmatprep.subr.mxu1 %v5939_v21 }
 0xd77   :  { %7063 = vmatmul.mubr.msk.f32.vlgmr.msra.gmra.mxu1 %vm213_vm2, %v5146_v47  ;;  %7434 = vcosq.f32 %v5235_v40  ;;  %v5337_v44 = vsel %vm5252_vm15, %v5336_v6, %v5312_v36  ;;  %7069 = vmatpush3.msra.mxu0 %v5939_v21  ;;  %v5937_v36 = vld [vmem:[#allocation11 + $0x128] sm:$0xff] }
 0xd78   :  { %7436 = vsinq.f32 %v5235_v40  ;;  %v6792_v26 = vmin.u32 %v5316_v61, %v5314_v31  ;;  %v5339_v18 = vsel %vm5251_vm0, 0, %v5337_v44  ;;  %7086 = vmatpush3.msra.mxu1 %v5939_v21  ;;  %7070 = vmatprep.subr.mxu0 %v5938_v35  ;;  %v5506_v21 = vld [vmem:[#allocation9 + $0x240] sm:$0xff] }
 0xd79   :  { %v5343_v38 = vand.u32 3, %v5339_v18  ;;  %7083 = vmatprep.subr.mxu1 %v5938_v35  ;;  %7071 = vmatpush3.msra.mxu0 %v5938_v35 }
 0xd7a   :  { %v5318_v4 = vclz %v6792_v26  ;;  %7087 = vmatpush3.msra.mxu1 %v5938_v35  ;;  %7072 = vmatprep.subr.mxu0 %v5937_v36 }
 0xd7b   :  { %vm5348_vm1 = vcmp.eq.s32.totalorder %v5343_v38, 2  ;;  %vm5345_vm3 = vcmp.eq.s32.totalorder %v5343_v38, 0  ;;  %vm5344_vm4 = vcmp.lt.s32.totalorder %v5343_v38, 2  ;;  %7084 = vmatprep.subr.mxu1 %v5937_v36  ;;  %7073 = vmatpush3.msra.mxu0 %v5937_v36 }
 0xd7c   :  { %v6793_v7 = vadd.s32 4294967294, %v5318_v4  ;;  %7088 = vmatpush3.msra.mxu1 %v5937_v36  ;;  %7074 = vmatprep.subr.mxu0 %v5936_v10 }
 0xd7d   :  { %7085 = vmatprep.subr.mxu1 %v5936_v10  ;;  %7075 = vmatpush3.msra.mxu0 %v5936_v10 }
 0xd7e   :  { %vm6794_vm10 = vcmp.lt.s32.totalorder %v6793_v7, 0  ;;  %7089 = vmatpush3.msra.mxu1 %v5936_v10 }
 0xd7f   :  { %v5321_v42 = vsel %vm6794_vm10, 0, %v6793_v7 }
 0xd80   :  { %v5322_v54 = vsub.s32 32, %v5321_v42  ;;  %v5326_v63 = vsub.s32 4294967266, %v5321_v42  ;;  %v5323_v56 = vshll.u32 %v5314_v31, %v5321_v42 }
 0xd82   :  { %v5324_v32 = vshrl.u32 %v5306_v39, %v5322_v54  ;;  %v5327_v19 = vadd.s32 127, %v5326_v63 }
 0xd84   :  { %v7435_v17 = vpop.eup %7434  ;;  %v5325_v16 = vor.u32 %v5324_v32, %v5323_v56  ;;  %v5328_v0 = vshll.u32 %v5327_v19, 23 }
 0xd85   :  { %v7437_v12 = vpop.eup %7436  ;;  %v5246_v23 = vxor.u32 2147483648, %v7435_v17 }
 0xd86   :  { %v5243_v41 = vxor.u32 2147483648, %v7437_v12  ;;  %v5329_v3 = vor.u32 4788187, %v5328_v0  ;;  %v5332_v27 = vcvt.s32.f32 %v5325_v16 }
 0xd87   :  { %v5247_v45 = vsel %vm5245_vm11, %v5246_v23, %v7437_v12 }
 0xd88   :  { %v5244_v29 = vsel %vm5242_vm12, %v7435_v17, %v5243_v41  ;;  %v5330_v11 = vand.u32 2147483647, %v5329_v3 }
 0xd89   :  { %v5248_v58 = vsel %vm5241_vm13, %v5244_v29, %v5247_v45 }
 0xd8a   :  { %v5249_v15 = vsel %vm5239_vm14, nan, %v5248_v58  ;;  %v5333_v62 = vmul.f32 %v5332_v27, %v5330_v11 }
 0xd8b   :  { %7065 = vmatprep.mubr.msk.f32.mxu1 %vm213_vm2, %v5249_v15 }
 0xd8c   :  { %v5334_v8 = vxor.u32 2147483648, %v5333_v62 }
 0xd8e   :  { %v5335_v5 = vsel %vm5252_vm15, %v5334_v8, %v5333_v62 }
 0xd8f   :  { %v5338_v1 = vsel %vm5251_vm0, %v10295_v43, %v5335_v5 }
 0xd90   :  { %7438 = vcosq.f32 %v5338_v1 }
 0xd91   :  { %7440 = vsinq.f32 %v5338_v1 }
 0xd9d   :  { %v7439_v60 = vpop.eup %7438 }
 0xd9e   :  { %v7441_v22 = vpop.eup %7440  ;;  %v5349_v30 = vxor.u32 2147483648, %v7439_v60 }
 0xd9f   :  { %v5346_v46 = vxor.u32 2147483648, %v7441_v22 }
 0xda0   :  { %v5350_v24 = vsel %vm5348_vm1, %v5349_v30, %v7441_v22 }
 0xda1   :  { %v5347_v13 = vsel %vm5345_vm3, %v7439_v60, %v5346_v46 }
 0xda2   :  { %v5351_v20 = vsel %vm5344_vm4, %v5347_v13, %v5350_v24 }
 0xda3   :  { %v5352_v34 = vsel %vm5342_vm5, nan, %v5351_v20 }
 0xda4   :  { %7066 = vmatmul.mubr.msk.f32.gmra.mxu1 %vm213_vm2, %v5352_v34  ;;  %v5508_v34 = vld [vmem:[#allocation9 + $0x250] sm:$0xff] }
 0xe37   :  { %v7064_v43 = vpop.f32.mrf.mxu1 }
 0xe38   :  { %v5448_v40 = vadd.f32 %v7064_v43, %v6796_v33  ;;  %v5507_v43 = vld [vmem:[#allocation9 + $0x248] sm:$0xff] }
 0xe39   :  { %v5442_v47 = vpop.f32.mrf.mxu1 }
 0xe3a   :  { %v5443_v25 = vadd.f32 %v6796_v33, %v5442_v47  ;;  %v5475_v61 = vmul.f32 %v5448_v40, %v5448_v40  ;;  %v5462_v7 = vsel %vm213_vm2, %v5448_v40, 0.0 }
 0xe3c   :  { %v5474_v31 = vmul.f32 %v5443_v25, %v5443_v25  ;;  %v5461_v26 = vsel %vm213_vm2, %v5443_v25, 0.0  ;;  %v5479_v39 = vsel %vm213_vm2, %v5475_v61, 0.0 }
 0xe3d   :  { %v5463_v14 = vadd.f32 %v5462_v7, %v5461_v26 }
 0xe3e   :  { %v5478_v9 = vsel %vm213_vm2, %v5474_v31, 0.0  ;;  %v5515_v31 = vld [vmem:[#allocation9 + $0x260] sm:$0xff] }
 0xe3f   :  { %v5480_v56 = vadd.f32 %v5479_v39, %v5478_v9 }
 0xe64   :  { %v7067_v49 = vpop.f32.mrf.mxu1 }
 0xe65   :  { %v5458_v52 = vadd.f32 %v7067_v49, %v6796_v33 }
 0xe66   :  { %v5452_v4 = vpop.f32.mrf.mxu1 }
 0xe67   :  { %v5453_v42 = vadd.f32 %v6796_v33, %v5452_v4  ;;  %v5477_v54 = vmul.f32 %v5458_v52, %v5458_v52  ;;  %v5466_v19 = vsel %vm213_vm2, %v5458_v52, 0.0  ;;  %v5517_v33 = vld [vmem:[#allocation9 + $0x270] sm:$0xff] }
 0xe69   :  { %v5464_v63 = vsel %vm213_vm2, %v5453_v42, 0.0  ;;  %v5476_v17 = vmul.f32 %v5453_v42, %v5453_v42  ;;  %v5483_v16 = vsel %vm213_vm2, %v5477_v54, 0.0 }
 0xe6a   :  { %v5465_v32 = vadd.f32 %v5464_v63, %v5463_v14 }
 0xe6b   :  { %v5481_v12 = vsel %vm213_vm2, %v5476_v17, 0.0 }
 0xe6c   :  { %v5467_v23 = vadd.f32 %v5466_v19, %v5465_v32  ;;  %v5482_v41 = vadd.f32 %v5481_v12, %v5480_v56 }
 0xe6e   :  { %v5468_v0 = vrot.slane %v5467_v23, 4  ;;  %v5484_v45 = vadd.f32 %v5483_v16, %v5482_v41 }
 0xe70   :  { %v5469_v29 = vadd.f32 %v5468_v0, %v5467_v23  ;;  %v5485_v3 = vrot.slane %v5484_v45, 4 }
 0xe72   :  { %v5470_v58 = vrot.slane %v5469_v29, 2  ;;  %v5486_v15 = vadd.f32 %v5485_v3, %v5484_v45  ;;  %v5509_v45 = vld [vmem:[#allocation9 + $0x258] sm:$0xff] }
 0xe74   :  { %v5471_v11 = vadd.f32 %v5470_v58, %v5469_v29  ;;  %v5487_v27 = vrot.slane %v5486_v15, 2 }
 0xe76   :  { %v5472_v62 = vrot.slane %v5471_v11, 1  ;;  %v5488_v8 = vadd.f32 %v5487_v27, %v5486_v15 }
 0xe78   :  { %v5473_v5 = vadd.f32 %v5472_v62, %v5471_v11  ;;  %v5489_v1 = vrot.slane %v5488_v8, 1 }
 0xe7a   :  { %v5490_v6 = vadd.f32 %v5489_v1, %v5488_v8  ;;  %v5491_v44 = vmul.f32 0.03125, %v5473_v5 }
 0xe7c   :  { %v5492_v18 = vmul.f32 0.03125, %v5490_v6  ;;  %v5493_v38 = vmul.f32 %v5491_v44, %v5491_v44  ;;  %v5498_v60 = vsub.f32 %v5458_v52, %v5491_v44  ;;  %v5496_v46 = vsub.f32 %v5448_v40, %v5491_v44  ;;  %v5516_v40 = vld [vmem:[#allocation9 + $0x268] sm:$0xff] }
 0xe7d   :  { %v5497_v24 = vsub.f32 %v5453_v42, %v5491_v44  ;;  %v5495_v13 = vsub.f32 %v5443_v25, %v5491_v44 }
 0xe7e   :  { %v5494_v22 = vsub.f32 %v5492_v18, %v5493_v38 }
 0xe80   :  { %v5499_v30 = vadd.f32 1e-05, %v5494_v22 }
 0xe82   :  { %7442 = vrsqrt.f32 %v5499_v30 }
 0xe8f   :  { %v7443_v20 = vpop.eup %7442 }
 0xe90   :  { %v5503_v35 = vmul.f32 %v7443_v20, %v5497_v24  ;;  %v5501_v36 = vmul.f32 %v7443_v20, %v5495_v13  ;;  %v5502_v10 = vmul.f32 %v7443_v20, %v5496_v46  ;;  %v5504_v47 = vmul.f32 %v7443_v20, %v5498_v60 }
 0xe92   :  { %v5512_v49 = vmul.f32 %v5508_v34, %v5503_v35  ;;  %v5510_v61 = vmul.f32 %v5506_v21, %v5501_v36  ;;  %v5511_v26 = vmul.f32 %v5507_v43, %v5502_v10  ;;  %v10516_v27 = vmul.f32 %v5509_v45, %v5504_v47 }
 0xe94   :  { %v10501_v52 = vadd.f32 %v5517_v33, %v5512_v49  ;;  %v10503_v4 = vadd.f32 %v5515_v31, %v5510_v61  ;;  %v10509_v14 = vadd.f32 %v5516_v40, %v5511_v26 }
 0xe96   :  { %v5732_v25 = vand.u32 2139095040, %v10501_v52  ;;  %v5523_v7 = vand.u32 2147483647, %v10503_v4  ;;  %v5526_v9 = vand.u32 2139095040, %v10503_v4  ;;  %v5729_v42 = vand.u32 2147483647, %v10501_v52 }
 0xe97   :  { %v5629_v19 = vand.u32 2139095040, %v10509_v14  ;;  %v5626_v1 = vand.u32 2147483647, %v10509_v14 }
 0xe98   :  { %v5733_v39 = vshrl.u32 %v5732_v25, 23  ;;  %v5527_v54 = vshrl.u32 %v5526_v9, 23  ;;  %v5530_v63 = vand.u32 8388607, %v5523_v7  ;;  %v5736_v17 = vand.u32 8388607, %v5729_v42 }
 0xe99   :  { %v5630_v0 = vshrl.u32 %v5629_v19, 23 }
 0xe9a   :  { %v6809_v56 = vadd.s32 4294967169, %v5733_v39  ;;  %v6801_v32 = vadd.s32 4294967169, %v5527_v54  ;;  %v5531_v41 = vor.u32 8388608, %v5530_v63  ;;  %v5737_v16 = vor.u32 8388608, %v5736_v17 }
 0xe9b   :  { %v6805_v58 = vadd.s32 4294967169, %v5630_v0 }
 0xe9c   :  { %v5739_v12 = vadd.s32 1, %v6809_v56  ;;  %v5533_v23 = vadd.s32 1, %v6801_v32  ;;  %v10518_v8 = vshll.u32 %v5531_v41, 8  ;;  %v10520_v5 = vshll.u32 %v5737_v16, 8 }
 0xe9d   :  { %v10525_v38 = vadd.s32 1, %v6805_v58 }
 0xe9e   :  { %vm5740_vm6 = vcmp.gt.s32.totalorder %v5739_v12, 0  ;;  %vm5534_vm7 = vcmp.gt.s32.totalorder %v5533_v23, 0 }
 0xe9f   :  { %v5741_v29 = vsel %vm5740_vm6, %v5739_v12, 0  ;;  %v5535_v3 = vsel %vm5534_vm7, %v5533_v23, 0  ;;  %vm5637_vm1 = vcmp.gt.s32.totalorder %v10525_v38, 0 }
 0xea0   :  { %v5743_v15 = vand.u32 31, %v5741_v29  ;;  %v5537_v11 = vand.u32 31, %v5535_v3  ;;  %v5536_v62 = vshrl.u32 %v5535_v3, 5  ;;  %v10523_v6 = vshrl.u32 %v5741_v29, 5 }
 0xea2   :  { %v5744_v44 = vsub.s32 32, %v5743_v15  ;;  %v5538_v18 = vsub.s32 32, %v5537_v11  ;;  %v5540_v60 = vshll.u32 %v7613_v50, %v5537_v11  ;;  %v5543_v22 = vshll.u32 %v7614_v53, %v5537_v11 }
 0xea3   :  { %v5546_v30 = vshll.u32 %v7615_v55, %v5537_v11  ;;  %v5549_v46 = vshll.u32 %v7616_v57, %v5537_v11  ;;  %v5552_v34 = vshll.u32 %v7617_v59, %v5537_v11  ;;  %vm5555_vm8 = vcmp.lt.s32.totalorder %v5536_v62, 1 }
 0xea4   :  { %v5541_v24 = vshrl.u32 %v7614_v53, %v5538_v18  ;;  %v5544_v13 = vshrl.u32 %v7615_v55, %v5538_v18  ;;  %v5547_v20 = vshrl.u32 %v7616_v57, %v5538_v18  ;;  %v5539_v21 = vshrl.u32 %v7613_v50, %v5538_v18 }
 0xea5   :  { %v5550_v35 = vshrl.u32 %v7617_v59, %v5538_v18  ;;  %v5553_v36 = vshrl.u32 %v7618_v2, %v5538_v18  ;;  %vm5556_vm9 = vcmp.lt.s32.totalorder %v5536_v62, 2  ;;  %vm5557_vm10 = vcmp.lt.s32.totalorder %v5536_v62, 3 }
 0xea6   :  { %v5542_v10 = vor.u32 %v5541_v24, %v5540_v60  ;;  %v5545_v43 = vor.u32 %v5544_v13, %v5543_v22  ;;  %v5548_v47 = vor.u32 %v5547_v20, %v5546_v30  ;;  %vm5558_vm11 = vcmp.lt.s32.totalorder %v5536_v62, 4 }
 0xea7   :  { %v5551_v33 = vor.u32 %v5550_v35, %v5549_v46  ;;  %v5554_v31 = vor.u32 %v5553_v36, %v5552_v34  ;;  %v5747_v54 = vshrl.u32 %v7614_v53, %v5744_v44  ;;  %v5745_v56 = vshrl.u32 %v7613_v50, %v5744_v44 }
 0xea8   :  { %v5559_v49 = vsel %vm5555_vm8, %v5539_v21, %v5542_v10  ;;  %v5560_v61 = vsel %vm5558_vm11, %v5548_v47, 2102212464  ;;  %v5563_v26 = vsel %vm5555_vm8, %v5542_v10, %v5545_v43  ;;  %v5567_v40 = vsel %vm5555_vm8, %v5545_v43, %v5548_v47 }
 0xea9   :  { %v5561_v25 = vsel %vm5557_vm10, %v5545_v43, %v5560_v61  ;;  %v5564_v9 = vsel %vm5558_vm11, %v5551_v33, 920167782  ;;  %v5568_v39 = vsel %vm5558_vm11, %v5554_v31, 1326507024  ;;  %v5746_v32 = vshll.u32 %v7613_v50, %v5743_v15  ;;  %v5518_v31 = vld [vmem:[#allocation9 + $0x278] sm:$0xff] }
 0xeaa   :  { %v5565_v63 = vsel %vm5557_vm10, %v5548_v47, %v5564_v9  ;;  %v5569_v17 = vsel %vm5557_vm10, %v5551_v33, %v5568_v39  ;;  %v5562_v19 = vsel %vm5556_vm9, %v5559_v49, %v5561_v25  ;;  %v5749_v41 = vshll.u32 %v7614_v53, %v5743_v15 }
 0xeab   :  { %v5566_v12 = vsel %vm5556_vm9, %v5563_v26, %v5565_v63  ;;  %v5570_v23 = vsel %vm5556_vm9, %v5567_v40, %v5569_v17  ;;  %v5748_v3 = vor.u32 %v5747_v54, %v5746_v32  ;;  %v5750_v58 = vshrl.u32 %v7615_v55, %v5744_v44 }
 0xeac   :  { %v10546_v16 = vmul.u32.u64.low %v10518_v8, %v5570_v23  ;;  %v10547_v0 = vmul.u32.u64.high %v10518_v8, %v5570_v23, %v10546_v16  ;;  %v10550_v45 = vmul.u32.u64.low %v10518_v8, %v5566_v12  ;;  %v10551_v29 = vmul.u32.u64.high %v10518_v8, %v5566_v12, %v10550_v45 }
 0xead   :  { %v5752_v11 = vshll.u32 %v7615_v55, %v5743_v15  ;;  %v5753_v18 = vshrl.u32 %v7616_v57, %v5744_v44  ;;  %v5578_v62 = vmul.u32 %v10518_v8, %v5562_v19  ;;  %v5755_v60 = vshll.u32 %v7616_v57, %v5743_v15 }
 0xeae   :  { %v5756_v22 = vshrl.u32 %v7617_v59, %v5744_v44  ;;  %v5759_v30 = vshrl.u32 %v7618_v2, %v5744_v44  ;;  %v5751_v46 = vor.u32 %v5750_v58, %v5749_v41  ;;  %v5758_v13 = vshll.u32 %v7617_v59, %v5743_v15 }
 0xeaf   :  { %v5754_v24 = vor.u32 %v5753_v18, %v5752_v11  ;;  %vm5761_vm12 = vcmp.lt.s32.totalorder %v10523_v6, 1  ;;  %vm5580_vm13 = vc.u32 %v10547_v0, %v10550_v45  ;;  %v5581_v20 = vadd.s32 1, %v10551_v29 }
 0xeb0   :  { %v5757_v34 = vor.u32 %v5756_v22, %v5755_v60  ;;  %vm5762_vm14 = vcmp.lt.s32.totalorder %v10523_v6, 2  ;;  %v5760_v8 = vor.u32 %v5759_v30, %v5758_v13  ;;  %vm5763_vm15 = vcmp.lt.s32.totalorder %v10523_v6, 3 }
 0xeb1   :  { %vm5764_vm0 = vcmp.lt.s32.totalorder %v10523_v6, 4  ;;  %v5769_v44 = vsel %vm5761_vm12, %v5748_v3, %v5751_v46  ;;  %v5582_v21 = vsel %vm5580_vm13, %v5581_v20, %v10551_v29  ;;  %v5773_v36 = vsel %vm5761_vm12, %v5751_v46, %v5754_v24 }
 0xeb2   :  { %v5766_v35 = vsel %vm5764_vm0, %v5754_v24, 2102212464  ;;  %v5770_v15 = vsel %vm5764_vm0, %v5757_v34, 920167782  ;;  %v5583_v10 = vadd.s32 %v5582_v21, %v5578_v62  ;;  %v5765_v43 = vsel %vm5761_vm12, %v5745_v56, %v5748_v3 }
 0xeb3   :  { %v5771_v47 = vsel %vm5763_vm15, %v5754_v24, %v5770_v15  ;;  %v5774_v33 = vsel %vm5764_vm0, %v5760_v8, 1326507024  ;;  %v5767_v49 = vsel %vm5763_vm15, %v5751_v46, %v5766_v35  ;;  %v5638_v17 = vsel %vm5637_vm1, %v10525_v38, 0 }
 0xeb4   :  { %v5772_v61 = vsel %vm5762_vm14, %v5769_v44, %v5771_v47  ;;  %v5775_v26 = vsel %vm5763_vm15, %v5757_v34, %v5774_v33  ;;  %v5584_v40 = vadd.s32 536870912, %v5583_v10  ;;  %v10586_v56 = vadd.f32 %v5518_v31, %v10516_v27 }
 0xeb5   :  { %v5776_v25 = vsel %vm5762_vm14, %v5773_v36, %v5775_v26  ;;  %v10576_v9 = vmul.u32.u64.low %v10520_v5, %v5772_v61  ;;  %v10577_v39 = vmul.u32.u64.high %v10520_v5, %v5772_v61, %v10576_v9  ;;  %v5768_v19 = vsel %vm5762_vm14, %v5765_v43, %v5767_v49 }
 0xeb6   :  { %v10581_v54 = vmul.u32.u64.low %v10520_v5, %v5776_v25  ;;  %v10582_v63 = vmul.u32.u64.high %v10520_v5, %v5776_v25, %v10581_v54  ;;  %v10588_v32 = vshrl.u32 %v5584_v40, 30  ;;  %v5640_v12 = vand.u32 31, %v5638_v17 }
 0xeb7   :  { %v5787_v41 = vadd.s32 1, %v10577_v39  ;;  %v5633_v16 = vand.u32 8388607, %v5626_v1  ;;  %v5784_v3 = vmul.u32 %v10520_v5, %v5768_v19  ;;  %v5835_v27 = vand.u32 2139095040, %v10586_v56 }
 0xeb8   :  { %v5586_v23 = vshll.u32 %v10588_v32, 30  ;;  %v5641_v29 = vsub.s32 32, %v5640_v12  ;;  %vm5786_vm3 = vc.u32 %v10582_v63, %v10576_v9  ;;  %v5832_v30 = vand.u32 2147483647, %v10586_v56 }
 0xeb9   :  { %v5788_v6 = vsel %vm5786_vm3, %v5787_v41, %v10577_v39  ;;  %v5634_v18 = vor.u32 8388608, %v5633_v16  ;;  %v5836_v46 = vshrl.u32 %v5835_v27, 23  ;;  %v5639_v24 = vshrl.u32 %v5638_v17, 5 }
 0xeba   :  { %v5587_v38 = vsub.s32 %v5583_v10, %v5586_v23  ;;  %v5789_v58 = vadd.s32 %v5788_v6, %v5784_v3  ;;  %v5644_v62 = vshrl.u32 %v7614_v53, %v5641_v29  ;;  %v5647_v22 = vshrl.u32 %v7615_v55, %v5641_v29 }
 0xebb   :  { %v5643_v13 = vshll.u32 %v7613_v50, %v5640_v12  ;;  %v5650_v20 = vshrl.u32 %v7616_v57, %v5641_v29  ;;  %v5646_v8 = vshll.u32 %v7614_v53, %v5640_v12  ;;  %v5652_v44 = vshll.u32 %v7616_v57, %v5640_v12 }
 0xebc   :  { %v5589_v11 = vsub.s32 0, %v5587_v38  ;;  %v5790_v60 = vadd.s32 536870912, %v5789_v58  ;;  %v5653_v21 = vshrl.u32 %v7617_v59, %v5641_v29  ;;  %v5649_v36 = vshll.u32 %v7615_v55, %v5640_v12 }
 0xebd   :  { %v5645_v15 = vor.u32 %v5644_v62, %v5643_v13  ;;  %v10612_v10 = vshll.u32 %v5634_v18, 8  ;;  %v5648_v47 = vor.u32 %v5647_v22, %v5646_v8  ;;  %v5656_v31 = vshrl.u32 %v7618_v2, %v5641_v29 }
 0xebe   :  { %v6802_v5 = vmin.u32 %v5589_v11, %v5587_v38  ;;  %v10606_v34 = vshrl.u32 %v5790_v60, 30  ;;  %v5654_v33 = vor.u32 %v5653_v21, %v5652_v44  ;;  %v5579_v49 = vadd.s32 %v10550_v45, %v10547_v0 }
 0xebf   :  { %v5651_v26 = vor.u32 %v5650_v20, %v5649_v36  ;;  %v6813_v40 = vadd.s32 4294967169, %v5836_v46  ;;  %v5642_v39 = vshrl.u32 %v7613_v50, %v5641_v29  ;;  %v5655_v54 = vshll.u32 %v7617_v59, %v5640_v12 }
 0xec0   :  { %v5591_v35 = vclz %v6802_v5  ;;  %v5792_v43 = vshll.u32 %v10606_v34, 30  ;;  %vm5661_vm4 = vcmp.lt.s32.totalorder %v5639_v24, 4  ;;  %vm5658_vm6 = vcmp.lt.s32.totalorder %v5639_v24, 1 }
 0xec1   :  { %vm5660_vm7 = vcmp.lt.s32.totalorder %v5639_v24, 3  ;;  %v5667_v17 = vsel %vm5661_vm4, %v5654_v33, 920167782  ;;  %v5657_v41 = vor.u32 %v5656_v31, %v5655_v54  ;;  %v5666_v0 = vsel %vm5658_vm6, %v5645_v15, %v5648_v47 }
 0xec2   :  { %v6803_v61 = vadd.s32 4294967294, %v5591_v35  ;;  %v10618_v25 = vsub.s32 %v5789_v58, %v5792_v43  ;;  %vm5525_vm8 = vcmp.lt.s32.totalorder %v10503_v4, 0  ;;  %vm5659_vm9 = vcmp.lt.s32.totalorder %v5639_v24, 2 }
 0xec3   :  { %v5668_v29 = vsel %vm5660_vm7, %v5651_v26, %v5667_v17  ;;  %v5662_v27 = vsel %vm5658_vm6, %v5642_v39, %v5645_v15  ;;  %v5663_v6 = vsel %vm5661_vm4, %v5651_v26, 2102212464  ;;  %v5670_v62 = vsel %vm5658_vm6, %v5648_v47, %v5651_v26 }
 0xec4   :  { %vm6804_vm5 = vcmp.lt.s32.totalorder %v6803_v61, 0  ;;  %v5795_v23 = vsub.s32 0, %v10618_v25  ;;  %v5669_v18 = vsel %vm5659_vm9, %v5666_v0, %v5668_v29  ;;  %v5671_v22 = vsel %vm5661_vm4, %v5657_v41, 1326507024 }
 0xec5   :  { %v5594_v19 = vsel %vm6804_vm5, 0, %v6803_v61  ;;  %v10634_v46 = vmul.u32.u64.low %v10612_v10, %v5669_v18  ;;  %v10635_v5 = vmul.u32.u64.high %v10612_v10, %v5669_v18, %v10634_v46  ;;  %v5664_v20 = vsel %vm5660_vm7, %v5648_v47, %v5663_v6 }
 0xec6   :  { %v5595_v45 = vsub.s32 32, %v5594_v19  ;;  %v5599_v16 = vsub.s32 4294967266, %v5594_v19  ;;  %v5596_v12 = vshll.u32 %v5587_v38, %v5594_v19  ;;  %v6810_v3 = vmin.u32 %v5795_v23, %v10618_v25 }
 0xec7   :  { %v5672_v8 = vsel %vm5660_vm7, %v5654_v33, %v5671_v22  ;;  %v5609_v44 = vsub.s32 4, %v10588_v32  ;;  %v5842_v15 = vadd.s32 1, %v6813_v40  ;;  %v5665_v47 = vsel %vm5659_vm9, %v5662_v27, %v5664_v20 }
 0xec8   :  { %v5597_v58 = vshrl.u32 %v5579_v49, %v5595_v45  ;;  %v5600_v11 = vadd.s32 127, %v5599_v16  ;;  %v5797_v60 = vclz %v6810_v3  ;;  %v5673_v35 = vsel %vm5659_vm9, %v5670_v62, %v5672_v8 }
 0xec9   :  { %v10643_v43 = vmul.u32.u64.low %v10612_v10, %v5673_v35  ;;  %v10644_v31 = vmul.u32.u64.high %v10612_v10, %v5673_v35, %v10643_v43  ;;  %v10648_v49 = vand.u32 8388607, %v5832_v30  ;;  %v5684_v33 = vadd.s32 1, %v10635_v5 }
 0xeca   :  { %v5598_v38 = vor.u32 %v5597_v58, %v5596_v12  ;;  %v5601_v13 = vshll.u32 %v5600_v11, 23  ;;  %v6811_v21 = vadd.s32 4294967294, %v5797_v60  ;;  %vm5843_vm11 = vcmp.gt.s32.totalorder %v5842_v15, 0 }
 0xecb   :  { %v5844_v54 = vsel %vm5843_vm11, %v5842_v15, 0  ;;  %v5610_v40 = vsel %vm5525_vm8, %v5609_v44, %v10588_v32  ;;  %v5785_v17 = vadd.s32 %v10576_v9, %v10582_v63  ;;  %v5681_v24 = vmul.u32 %v10612_v10, %v5665_v47 }
 0xecc   :  { %v5602_v36 = vor.u32 4788187, %v5601_v13  ;;  %vm6812_vm10 = vcmp.lt.s32.totalorder %v6811_v21, 0  ;;  %v5605_v26 = vcvt.s32.f32 %v5598_v38  ;;  %vm5683_vm12 = vc.u32 %v10644_v31, %v10634_v46 }
 0xecd   :  { %v5800_v39 = vsel %vm6812_vm10, 0, %v6811_v21  ;;  %v5846_v0 = vand.u32 31, %v5844_v54  ;;  %v5685_v12 = vsel %vm5683_vm12, %v5684_v33, %v10635_v5  ;;  %vm10664_vm13 = vcmp.le.f32.partialorder %v5523_v7, 0.7853982 }
 0xece   :  { %v5603_v61 = vand.u32 2147483647, %v5602_v36  ;;  %v5801_v19 = vsub.s32 32, %v5800_v39  ;;  %v5805_v23 = vsub.s32 4294967266, %v5800_v39  ;;  %v5802_v45 = vshll.u32 %v10618_v25, %v5800_v39 }
 0xecf   :  { %v5686_v32 = vadd.s32 %v5685_v12, %v5681_v24  ;;  %v5847_v27 = vsub.s32 32, %v5846_v0  ;;  %v5840_v6 = vor.u32 8388608, %v10648_v49  ;;  %v5612_v58 = vsel %vm10664_vm13, 0, %v5610_v40 }
 0xed0   :  { %v5606_v41 = vmul.f32 %v5605_v26, %v5603_v61  ;;  %v5803_v16 = vshrl.u32 %v5785_v17, %v5801_v19  ;;  %v5806_v29 = vadd.s32 127, %v5805_v23  ;;  %vm5731_vm14 = vcmp.lt.s32.totalorder %v10501_v52, 0 }
 0xed1   :  { %v5687_v11 = vadd.s32 536870912, %v5686_v32  ;;  %v10674_v18 = vshrl.u32 %v5844_v54, 5  ;;  %v5850_v60 = vshrl.u32 %v7614_v53, %v5847_v27  ;;  %v5853_v22 = vshrl.u32 %v7615_v55, %v5847_v27 }
 0xed2   :  { %v5607_v3 = vxor.u32 2147483648, %v5606_v41  ;;  %v5804_v63 = vor.u32 %v5803_v16, %v5802_v45  ;;  %v5807_v10 = vshll.u32 %v5806_v29, 23  ;;  %v5849_v38 = vshll.u32 %v7613_v50, %v5846_v0 }
 0xed3   :  { %v10681_v5 = vshrl.u32 %v5687_v11, 30  ;;  %v5852_v13 = vshll.u32 %v7614_v53, %v5846_v0  ;;  %v5856_v44 = vshrl.u32 %v7616_v57, %v5847_v27  ;;  %v5855_v35 = vshll.u32 %v7615_v55, %v5846_v0 }
 0xed4   :  { %v5608_v25 = vsel %vm5525_vm8, %v5607_v3, %v5606_v41  ;;  %v5808_v62 = vor.u32 4788187, %v5807_v10  ;;  %v5811_v8 = vcvt.s32.f32 %v5804_v63  ;;  %v5858_v15 = vshll.u32 %v7616_v57, %v5846_v0 }
 0xed5   :  { %v5611_v7 = vsel %vm10664_vm13, %v10503_v4, %v5608_v25  ;;  %v5689_v21 = vshll.u32 %v10681_v5, 30  ;;  %v5859_v36 = vshrl.u32 %v7617_v59, %v5847_v27  ;;  %v5851_v49 = vor.u32 %v5850_v60, %v5849_v38 }
 0xed6   :  { %7444 = vcosq.f32 %v5611_v7  ;;  %v5809_v20 = vand.u32 2147483647, %v5808_v62  ;;  %v5854_v47 = vor.u32 %v5853_v22, %v5852_v13  ;;  %v5862_v33 = vshrl.u32 %v7618_v2, %v5847_v27 }
 0xed7   :  { %7446 = vsinq.f32 %v5611_v7  ;;  %v5616_v61 = vand.u32 3, %v5612_v58  ;;  %vm10693_vm15 = vcmp.le.f32.partialorder %v5729_v42, 0.7853982  ;;  %v10697_v39 = vsub.s32 %v5686_v32, %v5689_v21 }
 0xed8   :  { %v5812_v43 = vmul.f32 %v5811_v8, %v5809_v20  ;;  %v5860_v54 = vor.u32 %v5859_v36, %v5858_v15  ;;  %v5815_v17 = vsub.s32 4, %v10606_v34  ;;  %v5857_v19 = vor.u32 %v5856_v44, %v5855_v35 }
 0xed9   :  { %v5861_v23 = vshll.u32 %v7617_v59, %v5846_v0  ;;  %v5692_v41 = vsub.s32 0, %v10697_v39  ;;  %vm5864_vm0 = vcmp.lt.s32.totalorder %v10674_v18, 1  ;;  %vm5867_vm1 = vcmp.lt.s32.totalorder %v10674_v18, 4 }
 0xeda   :  { %v5813_v40 = vxor.u32 2147483648, %v5812_v43  ;;  %v5880_v24 = vshll.u32 %v5840_v6, 8  ;;  %v5872_v16 = vsel %vm5864_vm0, %v5851_v49, %v5854_v47  ;;  %v5873_v29 = vsel %vm5867_vm1, %v5860_v54, 920167782 }
 0xedb   :  { %v5863_v45 = vor.u32 %v5862_v33, %v5861_v23  ;;  %v6806_v12 = vmin.u32 %v5692_v41, %v10697_v39  ;;  %v5848_v3 = vshrl.u32 %v7613_v50, %v5847_v27  ;;  %vm5866_vm3 = vcmp.lt.s32.totalorder %v10674_v18, 3 }
 0xedc   :  { %v5814_v42 = vsel %vm5731_vm14, %v5813_v40, %v5812_v43  ;;  %vm5865_vm4 = vcmp.lt.s32.totalorder %v10674_v18, 2  ;;  %v5869_v32 = vsel %vm5867_vm1, %v5857_v19, 2102212464  ;;  %v5874_v9 = vsel %vm5866_vm3, %v5857_v19, %v5873_v29 }
 0xedd   :  { %v5817_v0 = vsel %vm10693_vm15, %v10501_v52, %v5814_v42  ;;  %v5694_v63 = vclz %v6806_v12  ;;  %v5875_v10 = vsel %vm5865_vm4, %v5872_v16, %v5874_v9  ;;  %v5876_v6 = vsel %vm5864_vm0, %v5854_v47, %v5857_v19 }
 0xede   :  { %7448 = vcosq.f32 %v5817_v0  ;;  %v5877_v27 = vsel %vm5867_vm1, %v5863_v45, 1326507024  ;;  %v10725_v25 = vmul.u32.u64.low %v5880_v24, %v5875_v10  ;;  %v10726_v58 = vmul.u32.u64.high %v5880_v24, %v5875_v10, %v10725_v25 }
 0xedf   :  { %7450 = vsinq.f32 %v5817_v0  ;;  %v6807_v11 = vadd.s32 4294967294, %v5694_v63  ;;  %v5868_v7 = vsel %vm5864_vm0, %v5848_v3, %v5851_v49  ;;  %v5870_v62 = vsel %vm5866_vm3, %v5854_v47, %v5869_v32 }
 0xee0   :  { %v5878_v60 = vsel %vm5866_vm3, %v5860_v54, %v5877_v27  ;;  %vm5618_vm5 = vcmp.eq.s32.totalorder %v5616_v61, 0  ;;  %vm5621_vm6 = vcmp.eq.s32.totalorder %v5616_v61, 2  ;;  %v5816_v38 = vsel %vm5731_vm14, %v5815_v17, %v10606_v34 }
 0xee1   :  { %v5879_v13 = vsel %vm5865_vm4, %v5876_v6, %v5878_v60  ;;  %vm6808_vm7 = vcmp.lt.s32.totalorder %v6807_v11, 0  ;;  %v5682_v15 = vadd.s32 %v10634_v46, %v10644_v31  ;;  %v5871_v43 = vsel %vm5865_vm4, %v5868_v7, %v5870_v62 }
 0xee2   :  { %v10736_v44 = vmul.u32.u64.low %v5880_v24, %v5879_v13  ;;  %v10737_v21 = vmul.u32.u64.high %v5880_v24, %v5879_v13, %v10736_v44  ;;  %v5697_v36 = vsel %vm6808_vm7, 0, %v6807_v11  ;;  %v5890_v33 = vadd.s32 1, %v10726_v58 }
 0xee3   :  { %v7445_v22 = vpop.eup %7444  ;;  %v5698_v47 = vsub.s32 32, %v5697_v36  ;;  %v5702_v34 = vsub.s32 4294967266, %v5697_v36  ;;  %vm5615_vm8 = vweird.f32 %v10503_v4  ;;  %vm5617_vm9 = vcmp.lt.s32.totalorder %v5616_v61, 2 }
 0xee4   :  { %v7447_v20 = vpop.eup %7446  ;;  %v5622_v8 = vxor.u32 2147483648, %v7445_v22  ;;  %v5818_v40 = vsel %vm10693_vm15, 0, %v5816_v38  ;;  %v5699_v46 = vshll.u32 %v10697_v39, %v5697_v36  ;;  %v5887_v23 = vmul.u32 %v5880_v24, %v5871_v43 }
 0xee5   :  { %v5619_v35 = vxor.u32 2147483648, %v7447_v20  ;;  %v5700_v31 = vshrl.u32 %v5682_v15, %v5698_v47  ;;  %v5703_v19 = vadd.s32 127, %v5702_v34  ;;  %vm5889_vm10 = vc.u32 %v10737_v21, %v10725_v25 }
 0xee6   :  { %v5623_v49 = vsel %vm5621_vm6, %v5622_v8, %v7447_v20  ;;  %v5822_v41 = vand.u32 3, %v5818_v40  ;;  %v5891_v61 = vsel %vm5889_vm10, %v5890_v33, %v10726_v58  ;;  %vm5821_vm14 = vweird.f32 %v10501_v52 }
 0xee7   :  { %v5620_v54 = vsel %vm5618_vm5, %v7445_v22, %v5619_v35  ;;  %v5701_v4 = vor.u32 %v5700_v31, %v5699_v46  ;;  %v5704_v42 = vshll.u32 %v5703_v19, 23  ;;  %v5892_v45 = vadd.s32 %v5891_v61, %v5887_v23 }
 0xee8   :  { %v5624_v17 = vsel %vm5617_vm9, %v5620_v54, %v5623_v49  ;;  %vm5827_vm11 = vcmp.eq.s32.totalorder %v5822_v41, 2  ;;  %vm5824_vm12 = vcmp.eq.s32.totalorder %v5822_v41, 0  ;;  %vm5823_vm13 = vcmp.lt.s32.totalorder %v5822_v41, 2 }
 0xee9   :  { %v5625_v18 = vsel %vm5615_vm8, nan, %v5624_v17  ;;  %v5705_v16 = vor.u32 4788187, %v5704_v42  ;;  %v5893_v39 = vadd.s32 536870912, %v5892_v45  ;;  %v5708_v24 = vcvt.s32.f32 %v5701_v4 }
 0xeea   :  { %7076 = vmatprep.mubr.msk.f32.mxu0 %vm213_vm2, %v5625_v18  ;;  %vm5628_vm15 = vcmp.lt.s32.totalorder %v10509_v14, 0  ;;  %vm10758_vm0 = vcmp.le.f32.partialorder %v5626_v1, 0.7853982  ;;  %v5712_v38 = vsub.s32 4, %v10681_v5  ;;  %v5888_v15 = vadd.s32 %v10725_v25, %v10737_v21 }
 0xeeb   :  { %v7449_v26 = vpop.eup %7448  ;;  %v5706_v3 = vand.u32 2147483647, %v5705_v16  ;;  %v5894_v9 = vshrl.u32 %v5893_v39, 30  ;;  %vm5718_vm6 = vweird.f32 %v10509_v14  ;;  %vm5834_vm7 = vcmp.lt.s32.totalorder %v10586_v56, 0 }
 0xeec   :  { %v7451_v29 = vpop.eup %7450  ;;  %v5828_v0 = vxor.u32 2147483648, %v7449_v26  ;;  %v5713_v8 = vsel %vm5628_vm15, %v5712_v38, %v10681_v5  ;;  %vm5833_vm8 = vcmp.le.f32.partialorder %v5832_v30, 0.7853982 }
 0xeed   :  { %v5825_v12 = vxor.u32 2147483648, %v7451_v29  ;;  %v5709_v10 = vmul.f32 %v5708_v24, %v5706_v3  ;;  %v5895_v27 = vshll.u32 %v5894_v9, 30  ;;  %v5715_v1 = vsel %vm10758_vm0, 0, %v5713_v8 }
 0xeee   :  { %v5829_v32 = vsel %vm5827_vm11, %v5828_v0, %v7451_v29  ;;  %v5719_v49 = vand.u32 3, %v5715_v1  ;;  %v5918_v16 = vsub.s32 4, %v5894_v9 }
 0xeef   :  { %v5826_v63 = vsel %vm5824_vm12, %v7449_v26, %v5825_v12  ;;  %v5710_v11 = vxor.u32 2147483648, %v5709_v10  ;;  %v5896_v7 = vsub.s32 %v5892_v45, %v5895_v27  ;;  %vm5924_vm12 = vweird.f32 %v10586_v56 }
 0xef0   :  { %v5830_v6 = vsel %vm5823_vm13, %v5826_v63, %v5829_v32  ;;  %vm5724_vm3 = vcmp.eq.s32.totalorder %v5719_v49, 2  ;;  %vm5721_vm4 = vcmp.eq.s32.totalorder %v5719_v49, 0  ;;  %vm5720_vm5 = vcmp.lt.s32.totalorder %v5719_v49, 2 }
 0xef1   :  { %v5831_v58 = vsel %vm5821_vm14, nan, %v5830_v6  ;;  %v5711_v60 = vsel %vm5628_vm15, %v5710_v11, %v5709_v10  ;;  %v5898_v22 = vsub.s32 0, %v5896_v7  ;;  %v5919_v29 = vsel %vm5834_vm7, %v5918_v16, %v5894_v9  ;;  %v6818_v9 = vld [vmem:[%s11107_s5 + $0x9] ss:$0 sm:$0xff] }
 0xef2   :  { %7079 = vmatprep.mubr.msk.f32.mxu1 %vm213_vm2, %v5831_v58  ;;  %v5714_v52 = vsel %vm10758_vm0, %v10509_v14, %v5711_v60  ;;  %v5921_v0 = vsel %vm5833_vm8, 0, %v5919_v29 }
 0xef3   :  { %7452 = vcosq.f32 %v5714_v52  ;;  %v6814_v13 = vmin.u32 %v5898_v22, %v5896_v7  ;;  %v5925_v14 = vand.u32 3, %v5921_v0 }
 0xef4   :  { %7454 = vsinq.f32 %v5714_v52 }
 0xef5   :  { %v5900_v20 = vclz %v6814_v13  ;;  %vm5930_vm9 = vcmp.eq.s32.totalorder %v5925_v14, 2  ;;  %vm5927_vm10 = vcmp.eq.s32.totalorder %v5925_v14, 0  ;;  %vm5926_vm11 = vcmp.lt.s32.totalorder %v5925_v14, 2 }
 0xef7   :  { %v6815_v44 = vadd.s32 4294967294, %v5900_v20 }
 0xef9   :  { %vm6816_vm1 = vcmp.lt.s32.totalorder %v6815_v44, 0 }
 0xefa   :  { %v5903_v35 = vsel %vm6816_vm1, 0, %v6815_v44 }
 0xefb   :  { %v5904_v36 = vsub.s32 32, %v5903_v35  ;;  %v5908_v43 = vsub.s32 4294967266, %v5903_v35  ;;  %v5905_v47 = vshll.u32 %v5896_v7, %v5903_v35 }
 0xefd   :  { %v5906_v34 = vshrl.u32 %v5888_v15, %v5904_v36  ;;  %v5909_v33 = vadd.s32 127, %v5908_v43 }
 0xeff   :  { %v5907_v40 = vor.u32 %v5906_v34, %v5905_v47  ;;  %v5910_v17 = vshll.u32 %v5909_v33, 23 }
 0xf00   :  { %v7453_v54 = vpop.eup %7452 }
 0xf01   :  { %v7455_v46 = vpop.eup %7454  ;;  %v5725_v5 = vxor.u32 2147483648, %v7453_v54  ;;  %v5911_v19 = vor.u32 4788187, %v5910_v17  ;;  %v5914_v25 = vcvt.s32.f32 %v5907_v40 }
 0xf02   :  { %v5722_v31 = vxor.u32 2147483648, %v7455_v46 }
 0xf03   :  { %v5726_v18 = vsel %vm5724_vm3, %v5725_v5, %v7455_v46  ;;  %v5912_v41 = vand.u32 2147483647, %v5911_v19 }
 0xf04   :  { %v5723_v23 = vsel %vm5721_vm4, %v7453_v54, %v5722_v31 }
 0xf05   :  { %v5727_v21 = vsel %vm5720_vm5, %v5723_v23, %v5726_v18  ;;  %v5915_v42 = vmul.f32 %v5914_v25, %v5912_v41 }
 0xf06   :  { %v5728_v4 = vsel %vm5718_vm6, nan, %v5727_v21 }
 0xf07   :  { %7077 = vmatmul.mubr.msk.f32.vlgmr.msra.gmra.mxu0 %vm213_vm2, %v5728_v4  ;;  %v5916_v61 = vxor.u32 2147483648, %v5915_v42 }
 0xf09   :  { %v5917_v45 = vsel %vm5834_vm7, %v5916_v61, %v5915_v42 }
 0xf0a   :  { %v5920_v26 = vsel %vm5833_vm8, %v10586_v56, %v5917_v45 }
 0xf0b   :  { %7456 = vcosq.f32 %v5920_v26 }
 0xf0c   :  { %7458 = vsinq.f32 %v5920_v26 }
 0xf18   :  { %v7457_v39 = vpop.eup %7456 }
 0xf19   :  { %v7459_v12 = vpop.eup %7458  ;;  %v5931_v3 = vxor.u32 2147483648, %v7457_v39 }
 0xf1a   :  { %v5928_v24 = vxor.u32 2147483648, %v7459_v12 }
 0xf1b   :  { %v5932_v32 = vsel %vm5930_vm9, %v5931_v3, %v7459_v12 }
 0xf1c   :  { %v5929_v63 = vsel %vm5927_vm10, %v7457_v39, %v5928_v24  ;;  %v6093_v24 = vld [vmem:[#allocation9 + $0x290] sm:$0xff] }
 0xf1d   :  { %v5933_v30 = vsel %vm5926_vm11, %v5929_v63, %v5932_v32  ;;  %v6091_v32 = vld [vmem:[#allocation9 + $0x280] sm:$0xff]  ;;  %v6094_v63 = vld [vmem:[#allocation9 + $0x298] sm:$0xff] }
 0xf1e   :  { %v5934_v10 = vsel %vm5924_vm12, nan, %v5933_v30 }
 0xf1f   :  { %7080 = vmatmul.mubr.msk.f32.vlgmr.msra.gmra.mxu1 %vm213_vm2, %v5934_v10 }
 0xfc7   :  { %v7078_v6 = vpop.f32.mrf.mxu0 }
 0xfc8   :  { %v6029_v11 = vadd.f32 %v7078_v6, %v6818_v9 }
 0xfc9   :  { %v6023_v27 = vpop.f32.mrf.mxu0 }
 0xfca   :  { %v6024_v58 = vadd.f32 %v6818_v9, %v6023_v27  ;;  %v6043_v62 = vadd.f32 %v6029_v11, %v10175_v48 }
 0xfcc   :  { %v6042_v7 = vadd.f32 %v6024_v58, %v10172_v37  ;;  %v6060_v22 = vmul.f32 %v6043_v62, %v6043_v62  ;;  %v6047_v20 = vsel %vm213_vm2, %v6043_v62, 0.0  ;;  %v6100_v58 = vld [vmem:[#allocation9 + $0x2a0] sm:$0xff] }
 0xfce   :  { %v6059_v60 = vmul.f32 %v6042_v7, %v6042_v7  ;;  %v6046_v38 = vsel %vm213_vm2, %v6042_v7, 0.0  ;;  %v6064_v15 = vsel %vm213_vm2, %v6060_v22, 0.0 }
 0xfcf   :  { %v6048_v35 = vadd.f32 %v6047_v20, %v6046_v38 }
 0xfd0   :  { %v6063_v44 = vsel %vm213_vm2, %v6059_v60, 0.0 }
 0xfd1   :  { %v6065_v48 = vadd.f32 %v6064_v15, %v6063_v44 }
 0xfdf   :  { %v7081_v52 = vpop.f32.mrf.mxu1 }
 0xfe0   :  { %v6039_v56 = vadd.f32 %v7081_v52, %v6818_v9 }
 0xfe1   :  { %v6033_v13 = vpop.f32.mrf.mxu1 }
 0xfe2   :  { %v6045_v8 = vadd.f32 %v6039_v56, %v10184_v51  ;;  %v6034_v1 = vadd.f32 %v6818_v9, %v6033_v13  ;;  %v6102_v9 = vld [vmem:[#allocation9 + $0x2b0] sm:$0xff] }
 0xfe4   :  { %v6044_v37 = vadd.f32 %v6034_v1, %v10190_v28  ;;  %v6062_v36 = vmul.f32 %v6045_v8, %v6045_v8  ;;  %v6051_v34 = vsel %vm213_vm2, %v6045_v8, 0.0 }
 0xfe6   :  { %v6049_v43 = vsel %vm213_vm2, %v6044_v37, 0.0  ;;  %v6061_v49 = vmul.f32 %v6044_v37, %v6044_v37  ;;  %v6068_v40 = vsel %vm213_vm2, %v6062_v36, 0.0 }
 0xfe7   :  { %v6050_v47 = vadd.f32 %v6049_v43, %v6048_v35 }
 0xfe8   :  { %v6066_v33 = vsel %vm213_vm2, %v6061_v49, 0.0 }
 0xfe9   :  { %v6052_v54 = vadd.f32 %v6051_v34, %v6050_v47  ;;  %v6067_v51 = vadd.f32 %v6066_v33, %v6065_v48 }
 0xfeb   :  { %v6053_v17 = vrot.slane %v6052_v54, 4  ;;  %v6069_v46 = vadd.f32 %v6068_v40, %v6067_v51  ;;  %v6092_v51 = vld [vmem:[#allocation9 + $0x288] sm:$0xff] }
 0xfed   :  { %v6054_v5 = vadd.f32 %v6053_v17, %v6052_v54  ;;  %v6070_v31 = vrot.slane %v6069_v46, 4 }
 0xfef   :  { %v6055_v19 = vrot.slane %v6054_v5, 2  ;;  %v6071_v28 = vadd.f32 %v6070_v31, %v6069_v46 }
 0xff1   :  { %v6056_v18 = vadd.f32 %v6055_v19, %v6054_v5  ;;  %v6072_v23 = vrot.slane %v6071_v28, 2 }
 0xff3   :  { %v6057_v41 = vrot.slane %v6056_v18, 1  ;;  %v6073_v25 = vadd.f32 %v6072_v23, %v6071_v28 }
 0xff5   :  { %v6058_v21 = vadd.f32 %v6057_v41, %v6056_v18  ;;  %v6074_v4 = vrot.slane %v6073_v25, 1 }
 0xff7   :  { %v6075_v42 = vadd.f32 %v6074_v4, %v6073_v25  ;;  %v6076_v61 = vmul.f32 0.03125, %v6058_v21 }
 0xff9   :  { %v6077_v45 = vmul.f32 0.03125, %v6075_v42  ;;  %v6078_v26 = vmul.f32 %v6076_v61, %v6076_v61  ;;  %v6081_v16 = vsub.f32 %v6043_v62, %v6076_v61  ;;  %v6082_v14 = vsub.f32 %v6044_v37, %v6076_v61  ;;  %v6103_v62 = vld [vmem:[#allocation9 + $0x2b8] sm:$0xff] }
 0xffa   :  { %v6080_v39 = vsub.f32 %v6042_v7, %v6076_v61  ;;  %v6083_v12 = vsub.f32 %v6045_v8, %v6076_v61 }
 0xffb   :  { %v6079_v29 = vsub.f32 %v6077_v45, %v6078_v26 }
 0xffd   :  { %v6084_v0 = vadd.f32 1e-05, %v6079_v29 }
 0xfff   :  { %7460 = vrsqrt.f32 %v6084_v0 }
0x100c   :  { %v7461_v3 = vpop.eup %7460 }
0x100d   :  { %v6088_v30 = vmul.f32 %v7461_v3, %v6082_v14  ;;  %v6086_v10 = vmul.f32 %v7461_v3, %v6080_v39  ;;  %v6089_v6 = vmul.f32 %v7461_v3, %v6083_v12  ;;  %v6087_v27 = vmul.f32 %v7461_v3, %v6081_v16 }
0x100f   :  { %v6097_v11 = vmul.f32 %v6093_v24, %v6088_v30  ;;  %v6095_v60 = vmul.f32 %v6091_v32, %v6086_v10  ;;  %v6098_v52 = vmul.f32 %v6094_v63, %v6089_v6  ;;  %v10809_v31 = vmul.f32 %v6092_v51, %v6087_v27 }
0x1011   :  { %v10794_v22 = vadd.f32 %v6102_v9, %v6097_v11  ;;  %v10796_v56 = vadd.f32 %v6100_v58, %v6095_v60  ;;  %v10798_v7 = vadd.f32 %v6103_v62, %v6098_v52 }
0x1013   :  { %v6317_v38 = vand.u32 2139095040, %v10794_v22  ;;  %v6314_v13 = vand.u32 2147483647, %v10794_v22  ;;  %v6108_v20 = vand.u32 2147483647, %v10796_v56  ;;  %v6111_v8 = vand.u32 2139095040, %v10796_v56 }
0x1014   :  { %v6420_v37 = vand.u32 2139095040, %v10798_v7  ;;  %v6417_v18 = vand.u32 2147483647, %v10798_v7 }
0x1015   :  { %v6318_v44 = vshrl.u32 %v6317_v38, 23  ;;  %v6321_v1 = vand.u32 8388607, %v6314_v13  ;;  %v6112_v35 = vshrl.u32 %v6111_v8, 23  ;;  %v6115_v15 = vand.u32 8388607, %v6108_v20 }
0x1016   :  { %v6421_v43 = vshrl.u32 %v6420_v37, 23 }
0x1017   :  { %v6831_v48 = vadd.s32 4294967169, %v6318_v44  ;;  %v6823_v36 = vadd.s32 4294967169, %v6112_v35  ;;  %v6322_v47 = vor.u32 8388608, %v6321_v1  ;;  %v6116_v34 = vor.u32 8388608, %v6115_v15 }
0x1018   :  { %v6835_v54 = vadd.s32 4294967169, %v6421_v43 }
0x1019   :  { %v6324_v49 = vadd.s32 1, %v6831_v48  ;;  %v6118_v33 = vadd.s32 1, %v6823_v36  ;;  %v10811_v19 = vshll.u32 %v6322_v47, 8  ;;  %v10813_v28 = vshll.u32 %v6116_v34, 8 }
0x101a   :  { %v10816_v23 = vadd.s32 1, %v6835_v54 }
0x101b   :  { %vm6325_vm13 = vcmp.gt.s32.totalorder %v6324_v49, 0  ;;  %vm6119_vm14 = vcmp.gt.s32.totalorder %v6118_v33, 0 }
0x101c   :  { %v6326_v40 = vsel %vm6325_vm13, %v6324_v49, 0  ;;  %v6120_v5 = vsel %vm6119_vm14, %v6118_v33, 0  ;;  %vm6428_vm4 = vcmp.gt.s32.totalorder %v10816_v23, 0 }
0x101d   :  { %v6327_v17 = vshrl.u32 %v6326_v40, 5  ;;  %v6328_v46 = vand.u32 31, %v6326_v40  ;;  %v10819_v21 = vshrl.u32 %v6120_v5, 5  ;;  %v6122_v4 = vand.u32 31, %v6120_v5 }
0x101f   :  { %v6329_v41 = vsub.s32 32, %v6328_v46  ;;  %v6331_v25 = vshll.u32 %v7613_v50, %v6328_v46  ;;  %v6334_v42 = vshll.u32 %v7614_v53, %v6328_v46  ;;  %v6337_v61 = vshll.u32 %v7615_v55, %v6328_v46 }
0x1020   :  { %v6340_v45 = vshll.u32 %v7616_v57, %v6328_v46  ;;  %v6343_v26 = vshll.u32 %v7617_v59, %v6328_v46  ;;  %vm6346_vm15 = vcmp.lt.s32.totalorder %v6327_v17, 1  ;;  %vm6347_vm0 = vcmp.lt.s32.totalorder %v6327_v17, 2 }
0x1021   :  { %v6332_v16 = vshrl.u32 %v7614_v53, %v6329_v41  ;;  %v6335_v29 = vshrl.u32 %v7615_v55, %v6329_v41  ;;  %v6338_v0 = vshrl.u32 %v7616_v57, %v6329_v41  ;;  %v6330_v14 = vshrl.u32 %v7613_v50, %v6329_v41 }
0x1022   :  { %v6341_v39 = vshrl.u32 %v7617_v59, %v6329_v41  ;;  %v6344_v12 = vshrl.u32 %v7618_v2, %v6329_v41  ;;  %v6123_v63 = vsub.s32 32, %v6122_v4  ;;  %vm6348_vm1 = vcmp.lt.s32.totalorder %v6327_v17, 3 }
0x1023   :  { %v6333_v3 = vor.u32 %v6332_v16, %v6331_v25  ;;  %v6336_v24 = vor.u32 %v6335_v29, %v6334_v42  ;;  %v6339_v32 = vor.u32 %v6338_v0, %v6337_v61  ;;  %vm6349_vm3 = vcmp.lt.s32.totalorder %v6327_v17, 4 }
0x1024   :  { %v6342_v30 = vor.u32 %v6341_v39, %v6340_v45  ;;  %v6345_v10 = vor.u32 %v6344_v12, %v6343_v26  ;;  %v6125_v62 = vshll.u32 %v7613_v50, %v6122_v4  ;;  %v6126_v44 = vshrl.u32 %v7614_v53, %v6123_v63 }
0x1025   :  { %v6350_v6 = vsel %vm6346_vm15, %v6330_v14, %v6333_v3  ;;  %v6351_v27 = vsel %vm6349_vm3, %v6339_v32, 2102212464  ;;  %v6354_v9 = vsel %vm6346_vm15, %v6333_v3, %v6336_v24  ;;  %v6358_v58 = vsel %vm6346_vm15, %v6336_v24, %v6339_v32 }
0x1026   :  { %v6352_v11 = vsel %vm6348_vm1, %v6336_v24, %v6351_v27  ;;  %v6355_v60 = vsel %vm6349_vm3, %v6342_v30, 920167782  ;;  %v6359_v52 = vsel %vm6349_vm3, %v6345_v10, 1326507024  ;;  %v6128_v1 = vshll.u32 %v7614_v53, %v6122_v4  ;;  %v6101_v24 = vld [vmem:[#allocation9 + $0x2a8] sm:$0xff] }
0x1027   :  { %v6356_v38 = vsel %vm6348_vm1, %v6339_v32, %v6355_v60  ;;  %v6360_v8 = vsel %vm6348_vm1, %v6342_v30, %v6359_v52  ;;  %v6353_v35 = vsel %vm6347_vm0, %v6350_v6, %v6352_v11  ;;  %v6129_v48 = vshrl.u32 %v7615_v55, %v6123_v63 }
0x1028   :  { %v6357_v15 = vsel %vm6347_vm0, %v6354_v9, %v6356_v38  ;;  %v6361_v37 = vsel %vm6347_vm0, %v6358_v58, %v6360_v8  ;;  %v6127_v34 = vor.u32 %v6126_v44, %v6125_v62  ;;  %v6131_v54 = vshll.u32 %v7615_v55, %v6122_v4 }
0x1029   :  { %v10843_v36 = vmul.u32.u64.low %v10811_v19, %v6361_v37  ;;  %v10844_v43 = vmul.u32.u64.high %v10811_v19, %v6361_v37, %v10843_v36  ;;  %v10847_v49 = vmul.u32.u64.low %v10811_v19, %v6357_v15  ;;  %v10848_v47 = vmul.u32.u64.high %v10811_v19, %v6357_v15, %v10847_v49 }
0x102a   :  { %v6130_v33 = vor.u32 %v6129_v48, %v6128_v1  ;;  %v6132_v51 = vshrl.u32 %v7616_v57, %v6123_v63  ;;  %v6124_v40 = vshrl.u32 %v7613_v50, %v6123_v63  ;;  %v6134_v17 = vshll.u32 %v7616_v57, %v6122_v4 }
0x102b   :  { %v6135_v46 = vshrl.u32 %v7617_v59, %v6123_v63  ;;  %v6138_v5 = vshrl.u32 %v7618_v2, %v6123_v63  ;;  %v6369_v41 = vmul.u32 %v10811_v19, %v6353_v35  ;;  %v6137_v42 = vshll.u32 %v7617_v59, %v6122_v4 }
0x102c   :  { %v6133_v25 = vor.u32 %v6132_v51, %v6131_v54  ;;  %vm6140_vm5 = vcmp.lt.s32.totalorder %v10819_v21, 1  ;;  %vm6371_vm6 = vc.u32 %v10844_v43, %v10847_v49  ;;  %v6372_v61 = vadd.s32 1, %v10848_v47 }
0x102d   :  { %v6136_v45 = vor.u32 %v6135_v46, %v6134_v17  ;;  %vm6141_vm7 = vcmp.lt.s32.totalorder %v10819_v21, 2  ;;  %v6139_v26 = vor.u32 %v6138_v5, %v6137_v42  ;;  %vm6142_vm8 = vcmp.lt.s32.totalorder %v10819_v21, 3 }
0x102e   :  { %vm6143_vm9 = vcmp.lt.s32.totalorder %v10819_v21, 4  ;;  %v6148_v16 = vsel %vm6140_vm5, %v6127_v34, %v6130_v33  ;;  %v6373_v19 = vsel %vm6371_vm6, %v6372_v61, %v10848_v47  ;;  %v6152_v0 = vsel %vm6140_vm5, %v6130_v33, %v6133_v25 }
0x102f   :  { %v6145_v29 = vsel %vm6143_vm9, %v6133_v25, 2102212464  ;;  %v6149_v4 = vsel %vm6143_vm9, %v6136_v45, 920167782  ;;  %v6374_v14 = vadd.s32 %v6373_v19, %v6369_v41  ;;  %v6144_v39 = vsel %vm6140_vm5, %v6124_v40, %v6127_v34 }
0x1030   :  { %v6150_v12 = vsel %vm6142_vm8, %v6133_v25, %v6149_v4  ;;  %v6153_v3 = vsel %vm6143_vm9, %v6139_v26, 1326507024  ;;  %v6146_v32 = vsel %vm6142_vm8, %v6130_v33, %v6145_v29  ;;  %v6429_v10 = vsel %vm6428_vm4, %v10816_v23, 0 }
0x1031   :  { %v6151_v63 = vsel %vm6141_vm7, %v6148_v16, %v6150_v12  ;;  %v6154_v30 = vsel %vm6142_vm8, %v6136_v45, %v6153_v3  ;;  %v6375_v6 = vadd.s32 536870912, %v6374_v14  ;;  %v6424_v52 = vand.u32 8388607, %v6417_v18 }
0x1032   :  { %v6155_v27 = vsel %vm6141_vm7, %v6152_v0, %v6154_v30  ;;  %v10875_v9 = vmul.u32.u64.low %v10813_v28, %v6151_v63  ;;  %v10876_v58 = vmul.u32.u64.high %v10813_v28, %v6151_v63, %v10875_v9  ;;  %v10886_v62 = vadd.f32 %v6101_v24, %v10809_v31 }
0x1033   :  { %v10880_v11 = vmul.u32.u64.low %v10813_v28, %v6155_v27  ;;  %v10881_v60 = vmul.u32.u64.high %v10813_v28, %v6155_v27, %v10880_v11  ;;  %v10888_v23 = vshrl.u32 %v6375_v6, 30  ;;  %v6147_v38 = vsel %vm6141_vm7, %v6144_v39, %v6146_v32 }
0x1034   :  { %v6431_v8 = vand.u32 31, %v6429_v10  ;;  %v6166_v1 = vadd.s32 1, %v10876_v58  ;;  %v6163_v15 = vmul.u32 %v10813_v28, %v6147_v38  ;;  %v6425_v37 = vor.u32 8388608, %v6424_v52 }
0x1035   :  { %v6377_v44 = vshll.u32 %v10888_v23, 30  ;;  %vm6165_vm10 = vc.u32 %v10881_v60, %v10875_v9  ;;  %v6214_v31 = vand.u32 2139095040, %v10886_v62  ;;  %v6211_v28 = vand.u32 2147483647, %v10886_v62 }
0x1036   :  { %v6432_v35 = vsub.s32 32, %v6431_v8  ;;  %v6167_v36 = vsel %vm6165_vm10, %v6166_v1, %v10876_v58  ;;  %v6434_v54 = vshll.u32 %v7613_v50, %v6431_v8  ;;  %v6437_v17 = vshll.u32 %v7614_v53, %v6431_v8 }
0x1037   :  { %v6378_v48 = vsub.s32 %v6374_v14, %v6377_v44  ;;  %v6168_v47 = vadd.s32 %v6167_v36, %v6163_v15  ;;  %v10905_v46 = vshll.u32 %v6425_v37, 8  ;;  %v6215_v5 = vshrl.u32 %v6214_v31, 23 }
0x1038   :  { %v6435_v21 = vshrl.u32 %v7614_v53, %v6432_v35  ;;  %v6438_v34 = vshrl.u32 %v7615_v55, %v6432_v35  ;;  %v6441_v51 = vshrl.u32 %v7616_v57, %v6432_v35  ;;  %v6430_v25 = vshrl.u32 %v6429_v10, 5 }
0x1039   :  { %v6380_v33 = vsub.s32 0, %v6378_v48  ;;  %v6169_v40 = vadd.s32 536870912, %v6168_v47  ;;  %v6440_v61 = vshll.u32 %v7615_v55, %v6431_v8  ;;  %v6443_v16 = vshll.u32 %v7616_v57, %v6431_v8 }
0x103a   :  { %v6436_v42 = vor.u32 %v6435_v21, %v6434_v54  ;;  %v6439_v26 = vor.u32 %v6438_v34, %v6437_v17  ;;  %v6444_v19 = vshrl.u32 %v7617_v59, %v6432_v35  ;;  %v6446_v0 = vshll.u32 %v7617_v59, %v6431_v8 }
0x103b   :  { %v6832_v41 = vmin.u32 %v6380_v33, %v6378_v48  ;;  %v10908_v45 = vshrl.u32 %v6169_v40, 30  ;;  %v6442_v4 = vor.u32 %v6441_v51, %v6440_v61  ;;  %v6447_v14 = vshrl.u32 %v7618_v2, %v6432_v35 }
0x103c   :  { %v6370_v39 = vadd.s32 %v10847_v49, %v10844_v43  ;;  %v6445_v3 = vor.u32 %v6444_v19, %v6443_v16  ;;  %v6827_v24 = vadd.s32 4294967169, %v6215_v5  ;;  %vm6449_vm11 = vcmp.lt.s32.totalorder %v6430_v25, 1 }
0x103d   :  { %v6382_v29 = vclz %v6832_v41  ;;  %v6171_v12 = vshll.u32 %v10908_v45, 30  ;;  %v6448_v63 = vor.u32 %v6447_v14, %v6446_v0  ;;  %vm6452_vm12 = vcmp.lt.s32.totalorder %v6430_v25, 4 }
0x103e   :  { %vm6451_vm13 = vcmp.lt.s32.totalorder %v6430_v25, 3  ;;  %v6457_v10 = vsel %vm6449_vm11, %v6436_v42, %v6439_v26  ;;  %v6458_v6 = vsel %vm6452_vm12, %v6445_v3, 920167782  ;;  %v6454_v27 = vsel %vm6452_vm12, %v6442_v4, 2102212464 }
0x103f   :  { %v6833_v32 = vadd.s32 4294967294, %v6382_v29  ;;  %v10917_v30 = vsub.s32 %v6168_v47, %v6171_v12  ;;  %v6459_v58 = vsel %vm6451_vm13, %v6442_v4, %v6458_v6  ;;  %v6462_v11 = vsel %vm6452_vm12, %v6448_v63, 1326507024 }
0x1040   :  { %v6433_v52 = vshrl.u32 %v7613_v50, %v6432_v35  ;;  %v6461_v38 = vsel %vm6449_vm11, %v6439_v26, %v6442_v4  ;;  %vm6316_vm15 = vcmp.lt.s32.totalorder %v10794_v22, 0  ;;  %vm6450_vm0 = vcmp.lt.s32.totalorder %v6430_v25, 2 }
0x1041   :  { %vm6834_vm14 = vcmp.lt.s32.totalorder %v6833_v32, 0  ;;  %v6174_v49 = vsub.s32 0, %v10917_v30  ;;  %v6463_v1 = vsel %vm6451_vm13, %v6445_v3, %v6462_v11  ;;  %v6455_v31 = vsel %vm6451_vm13, %v6439_v26, %v6454_v27 }
0x1042   :  { %v6385_v43 = vsel %vm6834_vm14, 0, %v6833_v32  ;;  %v6453_v37 = vsel %vm6449_vm11, %v6433_v52, %v6436_v42  ;;  %v6460_v36 = vsel %vm6450_vm0, %v6457_v10, %v6459_v58  ;;  %v6464_v34 = vsel %vm6450_vm0, %v6461_v38, %v6463_v1 }
0x1043   :  { %v6386_v8 = vsub.s32 32, %v6385_v43  ;;  %v6390_v44 = vsub.s32 4294967266, %v6385_v43  ;;  %v6824_v15 = vmin.u32 %v6174_v49, %v10917_v30  ;;  %v6387_v47 = vshll.u32 %v6378_v48, %v6385_v43 }
0x1044   :  { %v10932_v54 = vmul.u32.u64.low %v10905_v46, %v6464_v34  ;;  %v10933_v51 = vmul.u32.u64.high %v10905_v46, %v6464_v34, %v10932_v54  ;;  %v6221_v40 = vadd.s32 1, %v6827_v24  ;;  %vm10942_vm1 = vcmp.le.f32.partialorder %v6314_v13, 0.7853982 }
0x1045   :  { %v6388_v21 = vshrl.u32 %v6370_v39, %v6386_v8  ;;  %v6391_v35 = vadd.s32 127, %v6390_v44  ;;  %v6176_v33 = vclz %v6824_v15  ;;  %v6400_v61 = vsub.s32 4, %v10888_v23 }
0x1046   :  { %v10936_v41 = vmul.u32.u64.low %v10905_v46, %v6460_v36  ;;  %v10937_v42 = vmul.u32.u64.high %v10905_v46, %v6460_v36, %v10936_v41  ;;  %vm6222_vm3 = vcmp.gt.s32.totalorder %v6221_v40, 0  ;;  %v6456_v19 = vsel %vm6450_vm0, %v6453_v37, %v6455_v31 }
0x1047   :  { %v6389_v17 = vor.u32 %v6388_v21, %v6387_v47  ;;  %v6392_v5 = vshll.u32 %v6391_v35, 23  ;;  %v6825_v26 = vadd.s32 4294967294, %v6176_v33  ;;  %v10950_v29 = vand.u32 8388607, %v6211_v28  ;;  %v11054_v47 = vld [vmem:[%s11108_s6] ss:$0 sm:$0xff] }
0x1048   :  { %v6223_v4 = vsel %vm6222_vm3, %v6221_v40, 0  ;;  %v6164_v14 = vadd.s32 %v10875_v9, %v10881_v60  ;;  %vm6474_vm5 = vc.u32 %v10933_v51, %v10936_v41  ;;  %v6475_v12 = vadd.s32 1, %v10937_v42 }
0x1049   :  { %v6393_v16 = vor.u32 4788187, %v6392_v5  ;;  %v6396_v0 = vcvt.s32.f32 %v6389_v17  ;;  %vm6826_vm4 = vcmp.lt.s32.totalorder %v6825_v26, 0  ;;  %v6225_v3 = vand.u32 31, %v6223_v4 }
0x104a   :  { %v6179_v39 = vsel %vm6826_vm4, 0, %v6825_v26  ;;  %v6401_v25 = vsel %vm6316_vm15, %v6400_v61, %v10888_v23  ;;  %v6472_v63 = vmul.u32 %v10905_v46, %v6456_v19  ;;  %v6476_v9 = vsel %vm6474_vm5, %v6475_v12, %v10937_v42 }
0x104b   :  { %v6394_v13 = vand.u32 2147483647, %v6393_v16  ;;  %v6180_v24 = vsub.s32 32, %v6179_v39  ;;  %v6184_v32 = vsub.s32 4294967266, %v6179_v39  ;;  %v6219_v60 = vor.u32 8388608, %v10950_v29 }
0x104c   :  { %v6226_v6 = vsub.s32 32, %v6225_v3  ;;  %v6181_v27 = vshll.u32 %v10917_v30, %v6179_v39  ;;  %v6477_v43 = vadd.s32 %v6476_v9, %v6472_v63  ;;  %v6403_v52 = vsel %vm10942_vm1, 0, %v6401_v25 }
0x104d   :  { %v6397_v10 = vmul.f32 %v6396_v0, %v6394_v13  ;;  %v6182_v58 = vshrl.u32 %v6164_v14, %v6180_v24  ;;  %v6185_v11 = vadd.s32 127, %v6184_v32  ;;  %v10966_v23 = vshrl.u32 %v6223_v4, 5 }
0x104e   :  { %v6228_v38 = vshll.u32 %v7613_v50, %v6225_v3  ;;  %v6478_v44 = vadd.s32 536870912, %v6477_v43  ;;  %v6231_v1 = vshll.u32 %v7614_v53, %v6225_v3  ;;  %vm6110_vm6 = vcmp.lt.s32.totalorder %v10796_v56, 0 }
0x104f   :  { %v6398_v49 = vxor.u32 2147483648, %v6397_v10  ;;  %v6183_v46 = vor.u32 %v6182_v58, %v6181_v27  ;;  %v6186_v8 = vshll.u32 %v6185_v11, 23  ;;  %v6229_v30 = vshrl.u32 %v7614_v53, %v6226_v6 }
0x1050   :  { %v6232_v37 = vshrl.u32 %v7615_v55, %v6226_v6  ;;  %v6235_v31 = vshrl.u32 %v7616_v57, %v6226_v6  ;;  %vm10981_vm7 = vcmp.le.f32.partialorder %v6108_v20, 0.7853982  ;;  %v10985_v35 = vshrl.u32 %v6478_v44, 30 }
0x1051   :  { %v6399_v15 = vsel %vm6316_vm15, %v6398_v49, %v6397_v10  ;;  %v6187_v21 = vor.u32 4788187, %v6186_v8  ;;  %v6234_v34 = vshll.u32 %v7615_v55, %v6225_v3  ;;  %v6190_v53 = vcvt.s32.f32 %v6183_v46 }
0x1052   :  { %v6402_v36 = vsel %vm10942_vm1, %v10794_v22, %v6399_v15  ;;  %v6237_v33 = vshll.u32 %v7616_v57, %v6225_v3  ;;  %v6238_v54 = vshrl.u32 %v7617_v59, %v6226_v6  ;;  %v6480_v17 = vshll.u32 %v10985_v35, 30 }
0x1053   :  { %7462 = vcosq.f32 %v6402_v36  ;;  %v6188_v40 = vand.u32 2147483647, %v6187_v21  ;;  %v6236_v5 = vor.u32 %v6235_v31, %v6234_v34  ;;  %v6230_v20 = vor.u32 %v6229_v30, %v6228_v38 }
0x1054   :  { %7464 = vsinq.f32 %v6402_v36  ;;  %v6233_v42 = vor.u32 %v6232_v37, %v6231_v1  ;;  %v6239_v48 = vor.u32 %v6238_v54, %v6237_v33  ;;  %v6241_v61 = vshrl.u32 %v7618_v2, %v6226_v6 }
0x1055   :  { %v10992_v26 = vand.u32 3, %v6403_v52  ;;  %v6191_v16 = vmul.f32 %v6190_v53, %v6188_v40  ;;  %v10994_v55 = vsub.s32 %v6477_v43, %v6480_v17  ;;  %v6240_v19 = vshll.u32 %v7617_v59, %v6225_v3 }
0x1056   :  { %v6194_v57 = vsub.s32 4, %v10908_v45  ;;  %v6227_v29 = vshrl.u32 %v7613_v50, %v6226_v6  ;;  %vm6243_vm8 = vcmp.lt.s32.totalorder %v10966_v23, 1  ;;  %vm6246_vm9 = vcmp.lt.s32.totalorder %v10966_v23, 4 }
0x1057   :  { %v6192_v4 = vxor.u32 2147483648, %v6191_v16  ;;  %v6483_v0 = vsub.s32 0, %v10994_v55  ;;  %v6242_v14 = vor.u32 %v6241_v61, %v6240_v19  ;;  %v6248_v2 = vsel %vm6246_vm9, %v6236_v5, 2102212464 }
0x1058   :  { %vm6244_vm10 = vcmp.lt.s32.totalorder %v10966_v23, 2  ;;  %v6251_v59 = vsel %vm6243_vm8, %v6230_v20, %v6233_v42  ;;  %v6252_v13 = vsel %vm6246_vm9, %v6239_v48, 920167782  ;;  %v6259_v50 = vshll.u32 %v6219_v60, 8 }
0x1059   :  { %v6193_v39 = vsel %vm6110_vm6, %v6192_v4, %v6191_v16  ;;  %v6836_v12 = vmin.u32 %v6483_v0, %v10994_v55  ;;  %vm6245_vm11 = vcmp.lt.s32.totalorder %v10966_v23, 3  ;;  %v6247_v3 = vsel %vm6243_vm8, %v6227_v29, %v6230_v20 }
0x105a   :  { %v6196_v25 = vsel %vm10981_vm7, %v10796_v56, %v6193_v39  ;;  %v6249_v24 = vsel %vm6245_vm11, %v6233_v42, %v6248_v2  ;;  %v6253_v32 = vsel %vm6245_vm11, %v6236_v5, %v6252_v13  ;;  %v6255_v63 = vsel %vm6243_vm8, %v6233_v42, %v6236_v5 }
0x105b   :  { %7466 = vcosq.f32 %v6196_v25  ;;  %v6485_v10 = vclz %v6836_v12  ;;  %v6254_v9 = vsel %vm6244_vm10, %v6251_v59, %v6253_v32  ;;  %v6256_v60 = vsel %vm6246_vm9, %v6242_v14, 1326507024 }
0x105c   :  { %7468 = vsinq.f32 %v6196_v25  ;;  %v6257_v6 = vsel %vm6245_vm11, %v6239_v48, %v6256_v60  ;;  %v11024_v27 = vmul.u32.u64.low %v6259_v50, %v6254_v9  ;;  %v11025_v58 = vmul.u32.u64.high %v6259_v50, %v6254_v9, %v11024_v27 }
0x105d   :  { %v6195_v11 = vsel %vm6110_vm6, %v6194_v57, %v10908_v45  ;;  %v6837_v43 = vadd.s32 4294967294, %v6485_v10  ;;  %v6258_v49 = vsel %vm6244_vm10, %v6255_v63, %v6257_v6  ;;  %vm6408_vm12 = vcmp.lt.s32.totalorder %v10992_v26, 2 }
0x105e   :  { %v11034_v52 = vmul.u32.u64.low %v6259_v50, %v6258_v49  ;;  %v11035_v38 = vmul.u32.u64.high %v6259_v50, %v6258_v49, %v11034_v52  ;;  %vm6409_vm13 = vcmp.eq.s32.totalorder %v10992_v26, 0  ;;  %vm6412_vm14 = vcmp.eq.s32.totalorder %v10992_v26, 2 }
0x105f   :  { %vm6838_vm15 = vcmp.lt.s32.totalorder %v6837_v43, 0  ;;  %v6250_v8 = vsel %vm6244_vm10, %v6247_v3, %v6249_v24  ;;  %v6197_v1 = vsel %vm10981_vm7, 0, %v6195_v11  ;;  %v6269_v30 = vadd.s32 1, %v11025_v58 }
0x1060   :  { %v7463_v46 = vpop.eup %7462  ;;  %v6488_v15 = vsel %vm6838_vm15, 0, %v6837_v43  ;;  %v6473_v31 = vadd.s32 %v10936_v41, %v10933_v51  ;;  %v6266_v33 = vmul.u32 %v6259_v50, %v6250_v8  ;;  %vm6268_vm0 = vc.u32 %v11035_v38, %v11024_v27 }
0x1061   :  { %v7465_v44 = vpop.eup %7464  ;;  %v6413_v45 = vxor.u32 2147483648, %v7463_v46  ;;  %v6489_v36 = vsub.s32 32, %v6488_v15  ;;  %v6493_v21 = vsub.s32 4294967266, %v6488_v15  ;;  %v6490_v53 = vshll.u32 %v10994_v55, %v6488_v15 }
0x1062   :  { %v6410_v37 = vxor.u32 2147483648, %v7465_v44  ;;  %v6270_v51 = vsel %vm6268_vm0, %v6269_v30, %v11025_v58  ;;  %vm6406_vm1 = vweird.f32 %v10794_v22  ;;  %v6201_v61 = vand.u32 3, %v6197_v1 }
0x1063   :  { %v6414_v34 = vsel %vm6412_vm14, %v6413_v45, %v7465_v44  ;;  %v6491_v54 = vshrl.u32 %v6473_v31, %v6489_v36  ;;  %v6494_v40 = vadd.s32 127, %v6493_v21  ;;  %v6271_v17 = vadd.s32 %v6270_v51, %v6266_v33 }
0x1064   :  { %v6411_v23 = vsel %vm6409_vm13, %v7463_v46, %v6410_v37  ;;  %vm6206_vm3 = vcmp.eq.s32.totalorder %v6201_v61, 2  ;;  %vm6203_vm4 = vcmp.eq.s32.totalorder %v6201_v61, 0  ;;  %vm6202_vm5 = vcmp.lt.s32.totalorder %v6201_v61, 2 }
0x1065   :  { %v6415_v41 = vsel %vm6408_vm12, %v6411_v23, %v6414_v34  ;;  %v6492_v20 = vor.u32 %v6491_v54, %v6490_v53  ;;  %v6495_v42 = vshll.u32 %v6494_v40, 23  ;;  %v6272_v16 = vadd.s32 536870912, %v6271_v17 }
0x1066   :  { %v6416_v5 = vsel %vm6406_vm1, nan, %v6415_v41  ;;  %vm6200_vm6 = vweird.f32 %v10796_v56  ;;  %vm6419_vm7 = vcmp.lt.s32.totalorder %v10798_v7, 0  ;;  %vm11070_vm8 = vcmp.le.f32.partialorder %v6417_v18, 0.7853982 }
0x1067   :  { %v6529_v48 = vmul.f32 %v11054_v47, %v6416_v5  ;;  %v6496_v55 = vor.u32 4788187, %v6495_v42  ;;  %v11062_v29 = vshrl.u32 %v6272_v16, 30  ;;  %v6499_v26 = vcvt.s32.f32 %v6492_v20 }
0x1068   :  { %v7467_v19 = vpop.eup %7466  ;;  %v6503_v6 = vsub.s32 4, %v10985_v35  ;;  %v6267_v49 = vadd.s32 %v11024_v27, %v11035_v38  ;;  %vm6509_vm13 = vweird.f32 %v10798_v7  ;;  %vm6213_vm14 = vcmp.lt.s32.totalorder %v10886_v62, 0 }
0x1069   :  { %v6537_v57 = vsel %vm213_vm2, %v6529_v48, 0.0  ;;  %v7469_v4 = vpop.eup %7468  ;;  %v6207_v22 = vxor.u32 2147483648, %v7467_v19  ;;  %v6497_v0 = vand.u32 2147483647, %v6496_v55  ;;  %v6274_v2 = vshll.u32 %v11062_v29, 30 }
0x106a   :  { %6538 = vadd.xlane.f32.xlu1 %v6537_v57  ;;  %v6204_v14 = vxor.u32 2147483648, %v7469_v4  ;;  %v6504_v18 = vsel %vm6419_vm7, %v6503_v6, %v10985_v35  ;;  %vm6212_vm15 = vcmp.le.f32.partialorder %v6211_v28, 0.7853982  ;;  %v6297_v42 = vsub.s32 4, %v11062_v29 }
0x106b   :  { %v6208_v59 = vsel %vm6206_vm3, %v6207_v22, %v7469_v4  ;;  %v6500_v13 = vmul.f32 %v6499_v26, %v6497_v0  ;;  %v6275_v39 = vsub.s32 %v6271_v17, %v6274_v2  ;;  %v6506_v8 = vsel %vm11070_vm8, 0, %v6504_v18 }
0x106c   :  { %v6205_v50 = vsel %vm6203_vm4, %v7467_v19, %v6204_v14  ;;  %v6510_v15 = vand.u32 3, %v6506_v8  ;;  %vm6303_vm4 = vweird.f32 %v10886_v62 }
0x106d   :  { %v6209_v12 = vsel %vm6202_vm5, %v6205_v50, %v6208_v59  ;;  %v6501_v3 = vxor.u32 2147483648, %v6500_v13  ;;  %v6277_v24 = vsub.s32 0, %v6275_v39  ;;  %vm6571_vm5 = vcmask 195712  }
0x106e   :  { %v6210_v25 = vsel %vm6200_vm6, nan, %v6209_v12  ;;  %vm6515_vm10 = vcmp.eq.s32.totalorder %v6510_v15, 2  ;;  %vm6512_vm11 = vcmp.eq.s32.totalorder %v6510_v15, 0  ;;  %vm6511_vm12 = vcmp.lt.s32.totalorder %v6510_v15, 2 }
0x106f   :  { %v6527_v32 = vmul.f32 %v11054_v47, %v6210_v25  ;;  %v6502_v10 = vsel %vm6419_vm7, %v6501_v3, %v6500_v13  ;;  %v6828_v56 = vmin.u32 %v6277_v24, %v6275_v39  ;;  %v6544_v12 = vstv %s11109_s7  ;;  %s7578_s7 = scalar_lea.vmem %s6590_s26, 16 }
0x1070   :  { %v6505_v9 = vsel %vm11070_vm8, %v10798_v7, %v6502_v10  ;;  %v6298_v7 = vsel %vm6213_vm14, %v6297_v42, %v11062_v29  ;;  %v6553_v29 = vlaneseq  ;;  %vm6578_vm6 = vcmask 261312   ;;  %p7579_p11 = scmp.ne.s32.totalorder %s6590_s26, %s7578_s7  ;;  %p7584_p13 = scmp.lt.s32.totalorder %s7582_s27, %s7578_s7 }
0x1071   :  { %v6531_v60 = vsel %vm213_vm2, %v6527_v32, 0.0  ;;  %7470 = vcosq.f32 %v6505_v9  ;;  %v6279_v58 = vclz %v6828_v56  ;;  %v6300_v48 = vsel %vm6212_vm15, 0, %v6298_v7 }
0x1072   :  { %6532 = vadd.xlane.f32.xlu0 %v6531_v60  ;;  %7472 = vsinq.f32 %v6505_v9  ;;  %v6304_v61 = vand.u32 3, %v6300_v48  ;;  %v6554_v2 = vand.u32 127, %v6553_v29  ;;  %v6556_v50 = vshrl.u32 %v6553_v29, 7  ;;  %p7585_p0 = por %p7584_p13, %p7583_p12 }
0x1073   :  { %v6829_v11 = vadd.s32 4294967294, %v6279_v58  ;;  %vm6581_vm7 = vcmask 253952  }
0x1074   :  { %vm6309_vm0 = vcmp.eq.s32.totalorder %v6304_v61, 2  ;;  %vm6306_vm1 = vcmp.eq.s32.totalorder %v6304_v61, 0  ;;  %vm6305_vm3 = vcmp.lt.s32.totalorder %v6304_v61, 2  ;;  %v6566_v3 = vadd.s32 4294967280, %v6554_v2  ;;  %p7586_p1 = pnand %p7585_p0, %p7579_p11 }
0x1075   :  { %vm6830_vm9 = vcmp.lt.s32.totalorder %v6829_v11, 0  ;;  %v6573_v25 = vadd.s32 4294967272, %v6554_v2  ;;  %v6557_v24 = vsub.s32 %v6554_v2, %v6556_v50 }
0x1076   :  { %v6282_v43 = vsel %vm6830_vm9, 0, %v6829_v11 }
0x1077   :  { %v6283_v52 = vsub.s32 32, %v6282_v43  ;;  %v6287_v46 = vsub.s32 4294967266, %v6282_v43  ;;  %v6284_v44 = vshll.u32 %v6275_v39, %v6282_v43  ;;  %v6559_v39 = vadd.s32 4294967288, %v6554_v2 }
0x1078   :  { %v6576_v56 = vsub.s32 %v6573_v25, %v6556_v50 }
0x1079   :  { %v6285_v45 = vshrl.u32 %v6267_v49, %v6283_v52  ;;  %v6288_v1 = vadd.s32 127, %v6287_v46  ;;  %v6562_v63 = vsub.s32 %v6559_v39, %v6556_v50 }
0x107b   :  { %v6286_v30 = vor.u32 %v6285_v45, %v6284_v44  ;;  %v6289_v37 = vshll.u32 %v6288_v1, 23 }
0x107d   :  { %v6290_v36 = vor.u32 4788187, %v6289_v37  ;;  %v6293_v33 = vcvt.s32.f32 %v6286_v30 }
0x107e   :  { %v7471_v31 = vpop.eup %7470 }
0x107f   :  { %v7473_v21 = vpop.eup %7472  ;;  %v6516_v35 = vxor.u32 2147483648, %v7471_v31  ;;  %v6291_v53 = vand.u32 2147483647, %v6290_v36 }
0x1080   :  { %v6513_v34 = vxor.u32 2147483648, %v7473_v21 }
0x1081   :  { %v6517_v27 = vsel %vm6515_vm10, %v6516_v35, %v7473_v21  ;;  %v6294_v23 = vmul.f32 %v6293_v33, %v6291_v53 }
0x1082   :  { %v6514_v38 = vsel %vm6512_vm11, %v7471_v31, %v6513_v34 }
0x1083   :  { %v6518_v54 = vsel %vm6511_vm12, %v6514_v38, %v6517_v27  ;;  %v6295_v51 = vxor.u32 2147483648, %v6294_v23 }
0x1084   :  { %v6519_v40 = vsel %vm6509_vm13, nan, %v6518_v54 }
0x1085   :  { %v6530_v41 = vmul.f32 %v11054_v47, %v6519_v40  ;;  %v6296_v17 = vsel %vm6213_vm14, %v6295_v51, %v6294_v23 }
0x1086   :  { %v6299_v20 = vsel %vm6212_vm15, %v10886_v62, %v6296_v17 }
0x1087   :  { %v6540_v5 = vsel %vm213_vm2, %v6530_v41, 0.0  ;;  %7474 = vcosq.f32 %v6299_v20 }
0x1088   :  { %6541 = vadd.xlane.f32.xlu1 %v6540_v5  ;;  %7476 = vsinq.f32 %v6299_v20 }
0x1094   :  { %v7475_v16 = vpop.eup %7474 }
0x1095   :  { %v7477_v55 = vpop.eup %7476  ;;  %v6310_v19 = vxor.u32 2147483648, %v7475_v16 }
0x1096   :  { %v6307_v57 = vxor.u32 2147483648, %v7477_v55 }
0x1097   :  { %v6311_v28 = vsel %vm6309_vm0, %v6310_v19, %v7477_v55 }
0x1098   :  { %v6308_v4 = vsel %vm6306_vm1, %v7475_v16, %v6307_v57 }
0x1099   :  { %v6312_v22 = vsel %vm6305_vm3, %v6308_v4, %v6311_v28 }
0x109a   :  { %v6313_v0 = vsel %vm6303_vm4, nan, %v6312_v22 }
0x109b   :  { %v6528_v26 = vmul.f32 %v11054_v47, %v6313_v0  ;;  %v6569_v47 = vsub.s32 %v6566_v3, %v6556_v50 }
0x109d   :  { %v6534_v14 = vsel %vm213_vm2, %v6528_v26, 0.0  ;;  %vm6564_vm2 = vcmask 130112  }
0x109e   :  { %6535 = vadd.xlane.f32.xlu0 %v6534_v14 }
0x10f3   :  { %v6539_v59 = vpop.xlane.xlu1 %6538 }
0x10f4   :  { %v6547_v10 = vadd.f32 %v6544_v12, %v6539_v59 }
0x10f6   :  { %v6570_v18 = vrot.slane %v6547_v10, %v6569_v47 }
0x10fb   :  { %v6533_v13 = vpop.xlane.xlu0 %6532 }
0x10fc   :  { %v6545_v32 = vadd.f32 %v6544_v12, %v6533_v13 }
0x10fe   :  { %v6558_v58 = vrot.slane %v6545_v32, %v6557_v24 }
0x1111   :  { %v6542_v62 = vpop.xlane.xlu1 %6541 }
0x1112   :  { %v6548_v60 = vadd.f32 %v6544_v12, %v6542_v62 }
0x1114   :  { %v6577_v43 = vrot.slane %v6548_v60, %v6576_v56 }
0x1127   :  { %v6536_v9 = vpop.xlane.xlu0 %6535 }
0x1128   :  { %v6546_v6 = vadd.f32 %v6544_v12, %v6536_v9 }
0x112a   :  { %v6563_v11 = vrot.slane %v6546_v6, %v6562_v63 }
0x112c   :  { %v6565_v49 = vsel %vm6564_vm2, %v6563_v11, %v6558_v58 }
0x112d   :  { %v6572_v52 = vsel %vm6571_vm5, %v6570_v18, %v6565_v49 }
0x112e   :  { %v6579_v46 = vsel %vm6578_vm6, %v6577_v43, %v6572_v52 }
0x112f   :  { %6582 = vst.msk [vmem:[#allocation12] sm:$0x1] %vm6581_vm7, %v6579_v46 }
0x1130   :  { %7589 = shalt.err (!%p7586_p1)
}
0x1131   :  { %6592 = dma.vmem_to_hbm [thread:$0]  %s6590_s26, 16, %s11110_s8, [#allocation5]  }
0x1132   :  { %7604 = dma.done.wait [#allocation5], 16  }
0x1133   :  { %7605 = vsyncadd [#allocation5], 4294967280 }
0x1134   :  { %6596 = vsyncpa [#allocation4], 1 }
0x1135   :  { %6597 = vsyncpa [#allocation7], 1 }
0x1136   :  { %6598 = vsyncpa [#allocation10], 1 }
0x1137   :  { %6599 = vsyncpa [#allocation5], 1 }

</bundles_post_ra>
